<compile_context>
chip_gen: v6e
topology: v6e:2x2x1
jax: 0.10.0
libtpu: 0.0.40
codegen_flags: <defaults>
</compile_context>

<pallas_src>
import functools

import jax
import jax.numpy as jnp
from jax import lax
from jax.experimental import pallas as pl
from jax.experimental.pallas import tpu as pltpu


def _rpab_kernel(x_ref, w1_ref, b1_ref, alpha_ref, w2_ref, b2_ref, sa_rhs_ref,
                 out_ref, padc_ref, col_ref, pad2d_ref, salhs_ref,
                 *, H, W, C, K):
    """One batch element per grid step. All compute (convs, PReLU, spatial
    attention, residual) happens here."""
    P = K // 2
    Hp = H + 2 * P
    Wp = W + 2 * P
    f32 = jnp.float32

    x = x_ref[0].astype(f32)                                 # (H, W, C)

    # ---- zero ONLY the halo strips of the padded scratch buffers -------------
    # (interiors are fully overwritten below; doing this every step keeps the
    #  kernel correct when the batch axis is split across cores.)
    zrow = jnp.zeros((1, W + 2, C), f32)
    padc_ref[0:1] = zrow
    padc_ref[H + 1:H + 2] = zrow
    zcol = jnp.zeros((H, 1, C), f32)
    padc_ref[1:1 + H, 0:1, :] = zcol
    padc_ref[1:1 + H, W + 1:W + 2, :] = zcol

    ztb = jnp.zeros((2, P, Wp), f32)
    pad2d_ref[:, 0:P, :] = ztb
    pad2d_ref[:, P + H:Hp, :] = ztb
    zlr = jnp.zeros((2, H, P), f32)
    pad2d_ref[:, P:P + H, 0:P] = zlr
    pad2d_ref[:, P:P + H, P + W:Wp] = zlr

    def conv3x3(w_ref, b_ref):
        # im2col: pack the 9 shifted windows into one (H*W, 9*C) matrix ...
        for t in range(9):
            dy, dx = t // 3, t % 3
            col_ref[:, t * C:(t + 1) * C] = (
                padc_ref[dy:dy + H, dx:dx + W, :].reshape(H * W, C))
        # ... then a single K=9*C MXU matmul (bf16 operands, f32 accumulation).
        acc = jnp.dot(col_ref[...].astype(jnp.bfloat16), w_ref[...],
                      preferred_element_type=f32)            # (H*W, C) f32
        return acc + b_ref[...]                              # (1, C) broadcast

    # ---- conv1: 3x3, pad=1, bias, PReLU ---------------------------------------
    padc_ref[1:1 + H, 1:1 + W, :] = x
    y1 = conv3x3(w1_ref, b1_ref)
    alpha = alpha_ref[0]
    y1 = jnp.where(y1 >= 0.0, y1, alpha * y1)                # PReLU (single alpha)

    # ---- conv2: 3x3, pad=1, bias ----------------------------------------------
    padc_ref[1:1 + H, 1:1 + W, :] = y1.reshape(H, W, C)
    y2 = conv3x3(w2_ref, b2_ref)                             # (H*W, C)
    y2_hwc = y2.reshape(H, W, C)

    # ---- SpatialAttention: channel mean/max -> KxK conv as ONE banded matmul --
    avg = jnp.mean(y2_hwc, axis=-1)                          # (H, W)
    mx = jnp.max(y2_hwc, axis=-1)                            # (H, W)
    pad2d_ref[0, P:P + H, P:P + W] = avg
    pad2d_ref[1, P:P + H, P:P + W] = mx
    for c in range(2):
        for dy in range(K):
            blk = c * K + dy
            salhs_ref[:, blk * Wp:(blk + 1) * Wp] = pad2d_ref[c, dy:dy + H, :]
    att = jnp.dot(salhs_ref[...], sa_rhs_ref[...],
                  preferred_element_type=f32)                # (H, W)
    sig = jax.nn.sigmoid(att)

    # ---- attention * y2 + residual --------------------------------------------
    out_ref[0] = (x + y2_hwc * sig[:, :, None]).astype(out_ref.dtype)


def _build_sa_band(sa_w, K, W):
    """Banded RHS for the spatial-attention conv, shape (2*K*(W+2P), W).

    band[(c*K+dy)*Wp + j, w] = sa_w[c, dy, j - w]  if 0 <= j - w < K else 0,
    so that  att[h, w] = sum_{c,dy} pad2d[c, h+dy, :] @ band_block(c, dy)."""
    P = K // 2
    Wp = W + 2 * P
    wt = sa_w.reshape(2, K, K)
    d = jnp.arange(Wp)[:, None] - jnp.arange(W)[None, :]     # (Wp, W), d = j - w
    mask = (d >= 0) & (d < K)
    dc = jnp.clip(d, 0, K - 1)
    band = jnp.where(mask[None, None, :, :], wt[:, :, dc], 0.0)   # (2, K, Wp, W)
    return band.reshape(2 * K * Wp, W).astype(jnp.float32)


def rpab_forward(x_nchw, params, kernel_size):
    """x_nchw: (B, C, H, W) float32 (PyTorch layout).  Returns (B, C, H, W)."""
    B, C, H, W = x_nchw.shape
    K = kernel_size
    P = K // 2
    Wp = W + 2 * P
    w1, b1, alpha, w2, b2, sa_w = params
    x = jnp.transpose(x_nchw, (0, 2, 3, 1))                  # -> NHWC

    # One-time weight preprocessing (layout / dtype glue only).
    w1_mat = w1.reshape(9 * C, C).astype(jnp.bfloat16)       # (9*C, C)
    w2_mat = w2.reshape(9 * C, C).astype(jnp.bfloat16)
    sa_rhs = _build_sa_band(sa_w, K, W)                      # (2*K*Wp, W) f32

    kern = functools.partial(_rpab_kernel, H=H, W=W, C=C, K=K)
    out = pl.pallas_call(
        kern,
        out_shape=jax.ShapeDtypeStruct((B, H, W, C), x.dtype),
        grid_spec=pltpu.PrefetchScalarGridSpec(
            num_scalar_prefetch=0,
            grid=(B,),
            in_specs=[
                pl.BlockSpec((1, H, W, C), lambda b: (b, 0, 0, 0)),    # x
                pl.BlockSpec((9 * C, C), lambda b: (0, 0)),            # conv1 W (bf16)
                pl.BlockSpec((1, C), lambda b: (0, 0)),                # conv1 b
                pl.BlockSpec(memory_space=pltpu.MemorySpace.SMEM),     # prelu alpha
                pl.BlockSpec((9 * C, C), lambda b: (0, 0)),            # conv2 W (bf16)
                pl.BlockSpec((1, C), lambda b: (0, 0)),                # conv2 b
                pl.BlockSpec((2 * K * Wp, W), lambda b: (0, 0)),       # SA banded W
            ],
            out_specs=pl.BlockSpec((1, H, W, C), lambda b: (b, 0, 0, 0)),
            scratch_shapes=[
                pltpu.VMEM((H + 2, W + 2, C), jnp.float32),            # 3x3 pad buf
                pltpu.VMEM((H * W, 9 * C), jnp.float32),               # im2col buf
                pltpu.VMEM((2, H + 2 * P, W + 2 * P), jnp.float32),    # SA pad buf
                pltpu.VMEM((H, 2 * K * Wp), jnp.float32),              # SA lhs buf
            ],
        ),
        compiler_params=pltpu.CompilerParams(
            dimension_semantics=("parallel",)),               # v7x: 2 TCs split batch
    )(x, w1_mat, b1, alpha, w2_mat, b2, sa_rhs)
    return jnp.transpose(out, (0, 3, 1, 2))                  # -> NCHW


def rpab_reference(x_nchw, params, kernel_size):
    """Pure-JAX f32 reference (lax.conv) for correctness checking."""
    w1, b1, alpha, w2, b2, sa_w = params
    K = kernel_size
    B, C, H, W = x_nchw.shape
    x = jnp.transpose(x_nchw, (0, 2, 3, 1)).astype(jnp.float32)
    dn = ("NHWC", "HWIO", "NHWC")
    w1_hwio = w1.reshape(3, 3, C, C)
    w2_hwio = w2.reshape(3, 3, C, C)
    y = lax.conv_general_dilated(x, w1_hwio, (1, 1), "SAME",
                                 dimension_numbers=dn) + b1.reshape(1, 1, 1, C)
    y = jnp.where(y >= 0, y, alpha[0] * y)
    y = lax.conv_general_dilated(y, w2_hwio, (1, 1), "SAME",
                                 dimension_numbers=dn) + b2.reshape(1, 1, 1, C)
    avg = jnp.mean(y, axis=-1, keepdims=True)
    mx = jnp.max(y, axis=-1, keepdims=True)
    cat = jnp.concatenate([avg, mx], axis=-1)                # (B, H, W, 2)
    sa_hwio = jnp.transpose(sa_w.reshape(2, K, K), (1, 2, 0))[:, :, :, None]
    att = lax.conv_general_dilated(cat, sa_hwio, (1, 1), "SAME",
                                   dimension_numbers=dn)
    att = jax.nn.sigmoid(att)
    out = x + y * att
    return jnp.transpose(out, (0, 3, 1, 2))


def init_params(key, C, K):
    """Deterministic synthetic init matching the PyTorch parameter shapes:
    conv1/conv2: (C, C, 3, 3) + bias (C,)   -> stored as (9, C, C), (1, C)
    PReLU: single alpha init 0.25
    SpatialAttention conv: (1, 2, K, K), no bias -> stored flat (2*K*K,)"""
    k1, k2, k3, k4, k5 = jax.random.split(key, 5)
    s = 1.0 / (3.0 * float(C) ** 0.5)
    w1 = jax.random.normal(k1, (9, C, C), jnp.float32) * s
    b1 = jax.random.normal(k2, (1, C), jnp.float32) * 0.1
    w2 = jax.random.normal(k3, (9, C, C), jnp.float32) * s
    b2 = jax.random.normal(k4, (1, C), jnp.float32) * 0.1
    alpha = jnp.array([0.25], jnp.float32)                   # nn.PReLU() default
    sa_w = jax.random.normal(k5, (2 * K * K,), jnp.float32) * (1.0 / (K * 2.0 ** 0.5))
    return (w1, b1, alpha, w2, b2, sa_w)


if __name__ == "__main__":
    key = jax.random.PRNGKey(0)
    kx, kp = jax.random.split(key)
    B, C, H, W = 2, 32, 16, 16      # batch, n_feat, spatial
    K = 7                           # SpatialAttention kernel_size

    x = jax.random.normal(kx, (B, C, H, W), jnp.float32)
    params = init_params(kp, C, K)

    out = rpab_forward(x, params, K)
    out = jax.block_until_ready(out)

    ref = rpab_reference(x, params, K)
    assert out.shape == (B, C, H, W)
    err = float(jnp.max(jnp.abs(out - ref)))
    # Tolerance accounts for bf16 MXU operands (f32 accumulation) in the two
    # 3x3 convs vs. the all-f32 reference.
    if not (err < 3e-2):
        raise AssertionError(f"mismatch vs reference: max abs err = {err}")

    print("KERNEL_OK")
</pallas_src>

<mosaic_0001>
module attributes {stable_mosaic.version = 11 : i64} {
  func.func @_rpab_kernel(%arg0: i32, %arg1: memref<1x16x16x32xf32, #tpu.memory_space<vmem>>, %arg2: memref<288x32xbf16, #tpu.memory_space<vmem>>, %arg3: memref<1x32xf32, #tpu.memory_space<vmem>>, %arg4: memref<1xf32, #tpu.memory_space<smem>>, %arg5: memref<288x32xbf16, #tpu.memory_space<vmem>>, %arg6: memref<1x32xf32, #tpu.memory_space<vmem>>, %arg7: memref<308x16xf32, #tpu.memory_space<vmem>>, %arg8: memref<1x16x16x32xf32, #tpu.memory_space<vmem>>, %arg9: memref<18x18x32xf32, #tpu.memory_space<vmem>>, %arg10: memref<256x288xf32, #tpu.memory_space<vmem>>, %arg11: memref<2x22x22xf32, #tpu.memory_space<vmem>>, %arg12: memref<16x308xf32, #tpu.memory_space<vmem>>) attributes {dimension_semantics = [#tpu.dimension_semantics<parallel>], iteration_bounds = array<i64: 2>, scalar_prefetch = 0 : i64, scratch_operands = 4 : i64, tpu.core_type = #tpu.core_type<tc>, window_params = [{transform_indices = @transform_0, window_bounds = array<i64: 1, 16, 16, 32>}, {pipeline_mode = #tpu.pipeline_mode<synchronous>, transform_indices = @transform_1, window_bounds = array<i64: 288, 32>}, {pipeline_mode = #tpu.pipeline_mode<synchronous>, transform_indices = @transform_2, window_bounds = array<i64: 1, 32>}, {transform_indices = @transform_3, window_bounds = array<i64: 1>}, {pipeline_mode = #tpu.pipeline_mode<synchronous>, transform_indices = @transform_4, window_bounds = array<i64: 288, 32>}, {pipeline_mode = #tpu.pipeline_mode<synchronous>, transform_indices = @transform_5, window_bounds = array<i64: 1, 32>}, {pipeline_mode = #tpu.pipeline_mode<synchronous>, transform_indices = @transform_6, window_bounds = array<i64: 308, 16>}, {transform_indices = @transform_7, window_bounds = array<i64: 1, 16, 16, 32>}]} {
    %c0 = arith.constant 0 : index
    %c0_0 = arith.constant 0 : index
    %c0_1 = arith.constant 0 : index
    %c0_2 = arith.constant 0 : index
    %0 = vector.load %arg1[%c0, %c0_0, %c0_1, %c0_2] : memref<1x16x16x32xf32, #tpu.memory_space<vmem>>, vector<1x16x16x32xf32>
    %1 = vector.shape_cast %0 : vector<1x16x16x32xf32> to vector<16x16x32xf32>
    %cst = arith.constant 0.000000e+00 : f32
    %2 = vector.broadcast %cst : f32 to vector<1x18x32xf32>
    %c0_3 = arith.constant 0 : index
    %c0_4 = arith.constant 0 : index
    %c0_5 = arith.constant 0 : index
    %3 = vector.load %arg9[%c0_3, %c0_4, %c0_5] : memref<18x18x32xf32, #tpu.memory_space<vmem>>, vector<1x18x32xf32>
    tpu.vector_store %arg9[%c0_3, %c0_4, %c0_5], %2 {strides = array<i32>} : memref<18x18x32xf32, #tpu.memory_space<vmem>>, vector<1x18x32xf32>,
    %c17 = arith.constant 17 : index
    %c0_6 = arith.constant 0 : index
    %c0_7 = arith.constant 0 : index
    %4 = vector.load %arg9[%c17, %c0_6, %c0_7] : memref<18x18x32xf32, #tpu.memory_space<vmem>>, vector<1x18x32xf32>
    tpu.vector_store %arg9[%c17, %c0_6, %c0_7], %2 {strides = array<i32>} : memref<18x18x32xf32, #tpu.memory_space<vmem>>, vector<1x18x32xf32>,
    %cst_8 = arith.constant 0.000000e+00 : f32
    %5 = vector.broadcast %cst_8 : f32 to vector<16x1x32xf32>
    %c1 = arith.constant 1 : index
    %c0_9 = arith.constant 0 : index
    %c0_10 = arith.constant 0 : index
    %6 = vector.load %arg9[%c1, %c0_9, %c0_10] : memref<18x18x32xf32, #tpu.memory_space<vmem>>, vector<16x1x32xf32>
    tpu.vector_store %arg9[%c1, %c0_9, %c0_10], %5 {strides = array<i32>} : memref<18x18x32xf32, #tpu.memory_space<vmem>>, vector<16x1x32xf32>,
    %c1_11 = arith.constant 1 : index
    %c17_12 = arith.constant 17 : index
    %c0_13 = arith.constant 0 : index
    %7 = vector.load %arg9[%c1_11, %c17_12, %c0_13] : memref<18x18x32xf32, #tpu.memory_space<vmem>>, vector<16x1x32xf32>
    tpu.vector_store %arg9[%c1_11, %c17_12, %c0_13], %5 {strides = array<i32>} : memref<18x18x32xf32, #tpu.memory_space<vmem>>, vector<16x1x32xf32>,
    %cst_14 = arith.constant 0.000000e+00 : f32
    %8 = vector.broadcast %cst_14 : f32 to vector<2x3x22xf32>
    %c0_15 = arith.constant 0 : index
    %c0_16 = arith.constant 0 : index
    %c0_17 = arith.constant 0 : index
    %9 = vector.load %arg11[%c0_15, %c0_16, %c0_17] : memref<2x22x22xf32, #tpu.memory_space<vmem>>, vector<2x3x22xf32>
    tpu.vector_store %arg11[%c0_15, %c0_16, %c0_17], %8 {strides = array<i32>} : memref<2x22x22xf32, #tpu.memory_space<vmem>>, vector<2x3x22xf32>,
    %c0_18 = arith.constant 0 : index
    %c19 = arith.constant 19 : index
    %c0_19 = arith.constant 0 : index
    %10 = vector.load %arg11[%c0_18, %c19, %c0_19] : memref<2x22x22xf32, #tpu.memory_space<vmem>>, vector<2x3x22xf32>
    tpu.vector_store %arg11[%c0_18, %c19, %c0_19], %8 {strides = array<i32>} : memref<2x22x22xf32, #tpu.memory_space<vmem>>, vector<2x3x22xf32>,
    %cst_20 = arith.constant 0.000000e+00 : f32
    %11 = vector.broadcast %cst_20 : f32 to vector<2x16x3xf32>
    %c0_21 = arith.constant 0 : index
    %c3 = arith.constant 3 : index
    %c0_22 = arith.constant 0 : index
    %12 = vector.load %arg11[%c0_21, %c3, %c0_22] : memref<2x22x22xf32, #tpu.memory_space<vmem>>, vector<2x16x3xf32>
    tpu.vector_store %arg11[%c0_21, %c3, %c0_22], %11 {strides = array<i32>} : memref<2x22x22xf32, #tpu.memory_space<vmem>>, vector<2x16x3xf32>,
    %c0_23 = arith.constant 0 : index
    %c3_24 = arith.constant 3 : index
    %c19_25 = arith.constant 19 : index
    %13 = vector.load %arg11[%c0_23, %c3_24, %c19_25] : memref<2x22x22xf32, #tpu.memory_space<vmem>>, vector<2x16x3xf32>
    tpu.vector_store %arg11[%c0_23, %c3_24, %c19_25], %11 {strides = array<i32>} : memref<2x22x22xf32, #tpu.memory_space<vmem>>, vector<2x16x3xf32>,
    %c1_26 = arith.constant 1 : index
    %c1_27 = arith.constant 1 : index
    %c0_28 = arith.constant 0 : index
    %14 = vector.load %arg9[%c1_26, %c1_27, %c0_28] : memref<18x18x32xf32, #tpu.memory_space<vmem>>, vector<16x16x32xf32>
    tpu.vector_store %arg9[%c1_26, %c1_27, %c0_28], %1 {strides = array<i32>} : memref<18x18x32xf32, #tpu.memory_space<vmem>>, vector<16x16x32xf32>,
    %c0_29 = arith.constant 0 : index
    %c0_30 = arith.constant 0 : index
    %c0_31 = arith.constant 0 : index
    %15 = vector.load %arg9[%c0_29, %c0_30, %c0_31] : memref<18x18x32xf32, #tpu.memory_space<vmem>>, vector<16x16x32xf32>
    %16 = vector.shape_cast %15 : vector<16x16x32xf32> to vector<256x32xf32>
    %c0_32 = arith.constant 0 : index
    %c0_33 = arith.constant 0 : index
    %17 = vector.load %arg10[%c0_32, %c0_33] : memref<256x288xf32, #tpu.memory_space<vmem>>, vector<256x32xf32>
    tpu.vector_store %arg10[%c0_32, %c0_33], %16 {strides = array<i32>} : memref<256x288xf32, #tpu.memory_space<vmem>>, vector<256x32xf32>,
    %c0_34 = arith.constant 0 : index
    %c1_35 = arith.constant 1 : index
    %c0_36 = arith.constant 0 : index
    %18 = vector.load %arg9[%c0_34, %c1_35, %c0_36] : memref<18x18x32xf32, #tpu.memory_space<vmem>>, vector<16x16x32xf32>
    %19 = vector.shape_cast %18 : vector<16x16x32xf32> to vector<256x32xf32>
    %c0_37 = arith.constant 0 : index
    %c32 = arith.constant 32 : index
    %20 = vector.load %arg10[%c0_37, %c32] : memref<256x288xf32, #tpu.memory_space<vmem>>, vector<256x32xf32>
    tpu.vector_store %arg10[%c0_37, %c32], %19 {strides = array<i32>} : memref<256x288xf32, #tpu.memory_space<vmem>>, vector<256x32xf32>,
    %c0_38 = arith.constant 0 : index
    %c2 = arith.constant 2 : index
    %c0_39 = arith.constant 0 : index
    %21 = vector.load %arg9[%c0_38, %c2, %c0_39] : memref<18x18x32xf32, #tpu.memory_space<vmem>>, vector<16x16x32xf32>
    %22 = vector.shape_cast %21 : vector<16x16x32xf32> to vector<256x32xf32>
    %c0_40 = arith.constant 0 : index
    %c64 = arith.constant 64 : index
    %23 = vector.load %arg10[%c0_40, %c64] : memref<256x288xf32, #tpu.memory_space<vmem>>, vector<256x32xf32>
    tpu.vector_store %arg10[%c0_40, %c64], %22 {strides = array<i32>} : memref<256x288xf32, #tpu.memory_space<vmem>>, vector<256x32xf32>,
    %c1_41 = arith.constant 1 : index
    %c0_42 = arith.constant 0 : index
    %c0_43 = arith.constant 0 : index
    %24 = vector.load %arg9[%c1_41, %c0_42, %c0_43] : memref<18x18x32xf32, #tpu.memory_space<vmem>>, vector<16x16x32xf32>
    %25 = vector.shape_cast %24 : vector<16x16x32xf32> to vector<256x32xf32>
    %c0_44 = arith.constant 0 : index
    %c96 = arith.constant 96 : index
    %26 = vector.load %arg10[%c0_44, %c96] : memref<256x288xf32, #tpu.memory_space<vmem>>, vector<256x32xf32>
    tpu.vector_store %arg10[%c0_44, %c96], %25 {strides = array<i32>} : memref<256x288xf32, #tpu.memory_space<vmem>>, vector<256x32xf32>,
    %c1_45 = arith.constant 1 : index
    %c1_46 = arith.constant 1 : index
    %c0_47 = arith.constant 0 : index
    %27 = vector.load %arg9[%c1_45, %c1_46, %c0_47] : memref<18x18x32xf32, #tpu.memory_space<vmem>>, vector<16x16x32xf32>
    %28 = vector.shape_cast %27 : vector<16x16x32xf32> to vector<256x32xf32>
    %c0_48 = arith.constant 0 : index
    %c128 = arith.constant 128 : index
    %29 = vector.load %arg10[%c0_48, %c128] : memref<256x288xf32, #tpu.memory_space<vmem>>, vector<256x32xf32>
    tpu.vector_store %arg10[%c0_48, %c128], %28 {strides = array<i32>} : memref<256x288xf32, #tpu.memory_space<vmem>>, vector<256x32xf32>,
    %c1_49 = arith.constant 1 : index
    %c2_50 = arith.constant 2 : index
    %c0_51 = arith.constant 0 : index
    %30 = vector.load %arg9[%c1_49, %c2_50, %c0_51] : memref<18x18x32xf32, #tpu.memory_space<vmem>>, vector<16x16x32xf32>
    %31 = vector.shape_cast %30 : vector<16x16x32xf32> to vector<256x32xf32>
    %c0_52 = arith.constant 0 : index
    %c160 = arith.constant 160 : index
    %32 = vector.load %arg10[%c0_52, %c160] : memref<256x288xf32, #tpu.memory_space<vmem>>, vector<256x32xf32>
    tpu.vector_store %arg10[%c0_52, %c160], %31 {strides = array<i32>} : memref<256x288xf32, #tpu.memory_space<vmem>>, vector<256x32xf32>,
    %c2_53 = arith.constant 2 : index
    %c0_54 = arith.constant 0 : index
    %c0_55 = arith.constant 0 : index
    %33 = vector.load %arg9[%c2_53, %c0_54, %c0_55] : memref<18x18x32xf32, #tpu.memory_space<vmem>>, vector<16x16x32xf32>
    %34 = vector.shape_cast %33 : vector<16x16x32xf32> to vector<256x32xf32>
    %c0_56 = arith.constant 0 : index
    %c192 = arith.constant 192 : index
    %35 = vector.load %arg10[%c0_56, %c192] : memref<256x288xf32, #tpu.memory_space<vmem>>, vector<256x32xf32>
    tpu.vector_store %arg10[%c0_56, %c192], %34 {strides = array<i32>} : memref<256x288xf32, #tpu.memory_space<vmem>>, vector<256x32xf32>,
    %c2_57 = arith.constant 2 : index
    %c1_58 = arith.constant 1 : index
    %c0_59 = arith.constant 0 : index
    %36 = vector.load %arg9[%c2_57, %c1_58, %c0_59] : memref<18x18x32xf32, #tpu.memory_space<vmem>>, vector<16x16x32xf32>
    %37 = vector.shape_cast %36 : vector<16x16x32xf32> to vector<256x32xf32>
    %c0_60 = arith.constant 0 : index
    %c224 = arith.constant 224 : index
    %38 = vector.load %arg10[%c0_60, %c224] : memref<256x288xf32, #tpu.memory_space<vmem>>, vector<256x32xf32>
    tpu.vector_store %arg10[%c0_60, %c224], %37 {strides = array<i32>} : memref<256x288xf32, #tpu.memory_space<vmem>>, vector<256x32xf32>,
    %c2_61 = arith.constant 2 : index
    %c2_62 = arith.constant 2 : index
    %c0_63 = arith.constant 0 : index
    %39 = vector.load %arg9[%c2_61, %c2_62, %c0_63] : memref<18x18x32xf32, #tpu.memory_space<vmem>>, vector<16x16x32xf32>
    %40 = vector.shape_cast %39 : vector<16x16x32xf32> to vector<256x32xf32>
    %c0_64 = arith.constant 0 : index
    %c256 = arith.constant 256 : index
    %41 = vector.load %arg10[%c0_64, %c256] : memref<256x288xf32, #tpu.memory_space<vmem>>, vector<256x32xf32>
    tpu.vector_store %arg10[%c0_64, %c256], %40 {strides = array<i32>} : memref<256x288xf32, #tpu.memory_space<vmem>>, vector<256x32xf32>,
    %c0_65 = arith.constant 0 : index
    %c0_66 = arith.constant 0 : index
    %42 = vector.load %arg10[%c0_65, %c0_66] : memref<256x288xf32, #tpu.memory_space<vmem>>, vector<256x288xf32>
    %43 = arith.truncf %42 : vector<256x288xf32> to vector<256x288xbf16>
    %c0_67 = arith.constant 0 : index
    %c0_68 = arith.constant 0 : index
    %44 = vector.load %arg2[%c0_67, %c0_68] : memref<288x32xbf16, #tpu.memory_space<vmem>>, vector<288x32xbf16>
    %cst_69 = arith.constant dense<0.000000e+00> : vector<256x32xf32>
    %45 = tpu.matmul %43, %44, %cst_69 {dimension_numbers = #tpu.dot_dimension_numbers<[1], [0], [0], [1], [0, 0, 1, 1], [], []>} : vector<256x288xbf16>, vector<288x32xbf16>, vector<256x32xf32> -> vector<256x32xf32>
    %c0_70 = arith.constant 0 : index
    %c0_71 = arith.constant 0 : index
    %46 = vector.load %arg3[%c0_70, %c0_71] : memref<1x32xf32, #tpu.memory_space<vmem>>, vector<1x32xf32>
    %47 = vector.broadcast %46 : vector<1x32xf32> to vector<256x32xf32>
    %48 = arith.addf %45, %47 : vector<256x32xf32>
    %c0_72 = arith.constant 0 : index
    %49 = memref.load %arg4[%c0_72] : memref<1xf32, #tpu.memory_space<smem>>
    %cst_73 = arith.constant 0.000000e+00 : f32
    %50 = vector.broadcast %cst_73 : f32 to vector<256x32xf32>
    %51 = arith.cmpf oge, %48, %50 : vector<256x32xf32>
    %52 = vector.broadcast %49 : f32 to vector<256x32xf32>
    %53 = arith.mulf %52, %48 : vector<256x32xf32>
    %54 = arith.select %51, %48, %53 : vector<256x32xi1>, vector<256x32xf32>
    %55 = vector.shape_cast %54 : vector<256x32xf32> to vector<16x16x32xf32>
    %c1_74 = arith.constant 1 : index
    %c1_75 = arith.constant 1 : index
    %c0_76 = arith.constant 0 : index
    %56 = vector.load %arg9[%c1_74, %c1_75, %c0_76] : memref<18x18x32xf32, #tpu.memory_space<vmem>>, vector<16x16x32xf32>
    tpu.vector_store %arg9[%c1_74, %c1_75, %c0_76], %55 {strides = array<i32>} : memref<18x18x32xf32, #tpu.memory_space<vmem>>, vector<16x16x32xf32>,
    %c0_77 = arith.constant 0 : index
    %c0_78 = arith.constant 0 : index
    %c0_79 = arith.constant 0 : index
    %57 = vector.load %arg9[%c0_77, %c0_78, %c0_79] : memref<18x18x32xf32, #tpu.memory_space<vmem>>, vector<16x16x32xf32>
    %58 = vector.shape_cast %57 : vector<16x16x32xf32> to vector<256x32xf32>
    %c0_80 = arith.constant 0 : index
    %c0_81 = arith.constant 0 : index
    %59 = vector.load %arg10[%c0_80, %c0_81] : memref<256x288xf32, #tpu.memory_space<vmem>>, vector<256x32xf32>
    tpu.vector_store %arg10[%c0_80, %c0_81], %58 {strides = array<i32>} : memref<256x288xf32, #tpu.memory_space<vmem>>, vector<256x32xf32>,
    %c0_82 = arith.constant 0 : index
    %c1_83 = arith.constant 1 : index
    %c0_84 = arith.constant 0 : index
    %60 = vector.load %arg9[%c0_82, %c1_83, %c0_84] : memref<18x18x32xf32, #tpu.memory_space<vmem>>, vector<16x16x32xf32>
    %61 = vector.shape_cast %60 : vector<16x16x32xf32> to vector<256x32xf32>
    %c0_85 = arith.constant 0 : index
    %c32_86 = arith.constant 32 : index
    %62 = vector.load %arg10[%c0_85, %c32_86] : memref<256x288xf32, #tpu.memory_space<vmem>>, vector<256x32xf32>
    tpu.vector_store %arg10[%c0_85, %c32_86], %61 {strides = array<i32>} : memref<256x288xf32, #tpu.memory_space<vmem>>, vector<256x32xf32>,
    %c0_87 = arith.constant 0 : index
    %c2_88 = arith.constant 2 : index
    %c0_89 = arith.constant 0 : index
    %63 = vector.load %arg9[%c0_87, %c2_88, %c0_89] : memref<18x18x32xf32, #tpu.memory_space<vmem>>, vector<16x16x32xf32>
    %64 = vector.shape_cast %63 : vector<16x16x32xf32> to vector<256x32xf32>
    %c0_90 = arith.constant 0 : index
    %c64_91 = arith.constant 64 : index
    %65 = vector.load %arg10[%c0_90, %c64_91] : memref<256x288xf32, #tpu.memory_space<vmem>>, vector<256x32xf32>
    tpu.vector_store %arg10[%c0_90, %c64_91], %64 {strides = array<i32>} : memref<256x288xf32, #tpu.memory_space<vmem>>, vector<256x32xf32>,
    %c1_92 = arith.constant 1 : index
    %c0_93 = arith.constant 0 : index
    %c0_94 = arith.constant 0 : index
    %66 = vector.load %arg9[%c1_92, %c0_93, %c0_94] : memref<18x18x32xf32, #tpu.memory_space<vmem>>, vector<16x16x32xf32>
    %67 = vector.shape_cast %66 : vector<16x16x32xf32> to vector<256x32xf32>
    %c0_95 = arith.constant 0 : index
    %c96_96 = arith.constant 96 : index
    %68 = vector.load %arg10[%c0_95, %c96_96] : memref<256x288xf32, #tpu.memory_space<vmem>>, vector<256x32xf32>
    tpu.vector_store %arg10[%c0_95, %c96_96], %67 {strides = array<i32>} : memref<256x288xf32, #tpu.memory_space<vmem>>, vector<256x32xf32>,
    %c1_97 = arith.constant 1 : index
    %c1_98 = arith.constant 1 : index
    %c0_99 = arith.constant 0 : index
    %69 = vector.load %arg9[%c1_97, %c1_98, %c0_99] : memref<18x18x32xf32, #tpu.memory_space<vmem>>, vector<16x16x32xf32>
    %70 = vector.shape_cast %69 : vector<16x16x32xf32> to vector<256x32xf32>
    %c0_100 = arith.constant 0 : index
    %c128_101 = arith.constant 128 : index
    %71 = vector.load %arg10[%c0_100, %c128_101] : memref<256x288xf32, #tpu.memory_space<vmem>>, vector<256x32xf32>
    tpu.vector_store %arg10[%c0_100, %c128_101], %70 {strides = array<i32>} : memref<256x288xf32, #tpu.memory_space<vmem>>, vector<256x32xf32>,
    %c1_102 = arith.constant 1 : index
    %c2_103 = arith.constant 2 : index
    %c0_104 = arith.constant 0 : index
    %72 = vector.load %arg9[%c1_102, %c2_103, %c0_104] : memref<18x18x32xf32, #tpu.memory_space<vmem>>, vector<16x16x32xf32>
    %73 = vector.shape_cast %72 : vector<16x16x32xf32> to vector<256x32xf32>
    %c0_105 = arith.constant 0 : index
    %c160_106 = arith.constant 160 : index
    %74 = vector.load %arg10[%c0_105, %c160_106] : memref<256x288xf32, #tpu.memory_space<vmem>>, vector<256x32xf32>
    tpu.vector_store %arg10[%c0_105, %c160_106], %73 {strides = array<i32>} : memref<256x288xf32, #tpu.memory_space<vmem>>, vector<256x32xf32>,
    %c2_107 = arith.constant 2 : index
    %c0_108 = arith.constant 0 : index
    %c0_109 = arith.constant 0 : index
    %75 = vector.load %arg9[%c2_107, %c0_108, %c0_109] : memref<18x18x32xf32, #tpu.memory_space<vmem>>, vector<16x16x32xf32>
    %76 = vector.shape_cast %75 : vector<16x16x32xf32> to vector<256x32xf32>
    %c0_110 = arith.constant 0 : index
    %c192_111 = arith.constant 192 : index
    %77 = vector.load %arg10[%c0_110, %c192_111] : memref<256x288xf32, #tpu.memory_space<vmem>>, vector<256x32xf32>
    tpu.vector_store %arg10[%c0_110, %c192_111], %76 {strides = array<i32>} : memref<256x288xf32, #tpu.memory_space<vmem>>, vector<256x32xf32>,
    %c2_112 = arith.constant 2 : index
    %c1_113 = arith.constant 1 : index
    %c0_114 = arith.constant 0 : index
    %78 = vector.load %arg9[%c2_112, %c1_113, %c0_114] : memref<18x18x32xf32, #tpu.memory_space<vmem>>, vector<16x16x32xf32>
    %79 = vector.shape_cast %78 : vector<16x16x32xf32> to vector<256x32xf32>
    %c0_115 = arith.constant 0 : index
    %c224_116 = arith.constant 224 : index
    %80 = vector.load %arg10[%c0_115, %c224_116] : memref<256x288xf32, #tpu.memory_space<vmem>>, vector<256x32xf32>
    tpu.vector_store %arg10[%c0_115, %c224_116], %79 {strides = array<i32>} : memref<256x288xf32, #tpu.memory_space<vmem>>, vector<256x32xf32>,
    %c2_117 = arith.constant 2 : index
    %c2_118 = arith.constant 2 : index
    %c0_119 = arith.constant 0 : index
    %81 = vector.load %arg9[%c2_117, %c2_118, %c0_119] : memref<18x18x32xf32, #tpu.memory_space<vmem>>, vector<16x16x32xf32>
    %82 = vector.shape_cast %81 : vector<16x16x32xf32> to vector<256x32xf32>
    %c0_120 = arith.constant 0 : index
    %c256_121 = arith.constant 256 : index
    %83 = vector.load %arg10[%c0_120, %c256_121] : memref<256x288xf32, #tpu.memory_space<vmem>>, vector<256x32xf32>
    tpu.vector_store %arg10[%c0_120, %c256_121], %82 {strides = array<i32>} : memref<256x288xf32, #tpu.memory_space<vmem>>, vector<256x32xf32>,
    %c0_122 = arith.constant 0 : index
    %c0_123 = arith.constant 0 : index
    %84 = vector.load %arg10[%c0_122, %c0_123] : memref<256x288xf32, #tpu.memory_space<vmem>>, vector<256x288xf32>
    %85 = arith.truncf %84 : vector<256x288xf32> to vector<256x288xbf16>
    %c0_124 = arith.constant 0 : index
    %c0_125 = arith.constant 0 : index
    %86 = vector.load %arg5[%c0_124, %c0_125] : memref<288x32xbf16, #tpu.memory_space<vmem>>, vector<288x32xbf16>
    %cst_126 = arith.constant dense<0.000000e+00> : vector<256x32xf32>
    %87 = tpu.matmul %85, %86, %cst_126 {dimension_numbers = #tpu.dot_dimension_numbers<[1], [0], [0], [1], [0, 0, 1, 1], [], []>} : vector<256x288xbf16>, vector<288x32xbf16>, vector<256x32xf32> -> vector<256x32xf32>
    %c0_127 = arith.constant 0 : index
    %c0_128 = arith.constant 0 : index
    %88 = vector.load %arg6[%c0_127, %c0_128] : memref<1x32xf32, #tpu.memory_space<vmem>>, vector<1x32xf32>
    %89 = vector.broadcast %88 : vector<1x32xf32> to vector<256x32xf32>
    %90 = arith.addf %87, %89 : vector<256x32xf32>
    %91 = vector.shape_cast %90 : vector<256x32xf32> to vector<16x16x32xf32>
    %cst_129 = arith.constant dense<0.000000e+00> : vector<16x16xf32>
    %92 = vector.multi_reduction <add>, %91, %cst_129 [2] : vector<16x16x32xf32> to vector<16x16xf32>
    %cst_130 = arith.constant 3.200000e+01 : f32
    %93 = vector.broadcast %cst_130 : f32 to vector<16x16xf32>
    %94 = arith.divf %92, %93 : vector<16x16xf32>
    %cst_131 = arith.constant dense<0xFF800000> : vector<16x16xf32>
    %95 = vector.multi_reduction <maximumf>, %91, %cst_131 [2] : vector<16x16x32xf32> to vector<16x16xf32>
    %c0_132 = arith.constant 0 : index
    %c3_133 = arith.constant 3 : index
    %c3_134 = arith.constant 3 : index
    %96 = vector.load %arg11[%c0_132, %c3_133, %c3_134] : memref<2x22x22xf32, #tpu.memory_space<vmem>>, vector<1x16x16xf32>
    %97 = vector.shape_cast %96 : vector<1x16x16xf32> to vector<16x16xf32>
    %98 = vector.shape_cast %94 : vector<16x16xf32> to vector<1x16x16xf32>
    tpu.vector_store %arg11[%c0_132, %c3_133, %c3_134], %98 {strides = array<i32>} : memref<2x22x22xf32, #tpu.memory_space<vmem>>, vector<1x16x16xf32>,
    %c1_135 = arith.constant 1 : index
    %c3_136 = arith.constant 3 : index
    %c3_137 = arith.constant 3 : index
    %99 = vector.load %arg11[%c1_135, %c3_136, %c3_137] : memref<2x22x22xf32, #tpu.memory_space<vmem>>, vector<1x16x16xf32>
    %100 = vector.shape_cast %99 : vector<1x16x16xf32> to vector<16x16xf32>
    %101 = vector.shape_cast %95 : vector<16x16xf32> to vector<1x16x16xf32>
    tpu.vector_store %arg11[%c1_135, %c3_136, %c3_137], %101 {strides = array<i32>} : memref<2x22x22xf32, #tpu.memory_space<vmem>>, vector<1x16x16xf32>,
    %c0_138 = arith.constant 0 : index
    %c0_139 = arith.constant 0 : index
    %c0_140 = arith.constant 0 : index
    %102 = vector.load %arg11[%c0_138, %c0_139, %c0_140] : memref<2x22x22xf32, #tpu.memory_space<vmem>>, vector<1x16x22xf32>
    %103 = vector.shape_cast %102 : vector<1x16x22xf32> to vector<16x22xf32>
    %c0_141 = arith.constant 0 : index
    %c0_142 = arith.constant 0 : index
    %104 = vector.load %arg12[%c0_141, %c0_142] : memref<16x308xf32, #tpu.memory_space<vmem>>, vector<16x22xf32>
    tpu.vector_store %arg12[%c0_141, %c0_142], %103 {strides = array<i32>} : memref<16x308xf32, #tpu.memory_space<vmem>>, vector<16x22xf32>,
    %c0_143 = arith.constant 0 : index
    %c1_144 = arith.constant 1 : index
    %c0_145 = arith.constant 0 : index
    %105 = vector.load %arg11[%c0_143, %c1_144, %c0_145] : memref<2x22x22xf32, #tpu.memory_space<vmem>>, vector<1x16x22xf32>
    %106 = vector.shape_cast %105 : vector<1x16x22xf32> to vector<16x22xf32>
    %c0_146 = arith.constant 0 : index
    %c22 = arith.constant 22 : index
    %107 = vector.load %arg12[%c0_146, %c22] : memref<16x308xf32, #tpu.memory_space<vmem>>, vector<16x22xf32>
    tpu.vector_store %arg12[%c0_146, %c22], %106 {strides = array<i32>} : memref<16x308xf32, #tpu.memory_space<vmem>>, vector<16x22xf32>,
    %c0_147 = arith.constant 0 : index
    %c2_148 = arith.constant 2 : index
    %c0_149 = arith.constant 0 : index
    %108 = vector.load %arg11[%c0_147, %c2_148, %c0_149] : memref<2x22x22xf32, #tpu.memory_space<vmem>>, vector<1x16x22xf32>
    %109 = vector.shape_cast %108 : vector<1x16x22xf32> to vector<16x22xf32>
    %c0_150 = arith.constant 0 : index
    %c44 = arith.constant 44 : index
    %110 = vector.load %arg12[%c0_150, %c44] : memref<16x308xf32, #tpu.memory_space<vmem>>, vector<16x22xf32>
    tpu.vector_store %arg12[%c0_150, %c44], %109 {strides = array<i32>} : memref<16x308xf32, #tpu.memory_space<vmem>>, vector<16x22xf32>,
    %c0_151 = arith.constant 0 : index
    %c3_152 = arith.constant 3 : index
    %c0_153 = arith.constant 0 : index
    %111 = vector.load %arg11[%c0_151, %c3_152, %c0_153] : memref<2x22x22xf32, #tpu.memory_space<vmem>>, vector<1x16x22xf32>
    %112 = vector.shape_cast %111 : vector<1x16x22xf32> to vector<16x22xf32>
    %c0_154 = arith.constant 0 : index
    %c66 = arith.constant 66 : index
    %113 = vector.load %arg12[%c0_154, %c66] : memref<16x308xf32, #tpu.memory_space<vmem>>, vector<16x22xf32>
    tpu.vector_store %arg12[%c0_154, %c66], %112 {strides = array<i32>} : memref<16x308xf32, #tpu.memory_space<vmem>>, vector<16x22xf32>,
    %c0_155 = arith.constant 0 : index
    %c4 = arith.constant 4 : index
    %c0_156 = arith.constant 0 : index
    %114 = vector.load %arg11[%c0_155, %c4, %c0_156] : memref<2x22x22xf32, #tpu.memory_space<vmem>>, vector<1x16x22xf32>
    %115 = vector.shape_cast %114 : vector<1x16x22xf32> to vector<16x22xf32>
    %c0_157 = arith.constant 0 : index
    %c88 = arith.constant 88 : index
    %116 = vector.load %arg12[%c0_157, %c88] : memref<16x308xf32, #tpu.memory_space<vmem>>, vector<16x22xf32>
    tpu.vector_store %arg12[%c0_157, %c88], %115 {strides = array<i32>} : memref<16x308xf32, #tpu.memory_space<vmem>>, vector<16x22xf32>,
    %c0_158 = arith.constant 0 : index
    %c5 = arith.constant 5 : index
    %c0_159 = arith.constant 0 : index
    %117 = vector.load %arg11[%c0_158, %c5, %c0_159] : memref<2x22x22xf32, #tpu.memory_space<vmem>>, vector<1x16x22xf32>
    %118 = vector.shape_cast %117 : vector<1x16x22xf32> to vector<16x22xf32>
    %c0_160 = arith.constant 0 : index
    %c110 = arith.constant 110 : index
    %119 = vector.load %arg12[%c0_160, %c110] : memref<16x308xf32, #tpu.memory_space<vmem>>, vector<16x22xf32>
    tpu.vector_store %arg12[%c0_160, %c110], %118 {strides = array<i32>} : memref<16x308xf32, #tpu.memory_space<vmem>>, vector<16x22xf32>,
    %c0_161 = arith.constant 0 : index
    %c6 = arith.constant 6 : index
    %c0_162 = arith.constant 0 : index
    %120 = vector.load %arg11[%c0_161, %c6, %c0_162] : memref<2x22x22xf32, #tpu.memory_space<vmem>>, vector<1x16x22xf32>
    %121 = vector.shape_cast %120 : vector<1x16x22xf32> to vector<16x22xf32>
    %c0_163 = arith.constant 0 : index
    %c132 = arith.constant 132 : index
    %122 = vector.load %arg12[%c0_163, %c132] : memref<16x308xf32, #tpu.memory_space<vmem>>, vector<16x22xf32>
    tpu.vector_store %arg12[%c0_163, %c132], %121 {strides = array<i32>} : memref<16x308xf32, #tpu.memory_space<vmem>>, vector<16x22xf32>,
    %c1_164 = arith.constant 1 : index
    %c0_165 = arith.constant 0 : index
    %c0_166 = arith.constant 0 : index
    %123 = vector.load %arg11[%c1_164, %c0_165, %c0_166] : memref<2x22x22xf32, #tpu.memory_space<vmem>>, vector<1x16x22xf32>
    %124 = vector.shape_cast %123 : vector<1x16x22xf32> to vector<16x22xf32>
    %c0_167 = arith.constant 0 : index
    %c154 = arith.constant 154 : index
    %125 = vector.load %arg12[%c0_167, %c154] : memref<16x308xf32, #tpu.memory_space<vmem>>, vector<16x22xf32>
    tpu.vector_store %arg12[%c0_167, %c154], %124 {strides = array<i32>} : memref<16x308xf32, #tpu.memory_space<vmem>>, vector<16x22xf32>,
    %c1_168 = arith.constant 1 : index
    %c1_169 = arith.constant 1 : index
    %c0_170 = arith.constant 0 : index
    %126 = vector.load %arg11[%c1_168, %c1_169, %c0_170] : memref<2x22x22xf32, #tpu.memory_space<vmem>>, vector<1x16x22xf32>
    %127 = vector.shape_cast %126 : vector<1x16x22xf32> to vector<16x22xf32>
    %c0_171 = arith.constant 0 : index
    %c176 = arith.constant 176 : index
    %128 = vector.load %arg12[%c0_171, %c176] : memref<16x308xf32, #tpu.memory_space<vmem>>, vector<16x22xf32>
    tpu.vector_store %arg12[%c0_171, %c176], %127 {strides = array<i32>} : memref<16x308xf32, #tpu.memory_space<vmem>>, vector<16x22xf32>,
    %c1_172 = arith.constant 1 : index
    %c2_173 = arith.constant 2 : index
    %c0_174 = arith.constant 0 : index
    %129 = vector.load %arg11[%c1_172, %c2_173, %c0_174] : memref<2x22x22xf32, #tpu.memory_space<vmem>>, vector<1x16x22xf32>
    %130 = vector.shape_cast %129 : vector<1x16x22xf32> to vector<16x22xf32>
    %c0_175 = arith.constant 0 : index
    %c198 = arith.constant 198 : index
    %131 = vector.load %arg12[%c0_175, %c198] : memref<16x308xf32, #tpu.memory_space<vmem>>, vector<16x22xf32>
    tpu.vector_store %arg12[%c0_175, %c198], %130 {strides = array<i32>} : memref<16x308xf32, #tpu.memory_space<vmem>>, vector<16x22xf32>,
    %c1_176 = arith.constant 1 : index
    %c3_177 = arith.constant 3 : index
    %c0_178 = arith.constant 0 : index
    %132 = vector.load %arg11[%c1_176, %c3_177, %c0_178] : memref<2x22x22xf32, #tpu.memory_space<vmem>>, vector<1x16x22xf32>
    %133 = vector.shape_cast %132 : vector<1x16x22xf32> to vector<16x22xf32>
    %c0_179 = arith.constant 0 : index
    %c220 = arith.constant 220 : index
    %134 = vector.load %arg12[%c0_179, %c220] : memref<16x308xf32, #tpu.memory_space<vmem>>, vector<16x22xf32>
    tpu.vector_store %arg12[%c0_179, %c220], %133 {strides = array<i32>} : memref<16x308xf32, #tpu.memory_space<vmem>>, vector<16x22xf32>,
    %c1_180 = arith.constant 1 : index
    %c4_181 = arith.constant 4 : index
    %c0_182 = arith.constant 0 : index
    %135 = vector.load %arg11[%c1_180, %c4_181, %c0_182] : memref<2x22x22xf32, #tpu.memory_space<vmem>>, vector<1x16x22xf32>
    %136 = vector.shape_cast %135 : vector<1x16x22xf32> to vector<16x22xf32>
    %c0_183 = arith.constant 0 : index
    %c242 = arith.constant 242 : index
    %137 = vector.load %arg12[%c0_183, %c242] : memref<16x308xf32, #tpu.memory_space<vmem>>, vector<16x22xf32>
    tpu.vector_store %arg12[%c0_183, %c242], %136 {strides = array<i32>} : memref<16x308xf32, #tpu.memory_space<vmem>>, vector<16x22xf32>,
    %c1_184 = arith.constant 1 : index
    %c5_185 = arith.constant 5 : index
    %c0_186 = arith.constant 0 : index
    %138 = vector.load %arg11[%c1_184, %c5_185, %c0_186] : memref<2x22x22xf32, #tpu.memory_space<vmem>>, vector<1x16x22xf32>
    %139 = vector.shape_cast %138 : vector<1x16x22xf32> to vector<16x22xf32>
    %c0_187 = arith.constant 0 : index
    %c264 = arith.constant 264 : index
    %140 = vector.load %arg12[%c0_187, %c264] : memref<16x308xf32, #tpu.memory_space<vmem>>, vector<16x22xf32>
    tpu.vector_store %arg12[%c0_187, %c264], %139 {strides = array<i32>} : memref<16x308xf32, #tpu.memory_space<vmem>>, vector<16x22xf32>,
    %c1_188 = arith.constant 1 : index
    %c6_189 = arith.constant 6 : index
    %c0_190 = arith.constant 0 : index
    %141 = vector.load %arg11[%c1_188, %c6_189, %c0_190] : memref<2x22x22xf32, #tpu.memory_space<vmem>>, vector<1x16x22xf32>
    %142 = vector.shape_cast %141 : vector<1x16x22xf32> to vector<16x22xf32>
    %c0_191 = arith.constant 0 : index
    %c286 = arith.constant 286 : index
    %143 = vector.load %arg12[%c0_191, %c286] : memref<16x308xf32, #tpu.memory_space<vmem>>, vector<16x22xf32>
    tpu.vector_store %arg12[%c0_191, %c286], %142 {strides = array<i32>} : memref<16x308xf32, #tpu.memory_space<vmem>>, vector<16x22xf32>,
    %c0_192 = arith.constant 0 : index
    %c0_193 = arith.constant 0 : index
    %144 = vector.load %arg12[%c0_192, %c0_193] : memref<16x308xf32, #tpu.memory_space<vmem>>, vector<16x308xf32>
    %c0_194 = arith.constant 0 : index
    %c0_195 = arith.constant 0 : index
    %145 = vector.load %arg7[%c0_194, %c0_195] : memref<308x16xf32, #tpu.memory_space<vmem>>, vector<308x16xf32>
    %cst_196 = arith.constant dense<0.000000e+00> : vector<16x16xf32>
    %146 = tpu.matmul %144, %145, %cst_196 {dimension_numbers = #tpu.dot_dimension_numbers<[1], [0], [0], [1], [0, 0, 1, 1], [], []>} : vector<16x308xf32>, vector<308x16xf32>, vector<16x16xf32> -> vector<16x16xf32>
    %147 = arith.negf %146 : vector<16x16xf32>
    %148 = math.exp %147 : vector<16x16xf32>
    %cst_197 = arith.constant 1.000000e+00 : f32
    %149 = vector.broadcast %cst_197 : f32 to vector<16x16xf32>
    %150 = arith.addf %149, %148 : vector<16x16xf32>
    %151 = arith.divf %149, %150 : vector<16x16xf32>
    %152 = vector.shape_cast %151 : vector<16x16xf32> to vector<16x16x1xf32>
    %153 = vector.broadcast %152 : vector<16x16x1xf32> to vector<16x16x32xf32>
    %154 = arith.mulf %91, %153 : vector<16x16x32xf32>
    %155 = arith.addf %1, %154 : vector<16x16x32xf32>
    %c0_198 = arith.constant 0 : index
    %c0_199 = arith.constant 0 : index
    %c0_200 = arith.constant 0 : index
    %c0_201 = arith.constant 0 : index
    %156 = vector.load %arg8[%c0_198, %c0_199, %c0_200, %c0_201] : memref<1x16x16x32xf32, #tpu.memory_space<vmem>>, vector<1x16x16x32xf32>
    %157 = vector.shape_cast %156 : vector<1x16x16x32xf32> to vector<16x16x32xf32>
    %158 = vector.shape_cast %155 : vector<16x16x32xf32> to vector<1x16x16x32xf32>
    tpu.vector_store %arg8[%c0_198, %c0_199, %c0_200, %c0_201], %158 {strides = array<i32>} : memref<1x16x16x32xf32, #tpu.memory_space<vmem>>, vector<1x16x16x32xf32>,
    return
  }
  func.func @transform_0(%arg0: i32) -> (i32, i32, i32, i32) {
    %c0_i32 = arith.constant 0 : i32
    %c0_i32_0 = arith.constant 0 : i32
    %c0_i32_1 = arith.constant 0 : i32
    %c0_i32_2 = arith.constant 0 : i32
    return %arg0, %c0_i32, %c0_i32_0, %c0_i32_1 : i32, i32, i32, i32
  }
  func.func @transform_1(%arg0: i32) -> (i32, i32) {
    %c0_i32 = arith.constant 0 : i32
    %c0_i32_0 = arith.constant 0 : i32
    %c0_i32_1 = arith.constant 0 : i32
    return %c0_i32, %c0_i32_0 : i32, i32
  }
  func.func @transform_2(%arg0: i32) -> (i32, i32) {
    %c0_i32 = arith.constant 0 : i32
    %c0_i32_0 = arith.constant 0 : i32
    %c0_i32_1 = arith.constant 0 : i32
    return %c0_i32, %c0_i32_0 : i32, i32
  }
  func.func @transform_3(%arg0: i32) -> i32 {
    %c0_i32 = arith.constant 0 : i32
    %c0_i32_0 = arith.constant 0 : i32
    return %c0_i32 : i32
  }
  func.func @transform_4(%arg0: i32) -> (i32, i32) {
    %c0_i32 = arith.constant 0 : i32
    %c0_i32_0 = arith.constant 0 : i32
    %c0_i32_1 = arith.constant 0 : i32
    return %c0_i32, %c0_i32_0 : i32, i32
  }
  func.func @transform_5(%arg0: i32) -> (i32, i32) {
    %c0_i32 = arith.constant 0 : i32
    %c0_i32_0 = arith.constant 0 : i32
    %c0_i32_1 = arith.constant 0 : i32
    return %c0_i32, %c0_i32_0 : i32, i32
  }
  func.func @transform_6(%arg0: i32) -> (i32, i32) {
    %c0_i32 = arith.constant 0 : i32
    %c0_i32_0 = arith.constant 0 : i32
    %c0_i32_1 = arith.constant 0 : i32
    return %c0_i32, %c0_i32_0 : i32, i32
  }
  func.func @transform_7(%arg0: i32) -> (i32, i32, i32, i32) {
    %c0_i32 = arith.constant 0 : i32
    %c0_i32_0 = arith.constant 0 : i32
    %c0_i32_1 = arith.constant 0 : i32
    %c0_i32_2 = arith.constant 0 : i32
    return %arg0, %c0_i32, %c0_i32_0, %c0_i32_1 : i32, i32, i32, i32
  }
}

</mosaic_0001>

<bundles_post_ra>
// kernel: tpu_custom_call.1
= control target key start
LH: loop header
LB: loop body
LE: loop exit
PB: predicated region body
PF: predicated region fallthrough
CT: control target
= control target key end

     0   :  { %s9960_s0 = inlined_call_operand.vmem [shape: f32[2,16,16,32], index: 0, kind: input, shape index: {}]   ;;  %s9961_s1 = inlined_call_operand.vmem [shape: bf16[288,32], index: 1, kind: input, shape index: {}]   ;;  %s9962_s2 = inlined_call_operand.vmem [shape: f32[1,32], index: 2, kind: input, shape index: {}]   ;;  %s9963_s3 = inlined_call_operand.<no memory space> [shape: f32[1], index: 3, kind: input, shape index: {}]   ;;  %s9964_s4 = inlined_call_operand.vmem [shape: bf16[288,32], index: 4, kind: input, shape index: {}]   ;;  %s9965_s5 = inlined_call_operand.vmem [shape: f32[1,32], index: 5, kind: input, shape index: {}]   ;;  %s9966_s6 = inlined_call_operand.vmem [shape: f32[308,16], index: 6, kind: input, shape index: {}]   ;;  %s9967_s7 = inlined_call_operand.hbm [shape: f32[2,16,16,32], index: 7, kind: output, shape index: {}]  }
   0x1   :  { %12 = sst [smem:[#allocation6]] %s9963_s3 }
   0x2   :  { %13 = vsyncpa [#allocation8], 0 }
   0x3   :  { %15 = vsyncpa [#allocation8 + $0x1], 0  ;;  %s6638_s26 = smov 0   ;;  %s6640_s27 = smov 0  }
   0x4   :  { %s6642_s28 = smov 0   ;;  %s6644_s29 = smov 0  }
   0x5 LB: > { %s6659_s3 = sadd.s32 4294967295, %s6574_s29   ;;  %s5926_s30 = sadd.s32 4294967294, %s6574_s29   ;;  %s6574_s29 = sphi %s6644_s29, %s10123_s29   ;;  %s6570_s28 = sphi %s6642_s28, %s10122_s28   ;;  %s6566_s27 = sphi %s6640_s27, %s10121_s27   ;;  %s6562_s26 = sphi %s6638_s26, %s10120_s26  }
   0x6   : > { %s6663_s8 = sadd.s32 1, %s6574_s29   ;;  %s180_s9 = sadd.s32 1, %s6570_s28 }
   0x7   : > { %s177_s10 = ssub.s32 %s6574_s29, %s6663_s8  ;;  %p190_p0 = scmp.ne.s32.totalorder %s6570_s28, %s6566_s27 }
   0x8   : > { %p178_p1 = scmp.eq.s32.totalorder %s177_s10, 0  ;;  %p191_p2 = scmp.eq.s32.totalorder %s6659_s3, 1 }
   0x9   : > { %p196_p3 = scmp.ne.s32.totalorder %s6566_s27, %s6562_s26  ;;  %p197_p4 = scmp.eq.s32.totalorder %s5926_s30, 1 }
   0xa   : > { %s6674_s11 = scalar_select %p178_p1, %s6570_s28, %s180_s9  }
   0xb   : > { %p6676_p5 = por %p191_p2, %p190_p0  ;;  %p6680_p6 = por %p197_p4, %p196_p3 }
   0xc   : > { %p5929_p7 = scmp.ge.s32.totalorder %s6574_s29, 1  ;;  %p241_p8 = scmp.lt.s32.totalorder %s6574_s29, 3 }
   0xe   : > { %p242_p9 = pnand %p5929_p7, %p241_p8 }
  0x10   : > { %245 = sbr.rel (%p242_p9) target bundleno = 1926 (0x786), region = 48 }
  0x15   : > { %vm311_vm0 = vcmask 261120   ;;  %vm314_vm1 = vcmask 254976   ;;  %vm321_vm2 = vcmask 253952   ;;  %v9968_v0 = vmov 0.0   ;;  %p273_p10 = scmp.lt.s32.totalorder %s6659_s3, 1  ;;  %v6468_v1 = vld [vmem:[%s9961_s1 + $0x78] sm:$0xff]  }
  0x16   : > { %312 = vst.msk [vmem:[#allocation2] sm:$0xff] %vm311_vm0, %v9968_v0  ;;  %313 = vst.msk [vmem:[#allocation2 + $0x8] sm:$0xff] %vm311_vm0, %v9968_v0  ;;  %6015 = vmatprep.subr.bf16.mxu0 %v6468_v1  ;;  %v6469_v2 = vld [vmem:[%s9961_s1 + $0x38] sm:$0xff]   ;;  %v6470_v3 = vld [vmem:[%s9961_s1 + $0x70] sm:$0xff]   ;;  %s6577_s14 = smov 32   ;;  %s6578_s15 = smov 64  }
  0x17   : > { %317 = vst.msk [vmem:[#allocation2 + $0x198] sm:$0xff] %vm311_vm0, %v9968_v0  ;;  %318 = vst.msk [vmem:[#allocation2 + $0x1a0] sm:$0xff] %vm311_vm0, %v9968_v0  ;;  %s274_s16 = scalar_select %p273_p10, %s6659_s3, 1  ;;  %6016 = vmatpush3.bf16.msra.mxu0 %v6469_v2  ;;  %v6471_v4 = vld [vmem:[%s9961_s1 + $0x30] sm:$0xff]   ;;  %v6472_v5 = vld [vmem:[%s9961_s1 + $0x68] sm:$0xff]   ;;  %vm625_vm3 = vcmask 523520  }
  0x18   : > { %315 = vst.msk [vmem:[#allocation2 + $0x10] sm:$0x3] %vm314_vm1, %v9968_v0  ;;  %319 = vst.msk [vmem:[#allocation2 + $0x1a8] sm:$0x3] %vm314_vm1, %v9968_v0  ;;  %6017 = vmatprep.subr.bf16.mxu0 %v6470_v3  ;;  %v6473_v24 = vld [vmem:[%s9961_s1 + $0x28] sm:$0xff]   ;;  %v6474_v25 = vld [vmem:[%s9961_s1 + $0x60] sm:$0xff]  }
  0x19   : > { %338 = vst.msk [vmem:[#allocation2 + $0x29] sm:$0x1] %vm321_vm2, %v9968_v0  ;;  %322 = vst.msk [vmem:[#allocation2 + $0x18] sm:$0x1] %vm321_vm2, %v9968_v0  ;;  %s6013_s21 = sshll.u32 %s274_s16, 8  ;;  %s6579_s20 = smov 96  }
  0x1a   : > { %323 = vst.msk [vmem:[#allocation2 + $0x30] sm:$0x1] %vm321_vm2, %v9968_v0  ;;  %324 = vst.msk [vmem:[#allocation2 + $0x48] sm:$0x1] %vm321_vm2, %v9968_v0  ;;  %s6779_s30 = scalar_lea.vmem %s9960_s0, %s6013_s21  ;;  %v6475_v60 = vld [vmem:[%s9961_s1 + $0x20] sm:$0xff]   ;;  %v6476_v63 = vld [vmem:[%s9961_s1 + $0x58] sm:$0xff]  }
  0x1b   : > { %325 = vst.msk [vmem:[#allocation2 + $0x60] sm:$0x1] %vm321_vm2, %v9968_v0  ;;  %326 = vst.msk [vmem:[#allocation2 + $0x78] sm:$0x1] %vm321_vm2, %v9968_v0  ;;  %v6785_v6 = vld [vmem:[%s6779_s30] sm:$0xff]  ;;  %v6788_v7 = vld [vmem:[%s6779_s30 + $0x8] sm:$0xff]  ;;  %6018 = vmatpush3.bf16.msra.mxu0 %v6471_v4 }
  0x1c   : > { %327 = vst.msk [vmem:[#allocation2 + $0x90] sm:$0x1] %vm321_vm2, %v9968_v0  ;;  %328 = vst.msk [vmem:[#allocation2 + $0xa8] sm:$0x1] %vm321_vm2, %v9968_v0  ;;  %v6791_v8 = vld [vmem:[%s6779_s30 + $0x10] sm:$0xff]  ;;  %v6802_v12 = vld [vmem:[%s6779_s30 + $0x18] sm:$0xff]  ;;  %6019 = vmatprep.subr.bf16.mxu0 %v6472_v5 }
  0x1d   : > { %329 = vst.msk [vmem:[#allocation2 + $0xc0] sm:$0x1] %vm321_vm2, %v9968_v0  ;;  %330 = vst.msk [vmem:[#allocation2 + $0xd8] sm:$0x1] %vm321_vm2, %v9968_v0  ;;  %v465_v9 = vld [vmem:[#allocation2 + $0x1] sm:$0xff]  ;;  %v6815_v15 = vld [vmem:[%s6779_s30 + $0x30] sm:$0xff] }
  0x1e   : > { %331 = vst.msk [vmem:[#allocation2 + $0xf0] sm:$0x1] %vm321_vm2, %v9968_v0  ;;  %332 = vst.msk [vmem:[#allocation2 + $0x108] sm:$0x1] %vm321_vm2, %v9968_v0  ;;  %v658_v10 = vld [vmem:[#allocation2 + $0x2] sm:$0xff]  ;;  %529 = vrot.lane.b32.xlu1 %v465_v9, %s6577_s14  ;;  %v6818_v16 = vld [vmem:[%s6779_s30 + $0x38] sm:$0xff] }
  0x1f   : > { %333 = vst.msk [vmem:[#allocation2 + $0x120] sm:$0x1] %vm321_vm2, %v9968_v0  ;;  %334 = vst.msk [vmem:[#allocation2 + $0x138] sm:$0x1] %vm321_vm2, %v9968_v0  ;;  %722 = vrot.lane.b32.xlu0 %v658_v10, %s6578_s15  ;;  %v466_v11 = vld [vmem:[#allocation2 + $0x9] sm:$0xff]  ;;  %v6805_v13 = vld [vmem:[%s6779_s30 + $0x20] sm:$0xff]  ;;  %6020 = vmatpush3.bf16.msra.mxu0 %v6473_v24 }
  0x20   : > { %335 = vst.msk [vmem:[#allocation2 + $0x150] sm:$0x1] %vm321_vm2, %v9968_v0  ;;  %336 = vst.msk [vmem:[#allocation2 + $0x168] sm:$0x1] %vm321_vm2, %v9968_v0  ;;  %v6810_v14 = vld [vmem:[%s6779_s30 + $0x28] sm:$0xff]  ;;  %v6827_v17 = vld [vmem:[%s6779_s30 + $0x40] sm:$0xff]  ;;  %6021 = vmatprep.subr.bf16.mxu0 %v6474_v25 }
  0x21   : > { %337 = vst.msk [vmem:[#allocation2 + $0x180] sm:$0x1] %vm321_vm2, %v9968_v0  ;;  %339 = vst.msk [vmem:[#allocation2 + $0x41] sm:$0x1] %vm321_vm2, %v9968_v0  ;;  %v6830_v18 = vld [vmem:[%s6779_s30 + $0x48] sm:$0xff]  ;;  %v6833_v19 = vld [vmem:[%s6779_s30 + $0x50] sm:$0xff] }
  0x22   : > { %340 = vst.msk [vmem:[#allocation2 + $0x59] sm:$0x1] %vm321_vm2, %v9968_v0  ;;  %341 = vst.msk [vmem:[#allocation2 + $0x71] sm:$0x1] %vm321_vm2, %v9968_v0  ;;  %v659_v20 = vld [vmem:[#allocation2 + $0xa] sm:$0xff]  ;;  %v6840_v21 = vld [vmem:[%s6779_s30 + $0x58] sm:$0xff]  ;;  %531 = vrot.lane.b32.xlu1 %v466_v11, %s6577_s14 }
  0x23   : > { %342 = vst.msk [vmem:[#allocation2 + $0x89] sm:$0x1] %vm321_vm2, %v9968_v0  ;;  %343 = vst.msk [vmem:[#allocation2 + $0xa1] sm:$0x1] %vm321_vm2, %v9968_v0  ;;  %v401_v22 = vld [vmem:[#allocation2] sm:$0xff]  ;;  %v402_v23 = vld [vmem:[#allocation2 + $0x8] sm:$0xff]  ;;  %6022 = vmatpush3.bf16.msra.mxu0 %v6475_v60 }
  0x24   : > { %344 = vst.msk [vmem:[#allocation2 + $0xb9] sm:$0x1] %vm321_vm2, %v9968_v0  ;;  %345 = vst.msk [vmem:[#allocation2 + $0xd1] sm:$0x1] %vm321_vm2, %v9968_v0  ;;  %v6996_v61 = vld [vmem:[%s6779_s30 + $0x60] sm:$0xff]  ;;  %v6999_v62 = vld [vmem:[%s6779_s30 + $0x68] sm:$0xff]  ;;  %6023 = vmatprep.subr.bf16.mxu0 %v6476_v63 }
  0x25   : > { %346 = vst.msk [vmem:[#allocation2 + $0xe9] sm:$0x1] %vm321_vm2, %v9968_v0  ;;  %347 = vst.msk [vmem:[#allocation2 + $0x101] sm:$0x1] %vm321_vm2, %v9968_v0  ;;  %v6477_v1 = vld [vmem:[%s9961_s1 + $0x18] sm:$0xff]   ;;  %v6478_v2 = vld [vmem:[%s9961_s1 + $0x50] sm:$0xff]  }
  0x26   : > { %348 = vst.msk [vmem:[#allocation2 + $0x119] sm:$0x1] %vm321_vm2, %v9968_v0  ;;  %349 = vst.msk [vmem:[#allocation2 + $0x131] sm:$0x1] %vm321_vm2, %v9968_v0  ;;  %724 = vrot.lane.b32.xlu1 %v659_v20, %s6578_s15  ;;  %v6479_v3 = vld [vmem:[%s9961_s1 + $0x10] sm:$0xff]   ;;  %v6480_v4 = vld [vmem:[%s9961_s1 + $0x48] sm:$0xff]  }
  0x27   : > { %350 = vst.msk [vmem:[#allocation2 + $0x149] sm:$0x1] %vm321_vm2, %v9968_v0  ;;  %351 = vst.msk [vmem:[#allocation2 + $0x161] sm:$0x1] %vm321_vm2, %v9968_v0  ;;  %6024 = vmatpush3.bf16.msra.mxu0 %v6477_v1  ;;  %v6481_v9 = vld [vmem:[%s9961_s1 + $0x8] sm:$0xff]   ;;  %v6482_v20 = vld [vmem:[%s9961_s1 + $0x40] sm:$0xff]  }
  0x28   : > { %352 = vst.msk [vmem:[#allocation2 + $0x179] sm:$0x1] %vm321_vm2, %v9968_v0  ;;  %353 = vst.msk [vmem:[#allocation2 + $0x191] sm:$0x1] %vm321_vm2, %v9968_v0  ;;  %6025 = vmatprep.subr.bf16.mxu0 %v6478_v2  ;;  %v6483_v11 = vld [vmem:[%s9961_s1 + $0x88] sm:$0xff]   ;;  %v6484_v24 = vld [vmem:[%s9961_s1] sm:$0xff]  }
  0x29   : > { %10021 = vst [vmem:[#allocation10_spill] sm:$0xff] %v6785_v6  ;;  %10022 = vst [vmem:[#allocation11_spill] sm:$0xff] %v6788_v7  ;;  %6322 = vmatprep.subr.bf16.mxu1 %v6483_v11  ;;  %v6485_v25 = vld [vmem:[%s9961_s1 + $0x80] sm:$0xff]   ;;  %v7074_v1 = vld [vmem:[%s6779_s30 + $0x70] sm:$0xff]  ;;  %vm818_vm4 = vcmask 785920   ;;  %vm1011_vm5 = vcmask 1048320  }
  0x2a   : > { %10023 = vst [vmem:[#allocation12_spill] sm:$0xff] %v6791_v8  ;;  %369 = vst.msk [vmem:[#allocation2 + $0x19] sm:$0xff] %vm311_vm0, %v6785_v6  ;;  %6323 = vmatpush3.bf16.msra.mxu1 %v6483_v11  ;;  %v7077_v2 = vld [vmem:[%s6779_s30 + $0x78] sm:$0xff]  ;;  %s6580_s17 = smov 48   ;;  %s6581_s18 = smov 26  }
  0x2b   : > { %370 = vst.msk [vmem:[#allocation2 + $0x21] sm:$0xff] %vm311_vm0, %v6788_v7  ;;  %371 = vst.msk [vmem:[#allocation2 + $0x31] sm:$0xff] %vm311_vm0, %v6791_v8  ;;  %6026 = vmatpush3.bf16.msra.mxu0 %v6479_v3  ;;  %6324 = vmatprep.subr.bf16.mxu1 %v6485_v25  ;;  %s6582_s23 = smov 70   ;;  %s6583_s24 = smov 22  }
  0x2c   : > { %10024 = vst [vmem:[#allocation13_spill] sm:$0xff] %v6802_v12  ;;  %10025 = vst [vmem:[#allocation14_spill] sm:$0xff] %v6805_v13  ;;  %6027 = vmatprep.subr.bf16.mxu0 %v6480_v4  ;;  %s6584_s25 = smov 92   ;;  %s6585_s9 = smov 44  }
  0x2d   : > { %372 = vst.msk [vmem:[#allocation2 + $0x39] sm:$0xff] %vm311_vm0, %v6802_v12  ;;  %10026 = vst [vmem:[#allocation15_spill] sm:$0xff] %v6810_v14  ;;  %v5380_v12 = vld [vmem:[%s9966_s6 + $0x70] sm:$0xff]  ;;  %s6586_s16 = smov 66   ;;  %s6587_s19 = smov 114  }
  0x2e   : > { %373 = vst.msk [vmem:[#allocation2 + $0x49] sm:$0xff] %vm311_vm0, %v6805_v13  ;;  %10027 = vst [vmem:[#allocation16_spill] sm:$0xff] %v6815_v15  ;;  %6325 = vmatpush3.bf16.msra.mxu1 %v6485_v25  ;;  %s6589_s21 = smov 110   ;;  %s6593_s10 = smov [#allocation7]  }
  0x2f   : > { %10028 = vst [vmem:[#allocation17_spill] sm:$0xff] %v6818_v16  ;;  %374 = vst.msk [vmem:[#allocation2 + $0x51] sm:$0xff] %vm311_vm0, %v6810_v14  ;;  %6028 = vmatpush3.bf16.msra.mxu0 %v6481_v9 }
  0x30   : > { %375 = vst.msk [vmem:[#allocation2 + $0x61] sm:$0xff] %vm311_vm0, %v6815_v15  ;;  %376 = vst.msk [vmem:[#allocation2 + $0x69] sm:$0xff] %vm311_vm0, %v6818_v16  ;;  %6029 = vmatprep.subr.bf16.mxu0 %v6482_v20 }
  0x31   : > { %10029 = vst [vmem:[#allocation18_spill] sm:$0xff] %v6827_v17  ;;  %10030 = vst [vmem:[#allocation19_spill] sm:$0xff] %v6830_v18  ;;  %v6867_v31 = vld [vmem:[#allocation2 + $0x18] sm:$0xff] }
  0x32   : > { %10031 = vst [vmem:[#allocation20_spill] sm:$0xff] %v6833_v19  ;;  %377 = vst.msk [vmem:[#allocation2 + $0x79] sm:$0xff] %vm311_vm0, %v6827_v17  ;;  %v6855_v26 = vld [vmem:[#allocation2 + $0x1a] sm:$0xff]  ;;  %v6857_v27 = vld [vmem:[#allocation2 + $0x22] sm:$0xff] }
  0x33   : > { %378 = vst.msk [vmem:[#allocation2 + $0x81] sm:$0xff] %vm311_vm0, %v6830_v18  ;;  %10032 = vst [vmem:[#allocation21_spill] sm:$0xff] %v6840_v21  ;;  %v6859_v28 = vld [vmem:[#allocation2 + $0x30] sm:$0xff]  ;;  %1172 = vrot.lane.b32.xlu0 %v6855_v26, %s6577_s14  ;;  %v6865_v30 = vld [vmem:[#allocation2 + $0x20] sm:$0xff]  ;;  %6030 = vmatpush3.bf16.msra.mxu0 %v6484_v24 }
  0x34   : > { %379 = vst.msk [vmem:[#allocation2 + $0x91] sm:$0xff] %vm311_vm0, %v6833_v19  ;;  %380 = vst.msk [vmem:[#allocation2 + $0x99] sm:$0xff] %vm311_vm0, %v6840_v21  ;;  %v6863_v29 = vld [vmem:[#allocation2 + $0x31] sm:$0xff]  ;;  %v6874_v33 = vld [vmem:[#allocation2 + $0x39] sm:$0xff] }
  0x35   : > { %433 = vst.msk [vmem:[#allocation3] sm:$0xff] %vm311_vm0, %v401_v22  ;;  %434 = vst.msk [vmem:[#allocation3 + $0x18] sm:$0xff] %vm311_vm0, %v402_v23  ;;  %v6872_v32 = vld [vmem:[#allocation2 + $0x38] sm:$0xff]  ;;  %v6886_v36 = vld [vmem:[#allocation2 + $0x21] sm:$0xff] }
  0x36   : > { %437 = vst.msk [vmem:[#allocation3 + $0x60] sm:$0xff] %vm311_vm0, %v6859_v28  ;;  %v6876_v34 = vld [vmem:[#allocation2 + $0x3a] sm:$0xff]  ;;  %1078 = vst.msk [vmem:[#allocation3 + $0x38] sm:$0xff] %vm311_vm0, %v6863_v29  ;;  %v6884_v35 = vld [vmem:[#allocation2 + $0x32] sm:$0xff]  ;;  %1367 = vrot.lane.b32.xlu1 %v6872_v32, %s6578_s15 }
  0x37   : > { %436 = vst.msk [vmem:[#allocation3 + $0x48] sm:$0xff] %vm311_vm0, %v6865_v30  ;;  %435 = vst.msk [vmem:[#allocation3 + $0x30] sm:$0xff] %vm311_vm0, %v6867_v31  ;;  %v6888_v37 = vld [vmem:[#allocation2 + $0x19] sm:$0xff]  ;;  %v6896_v38 = vld [vmem:[#allocation2 + $0x50] sm:$0xff]  ;;  %1174 = vrot.lane.b32.xlu0 %v6857_v27, %s6577_s14 }
  0x38   : > { %1079 = vst.msk [vmem:[#allocation3 + $0x50] sm:$0xff] %vm311_vm0, %v6874_v33  ;;  %1718 = vst.msk [vmem:[#allocation3 + $0x28] sm:$0xff] %vm311_vm0, %v6876_v34  ;;  %v6898_v39 = vld [vmem:[#allocation2 + $0x48] sm:$0xff]  ;;  %v6900_v40 = vld [vmem:[#allocation2 + $0x51] sm:$0xff] }
  0x39   : > { %438 = vst.msk [vmem:[#allocation3 + $0x78] sm:$0xff] %vm311_vm0, %v6872_v32  ;;  %1076 = vst.msk [vmem:[#allocation3 + $0x8] sm:$0xff] %vm311_vm0, %v6888_v37  ;;  %v6910_v41 = vld [vmem:[#allocation2 + $0x49] sm:$0xff]  ;;  %v6912_v42 = vld [vmem:[#allocation2 + $0x52] sm:$0xff] }
  0x3a   : > { %1077 = vst.msk [vmem:[#allocation3 + $0x20] sm:$0xff] %vm311_vm0, %v6886_v36  ;;  %1717 = vst.msk [vmem:[#allocation3 + $0x10] sm:$0xff] %vm311_vm0, %v6884_v35  ;;  %v6914_v43 = vld [vmem:[#allocation2 + $0x4a] sm:$0xff]  ;;  %v6926_v45 = vld [vmem:[#allocation2 + $0x60] sm:$0xff]  ;;  %1559 = vrot.lane.b32.xlu1 %v6874_v33, %s6579_s20 }
  0x3b   : > { %1081 = vst.msk [vmem:[#allocation3 + $0x80] sm:$0xff] %vm311_vm0, %v6900_v40  ;;  %440 = vst.msk [vmem:[#allocation3 + $0xa8] sm:$0xff] %vm311_vm0, %v6896_v38  ;;  %v6924_v44 = vld [vmem:[#allocation2 + $0x68] sm:$0xff]  ;;  %v6948_v50 = vld [vmem:[#allocation2 + $0x80] sm:$0xff]  ;;  %1365 = vrot.lane.b32.xlu0 %v6859_v28, %s6578_s15 }
  0x3c   : > { %439 = vst.msk [vmem:[#allocation3 + $0x90] sm:$0xff] %vm311_vm0, %v6898_v39  ;;  %v6928_v46 = vld [vmem:[#allocation2 + $0x69] sm:$0xff]  ;;  %1719 = vst.msk [vmem:[#allocation3 + $0x40] sm:$0xff] %vm311_vm0, %v6914_v43  ;;  %v6936_v47 = vld [vmem:[#allocation2 + $0x61] sm:$0xff] }
  0x3d   : > { %1720 = vst.msk [vmem:[#allocation3 + $0x58] sm:$0xff] %vm311_vm0, %v6912_v42  ;;  %1080 = vst.msk [vmem:[#allocation3 + $0x68] sm:$0xff] %vm311_vm0, %v6910_v41  ;;  %v6938_v48 = vld [vmem:[#allocation2 + $0x6a] sm:$0xff]  ;;  %v6940_v49 = vld [vmem:[#allocation2 + $0x62] sm:$0xff] }
  0x3e   : > { %1083 = vst.msk [vmem:[#allocation3 + $0xb0] sm:$0xff] %vm311_vm0, %v6928_v46  ;;  %442 = vst.msk [vmem:[#allocation3 + $0xd8] sm:$0xff] %vm311_vm0, %v6924_v44  ;;  %v6950_v51 = vld [vmem:[#allocation2 + $0x78] sm:$0xff]  ;;  %v6952_v52 = vld [vmem:[#allocation2 + $0x81] sm:$0xff]  ;;  %917 = vrot.lane.b32.xlu1 %v6865_v30, %s6579_s20 }
  0x3f   : > { %441 = vst.msk [vmem:[#allocation3 + $0xc0] sm:$0xff] %vm311_vm0, %v6926_v45  ;;  %1082 = vst.msk [vmem:[#allocation3 + $0x98] sm:$0xff] %vm311_vm0, %v6936_v47  ;;  %v6962_v53 = vld [vmem:[#allocation2 + $0x79] sm:$0xff]  ;;  %v6964_v54 = vld [vmem:[#allocation2 + $0x82] sm:$0xff]  ;;  %1557 = vrot.lane.b32.xlu0 %v6863_v29, %s6579_s20 }
  0x40   : > { %1721 = vst.msk [vmem:[#allocation3 + $0x70] sm:$0xff] %vm311_vm0, %v6940_v49  ;;  %1722 = vst.msk [vmem:[#allocation3 + $0x88] sm:$0xff] %vm311_vm0, %v6938_v48  ;;  %v6966_v55 = vld [vmem:[#allocation2 + $0x7a] sm:$0xff]  ;;  %v6984_v57 = vld [vmem:[#allocation2 + $0x91] sm:$0xff] }
  0x41   : > { %1085 = vst.msk [vmem:[#allocation3 + $0xe0] sm:$0xff] %vm311_vm0, %v6952_v52  ;;  %444 = vst.msk [vmem:[#allocation3 + $0x108] sm:$0xff] %vm311_vm0, %v6948_v50  ;;  %v6976_v56 = vld [vmem:[#allocation2 + $0x99] sm:$0xff]  ;;  %v7115_v24 = vld [vmem:[%s6779_s30 + $0x88] sm:$0xff] }
  0x42   : > { %443 = vst.msk [vmem:[#allocation3 + $0xf0] sm:$0xff] %vm311_vm0, %v6950_v51  ;;  %1723 = vst.msk [vmem:[#allocation3 + $0xa0] sm:$0xff] %vm311_vm0, %v6966_v55  ;;  %v6986_v58 = vld [vmem:[#allocation2 + $0x9a] sm:$0xff]  ;;  %v6988_v59 = vld [vmem:[#allocation2 + $0x92] sm:$0xff]  ;;  %1178 = vrot.lane.b32.xlu1 %v6876_v34, %s6577_s14 }
  0x43   : > { %1724 = vst.msk [vmem:[#allocation3 + $0xb8] sm:$0xff] %vm311_vm0, %v6964_v54  ;;  %1084 = vst.msk [vmem:[#allocation3 + $0xc8] sm:$0xff] %vm311_vm0, %v6962_v53  ;;  %915 = vrot.lane.b32.xlu0 %v6867_v31, %s6579_s20  ;;  %v1751_v30 = vld [vmem:[#allocation3 + $0x10] sm:$0xff]  ;;  %v1754_v31 = vld [vmem:[#allocation3 + $0x28] sm:$0xff] }
  0x44   : > { %1087 = vst.msk [vmem:[#allocation3 + $0x110] sm:$0xff] %vm311_vm0, %v6976_v56  ;;  %10033 = vst [vmem:[#allocation22_spill] sm:$0xff] %v6996_v61  ;;  %v1847_v60 = vpack.c.bf16 %v1754_v31, %v1751_v30  ;;  %v1760_v63 = vld [vmem:[#allocation3 + $0x58] sm:$0xff]  ;;  %v7173_v31 = vld [vmem:[%s6779_s30 + $0x98] sm:$0xff] }
  0x45   : > { %10034 = vst [vmem:[#allocation23_spill] sm:$0xff] %v6999_v62  ;;  %1086 = vst.msk [vmem:[#allocation3 + $0xf8] sm:$0xff] %vm311_vm0, %v6984_v57 }
  0x46   : > { %1725 = vst.msk [vmem:[#allocation3 + $0xd0] sm:$0xff] %vm311_vm0, %v6988_v59  ;;  %1726 = vst.msk [vmem:[#allocation3 + $0xe8] sm:$0xff] %vm311_vm0, %v6986_v58  ;;  %535 = vrot.lane.b32.xlu1 %v6886_v36, %s6577_s14  ;;  %v1757_v36 = vld [vmem:[#allocation3 + $0x40] sm:$0xff]  ;;  %6326 = vmatprep.mubr.msk.bf16.mxu1 %vm311_vm0, %v1847_v60 }
  0x47   : > { %381 = vst.msk [vmem:[#allocation2 + $0xa9] sm:$0xff] %vm311_vm0, %v6996_v61  ;;  %382 = vst.msk [vmem:[#allocation2 + $0xb1] sm:$0xff] %vm311_vm0, %v6999_v62  ;;  %1176 = vrot.lane.b32.xlu0 %v6884_v35, %s6577_s14 }
  0x48   : > { %10035 = vst [vmem:[#allocation24_spill] sm:$0xff] %v7074_v1  ;;  %10036 = vst [vmem:[#allocation25_spill] sm:$0xff] %v7077_v2 }
  0x49   : > { %383 = vst.msk [vmem:[#allocation2 + $0xc1] sm:$0xff] %vm311_vm0, %v7074_v1  ;;  %384 = vst.msk [vmem:[#allocation2 + $0xc9] sm:$0xff] %vm311_vm0, %v7077_v2 }
  0x4a   : > { %1371 = vrot.lane.b32.xlu1 %v6896_v38, %s6578_s15  ;;  %386 = vst.msk [vmem:[#allocation2 + $0xe1] sm:$0xff] %vm311_vm0, %v7115_v24  ;;  %388 = vst.msk [vmem:[#allocation2 + $0xf9] sm:$0xff] %vm311_vm0, %v7173_v31 }
  0x4b   : > { %533 = vrot.lane.b32.xlu0 %v6888_v37, %s6577_s14  ;;  %v1850_v37 = vpack.c.bf16 %v1760_v63, %v1757_v36  ;;  %v1766_v36 = vld [vmem:[#allocation3 + $0x88] sm:$0xff]  ;;  %v1769_v63 = vld [vmem:[#allocation3 + $0xa0] sm:$0xff] }
  0x4d   : > { %6327 = vmatmul.mubr.msk.bf16.vlgmr.msra.gmra.mxu1 %vm311_vm0, %v1850_v37  ;;  %v1772_v37 = vld [vmem:[#allocation3 + $0xb8] sm:$0xff] }
  0x4e   : > { %v7034_v5 = vld [vmem:[#allocation2 + $0xb1] sm:$0xff]  ;;  %v7041_v10 = vld [vmem:[#allocation2 + $0xa9] sm:$0xff]  ;;  %728 = vrot.lane.b32.xlu1 %v6857_v27, %s6578_s15  ;;  %v7104_v27 = vld [vmem:[%s6779_s30 + $0x80] sm:$0xff]  ;;  %v1856_v0 = vpack.c.bf16 %v1772_v37, %v1769_v63 }
  0x4f   : > { %1089 = vst.msk [vmem:[#allocation3 + $0x140] sm:$0xff] %vm311_vm0, %v7034_v5  ;;  %1088 = vst.msk [vmem:[#allocation3 + $0x128] sm:$0xff] %vm311_vm0, %v7041_v10  ;;  %v7055_v22 = vld [vmem:[#allocation2 + $0xb2] sm:$0xff]  ;;  %v7057_v23 = vld [vmem:[#allocation2 + $0xaa] sm:$0xff]  ;;  %1369 = vrot.lane.b32.xlu0 %v6898_v39, %s6578_s15 }
  0x50   : > { %1727 = vst.msk [vmem:[#allocation3 + $0x100] sm:$0xff] %vm311_vm0, %v7057_v23  ;;  %1728 = vst.msk [vmem:[#allocation3 + $0x118] sm:$0xff] %vm311_vm0, %v7055_v22  ;;  %v7093_v3 = vld [vmem:[#allocation2 + $0xc8] sm:$0xff]  ;;  %v7095_v4 = vld [vmem:[#allocation2 + $0xc0] sm:$0xff] }
  0x51   : > { %v7097_v9 = vld [vmem:[#allocation2 + $0xc9] sm:$0xff]  ;;  %v7099_v11 = vld [vmem:[#allocation2 + $0xc1] sm:$0xff]  ;;  %450 = vst.msk [vmem:[#allocation3 + $0x198] sm:$0xff] %vm311_vm0, %v7093_v3  ;;  %449 = vst.msk [vmem:[#allocation3 + $0x180] sm:$0xff] %vm311_vm0, %v7095_v4 }
  0x52   : > { %1563 = vrot.lane.b32.xlu1 %v6900_v40, %s6579_s20  ;;  %v7101_v20 = vld [vmem:[#allocation2 + $0xca] sm:$0xff]  ;;  %1091 = vst.msk [vmem:[#allocation3 + $0x170] sm:$0xff] %vm311_vm0, %v7097_v9  ;;  %385 = vst.msk [vmem:[#allocation2 + $0xd9] sm:$0xff] %vm311_vm0, %v7104_v27  ;;  %v1775_v63 = vld [vmem:[#allocation3 + $0xd0] sm:$0xff] }
  0x53   : > { %726 = vrot.lane.b32.xlu0 %v6855_v26, %s6578_s15  ;;  %v7112_v26 = vld [vmem:[#allocation2 + $0xc2] sm:$0xff]  ;;  %1090 = vst.msk [vmem:[#allocation3 + $0x158] sm:$0xff] %vm311_vm0, %v7099_v11  ;;  %1730 = vst.msk [vmem:[#allocation3 + $0x148] sm:$0xff] %vm311_vm0, %v7101_v20  ;;  %v1778_v37 = vld [vmem:[#allocation3 + $0xe8] sm:$0xff] }
  0x54   : > { %1729 = vst.msk [vmem:[#allocation3 + $0x130] sm:$0xff] %vm311_vm0, %v7112_v26  ;;  %v1859_v1 = vpack.c.bf16 %v1778_v37, %v1775_v63  ;;  %v414_v37 = vld [vmem:[#allocation2 + $0x98] sm:$0xff] }
  0x55   : > { %446 = vst.msk [vmem:[#allocation3 + $0x138] sm:$0xff] %vm311_vm0, %v414_v37 }
  0x56   : > { %921 = vrot.lane.b32.xlu1 %v6872_v32, %s6579_s20 }
  0x57   : > { %1561 = vrot.lane.b32.xlu0 %v6910_v41, %s6579_s20  ;;  %v1781_v2 = vld [vmem:[#allocation3 + $0x100] sm:$0xff]  ;;  %v1784_v61 = vld [vmem:[#allocation3 + $0x118] sm:$0xff] }
  0x58   : > { %v1862_v19 = vpack.c.bf16 %v1784_v61, %v1781_v2  ;;  %v7310_v61 = vld [vmem:[#allocation2 + $0xb0] sm:$0xff] }
  0x59   : > { %v7135_v25 = vld [vmem:[#allocation2 + $0xe0] sm:$0xff]  ;;  %v7137_v30 = vld [vmem:[#allocation2 + $0xd8] sm:$0xff] }
  0x5a   : > { %1182 = vrot.lane.b32.xlu1 %v6912_v42, %s6577_s14  ;;  %452 = vst.msk [vmem:[#allocation3 + $0x1c8] sm:$0xff] %vm311_vm0, %v7135_v25  ;;  %451 = vst.msk [vmem:[#allocation3 + $0x1b0] sm:$0xff] %vm311_vm0, %v7137_v30  ;;  %v7155_v32 = vld [vmem:[#allocation2 + $0xd9] sm:$0xff] }
  0x5b   : > { %919 = vrot.lane.b32.xlu0 %v6859_v28, %s6579_s20  ;;  %v7149_v28 = vld [vmem:[#allocation2 + $0xe1] sm:$0xff]  ;;  %1092 = vst.msk [vmem:[#allocation3 + $0x188] sm:$0xff] %vm311_vm0, %v7155_v32 }
  0x5c   : > { %1093 = vst.msk [vmem:[#allocation3 + $0x1a0] sm:$0xff] %vm311_vm0, %v7149_v28 }
  0x5e   : > { %539 = vrot.lane.b32.xlu1 %v6874_v33, %s6577_s14  ;;  %v7170_v33 = vld [vmem:[%s6779_s30 + $0x90] sm:$0xff] }
  0x5f   : > { %1180 = vrot.lane.b32.xlu0 %v6914_v43, %s6577_s14  ;;  %387 = vst.msk [vmem:[#allocation2 + $0xf1] sm:$0xff] %vm311_vm0, %v7170_v33 }
  0x62   : > { %1375 = vrot.lane.b32.xlu1 %v6924_v44, %s6578_s15 }
  0x63   : > { %537 = vrot.lane.b32.xlu0 %v6863_v29, %s6577_s14  ;;  %v7167_v29 = vld [vmem:[#allocation2 + $0xe2] sm:$0xff] }
  0x64   : > { %1732 = vst.msk [vmem:[#allocation3 + $0x178] sm:$0xff] %vm311_vm0, %v7167_v29 }
  0x66   : > { %732 = vrot.lane.b32.xlu1 %v6876_v34, %s6578_s15  ;;  %v7181_v34 = vld [vmem:[#allocation2 + $0xda] sm:$0xff] }
  0x67   : > { %1373 = vrot.lane.b32.xlu0 %v6926_v45, %s6578_s15  ;;  %1731 = vst.msk [vmem:[#allocation3 + $0x160] sm:$0xff] %vm311_vm0, %v7181_v34 }
  0x6a   : > { %1567 = vrot.lane.b32.xlu1 %v6928_v46, %s6579_s20 }
  0x6b   : > { %730 = vrot.lane.b32.xlu0 %v6884_v35, %s6578_s15  ;;  %v1763_v35 = vld [vmem:[#allocation3 + $0x70] sm:$0xff] }
  0x6c   : > { %v1853_v60 = vpack.c.bf16 %v1766_v36, %v1763_v35  ;;  %v7279_v36 = vld [vmem:[%s6779_s30 + $0xb8] sm:$0xff] }
  0x6d   : > { %392 = vst.msk [vmem:[#allocation2 + $0x129] sm:$0xff] %vm311_vm0, %v7279_v36 }
  0x6e   : > { %925 = vrot.lane.b32.xlu1 %v6896_v38, %s6579_s20  ;;  %6330 = vmatprep.mubr.msk.bf16.mxu1 %vm311_vm0, %v1853_v60  ;;  %v7201_v38 = vld [vmem:[#allocation2 + $0xf9] sm:$0xff] }
  0x6f   : > { %1565 = vrot.lane.b32.xlu0 %v6936_v47, %s6579_s20  ;;  %6331 = vmatmul.mubr.msk.bf16.gmra.mxu1 %vm311_vm0, %v1856_v0  ;;  %1095 = vst.msk [vmem:[#allocation3 + $0x1d0] sm:$0xff] %vm311_vm0, %v7201_v38  ;;  %v7219_v0 = vld [vmem:[#allocation2 + $0xfa] sm:$0xff] }
  0x70   : > { %1734 = vst.msk [vmem:[#allocation3 + $0x1a8] sm:$0xff] %vm311_vm0, %v7219_v0  ;;  %6334 = vmatprep.mubr.msk.bf16.mxu1 %vm311_vm0, %v1859_v1  ;;  %v7320_v1 = vld [vmem:[#allocation2 + $0xa8] sm:$0xff] }
  0x72   : > { %1186 = vrot.lane.b32.xlu1 %v6938_v48, %s6577_s14 }
  0x73   : > { %923 = vrot.lane.b32.xlu0 %v6898_v39, %s6579_s20  ;;  %v7207_v39 = vld [vmem:[#allocation2 + $0xf1] sm:$0xff] }
  0x74   : > { %1094 = vst.msk [vmem:[#allocation3 + $0x1b8] sm:$0xff] %vm311_vm0, %v7207_v39 }
  0x76   : > { %543 = vrot.lane.b32.xlu1 %v6900_v40, %s6577_s14  ;;  %v7222_v40 = vld [vmem:[%s6779_s30 + $0xa0] sm:$0xff] }
  0x77   : > { %1184 = vrot.lane.b32.xlu0 %v6940_v49, %s6577_s14  ;;  %389 = vst.msk [vmem:[#allocation2 + $0x109] sm:$0xff] %vm311_vm0, %v7222_v40  ;;  %6335 = vmatmul.mubr.msk.bf16.gmra.mxu1 %vm311_vm0, %v1862_v19  ;;  %v7316_v19 = vld [vmem:[#allocation2 + $0x129] sm:$0xff] }
  0x78   : > { %1099 = vst.msk [vmem:[#allocation3 + $0x230] sm:$0xff] %vm311_vm0, %v7316_v19 }
  0x7a   : > { %1379 = vrot.lane.b32.xlu1 %v6948_v50, %s6578_s15 }
  0x7b   : > { %541 = vrot.lane.b32.xlu0 %v6910_v41, %s6577_s14  ;;  %v7225_v41 = vld [vmem:[%s6779_s30 + $0xa8] sm:$0xff] }
  0x7c   : > { %390 = vst.msk [vmem:[#allocation2 + $0x111] sm:$0xff] %vm311_vm0, %v7225_v41 }
  0x7e   : > { %736 = vrot.lane.b32.xlu1 %v6912_v42, %s6578_s15  ;;  %v7233_v42 = vld [vmem:[#allocation2 + $0xf2] sm:$0xff]  ;;  %v7261_v35 = vld [vmem:[#allocation2 + $0x109] sm:$0xff] }
  0x7f   : > { %1377 = vrot.lane.b32.xlu0 %v6950_v51, %s6578_s15  ;;  %1733 = vst.msk [vmem:[#allocation3 + $0x190] sm:$0xff] %vm311_vm0, %v7233_v42  ;;  %1096 = vst.msk [vmem:[#allocation3 + $0x1e8] sm:$0xff] %vm311_vm0, %v7261_v35 }
  0x82   : > { %1571 = vrot.lane.b32.xlu1 %v6952_v52, %s6579_s20 }
  0x83   : > { %734 = vrot.lane.b32.xlu0 %v6914_v43, %s6578_s15  ;;  %v7249_v43 = vld [vmem:[#allocation2 + $0x98] sm:$0xff]  ;;  %v7287_v60 = vld [vmem:[#allocation2 + $0x10a] sm:$0xff] }
  0x84   : > { %1735 = vst.msk [vmem:[#allocation3 + $0x1c0] sm:$0xff] %vm311_vm0, %v7287_v60 }
  0x86   : > { %929 = vrot.lane.b32.xlu1 %v6924_v44, %s6579_s20  ;;  %v7253_v44 = vld [vmem:[#allocation2 + $0x111] sm:$0xff] }
  0x87   : > { %1569 = vrot.lane.b32.xlu0 %v6962_v53, %s6579_s20  ;;  %1097 = vst.msk [vmem:[#allocation3 + $0x200] sm:$0xff] %vm311_vm0, %v7253_v44 }
  0x8a   : > { %1190 = vrot.lane.b32.xlu1 %v6964_v54, %s6577_s14 }
  0x8b   : > { %927 = vrot.lane.b32.xlu0 %v6926_v45, %s6579_s20  ;;  %v7257_v45 = vld [vmem:[#allocation2 + $0x90] sm:$0xff] }
  0x8e   : > { %547 = vrot.lane.b32.xlu1 %v6928_v46, %s6577_s14  ;;  %v7273_v46 = vld [vmem:[#allocation2 + $0x112] sm:$0xff] }
  0x8f   : > { %1188 = vrot.lane.b32.xlu0 %v6966_v55, %s6577_s14  ;;  %1736 = vst.msk [vmem:[#allocation3 + $0x1d8] sm:$0xff] %vm311_vm0, %v7273_v46 }
  0x92   : > { %1383 = vrot.lane.b32.xlu1 %v7249_v43, %s6578_s15 }
  0x93   : > { %545 = vrot.lane.b32.xlu0 %v6936_v47, %s6577_s14  ;;  %v7276_v47 = vld [vmem:[%s6779_s30 + $0xb0] sm:$0xff] }
  0x94   : > { %10037 = vst [vmem:[#allocation26_spill] sm:$0xff] %v7276_v47  ;;  %391 = vst.msk [vmem:[#allocation2 + $0x121] sm:$0xff] %vm311_vm0, %v7276_v47 }
  0x96   : > { %740 = vrot.lane.b32.xlu1 %v6938_v48, %s6578_s15  ;;  %v530_v48 = vpop.permute.xlu1 %529 }
  0x97   : > { %1381 = vrot.lane.b32.xlu0 %v7257_v45, %s6578_s15  ;;  %626 = vst.msk [vmem:[#allocation3] sm:$0xff] %vm625_vm3, %v530_v48 }
  0x9a   : > { %1575 = vrot.lane.b32.xlu1 %v6976_v56, %s6579_s20  ;;  %v532_v62 = vpop.permute.xlu1 %531 }
  0x9b   : > { %738 = vrot.lane.b32.xlu0 %v6940_v49, %s6578_s15  ;;  %v723_v49 = vpop.permute.xlu0 %722  ;;  %627 = vst.msk [vmem:[#allocation3 + $0x18] sm:$0xff] %vm625_vm3, %v532_v62 }
  0x9c   : > { %819 = vst.msk [vmem:[#allocation3] sm:$0xff] %vm818_vm4, %v723_v49  ;;  %v7325_v49 = vld [vmem:[#allocation2 + $0x121] sm:$0xff] }
  0x9d   : > { %1098 = vst.msk [vmem:[#allocation3 + $0x218] sm:$0xff] %vm311_vm0, %v7325_v49 }
  0x9e   : > { %933 = vrot.lane.b32.xlu1 %v6948_v50, %s6579_s20  ;;  %v725_v48 = vpop.permute.xlu1 %724 }
  0x9f   : > { %1573 = vrot.lane.b32.xlu0 %v6984_v57, %s6579_s20  ;;  %820 = vst.msk [vmem:[#allocation3 + $0x18] sm:$0xff] %vm818_vm4, %v725_v48  ;;  %v413_v48 = vld [vmem:[#allocation2 + $0x90] sm:$0xff] }
  0xa0   : > { %445 = vst.msk [vmem:[#allocation3 + $0x120] sm:$0xff] %vm311_vm0, %v413_v48 }
  0xa2   : > { %1194 = vrot.lane.b32.xlu1 %v6986_v58, %s6577_s14 }
  0xa3   : > { %931 = vrot.lane.b32.xlu0 %v6950_v51, %s6579_s20 }
  0xa5   : > { %v1173_v50 = vpop.permute.xlu0 %1172 }
  0xa6   : > { %1268 = vst.msk [vmem:[#allocation3 + $0x8] sm:$0xff] %vm625_vm3, %v1173_v50  ;;  %551 = vrot.lane.b32.xlu1 %v6952_v52, %s6577_s14  ;;  %v7341_v50 = vld [vmem:[#allocation2 + $0x12a] sm:$0xff] }
  0xa7   : > { %1192 = vrot.lane.b32.xlu0 %v6988_v59, %s6577_s14  ;;  %1738 = vst.msk [vmem:[#allocation3 + $0x208] sm:$0xff] %vm311_vm0, %v7341_v50 }
  0xa8   : > { %v1368_v62 = vpop.permute.xlu1 %1367 }
  0xa9   : > { %v1175_v51 = vpop.permute.xlu0 %1174 }
  0xaa   : > { %1269 = vst.msk [vmem:[#allocation3 + $0x20] sm:$0xff] %vm625_vm3, %v1175_v51  ;;  %1387 = vrot.lane.b32.xlu1 %v7310_v61, %s6578_s15  ;;  %v7344_v51 = vld [vmem:[%s6779_s30 + $0xc0] sm:$0xff] }
  0xab   : > { %1462 = vst.msk [vmem:[#allocation3 + $0x20] sm:$0xff] %vm818_vm4, %v1368_v62  ;;  %549 = vrot.lane.b32.xlu0 %v6962_v53, %s6577_s14  ;;  %10038 = vst [vmem:[#allocation27_spill] sm:$0xff] %v7344_v51  ;;  %v7348_v62 = vld [vmem:[%s6779_s30 + $0xc8] sm:$0xff] }
  0xac   : > { %v1560_v2 = vpop.permute.xlu1 %1559  ;;  %10039 = vst [vmem:[#allocation28_spill] sm:$0xff] %v7348_v62  ;;  %393 = vst.msk [vmem:[#allocation2 + $0x139] sm:$0xff] %vm311_vm0, %v7344_v51 }
  0xad   : > { %v1366_v52 = vpop.permute.xlu0 %1365  ;;  %1654 = vst.msk [vmem:[#allocation3 + $0x20] sm:$0xff] %vm1011_vm5, %v1560_v2 }
  0xae   : > { %1461 = vst.msk [vmem:[#allocation3 + $0x8] sm:$0xff] %vm818_vm4, %v1366_v52  ;;  %744 = vrot.lane.b32.xlu1 %v6964_v54, %s6578_s15  ;;  %v7355_v52 = vld [vmem:[#allocation2 + $0x122] sm:$0xff] }
  0xaf   : > { %1385 = vrot.lane.b32.xlu0 %v7320_v1, %s6578_s15  ;;  %394 = vst.msk [vmem:[#allocation2 + $0x141] sm:$0xff] %vm311_vm0, %v7348_v62  ;;  %1737 = vst.msk [vmem:[#allocation3 + $0x1f0] sm:$0xff] %vm311_vm0, %v7355_v52 }
  0xb0   : > { %v918_v63 = vpop.permute.xlu1 %917 }
  0xb1   : > { %v1558_v53 = vpop.permute.xlu0 %1557  ;;  %1013 = vst.msk [vmem:[#allocation3 + $0x18] sm:$0xff] %vm1011_vm5, %v918_v63 }
  0xb2   : > { %1653 = vst.msk [vmem:[#allocation3 + $0x8] sm:$0xff] %vm1011_vm5, %v1558_v53  ;;  %1579 = vrot.lane.b32.xlu1 %v7034_v5, %s6579_s20 }
  0xb3   : > { %742 = vrot.lane.b32.xlu0 %v6966_v55, %s6578_s15 }
  0xb4   : > { %v1179_v55 = vpop.permute.xlu1 %1178  ;;  %v1753_v2 = vld [vmem:[#allocation3 + $0x20] sm:$0xff] }
  0xb5   : > { %v916_v54 = vpop.permute.xlu0 %915  ;;  %1271 = vst.msk [vmem:[#allocation3 + $0x50] sm:$0xff] %vm625_vm3, %v1179_v55 }
  0xb6   : > { %1012 = vst.msk [vmem:[#allocation3] sm:$0xff] %vm1011_vm5, %v916_v54  ;;  %937 = vrot.lane.b32.xlu1 %v7249_v43, %s6579_s20 }
  0xb7   : > { %1577 = vrot.lane.b32.xlu0 %v7041_v10, %s6579_s20 }
  0xb8   : > { %v536_v37 = vpop.permute.xlu1 %535  ;;  %v1752_v54 = vld [vmem:[#allocation3 + $0x18] sm:$0xff] }
  0xb9   : > { %v1177_v53 = vpop.permute.xlu0 %1176  ;;  %v1750_v63 = vld [vmem:[#allocation3 + $0x8] sm:$0xff]  ;;  %629 = vst.msk [vmem:[#allocation3 + $0x48] sm:$0xff] %vm625_vm3, %v536_v37  ;;  %v416_v37 = vld [vmem:[#allocation2 + $0xb0] sm:$0xff] }
  0xba   : > { %1270 = vst.msk [vmem:[#allocation3 + $0x38] sm:$0xff] %vm625_vm3, %v1177_v53  ;;  %v1846_v48 = vpack.c.bf16 %v1753_v2, %v1750_v63  ;;  %1198 = vrot.lane.b32.xlu1 %v7055_v22, %s6577_s14  ;;  %v7382_v53 = vld [vmem:[#allocation2 + $0x141] sm:$0xff] }
  0xbb   : > { %935 = vrot.lane.b32.xlu0 %v7257_v45, %s6579_s20  ;;  %1101 = vst.msk [vmem:[#allocation3 + $0x260] sm:$0xff] %vm311_vm0, %v7382_v53  ;;  %448 = vst.msk [vmem:[#allocation3 + $0x168] sm:$0xff] %vm311_vm0, %v416_v37 }
  0xbc   : > { %2124 = vmatprep.mubr.bf16.mxu0 %v1846_v48  ;;  %v1372_v43 = vpop.permute.xlu1 %1371  ;;  %v7405_v48 = vld [vmem:[#allocation2 + $0x142] sm:$0xff] }
  0xbd   : > { %v534_v55 = vpop.permute.xlu0 %533  ;;  %v1749_v21 = vld [vmem:[#allocation3] sm:$0xff]  ;;  %1464 = vst.msk [vmem:[#allocation3 + $0x50] sm:$0xff] %vm818_vm4, %v1372_v43  ;;  %v7412_v43 = vld [vmem:[%s6779_s30 + $0xd8] sm:$0xff] }
  0xbe   : > { %628 = vst.msk [vmem:[#allocation3 + $0x30] sm:$0xff] %vm625_vm3, %v534_v55  ;;  %v1845_v17 = vpack.c.bf16 %v1752_v54, %v1749_v21  ;;  %555 = vrot.lane.b32.xlu1 %v6976_v56, %s6577_s14  ;;  %v7389_v56 = vld [vmem:[#allocation2 + $0x139] sm:$0xff]  ;;  %v415_v54 = vld [vmem:[#allocation2 + $0xa8] sm:$0xff]  ;;  %v7408_v55 = vld [vmem:[%s6779_s30 + $0xd0] sm:$0xff] }
  0xbf   : > { %1196 = vrot.lane.b32.xlu0 %v7057_v23, %s6577_s14  ;;  %1100 = vst.msk [vmem:[#allocation3 + $0x248] sm:$0xff] %vm311_vm0, %v7389_v56  ;;  %10040 = vst [vmem:[#allocation29_spill] sm:$0xff] %v7408_v55 }
  0xc0   : > { %2125 = vmatmul.mubr.bf16.vlgmr.msra.gmra.mxu0 %v1845_v17  ;;  %v729_v2 = vpop.permute.xlu1 %728  ;;  %447 = vst.msk [vmem:[#allocation3 + $0x150] sm:$0xff] %vm311_vm0, %v415_v54  ;;  %10041 = vst [vmem:[#allocation30_spill] sm:$0xff] %v7412_v43  ;;  %v1793_v54 = vld [vmem:[#allocation3 + $0x160] sm:$0xff] }
  0xc1   : > { %v1370_v45 = vpop.permute.xlu0 %1369  ;;  %822 = vst.msk [vmem:[#allocation3 + $0x48] sm:$0xff] %vm818_vm4, %v729_v2 }
  0xc2   : > { %1463 = vst.msk [vmem:[#allocation3 + $0x38] sm:$0xff] %vm818_vm4, %v1370_v45  ;;  %1391 = vrot.lane.b32.xlu1 %v7093_v3, %s6578_s15  ;;  %v7419_v45 = vld [vmem:[#allocation2 + $0x13a] sm:$0xff] }
  0xc3   : > { %553 = vrot.lane.b32.xlu0 %v6984_v57, %s6577_s14  ;;  %395 = vst.msk [vmem:[#allocation2 + $0x151] sm:$0xff] %vm311_vm0, %v7408_v55  ;;  %1740 = vst.msk [vmem:[#allocation3 + $0x238] sm:$0xff] %vm311_vm0, %v7405_v48 }
  0xc4   : > { %v1564_v21 = vpop.permute.xlu1 %1563  ;;  %396 = vst.msk [vmem:[#allocation2 + $0x159] sm:$0xff] %vm311_vm0, %v7412_v43  ;;  %1739 = vst.msk [vmem:[#allocation3 + $0x220] sm:$0xff] %vm311_vm0, %v7419_v45  ;;  %v5394_v43 = vld [vmem:[%s9966_s6 + $0xe0] sm:$0xff] }
  0xc5   : > { %v727_v17 = vpop.permute.xlu0 %726  ;;  %1656 = vst.msk [vmem:[#allocation3 + $0x50] sm:$0xff] %vm1011_vm5, %v1564_v21  ;;  %v1790_v21 = vld [vmem:[#allocation3 + $0x148] sm:$0xff] }
  0xc6   : > { %821 = vst.msk [vmem:[#allocation3 + $0x30] sm:$0xff] %vm818_vm4, %v727_v17  ;;  %748 = vrot.lane.b32.xlu1 %v6986_v58, %s6578_s15  ;;  %v1787_v17 = vld [vmem:[#allocation3 + $0x130] sm:$0xff] }
  0xc7   : > { %1389 = vrot.lane.b32.xlu0 %v7095_v4, %s6578_s15  ;;  %v1865_v37 = vpack.c.bf16 %v1790_v21, %v1787_v17 }
  0xc8   : > { %v922_v63 = vpop.permute.xlu1 %921 }
  0xc9   : > { %v1562_v57 = vpop.permute.xlu0 %1561  ;;  %1015 = vst.msk [vmem:[#allocation3 + $0x48] sm:$0xff] %vm1011_vm5, %v922_v63  ;;  %6338 = vmatprep.mubr.msk.bf16.mxu1 %vm311_vm0, %v1865_v37 }
  0xca   : > { %1655 = vst.msk [vmem:[#allocation3 + $0x38] sm:$0xff] %vm1011_vm5, %v1562_v57  ;;  %1583 = vrot.lane.b32.xlu1 %v7097_v9, %s6579_s20 }
  0xcb   : > { %746 = vrot.lane.b32.xlu0 %v6988_v59, %s6578_s15  ;;  %v7470_v37 = vld [vmem:[#allocation2 + $0x15a] sm:$0xff] }
  0xcc   : > { %v1183_v59 = vpop.permute.xlu1 %1182  ;;  %v1759_v2 = vld [vmem:[#allocation3 + $0x50] sm:$0xff]  ;;  %1742 = vst.msk [vmem:[#allocation3 + $0x268] sm:$0xff] %vm311_vm0, %v7470_v37 }
  0xcd   : > { %v920_v58 = vpop.permute.xlu0 %919  ;;  %1273 = vst.msk [vmem:[#allocation3 + $0x80] sm:$0xff] %vm625_vm3, %v1183_v59 }
  0xce   : > { %1014 = vst.msk [vmem:[#allocation3 + $0x30] sm:$0xff] %vm1011_vm5, %v920_v58  ;;  %941 = vrot.lane.b32.xlu1 %v7310_v61, %s6579_s20  ;;  %v1796_v58 = vld [vmem:[#allocation3 + $0x178] sm:$0xff] }
  0xcf   : > { %1581 = vrot.lane.b32.xlu0 %v7099_v11, %s6579_s20  ;;  %v1868_v15 = vpack.c.bf16 %v1796_v58, %v1793_v54  ;;  %v7473_v54 = vld [vmem:[%s6779_s30 + $0xe0] sm:$0xff]  ;;  %v7476_v58 = vld [vmem:[%s6779_s30 + $0xe8] sm:$0xff] }
  0xd0   : > { %v540_v59 = vpop.permute.xlu1 %539  ;;  %v1758_v16 = vld [vmem:[#allocation3 + $0x48] sm:$0xff]  ;;  %10042 = vst [vmem:[#allocation31_spill] sm:$0xff] %v7473_v54  ;;  %10043 = vst [vmem:[#allocation32_spill] sm:$0xff] %v7476_v58 }
  0xd1   : > { %v1181_v57 = vpop.permute.xlu0 %1180  ;;  %v1756_v63 = vld [vmem:[#allocation3 + $0x38] sm:$0xff]  ;;  %631 = vst.msk [vmem:[#allocation3 + $0x78] sm:$0xff] %vm625_vm3, %v540_v59  ;;  %6339 = vmatmul.mubr.msk.bf16.gmra.mxu1 %vm311_vm0, %v1868_v15  ;;  %v7448_v15 = vld [vmem:[#allocation2 + $0x159] sm:$0xff] }
  0xd2   : > { %1272 = vst.msk [vmem:[#allocation3 + $0x68] sm:$0xff] %vm625_vm3, %v1181_v57  ;;  %v1849_v18 = vpack.c.bf16 %v1759_v2, %v1756_v63  ;;  %1202 = vrot.lane.b32.xlu1 %v7101_v20, %s6577_s14  ;;  %v7455_v57 = vld [vmem:[#allocation2 + $0x151] sm:$0xff] }
  0xd3   : > { %939 = vrot.lane.b32.xlu0 %v7320_v1, %s6579_s20  ;;  %1103 = vst.msk [vmem:[#allocation3 + $0x290] sm:$0xff] %vm311_vm0, %v7448_v15  ;;  %1102 = vst.msk [vmem:[#allocation3 + $0x278] sm:$0xff] %vm311_vm0, %v7455_v57 }
  0xd4   : > { %2132 = vmatprep.mubr.bf16.mxu0 %v1849_v18  ;;  %v1376_v2 = vpop.permute.xlu1 %1375  ;;  %397 = vst.msk [vmem:[#allocation2 + $0x169] sm:$0xff] %vm311_vm0, %v7473_v54  ;;  %398 = vst.msk [vmem:[#allocation2 + $0x171] sm:$0xff] %vm311_vm0, %v7476_v58 }
  0xd5   : > { %v538_v61 = vpop.permute.xlu0 %537  ;;  %v1755_v17 = vld [vmem:[#allocation3 + $0x30] sm:$0xff]  ;;  %1466 = vst.msk [vmem:[#allocation3 + $0x80] sm:$0xff] %vm818_vm4, %v1376_v2 }
  0xd6   : > { %630 = vst.msk [vmem:[#allocation3 + $0x60] sm:$0xff] %vm625_vm3, %v538_v61  ;;  %v1848_v21 = vpack.c.bf16 %v1758_v16, %v1755_v17  ;;  %559 = vrot.lane.b32.xlu1 %v7034_v5, %s6577_s14 }
  0xd7   : > { %1200 = vrot.lane.b32.xlu0 %v7112_v26, %s6577_s14 }
  0xd8   : > { %2133 = vmatmul.mubr.bf16.gmra.mxu0 %v1848_v21  ;;  %v733_v1 = vpop.permute.xlu1 %732 }
  0xd9   : > { %v1374_v18 = vpop.permute.xlu0 %1373  ;;  %824 = vst.msk [vmem:[#allocation3 + $0x78] sm:$0xff] %vm818_vm4, %v733_v1 }
  0xda   : > { %1465 = vst.msk [vmem:[#allocation3 + $0x68] sm:$0xff] %vm818_vm4, %v1374_v18  ;;  %1395 = vrot.lane.b32.xlu1 %v7135_v25, %s6578_s15 }
  0xdb   : > { %557 = vrot.lane.b32.xlu0 %v7041_v10, %s6577_s14 }
  0xdc   : > { %v1568_v5 = vpop.permute.xlu1 %1567 }
  0xdd   : > { %v731_v16 = vpop.permute.xlu0 %730  ;;  %1658 = vst.msk [vmem:[#allocation3 + $0x80] sm:$0xff] %vm1011_vm5, %v1568_v5 }
  0xde   : > { %823 = vst.msk [vmem:[#allocation3 + $0x60] sm:$0xff] %vm818_vm4, %v731_v16  ;;  %752 = vrot.lane.b32.xlu1 %v7055_v22, %s6578_s15 }
  0xdf   : > { %1393 = vrot.lane.b32.xlu0 %v7137_v30, %s6578_s15 }
  0xe0   : > { %v926_v63 = vpop.permute.xlu1 %925 }
  0xe1   : > { %v1566_v10 = vpop.permute.xlu0 %1565  ;;  %1017 = vst.msk [vmem:[#allocation3 + $0x78] sm:$0xff] %vm1011_vm5, %v926_v63  ;;  %v7506_v63 = vld [vmem:[#allocation2 + $0xf8] sm:$0xff] }
  0xe2   : > { %1657 = vst.msk [vmem:[#allocation3 + $0x68] sm:$0xff] %vm1011_vm5, %v1566_v10  ;;  %1587 = vrot.lane.b32.xlu1 %v7149_v28, %s6579_s20 }
  0xe3   : > { %750 = vrot.lane.b32.xlu0 %v7057_v23, %s6578_s15  ;;  %v7485_v23 = vld [vmem:[#allocation2 + $0x152] sm:$0xff] }
  0xe4   : > { %v1187_v22 = vpop.permute.xlu1 %1186  ;;  %v1765_v61 = vld [vmem:[#allocation3 + $0x80] sm:$0xff]  ;;  %1741 = vst.msk [vmem:[#allocation3 + $0x250] sm:$0xff] %vm311_vm0, %v7485_v23 }
  0xe5   : > { %v924_v59 = vpop.permute.xlu0 %923  ;;  %1275 = vst.msk [vmem:[#allocation3 + $0xb0] sm:$0xff] %vm625_vm3, %v1187_v22  ;;  %v7512_v22 = vld [vmem:[#allocation2 + $0x171] sm:$0xff] }
  0xe6   : > { %1016 = vst.msk [vmem:[#allocation3 + $0x60] sm:$0xff] %vm1011_vm5, %v924_v59  ;;  %945 = vrot.lane.b32.xlu1 %v7093_v3, %s6579_s20 }
  0xe7   : > { %1585 = vrot.lane.b32.xlu0 %v7155_v32, %s6579_s20  ;;  %1105 = vst.msk [vmem:[#allocation3 + $0x2c0] sm:$0xff] %vm311_vm0, %v7512_v22 }
  0xe8   : > { %v544_v21 = vpop.permute.xlu1 %543  ;;  %v1764_v1 = vld [vmem:[#allocation3 + $0x78] sm:$0xff] }
  0xe9   : > { %v1185_v17 = vpop.permute.xlu0 %1184  ;;  %v1762_v2 = vld [vmem:[#allocation3 + $0x68] sm:$0xff]  ;;  %633 = vst.msk [vmem:[#allocation3 + $0xa8] sm:$0xff] %vm625_vm3, %v544_v21 }
  0xea   : > { %1274 = vst.msk [vmem:[#allocation3 + $0x98] sm:$0xff] %vm625_vm3, %v1185_v17  ;;  %v1852_v18 = vpack.c.bf16 %v1765_v61, %v1762_v2  ;;  %1206 = vrot.lane.b32.xlu1 %v7167_v29, %s6577_s14  ;;  %v7516_v61 = vld [vmem:[#allocation2 + $0xf0] sm:$0xff] }
  0xeb   : > { %943 = vrot.lane.b32.xlu0 %v7095_v4, %s6579_s20  ;;  %v7521_v2 = vld [vmem:[#allocation2 + $0x169] sm:$0xff] }
  0xec   : > { %2140 = vmatprep.mubr.bf16.mxu0 %v1852_v18  ;;  %v1380_v3 = vpop.permute.xlu1 %1379  ;;  %1104 = vst.msk [vmem:[#allocation3 + $0x2a8] sm:$0xff] %vm311_vm0, %v7521_v2  ;;  %v7536_v18 = vld [vmem:[#allocation2 + $0x172] sm:$0xff] }
  0xed   : > { %v542_v16 = vpop.permute.xlu0 %541  ;;  %v1761_v5 = vld [vmem:[#allocation3 + $0x60] sm:$0xff]  ;;  %1468 = vst.msk [vmem:[#allocation3 + $0xb0] sm:$0xff] %vm818_vm4, %v1380_v3 }
  0xee   : > { %632 = vst.msk [vmem:[#allocation3 + $0x90] sm:$0xff] %vm625_vm3, %v542_v16  ;;  %v1851_v10 = vpack.c.bf16 %v1764_v1, %v1761_v5  ;;  %563 = vrot.lane.b32.xlu1 %v7097_v9, %s6577_s14  ;;  %v7539_v1 = vld [vmem:[%s6779_s30 + $0xf0] sm:$0xff]  ;;  %v7542_v16 = vld [vmem:[%s6779_s30 + $0xf8] sm:$0xff]  ;;  %s2414_s30 = sld [smem:[#allocation6]] }
  0xef   : > { %1204 = vrot.lane.b32.xlu0 %v7181_v34, %s6577_s14  ;;  %10044 = vst [vmem:[#allocation33_spill] sm:$0xff] %v7539_v1  ;;  %10045 = vst [vmem:[#allocation34_spill] sm:$0xff] %v7542_v16 }
  0xf0   : > { %2141 = vmatmul.mubr.bf16.gmra.mxu0 %v1851_v10  ;;  %v737_v59 = vpop.permute.xlu1 %736  ;;  %399 = vst.msk [vmem:[#allocation2 + $0x181] sm:$0xff] %vm311_vm0, %v7539_v1  ;;  %400 = vst.msk [vmem:[#allocation2 + $0x189] sm:$0xff] %vm311_vm0, %v7542_v16  ;;  %v1799_v10 = vld [vmem:[#allocation3 + $0x190] sm:$0xff] }
  0xf1   : > { %v1378_v4 = vpop.permute.xlu0 %1377  ;;  %826 = vst.msk [vmem:[#allocation3 + $0xa8] sm:$0xff] %vm818_vm4, %v737_v59 }
  0xf2   : > { %1467 = vst.msk [vmem:[#allocation3 + $0x98] sm:$0xff] %vm818_vm4, %v1378_v4  ;;  %1399 = vrot.lane.b32.xlu1 %v7506_v63, %s6578_s15  ;;  %v1802_v4 = vld [vmem:[#allocation3 + $0x1a8] sm:$0xff] }
  0xf3   : > { %561 = vrot.lane.b32.xlu0 %v7099_v11, %s6577_s14  ;;  %1744 = vst.msk [vmem:[#allocation3 + $0x298] sm:$0xff] %vm311_vm0, %v7536_v18 }
  0xf4   : > { %v1572_v17 = vpop.permute.xlu1 %1571 }
  0xf5   : > { %v735_v9 = vpop.permute.xlu0 %734  ;;  %1660 = vst.msk [vmem:[#allocation3 + $0xb0] sm:$0xff] %vm1011_vm5, %v1572_v17  ;;  %v1871_v17 = vpack.c.bf16 %v1802_v4, %v1799_v10 }
  0xf6   : > { %825 = vst.msk [vmem:[#allocation3 + $0x90] sm:$0xff] %vm818_vm4, %v735_v9  ;;  %756 = vrot.lane.b32.xlu1 %v7101_v20, %s6578_s15 }
  0xf7   : > { %1397 = vrot.lane.b32.xlu0 %v7516_v61, %s6578_s15  ;;  %6342 = vmatprep.mubr.msk.bf16.mxu1 %vm311_vm0, %v1871_v17 }
  0xf8   : > { %v930_v21 = vpop.permute.xlu1 %929 }
  0xf9   : > { %v1570_v11 = vpop.permute.xlu0 %1569  ;;  %1019 = vst.msk [vmem:[#allocation3 + $0xa8] sm:$0xff] %vm1011_vm5, %v930_v21  ;;  %v1808_v21 = vld [vmem:[#allocation3 + $0x1d8] sm:$0xff] }
  0xfa   : > { %1659 = vst.msk [vmem:[#allocation3 + $0x98] sm:$0xff] %vm1011_vm5, %v1570_v11  ;;  %1591 = vrot.lane.b32.xlu1 %v7201_v38, %s6579_s20  ;;  %v1805_v11 = vld [vmem:[#allocation3 + $0x1c0] sm:$0xff] }
  0xfb   : > { %754 = vrot.lane.b32.xlu0 %v7112_v26, %s6578_s15  ;;  %v7551_v26 = vld [vmem:[#allocation2 + $0x16a] sm:$0xff]  ;;  %v1874_v1 = vpack.c.bf16 %v1808_v21, %v1805_v11  ;;  %v7589_v11 = vld [vmem:[#allocation2 + $0x181] sm:$0xff] }
  0xfc   : > { %v1191_v20 = vpop.permute.xlu1 %1190  ;;  %v1771_v3 = vld [vmem:[#allocation3 + $0xb0] sm:$0xff]  ;;  %1743 = vst.msk [vmem:[#allocation3 + $0x280] sm:$0xff] %vm311_vm0, %v7551_v26  ;;  %1106 = vst.msk [vmem:[#allocation3 + $0x2d8] sm:$0xff] %vm311_vm0, %v7589_v11 }
  0xfd   : > { %v928_v5 = vpop.permute.xlu0 %927  ;;  %1277 = vst.msk [vmem:[#allocation3 + $0xe0] sm:$0xff] %vm625_vm3, %v1191_v20  ;;  %6343 = vmatmul.mubr.msk.bf16.gmra.mxu1 %vm311_vm0, %v1874_v1  ;;  %v7582_v1 = vld [vmem:[#allocation2 + $0x108] sm:$0xff] }
  0xfe   : > { %1018 = vst.msk [vmem:[#allocation3 + $0x90] sm:$0xff] %vm1011_vm5, %v928_v5  ;;  %949 = vrot.lane.b32.xlu1 %v7135_v25, %s6579_s20 }
  0xff   : > { %1589 = vrot.lane.b32.xlu0 %v7207_v39, %s6579_s20 }
 0x100   : > { %v548_v5 = vpop.permute.xlu1 %547  ;;  %v1770_v16 = vld [vmem:[#allocation3 + $0xa8] sm:$0xff] }
 0x101   : > { %v1189_v59 = vpop.permute.xlu0 %1188  ;;  %v1768_v9 = vld [vmem:[#allocation3 + $0x98] sm:$0xff]  ;;  %635 = vst.msk [vmem:[#allocation3 + $0xd8] sm:$0xff] %vm625_vm3, %v548_v5  ;;  %v422_v5 = vld [vmem:[#allocation2 + $0xf8] sm:$0xff] }
 0x102   : > { %1276 = vst.msk [vmem:[#allocation3 + $0xc8] sm:$0xff] %vm625_vm3, %v1189_v59  ;;  %v1855_v20 = vpack.c.bf16 %v1771_v3, %v1768_v9  ;;  %1210 = vrot.lane.b32.xlu1 %v7219_v0, %s6577_s14  ;;  %v7574_v59 = vld [vmem:[#allocation2 + $0x110] sm:$0xff] }
 0x103   : > { %947 = vrot.lane.b32.xlu0 %v7137_v30, %s6579_s20  ;;  %454 = vst.msk [vmem:[#allocation3 + $0x1f8] sm:$0xff] %vm311_vm0, %v422_v5 }
 0x104   : > { %2148 = vmatprep.mubr.bf16.mxu0 %v1855_v20  ;;  %v1384_v3 = vpop.permute.xlu1 %1383  ;;  %v7605_v20 = vld [vmem:[#allocation2 + $0x18a] sm:$0xff] }
 0x105   : > { %v546_v25 = vpop.permute.xlu0 %545  ;;  %v1767_v10 = vld [vmem:[#allocation3 + $0x90] sm:$0xff]  ;;  %1470 = vst.msk [vmem:[#allocation3 + $0xe0] sm:$0xff] %vm818_vm4, %v1384_v3 }
 0x106   : > { %634 = vst.msk [vmem:[#allocation3 + $0xc0] sm:$0xff] %vm625_vm3, %v546_v25  ;;  %v1854_v4 = vpack.c.bf16 %v1770_v16, %v1767_v10  ;;  %567 = vrot.lane.b32.xlu1 %v7149_v28, %s6577_s14  ;;  %v7584_v16 = vld [vmem:[#allocation2 + $0x189] sm:$0xff] }
 0x107   : > { %1208 = vrot.lane.b32.xlu0 %v7233_v42, %s6577_s14  ;;  %1107 = vst.msk [vmem:[#allocation3 + $0x2f0] sm:$0xff] %vm311_vm0, %v7584_v16  ;;  %v421_v25 = vld [vmem:[#allocation2 + $0xf0] sm:$0xff]  ;;  %1746 = vst.msk [vmem:[#allocation3 + $0x2c8] sm:$0xff] %vm311_vm0, %v7605_v20  ;;  %v7611_v3 = vld [vmem:[#allocation2 + $0x182] sm:$0xff] }
 0x108   : > { %2149 = vmatmul.mubr.bf16.gmra.mxu0 %v1854_v4  ;;  %v741_v9 = vpop.permute.xlu1 %740  ;;  %453 = vst.msk [vmem:[#allocation3 + $0x1e0] sm:$0xff] %vm311_vm0, %v421_v25  ;;  %1745 = vst.msk [vmem:[#allocation3 + $0x2b0] sm:$0xff] %vm311_vm0, %v7611_v3  ;;  %v7632_v25 = vld [vmem:[#allocation2 + $0x128] sm:$0xff] }
 0x109   : > { %v1382_v30 = vpop.permute.xlu0 %1381  ;;  %828 = vst.msk [vmem:[#allocation3 + $0xd8] sm:$0xff] %vm818_vm4, %v741_v9 }
 0x10a   : > { %1469 = vst.msk [vmem:[#allocation3 + $0xc8] sm:$0xff] %vm818_vm4, %v1382_v30  ;;  %1403 = vrot.lane.b32.xlu1 %v7574_v59, %s6578_s15 }
 0x10b   : > { %565 = vrot.lane.b32.xlu0 %v7155_v32, %s6577_s14 }
 0x10c   : > { %v1576_v28 = vpop.permute.xlu1 %1575 }
 0x10d   : > { %v739_v17 = vpop.permute.xlu0 %738  ;;  %1662 = vst.msk [vmem:[#allocation3 + $0xe0] sm:$0xff] %vm1011_vm5, %v1576_v28 }
 0x10e   : > { %827 = vst.msk [vmem:[#allocation3 + $0xc0] sm:$0xff] %vm818_vm4, %v739_v17  ;;  %760 = vrot.lane.b32.xlu1 %v7167_v29, %s6578_s15 }
 0x10f   : > { %1401 = vrot.lane.b32.xlu0 %v7582_v1, %s6578_s15 }
 0x110   : > { %v934_v21 = vpop.permute.xlu1 %933 }
 0x111   : > { %v1574_v32 = vpop.permute.xlu0 %1573  ;;  %1021 = vst.msk [vmem:[#allocation3 + $0xd8] sm:$0xff] %vm1011_vm5, %v934_v21 }
 0x112   : > { %1661 = vst.msk [vmem:[#allocation3 + $0xc8] sm:$0xff] %vm1011_vm5, %v1574_v32  ;;  %1595 = vrot.lane.b32.xlu1 %v7253_v44, %s6579_s20 }
 0x113   : > { %758 = vrot.lane.b32.xlu0 %v7181_v34, %s6578_s15 }
 0x114   : > { %v1195_v29 = vpop.permute.xlu1 %1194  ;;  %v1777_v34 = vld [vmem:[#allocation3 + $0xe0] sm:$0xff] }
 0x115   : > { %v932_v10 = vpop.permute.xlu0 %931  ;;  %1279 = vst.msk [vmem:[#allocation3 + $0x110] sm:$0xff] %vm625_vm3, %v1195_v29  ;;  %v7640_v29 = vld [vmem:[#allocation2 + $0x120] sm:$0xff] }
 0x116   : > { %1020 = vst.msk [vmem:[#allocation3 + $0xc0] sm:$0xff] %vm1011_vm5, %v932_v10  ;;  %953 = vrot.lane.b32.xlu1 %v7506_v63, %s6579_s20 }
 0x117   : > { %1593 = vrot.lane.b32.xlu0 %v7261_v35, %s6579_s20 }
 0x118   : > { %v552_v9 = vpop.permute.xlu1 %551  ;;  %v1776_v28 = vld [vmem:[#allocation3 + $0xd8] sm:$0xff] }
 0x119   : > { %v1193_v4 = vpop.permute.xlu0 %1192  ;;  %v1774_v30 = vld [vmem:[#allocation3 + $0xc8] sm:$0xff]  ;;  %637 = vst.msk [vmem:[#allocation3 + $0x108] sm:$0xff] %vm625_vm3, %v552_v9  ;;  %v423_v9 = vld [vmem:[#allocation2 + $0x108] sm:$0xff] }
 0x11a   : > { %1278 = vst.msk [vmem:[#allocation3 + $0xf8] sm:$0xff] %vm625_vm3, %v1193_v4  ;;  %v1858_v17 = vpack.c.bf16 %v1777_v34, %v1774_v30  ;;  %1214 = vrot.lane.b32.xlu1 %v7273_v46, %s6577_s14  ;;  %v424_v30 = vld [vmem:[#allocation2 + $0x110] sm:$0xff] }
 0x11b   : > { %951 = vrot.lane.b32.xlu0 %v7516_v61, %s6579_s20  ;;  %456 = vst.msk [vmem:[#allocation3 + $0x228] sm:$0xff] %vm311_vm0, %v424_v30  ;;  %455 = vst.msk [vmem:[#allocation3 + $0x210] sm:$0xff] %vm311_vm0, %v423_v9 }
 0x11c   : > { %2156 = vmatprep.mubr.bf16.mxu0 %v1858_v17  ;;  %v1388_v63 = vpop.permute.xlu1 %1387 }
 0x11d   : > { %v550_v32 = vpop.permute.xlu0 %549  ;;  %v1773_v21 = vld [vmem:[#allocation3 + $0xc0] sm:$0xff]  ;;  %1472 = vst.msk [vmem:[#allocation3 + $0x110] sm:$0xff] %vm818_vm4, %v1388_v63 }
 0x11e   : > { %636 = vst.msk [vmem:[#allocation3 + $0xf0] sm:$0xff] %vm625_vm3, %v550_v32  ;;  %v1857_v5 = vpack.c.bf16 %v1776_v28, %v1773_v21  ;;  %571 = vrot.lane.b32.xlu1 %v7201_v38, %s6577_s14  ;;  %v1814_v32 = vld [vmem:[#allocation3 + $0x208] sm:$0xff] }
 0x11f   : > { %1212 = vrot.lane.b32.xlu0 %v7287_v60, %s6577_s14 }
 0x120   : > { %2157 = vmatmul.mubr.bf16.gmra.mxu0 %v1857_v5  ;;  %v745_v10 = vpop.permute.xlu1 %744 }
 0x121   : > { %v1386_v61 = vpop.permute.xlu0 %1385  ;;  %830 = vst.msk [vmem:[#allocation3 + $0x108] sm:$0xff] %vm818_vm4, %v745_v10  ;;  %v1820_v10 = vld [vmem:[#allocation3 + $0x238] sm:$0xff] }
 0x122   : > { %1471 = vst.msk [vmem:[#allocation3 + $0xf8] sm:$0xff] %vm818_vm4, %v1386_v61  ;;  %1407 = vrot.lane.b32.xlu1 %v7632_v25, %s6578_s15  ;;  %v1817_v61 = vld [vmem:[#allocation3 + $0x220] sm:$0xff] }
 0x123   : > { %569 = vrot.lane.b32.xlu0 %v7207_v39, %s6577_s14 }
 0x124   : > { %v1580_v38 = vpop.permute.xlu1 %1579 }
 0x125   : > { %v743_v34 = vpop.permute.xlu0 %742  ;;  %1664 = vst.msk [vmem:[#allocation3 + $0x110] sm:$0xff] %vm1011_vm5, %v1580_v38 }
 0x126   : > { %829 = vst.msk [vmem:[#allocation3 + $0xf0] sm:$0xff] %vm818_vm4, %v743_v34  ;;  %764 = vrot.lane.b32.xlu1 %v7219_v0, %s6578_s15 }
 0x127   : > { %1405 = vrot.lane.b32.xlu0 %v7640_v29, %s6578_s15 }
 0x128   : > { %v938_v39 = vpop.permute.xlu1 %937 }
 0x129   : > { %v1578_v4 = vpop.permute.xlu0 %1577  ;;  %1023 = vst.msk [vmem:[#allocation3 + $0x108] sm:$0xff] %vm1011_vm5, %v938_v39 }
 0x12a   : > { %1663 = vst.msk [vmem:[#allocation3 + $0xf8] sm:$0xff] %vm1011_vm5, %v1578_v4  ;;  %1599 = vrot.lane.b32.xlu1 %v7316_v19, %s6579_s20  ;;  %v1880_v4 = vpack.c.bf16 %v1820_v10, %v1817_v61 }
 0x12b   : > { %762 = vrot.lane.b32.xlu0 %v7233_v42, %s6578_s15  ;;  %v1811_v42 = vld [vmem:[#allocation3 + $0x1f0] sm:$0xff] }
 0x12c   : > { %v1199_v0 = vpop.permute.xlu1 %1198  ;;  %v1783_v28 = vld [vmem:[#allocation3 + $0x110] sm:$0xff]  ;;  %v1877_v5 = vpack.c.bf16 %v1814_v32, %v1811_v42  ;;  %v7684_v42 = vld [vmem:[#allocation2 + $0x138] sm:$0xff] }
 0x12d   : > { %v936_v17 = vpop.permute.xlu0 %935  ;;  %1281 = vst.msk [vmem:[#allocation3 + $0x140] sm:$0xff] %vm625_vm3, %v1199_v0  ;;  %v7676_v0 = vld [vmem:[#allocation2 + $0x140] sm:$0xff] }
 0x12e   : > { %1022 = vst.msk [vmem:[#allocation3 + $0xf0] sm:$0xff] %vm1011_vm5, %v936_v17  ;;  %957 = vrot.lane.b32.xlu1 %v7574_v59, %s6579_s20  ;;  %6346 = vmatprep.mubr.msk.bf16.mxu1 %vm311_vm0, %v1877_v5  ;;  %v425_v5 = vld [vmem:[#allocation2 + $0x120] sm:$0xff] }
 0x12f   : > { %1597 = vrot.lane.b32.xlu0 %v7325_v49, %s6579_s20  ;;  %6347 = vmatmul.mubr.msk.bf16.gmra.mxu1 %vm311_vm0, %v1880_v4  ;;  %457 = vst.msk [vmem:[#allocation3 + $0x240] sm:$0xff] %vm311_vm0, %v425_v5 }
 0x130   : > { %v556_v34 = vpop.permute.xlu1 %555  ;;  %v1782_v39 = vld [vmem:[#allocation3 + $0x108] sm:$0xff] }
 0x131   : > { %v1197_v21 = vpop.permute.xlu0 %1196  ;;  %v1780_v63 = vld [vmem:[#allocation3 + $0xf8] sm:$0xff]  ;;  %639 = vst.msk [vmem:[#allocation3 + $0x138] sm:$0xff] %vm625_vm3, %v556_v34 }
 0x132   : > { %1280 = vst.msk [vmem:[#allocation3 + $0x128] sm:$0xff] %vm625_vm3, %v1197_v21  ;;  %v1861_v38 = vpack.c.bf16 %v1783_v28, %v1780_v63  ;;  %1218 = vrot.lane.b32.xlu1 %v7341_v50, %s6577_s14  ;;  %v426_v63 = vld [vmem:[#allocation2 + $0x128] sm:$0xff] }
 0x133   : > { %955 = vrot.lane.b32.xlu0 %v7582_v1, %s6579_s20  ;;  %458 = vst.msk [vmem:[#allocation3 + $0x258] sm:$0xff] %vm311_vm0, %v426_v63 }
 0x134   : > { %2164 = vmatprep.mubr.bf16.mxu0 %v1861_v38  ;;  %v1392_v9 = vpop.permute.xlu1 %1391 }
 0x135   : > { %v554_v59 = vpop.permute.xlu0 %553  ;;  %v1779_v30 = vld [vmem:[#allocation3 + $0xf0] sm:$0xff]  ;;  %1474 = vst.msk [vmem:[#allocation3 + $0x140] sm:$0xff] %vm818_vm4, %v1392_v9 }
 0x136   : > { %638 = vst.msk [vmem:[#allocation3 + $0x120] sm:$0xff] %vm625_vm3, %v554_v59  ;;  %v1860_v17 = vpack.c.bf16 %v1782_v39, %v1779_v30  ;;  %575 = vrot.lane.b32.xlu1 %v7253_v44, %s6577_s14 }
 0x137   : > { %1216 = vrot.lane.b32.xlu0 %v7355_v52, %s6577_s14 }
 0x138   : > { %2165 = vmatmul.mubr.bf16.gmra.mxu0 %v1860_v17  ;;  %v749_v28 = vpop.permute.xlu1 %748  ;;  %v7718_v17 = vld [vmem:[#allocation2 + $0x158] sm:$0xff] }
 0x139   : > { %v1390_v1 = vpop.permute.xlu0 %1389  ;;  %832 = vst.msk [vmem:[#allocation3 + $0x138] sm:$0xff] %vm818_vm4, %v749_v28  ;;  %v7726_v28 = vld [vmem:[#allocation2 + $0x150] sm:$0xff] }
 0x13a   : > { %1473 = vst.msk [vmem:[#allocation3 + $0x128] sm:$0xff] %vm818_vm4, %v1390_v1  ;;  %1411 = vrot.lane.b32.xlu1 %v7676_v0, %s6578_s15 }
 0x13b   : > { %573 = vrot.lane.b32.xlu0 %v7261_v35, %s6577_s14 }
 0x13c   : > { %v1584_v44 = vpop.permute.xlu1 %1583 }
 0x13d   : > { %v747_v32 = vpop.permute.xlu0 %746  ;;  %1666 = vst.msk [vmem:[#allocation3 + $0x140] sm:$0xff] %vm1011_vm5, %v1584_v44 }
 0x13e   : > { %831 = vst.msk [vmem:[#allocation3 + $0x120] sm:$0xff] %vm818_vm4, %v747_v32  ;;  %768 = vrot.lane.b32.xlu1 %v7273_v46, %s6578_s15 }
 0x13f   : > { %1409 = vrot.lane.b32.xlu0 %v7684_v42, %s6578_s15 }
 0x140   : > { %v942_v35 = vpop.permute.xlu1 %941 }
 0x141   : > { %v1582_v21 = vpop.permute.xlu0 %1581  ;;  %1025 = vst.msk [vmem:[#allocation3 + $0x138] sm:$0xff] %vm1011_vm5, %v942_v35  ;;  %v427_v35 = vld [vmem:[#allocation2 + $0x138] sm:$0xff] }
 0x142   : > { %1665 = vst.msk [vmem:[#allocation3 + $0x128] sm:$0xff] %vm1011_vm5, %v1582_v21  ;;  %1603 = vrot.lane.b32.xlu1 %v7382_v53, %s6579_s20  ;;  %v428_v21 = vld [vmem:[#allocation2 + $0x140] sm:$0xff] }
 0x143   : > { %766 = vrot.lane.b32.xlu0 %v7287_v60, %s6578_s15  ;;  %460 = vst.msk [vmem:[#allocation3 + $0x288] sm:$0xff] %vm311_vm0, %v428_v21  ;;  %459 = vst.msk [vmem:[#allocation3 + $0x270] sm:$0xff] %vm311_vm0, %v427_v35  ;;  %v430_v21 = vld [vmem:[#allocation2 + $0x158] sm:$0xff]  ;;  %v429_v35 = vld [vmem:[#allocation2 + $0x150] sm:$0xff] }
 0x144   : > { %v1203_v46 = vpop.permute.xlu1 %1202  ;;  %v1789_v10 = vld [vmem:[#allocation3 + $0x140] sm:$0xff]  ;;  %462 = vst.msk [vmem:[#allocation3 + $0x2b8] sm:$0xff] %vm311_vm0, %v430_v21  ;;  %461 = vst.msk [vmem:[#allocation3 + $0x2a0] sm:$0xff] %vm311_vm0, %v429_v35 }
 0x145   : > { %v940_v61 = vpop.permute.xlu0 %939  ;;  %1283 = vst.msk [vmem:[#allocation3 + $0x170] sm:$0xff] %vm625_vm3, %v1203_v46  ;;  %v1823_v46 = vld [vmem:[#allocation3 + $0x250] sm:$0xff] }
 0x146   : > { %1024 = vst.msk [vmem:[#allocation3 + $0x120] sm:$0xff] %vm1011_vm5, %v940_v61  ;;  %961 = vrot.lane.b32.xlu1 %v7632_v25, %s6579_s20 }
 0x147   : > { %1601 = vrot.lane.b32.xlu0 %v7389_v56, %s6579_s20 }
 0x148   : > { %v560_v38 = vpop.permute.xlu1 %559  ;;  %v1788_v39 = vld [vmem:[#allocation3 + $0x138] sm:$0xff] }
 0x149   : > { %v1201_v60 = vpop.permute.xlu0 %1200  ;;  %v1786_v34 = vld [vmem:[#allocation3 + $0x128] sm:$0xff]  ;;  %641 = vst.msk [vmem:[#allocation3 + $0x168] sm:$0xff] %vm625_vm3, %v560_v38 }
 0x14a   : > { %1282 = vst.msk [vmem:[#allocation3 + $0x158] sm:$0xff] %vm625_vm3, %v1201_v60  ;;  %v1864_v4 = vpack.c.bf16 %v1789_v10, %v1786_v34  ;;  %1222 = vrot.lane.b32.xlu1 %v7405_v48, %s6577_s14  ;;  %v1826_v10 = vld [vmem:[#allocation3 + $0x268] sm:$0xff] }
 0x14b   : > { %959 = vrot.lane.b32.xlu0 %v7640_v29, %s6579_s20  ;;  %v1883_v38 = vpack.c.bf16 %v1826_v10, %v1823_v46  ;;  %v7798_v10 = vpop.f32.mrf.mxu1 }
 0x14c   : > { %2172 = vmatprep.mubr.bf16.mxu0 %v1864_v4  ;;  %v1396_v25 = vpop.permute.xlu1 %1395  ;;  %v1829_v4 = vld [vmem:[#allocation3 + $0x280] sm:$0xff] }
 0x14d   : > { %v558_v59 = vpop.permute.xlu0 %557  ;;  %v1785_v30 = vld [vmem:[#allocation3 + $0x120] sm:$0xff]  ;;  %1476 = vst.msk [vmem:[#allocation3 + $0x170] sm:$0xff] %vm818_vm4, %v1396_v25  ;;  %6350 = vmatprep.mubr.msk.bf16.mxu1 %vm311_vm0, %v1883_v38 }
 0x14e   : > { %640 = vst.msk [vmem:[#allocation3 + $0x150] sm:$0xff] %vm625_vm3, %v558_v59  ;;  %v1863_v9 = vpack.c.bf16 %v1788_v39, %v1785_v30  ;;  %579 = vrot.lane.b32.xlu1 %v7316_v19, %s6577_s14  ;;  %v1832_v39 = vld [vmem:[#allocation3 + $0x298] sm:$0xff] }
 0x14f   : > { %1220 = vrot.lane.b32.xlu0 %v7419_v45, %s6577_s14  ;;  %v1886_v30 = vpack.c.bf16 %v1832_v39, %v1829_v4  ;;  %v2287_v4 = vpop.f32.mrf.mxu1 }
 0x150   : > { %2173 = vmatmul.mubr.bf16.gmra.mxu0 %v1863_v9  ;;  %v753_v1 = vpop.permute.xlu1 %752 }
 0x151   : > { %v1394_v29 = vpop.permute.xlu0 %1393  ;;  %834 = vst.msk [vmem:[#allocation3 + $0x168] sm:$0xff] %vm818_vm4, %v753_v1  ;;  %6351 = vmatmul.mubr.msk.bf16.gmra.mxu1 %vm311_vm0, %v1886_v30  ;;  %v7762_v1 = vld [vmem:[#allocation2 + $0x170] sm:$0xff] }
 0x152   : > { %1475 = vst.msk [vmem:[#allocation3 + $0x158] sm:$0xff] %vm818_vm4, %v1394_v29  ;;  %1415 = vrot.lane.b32.xlu1 %v7718_v17, %s6578_s15 }
 0x153   : > { %577 = vrot.lane.b32.xlu0 %v7325_v49, %s6577_s14 }
 0x154   : > { %v1588_v19 = vpop.permute.xlu1 %1587 }
 0x155   : > { %v751_v32 = vpop.permute.xlu0 %750  ;;  %1668 = vst.msk [vmem:[#allocation3 + $0x170] sm:$0xff] %vm1011_vm5, %v1588_v19  ;;  %v7770_v19 = vld [vmem:[#allocation2 + $0x168] sm:$0xff] }
 0x156   : > { %833 = vst.msk [vmem:[#allocation3 + $0x150] sm:$0xff] %vm818_vm4, %v751_v32  ;;  %772 = vrot.lane.b32.xlu1 %v7341_v50, %s6578_s15 }
 0x157   : > { %1413 = vrot.lane.b32.xlu0 %v7726_v28, %s6578_s15 }
 0x158   : > { %v946_v49 = vpop.permute.xlu1 %945 }
 0x159   : > { %v1586_v44 = vpop.permute.xlu0 %1585  ;;  %1027 = vst.msk [vmem:[#allocation3 + $0x168] sm:$0xff] %vm1011_vm5, %v946_v49 }
 0x15a   : > { %1667 = vst.msk [vmem:[#allocation3 + $0x158] sm:$0xff] %vm1011_vm5, %v1586_v44  ;;  %1607 = vrot.lane.b32.xlu1 %v7448_v15, %s6579_s20 }
 0x15b   : > { %770 = vrot.lane.b32.xlu0 %v7355_v52, %s6578_s15 }
 0x15c   : > { %v1207_v50 = vpop.permute.xlu1 %1206  ;;  %v1795_v5 = vld [vmem:[#allocation3 + $0x170] sm:$0xff] }
 0x15d   : > { %v944_v63 = vpop.permute.xlu0 %943  ;;  %1285 = vst.msk [vmem:[#allocation3 + $0x1a0] sm:$0xff] %vm625_vm3, %v1207_v50 }
 0x15e   : > { %1026 = vst.msk [vmem:[#allocation3 + $0x150] sm:$0xff] %vm1011_vm5, %v944_v63  ;;  %965 = vrot.lane.b32.xlu1 %v7676_v0, %s6579_s20 }
 0x15f   : > { %1605 = vrot.lane.b32.xlu0 %v7455_v57, %s6579_s20 }
 0x160   : > { %v564_v60 = vpop.permute.xlu1 %563  ;;  %v1794_v59 = vld [vmem:[#allocation3 + $0x168] sm:$0xff] }
 0x161   : > { %v1205_v52 = vpop.permute.xlu0 %1204  ;;  %v1792_v61 = vld [vmem:[#allocation3 + $0x158] sm:$0xff]  ;;  %643 = vst.msk [vmem:[#allocation3 + $0x198] sm:$0xff] %vm625_vm3, %v564_v60 }
 0x162   : > { %1284 = vst.msk [vmem:[#allocation3 + $0x188] sm:$0xff] %vm625_vm3, %v1205_v52  ;;  %v1867_v34 = vpack.c.bf16 %v1795_v5, %v1792_v61  ;;  %1226 = vrot.lane.b32.xlu1 %v7470_v37, %s6577_s14 }
 0x163   : > { %963 = vrot.lane.b32.xlu0 %v7684_v42, %s6579_s20 }
 0x164   : > { %2180 = vmatprep.mubr.bf16.mxu0 %v1867_v34  ;;  %v1400_v9 = vpop.permute.xlu1 %1399 }
 0x165   : > { %v562_v0 = vpop.permute.xlu0 %561  ;;  %v1791_v25 = vld [vmem:[#allocation3 + $0x150] sm:$0xff]  ;;  %1478 = vst.msk [vmem:[#allocation3 + $0x1a0] sm:$0xff] %vm818_vm4, %v1400_v9 }
 0x166   : > { %642 = vst.msk [vmem:[#allocation3 + $0x180] sm:$0xff] %vm625_vm3, %v562_v0  ;;  %v1866_v29 = vpack.c.bf16 %v1794_v59, %v1791_v25  ;;  %583 = vrot.lane.b32.xlu1 %v7382_v53, %s6577_s14  ;;  %v7806_v59 = vld [vmem:[#allocation2 + $0x188] sm:$0xff]  ;;  %v7812_v25 = vld [vmem:[%s9962_s2] ss:$0 sm:$0xff] }
 0x167   : > { %1224 = vrot.lane.b32.xlu0 %v7485_v23, %s6577_s14 }
 0x168   : > { %2181 = vmatmul.mubr.bf16.gmra.mxu0 %v1866_v29  ;;  %v757_v32 = vpop.permute.xlu1 %756  ;;  %v7819_v29 = vld [vmem:[#allocation2 + $0x180] sm:$0xff] }
 0x169   : > { %v1398_v42 = vpop.permute.xlu0 %1397  ;;  %836 = vst.msk [vmem:[#allocation3 + $0x198] sm:$0xff] %vm818_vm4, %v757_v32 }
 0x16a   : > { %1477 = vst.msk [vmem:[#allocation3 + $0x188] sm:$0xff] %vm818_vm4, %v1398_v42  ;;  %1419 = vrot.lane.b32.xlu1 %v7762_v1, %s6578_s15  ;;  %v7821_v42 = vpop.f32.mrf.mxu1 }
 0x16b   : > { %581 = vrot.lane.b32.xlu0 %v7389_v56, %s6577_s14 }
 0x16c   : > { %v1592_v53 = vpop.permute.xlu1 %1591 }
 0x16d   : > { %v755_v44 = vpop.permute.xlu0 %754  ;;  %1670 = vst.msk [vmem:[#allocation3 + $0x1a0] sm:$0xff] %vm1011_vm5, %v1592_v53 }
 0x16e   : > { %835 = vst.msk [vmem:[#allocation3 + $0x180] sm:$0xff] %vm818_vm4, %v755_v44  ;;  %776 = vrot.lane.b32.xlu1 %v7405_v48, %s6578_s15 }
 0x16f   : > { %1417 = vrot.lane.b32.xlu0 %v7770_v19, %s6578_s15 }
 0x170   : > { %v950_v56 = vpop.permute.xlu1 %949 }
 0x171   : > { %v1590_v49 = vpop.permute.xlu0 %1589  ;;  %1029 = vst.msk [vmem:[#allocation3 + $0x198] sm:$0xff] %vm1011_vm5, %v950_v56 }
 0x172   : > { %1669 = vst.msk [vmem:[#allocation3 + $0x188] sm:$0xff] %vm1011_vm5, %v1590_v49  ;;  %1611 = vrot.lane.b32.xlu1 %v7512_v22, %s6579_s20  ;;  %v7825_v49 = vstv %s2414_s30  ;;  %s6518_s30 = sshll.u32 %s6593_s10, 4  ;;  %s6519_s30 = int_to_ptr.vmem [resolvable:$false] %s6518_s30 }
 0x173   : > { %774 = vrot.lane.b32.xlu0 %v7419_v45, %s6578_s15 }
 0x174   : > { %v1211_v48 = vpop.permute.xlu1 %1210  ;;  %v1801_v50 = vld [vmem:[#allocation3 + $0x1a0] sm:$0xff] }
 0x175   : > { %v948_v63 = vpop.permute.xlu0 %947  ;;  %1287 = vst.msk [vmem:[#allocation3 + $0x1d0] sm:$0xff] %vm625_vm3, %v1211_v48 }
 0x176   : > { %1028 = vst.msk [vmem:[#allocation3 + $0x180] sm:$0xff] %vm1011_vm5, %v948_v63  ;;  %969 = vrot.lane.b32.xlu1 %v7718_v17, %s6579_s20 }
 0x177   : > { %1609 = vrot.lane.b32.xlu0 %v7521_v2, %s6579_s20 }
 0x178   : > { %v568_v52 = vpop.permute.xlu1 %567  ;;  %v1800_v46 = vld [vmem:[#allocation3 + $0x198] sm:$0xff] }
 0x179   : > { %v1209_v45 = vpop.permute.xlu0 %1208  ;;  %v1798_v5 = vld [vmem:[#allocation3 + $0x188] sm:$0xff]  ;;  %645 = vst.msk [vmem:[#allocation3 + $0x1c8] sm:$0xff] %vm625_vm3, %v568_v52 }
 0x17a   : > { %1286 = vst.msk [vmem:[#allocation3 + $0x1b8] sm:$0xff] %vm625_vm3, %v1209_v45  ;;  %v1870_v61 = vpack.c.bf16 %v1801_v50, %v1798_v5  ;;  %1230 = vrot.lane.b32.xlu1 %v7536_v18, %s6577_s14  ;;  %v432_v5 = vld [vmem:[#allocation2 + $0x170] sm:$0xff]  ;;  %v1715_v52 = vld [vmem:[#allocation2 + $0x19a] sm:$0xff] }
 0x17b   : > { %967 = vrot.lane.b32.xlu0 %v7726_v28, %s6579_s20  ;;  %464 = vst.msk [vmem:[#allocation3 + $0x2e8] sm:$0xff] %vm311_vm0, %v432_v5  ;;  %1747 = vst.msk [vmem:[#allocation3 + $0x2e0] sm:$0xff] %vm311_vm0, %v1715_v52 }
 0x17c   : > { %2188 = vmatprep.mubr.bf16.mxu0 %v1870_v61  ;;  %v1404_v34 = vpop.permute.xlu1 %1403  ;;  %v1716_v61 = vld [vmem:[#allocation2 + $0x1a2] sm:$0xff] }
 0x17d   : > { %v566_v60 = vpop.permute.xlu0 %565  ;;  %v1797_v17 = vld [vmem:[#allocation3 + $0x180] sm:$0xff]  ;;  %1480 = vst.msk [vmem:[#allocation3 + $0x1d0] sm:$0xff] %vm818_vm4, %v1404_v34 }
 0x17e   : > { %644 = vst.msk [vmem:[#allocation3 + $0x1b0] sm:$0xff] %vm625_vm3, %v566_v60  ;;  %v1869_v38 = vpack.c.bf16 %v1800_v46, %v1797_v17  ;;  %587 = vrot.lane.b32.xlu1 %v7448_v15, %s6577_s14 }
 0x17f   : > { %1228 = vrot.lane.b32.xlu0 %v7551_v26, %s6577_s14  ;;  %1748 = vst.msk [vmem:[#allocation3 + $0x2f8] sm:$0xff] %vm311_vm0, %v1716_v61 }
 0x180   : > { %v6031_v28 = vpop.f32.mrf.mxu0  ;;  %2189 = vmatmul.mubr.bf16.gmra.mxu0 %v1869_v38  ;;  %v761_v0 = vpop.permute.xlu1 %760 }
 0x181   : > { %v1402_v39 = vpop.permute.xlu0 %1401  ;;  %838 = vst.msk [vmem:[#allocation3 + $0x1c8] sm:$0xff] %vm818_vm4, %v761_v0 }
 0x182   : > { %1479 = vst.msk [vmem:[#allocation3 + $0x1b8] sm:$0xff] %vm818_vm4, %v1402_v39  ;;  %v6032_v30 = vpop.f32.mrf.mxu0  ;;  %1423 = vrot.lane.b32.xlu1 %v7806_v59, %s6578_s15  ;;  %v1835_v39 = vld [vmem:[#allocation3 + $0x2b0] sm:$0xff] }
 0x183   : > { %v6033_v9 = vadd.f32 %v6032_v30, %v6031_v28  ;;  %585 = vrot.lane.b32.xlu0 %v7455_v57, %s6577_s14  ;;  %v2290_v57 = vpop.f32.mrf.mxu1  ;;  %v1838_v30 = vld [vmem:[#allocation3 + $0x2c8] sm:$0xff] }
 0x184   : > { %v6034_v15 = vpop.f32.mrf.mxu0  ;;  %v1596_v56 = vpop.permute.xlu1 %1595 }
 0x185   : > { %v759_v32 = vpop.permute.xlu0 %758  ;;  %v2127_v44 = vadd.f32 %v6033_v9, %v7812_v25  ;;  %1672 = vst.msk [vmem:[#allocation3 + $0x1d0] sm:$0xff] %vm1011_vm5, %v1596_v56 }
 0x186   : > { %837 = vst.msk [vmem:[#allocation3 + $0x1b0] sm:$0xff] %vm818_vm4, %v759_v32  ;;  %v6035_v53 = vpop.f32.mrf.mxu0  ;;  %780 = vrot.lane.b32.xlu1 %v7470_v37, %s6578_s15  ;;  %v431_v37 = vld [vmem:[#allocation2 + $0x168] sm:$0xff]  ;;  %v1841_v32 = vld [vmem:[#allocation3 + $0x2e0] sm:$0xff] }
 0x187   : > { %v6036_v21 = vadd.f32 %v6035_v53, %v6034_v15  ;;  %v2288_v35 = vadd.f32 %v2287_v4, %v2127_v44  ;;  %1421 = vrot.lane.b32.xlu0 %v7819_v29, %s6578_s15  ;;  %463 = vst.msk [vmem:[#allocation3 + $0x2d0] sm:$0xff] %vm311_vm0, %v431_v37  ;;  %v1889_v15 = vpack.c.bf16 %v1838_v30, %v1835_v39  ;;  %v1844_v44 = vld [vmem:[#allocation3 + $0x2f8] sm:$0xff]  ;;  %3886 = vst.msk [vmem:[#allocation3 + $0x2e0] sm:$0xff] %vm311_vm0, %v1715_v52 }
 0x188   : > { %v954_v45 = vpop.permute.xlu1 %953  ;;  %3887 = vst.msk [vmem:[#allocation3 + $0x2f8] sm:$0xff] %vm311_vm0, %v1716_v61  ;;  %v1331_v61 = vld [vmem:[#allocation2 + $0x198] sm:$0xff]  ;;  %v2545_v30 = vld [vmem:[#allocation2 + $0x8] sm:$0xff] }
 0x189   : > { %vm2415_vm6 = vcmp.ge.f32.partialorder %v2288_v35, 0.0  ;;  %v2448_v63 = vmul.f32 %v7825_v49, %v2288_v35  ;;  %v1594_v48 = vpop.permute.xlu0 %1593  ;;  %v2130_v50 = vadd.f32 %v6036_v21, %v7812_v25  ;;  %1031 = vst.msk [vmem:[#allocation3 + $0x1c8] sm:$0xff] %vm1011_vm5, %v954_v45  ;;  %6354 = vmatprep.mubr.msk.bf16.mxu1 %vm311_vm0, %v1889_v15  ;;  %v1332_v45 = vld [vmem:[#allocation2 + $0x1a0] sm:$0xff] }
 0x18a   : > { %1671 = vst.msk [vmem:[#allocation3 + $0x1b8] sm:$0xff] %vm1011_vm5, %v1594_v48  ;;  %1615 = vrot.lane.b32.xlu1 %v7584_v16, %s6579_s20  ;;  %v1523_v15 = vld [vmem:[#allocation2 + $0x199] sm:$0xff] }
 0x18b   : > { %v2480_v46 = vsel %vm2415_vm6, %v2288_v35, %v2448_v63  ;;  %v2291_v60 = vadd.f32 %v2290_v57, %v2130_v50  ;;  %778 = vrot.lane.b32.xlu0 %v7485_v23, %s6578_s15  ;;  %2577 = vst.msk [vmem:[#allocation3 + $0x18] sm:$0xff] %vm311_vm0, %v2545_v30 }
 0x18c   : > { %2512 = vst.msk [vmem:[#allocation2 + $0x19] sm:$0xff] %vm311_vm0, %v2480_v46  ;;  %v1215_v23 = vpop.permute.xlu1 %1214  ;;  %v1807_v28 = vld [vmem:[#allocation3 + $0x1d0] sm:$0xff] }
 0x18d   : > { %vm2416_vm7 = vcmp.ge.f32.partialorder %v2291_v60, 0.0  ;;  %v2449_v17 = vmul.f32 %v7825_v49, %v2291_v60  ;;  %v952_v34 = vpop.permute.xlu0 %951  ;;  %1289 = vst.msk [vmem:[#allocation3 + $0x200] sm:$0xff] %vm625_vm3, %v1215_v23 }
 0x18e   : > { %1030 = vst.msk [vmem:[#allocation3 + $0x1b0] sm:$0xff] %vm1011_vm5, %v952_v34  ;;  %973 = vrot.lane.b32.xlu1 %v7762_v1, %s6579_s20  ;;  %v1892_v1 = vpack.c.bf16 %v1844_v44, %v1841_v32  ;;  %v2544_v32 = vld [vmem:[#allocation2] sm:$0xff] }
 0x18f   : > { %v2481_v38 = vsel %vm2416_vm7, %v2291_v60, %v2449_v17  ;;  %1613 = vrot.lane.b32.xlu0 %v7589_v11, %s6579_s20  ;;  %2576 = vst.msk [vmem:[#allocation3] sm:$0xff] %vm311_vm0, %v2544_v32 }
 0x190   : > { %2513 = vst.msk [vmem:[#allocation2 + $0x21] sm:$0xff] %vm311_vm0, %v2481_v38  ;;  %v572_v0 = vpop.permute.xlu1 %571  ;;  %v1806_v11 = vld [vmem:[#allocation3 + $0x1c8] sm:$0xff]  ;;  %6355 = vmatmul.mubr.msk.bf16.gmra.mxu1 %vm311_vm0, %v1892_v1 }
 0x191   : > { %v1213_v16 = vpop.permute.xlu0 %1212  ;;  %v1804_v4 = vld [vmem:[#allocation3 + $0x1b8] sm:$0xff]  ;;  %647 = vst.msk [vmem:[#allocation3 + $0x1f8] sm:$0xff] %vm625_vm3, %v572_v0  ;;  %v6487_v38 = vld [vmem:[%s9964_s4 + $0x38] sm:$0xff]  }
 0x192   : > { %1288 = vst.msk [vmem:[#allocation3 + $0x1e8] sm:$0xff] %vm625_vm3, %v1213_v16  ;;  %v1873_v9 = vpack.c.bf16 %v1807_v28, %v1804_v4  ;;  %1234 = vrot.lane.b32.xlu1 %v7605_v20, %s6577_s14  ;;  %v1524_v4 = vld [vmem:[#allocation2 + $0x1a1] sm:$0xff] }
 0x193   : > { %971 = vrot.lane.b32.xlu0 %v7770_v19, %s6579_s20  ;;  %v7857_v53 = vld [vmem:[#allocation2 + $0x19] sm:$0xff] }
 0x194   : > { %v2546_v56 = vld [vmem:[#allocation2 + $0x18] sm:$0xff]  ;;  %2196 = vmatprep.mubr.bf16.mxu0 %v1873_v9  ;;  %3216 = vst.msk [vmem:[#allocation3 + $0x8] sm:$0xff] %vm311_vm0, %v7857_v53  ;;  %v1408_v35 = vpop.permute.xlu1 %1407  ;;  %v6488_v9 = vld [vmem:[%s9964_s4 + $0x70] sm:$0xff]  }
 0x195   : > { %2578 = vst.msk [vmem:[#allocation3 + $0x30] sm:$0xff] %vm311_vm0, %v2546_v56  ;;  %v570_v21 = vpop.permute.xlu0 %569  ;;  %v1803_v19 = vld [vmem:[#allocation3 + $0x1b0] sm:$0xff] }
 0x196   : > { %646 = vst.msk [vmem:[#allocation3 + $0x1e0] sm:$0xff] %vm625_vm3, %v570_v21  ;;  %v1872_v57 = vpack.c.bf16 %v1806_v11, %v1803_v19  ;;  %591 = vrot.lane.b32.xlu1 %v7512_v22, %s6577_s14  ;;  %v6490_v21 = vld [vmem:[%s9964_s4 + $0x68] sm:$0xff]  }
 0x197   : > { %1482 = vst.msk [vmem:[#allocation3 + $0x200] sm:$0xff] %vm818_vm4, %v1408_v35  ;;  %1232 = vrot.lane.b32.xlu0 %v7611_v3, %s6577_s14  ;;  %v7874_v63 = vld [vmem:[#allocation2 + $0x21] sm:$0xff] }
 0x198   : > { %v6037_v20 = vpop.f32.mrf.mxu0  ;;  %2197 = vmatmul.mubr.bf16.gmra.mxu0 %v1872_v57  ;;  %v2547_v48 = vld [vmem:[#allocation2 + $0x20] sm:$0xff]  ;;  %3217 = vst.msk [vmem:[#allocation3 + $0x20] sm:$0xff] %vm311_vm0, %v7874_v63  ;;  %v765_v52 = vpop.permute.xlu1 %764  ;;  %v6491_v19 = vld [vmem:[%s9964_s4 + $0x88] sm:$0xff]  }
 0x199   : > { %v1406_v50 = vpop.permute.xlu0 %1405  ;;  %2579 = vst.msk [vmem:[#allocation3 + $0x48] sm:$0xff] %vm311_vm0, %v2547_v48  ;;  %v6492_v35 = vld [vmem:[%s9964_s4 + $0x28] sm:$0xff]   ;;  %6358 = vmatprep.subr.bf16.mxu0 %v6491_v19 }
 0x19a   : > { %1481 = vst.msk [vmem:[#allocation3 + $0x1e8] sm:$0xff] %vm818_vm4, %v1406_v50  ;;  %v6038_v5 = vpop.f32.mrf.mxu0  ;;  %840 = vst.msk [vmem:[#allocation3 + $0x1f8] sm:$0xff] %vm818_vm4, %v765_v52  ;;  %1427 = vrot.lane.b32.xlu1 %v1332_v45, %s6578_s15  ;;  %6359 = vmatpush3.bf16.msra.mxu0 %v6491_v19  ;;  %v7941_v52 = vpop.f32.mrf.mxu1  ;;  %v2801_v19 = vld [vmem:[#allocation2 + $0xa] sm:$0xff] }
 0x19b   : > { %v6039_v3 = vadd.f32 %v6038_v5, %v6037_v20  ;;  %589 = vrot.lane.b32.xlu0 %v7521_v2, %s6577_s14  ;;  %v6486_v2 = vld [vmem:[%s9964_s4 + $0x78] sm:$0xff]   ;;  %v6493_v5 = vld [vmem:[%s9964_s4 + $0x60] sm:$0xff]  }
 0x19c   : > { %v6040_v22 = vpop.f32.mrf.mxu0  ;;  %v1600_v17 = vpop.permute.xlu1 %1599  ;;  %6145 = vmatprep.subr.bf16.mxu1 %v6486_v2  ;;  %v2608_v2 = vld [vmem:[#allocation2 + $0x1] sm:$0xff] }
 0x19d   : > { %v2135_v46 = vadd.f32 %v6039_v3, %v7812_v25  ;;  %v763_v60 = vpop.permute.xlu0 %762  ;;  %1674 = vst.msk [vmem:[#allocation3 + $0x200] sm:$0xff] %vm1011_vm5, %v1600_v17  ;;  %6146 = vmatpush3.bf16.msra.mxu1 %v6487_v38  ;;  %v6494_v3 = vld [vmem:[%s9964_s4 + $0x80] sm:$0xff]  }
 0x19e   : > { %839 = vst.msk [vmem:[#allocation3 + $0x1e0] sm:$0xff] %vm818_vm4, %v763_v60  ;;  %v6041_v37 = vpop.f32.mrf.mxu0  ;;  %784 = vrot.lane.b32.xlu1 %v7536_v18, %s6578_s15  ;;  %6147 = vmatprep.subr.bf16.mxu1 %v6488_v9  ;;  %v2609_v60 = vld [vmem:[#allocation2 + $0x9] sm:$0xff] }
 0x19f   : > { %v2296_v34 = vadd.f32 %v7798_v10, %v2135_v46  ;;  %v6042_v23 = vadd.f32 %v6041_v37, %v6040_v22  ;;  %1425 = vrot.lane.b32.xlu0 %v1331_v61, %s6578_s15  ;;  %6360 = vmatprep.subr.bf16.mxu0 %v6494_v3 }
 0x1a0   : > { %v958_v39 = vpop.permute.xlu1 %957  ;;  %6361 = vmatpush3.bf16.msra.mxu0 %v6494_v3  ;;  %v6500_v3 = vld [vmem:[%s9964_s4 + $0x48] sm:$0xff]  }
 0x1a1   : > { %vm2417_vm8 = vcmp.ge.f32.partialorder %v2296_v34, 0.0  ;;  %v2450_v28 = vmul.f32 %v7825_v49, %v2296_v34  ;;  %v2138_v10 = vadd.f32 %v6042_v23, %v7812_v25  ;;  %v1598_v16 = vpop.permute.xlu0 %1597  ;;  %1033 = vst.msk [vmem:[#allocation3 + $0x1f8] sm:$0xff] %vm1011_vm5, %v958_v39  ;;  %v6497_v39 = vld [vmem:[%s9964_s4 + $0x18] sm:$0xff]  }
 0x1a2   : > { %1673 = vst.msk [vmem:[#allocation3 + $0x1e8] sm:$0xff] %vm1011_vm5, %v1598_v16  ;;  %1619 = vrot.lane.b32.xlu1 %v1524_v4, %s6579_s20  ;;  %v6496_v4 = vld [vmem:[%s9964_s4 + $0x58] sm:$0xff]  }
 0x1a3   : > { %v2482_v0 = vsel %vm2417_vm8, %v2296_v34, %v2450_v28  ;;  %v2299_v18 = vadd.f32 %v7821_v42, %v2138_v10  ;;  %782 = vrot.lane.b32.xlu0 %v7551_v26, %s6578_s15  ;;  %v6489_v42 = vld [vmem:[%s9964_s4 + $0x30] sm:$0xff]   ;;  %v7951_v34 = vld [vmem:[#allocation2 + $0x1a] sm:$0xff]  ;;  %v2303_v10 = vpop.f32.mrf.mxu1 }
 0x1a4   : > { %2514 = vst.msk [vmem:[#allocation2 + $0x31] sm:$0xff] %vm311_vm0, %v2482_v0  ;;  %v1219_v11 = vpop.permute.xlu1 %1218  ;;  %6148 = vmatpush3.bf16.msra.mxu1 %v6489_v42  ;;  %v1813_v56 = vld [vmem:[#allocation3 + $0x200] sm:$0xff] }
 0x1a5   : > { %vm2418_vm9 = vcmp.ge.f32.partialorder %v2299_v18, 0.0  ;;  %v2451_v44 = vmul.f32 %v7825_v49, %v2299_v18  ;;  %v956_v26 = vpop.permute.xlu0 %955  ;;  %1291 = vst.msk [vmem:[#allocation3 + $0x230] sm:$0xff] %vm625_vm3, %v1219_v11  ;;  %6149 = vmatprep.subr.bf16.mxu1 %v6490_v21  ;;  %v7984_v11 = vpop.f32.mrf.mxu1 }
 0x1a6   : > { %1032 = vst.msk [vmem:[#allocation3 + $0x1e0] sm:$0xff] %vm1011_vm5, %v956_v26  ;;  %977 = vrot.lane.b32.xlu1 %v7806_v59, %s6579_s20  ;;  %v7934_v59 = vld [vmem:[#allocation2 + $0x22] sm:$0xff] }
 0x1a7   : > { %v2483_v1 = vsel %vm2418_vm9, %v2299_v18, %v2451_v44  ;;  %1617 = vrot.lane.b32.xlu0 %v1523_v15, %s6579_s20  ;;  %v6498_v44 = vld [vmem:[%s9964_s4 + $0x50] sm:$0xff]  }
 0x1a8   : > { %2515 = vst.msk [vmem:[#allocation2 + $0x39] sm:$0xff] %vm311_vm0, %v2483_v1  ;;  %v576_v48 = vpop.permute.xlu1 %575  ;;  %6150 = vmatpush3.bf16.msra.mxu1 %v6492_v35  ;;  %v1812_v45 = vld [vmem:[#allocation3 + $0x1f8] sm:$0xff]  ;;  %v6499_v1 = vld [vmem:[%s9964_s4 + $0x10] sm:$0xff]  }
 0x1a9   : > { %v1217_v57 = vpop.permute.xlu0 %1216  ;;  %v1810_v20 = vld [vmem:[#allocation3 + $0x1e8] sm:$0xff]  ;;  %649 = vst.msk [vmem:[#allocation3 + $0x228] sm:$0xff] %vm625_vm3, %v576_v48  ;;  %6151 = vmatprep.subr.bf16.mxu1 %v6493_v5  ;;  %v2800_v5 = vld [vmem:[#allocation2 + $0x2] sm:$0xff] }
 0x1aa   : > { %1290 = vst.msk [vmem:[#allocation3 + $0x218] sm:$0xff] %vm625_vm3, %v1217_v57  ;;  %v1876_v50 = vpack.c.bf16 %v1813_v56, %v1810_v20  ;;  %3314 = vrot.lane.b32.xlu1 %v7934_v59, %s6577_s14 }
 0x1ab   : > { %975 = vrot.lane.b32.xlu0 %v7819_v29, %s6579_s20  ;;  %v6495_v29 = vld [vmem:[%s9964_s4 + $0x20] sm:$0xff]   ;;  %v3186_v22 = vld [vmem:[#allocation2 + $0x31] sm:$0xff] }
 0x1ac   : > { %2204 = vmatprep.mubr.bf16.mxu0 %v1876_v50  ;;  %3218 = vst.msk [vmem:[#allocation3 + $0x38] sm:$0xff] %vm311_vm0, %v3186_v22  ;;  %v2548_v37 = vld [vmem:[#allocation2 + $0x30] sm:$0xff]  ;;  %v1412_v17 = vpop.permute.xlu1 %1411  ;;  %6152 = vmatpush3.bf16.msra.mxu1 %v6495_v29  ;;  %v6501_v29 = vld [vmem:[%s9964_s4 + $0x8] sm:$0xff]  }
 0x1ad   : > { %v574_v61 = vpop.permute.xlu0 %573  ;;  %v1809_v46 = vld [vmem:[#allocation3 + $0x1e0] sm:$0xff]  ;;  %2580 = vst.msk [vmem:[#allocation3 + $0x60] sm:$0xff] %vm311_vm0, %v2548_v37  ;;  %6153 = vmatprep.subr.bf16.mxu1 %v6496_v4 }
 0x1ae   : > { %648 = vst.msk [vmem:[#allocation3 + $0x210] sm:$0xff] %vm625_vm3, %v574_v61  ;;  %v1875_v23 = vpack.c.bf16 %v1812_v45, %v1809_v46  ;;  %2674 = vrot.lane.b32.xlu1 %v2609_v60, %s6577_s14  ;;  %v7991_v20 = vld [vmem:[#allocation2 + $0x30] sm:$0xff]  ;;  %v2306_v45 = vpop.f32.mrf.mxu1 }
 0x1af   : > { %1484 = vst.msk [vmem:[#allocation3 + $0x230] sm:$0xff] %vm818_vm4, %v1412_v17  ;;  %3312 = vrot.lane.b32.xlu0 %v7951_v34, %s6577_s14  ;;  %v7957_v38 = vld [vmem:[#allocation2 + $0x3a] sm:$0xff]  ;;  %v7960_v16 = vld [vmem:[#allocation2 + $0x32] sm:$0xff] }
 0x1b0   : > { %v6043_v28 = vpop.f32.mrf.mxu0  ;;  %2205 = vmatmul.mubr.bf16.gmra.mxu0 %v1875_v23  ;;  %3857 = vst.msk [vmem:[#allocation3 + $0x28] sm:$0xff] %vm311_vm0, %v7957_v38  ;;  %3856 = vst.msk [vmem:[#allocation3 + $0x10] sm:$0xff] %vm311_vm0, %v7960_v16  ;;  %v3187_v0 = vld [vmem:[#allocation2 + $0x39] sm:$0xff]  ;;  %v769_v15 = vpop.permute.xlu1 %768  ;;  %6154 = vmatpush3.bf16.msra.mxu1 %v6497_v39 }
 0x1b1   : > { %v1410_v30 = vpop.permute.xlu0 %1409  ;;  %v2549_v18 = vld [vmem:[#allocation2 + $0x38] sm:$0xff]  ;;  %3219 = vst.msk [vmem:[#allocation3 + $0x50] sm:$0xff] %vm311_vm0, %v3187_v0  ;;  %6155 = vmatprep.subr.bf16.mxu1 %v6498_v44 }
 0x1b2   : > { %1483 = vst.msk [vmem:[#allocation3 + $0x218] sm:$0xff] %vm818_vm4, %v1410_v30  ;;  %v6044_v9 = vpop.f32.mrf.mxu0  ;;  %842 = vst.msk [vmem:[#allocation3 + $0x228] sm:$0xff] %vm818_vm4, %v769_v15  ;;  %v7977_v32 = vld [vmem:[#allocation2 + $0x38] sm:$0xff] }
 0x1b3   : > { %2581 = vst.msk [vmem:[#allocation3 + $0x78] sm:$0xff] %vm311_vm0, %v2549_v18  ;;  %v6045_v42 = vadd.f32 %v6044_v9, %v6043_v28  ;;  %2672 = vrot.lane.b32.xlu0 %v2608_v2, %s6577_s14  ;;  %3506 = vrot.lane.b32.xlu1 %v7977_v32, %s6578_s15  ;;  %v8008_v23 = vld [vmem:[#allocation2 + $0x39] sm:$0xff]  ;;  %v8021_v30 = vld [vmem:[#allocation2 + $0x31] sm:$0xff] }
 0x1b4   : > { %v6046_v26 = vpop.f32.mrf.mxu0  ;;  %v1604_v57 = vpop.permute.xlu1 %1603  ;;  %6156 = vmatpush3.bf16.msra.mxu1 %v6499_v1  ;;  %v6502_v2 = vld [vmem:[%s9964_s4 + $0x40] sm:$0xff]  }
 0x1b5   : > { %v767_v56 = vpop.permute.xlu0 %766  ;;  %v2143_v21 = vadd.f32 %v6045_v42, %v7812_v25  ;;  %1676 = vst.msk [vmem:[#allocation3 + $0x230] sm:$0xff] %vm1011_vm5, %v1604_v57  ;;  %6157 = vmatprep.subr.bf16.mxu1 %v6500_v3  ;;  %v6503_v28 = vld [vmem:[%s9964_s4] sm:$0xff]  }
 0x1b6   : > { %841 = vst.msk [vmem:[#allocation3 + $0x210] sm:$0xff] %vm818_vm4, %v767_v56  ;;  %v6047_v35 = vpop.f32.mrf.mxu0  ;;  %v2993_v18 = vld [vmem:[#allocation2 + $0x20] sm:$0xff] }
 0x1b7   : > { %v6048_v48 = vadd.f32 %v6047_v35, %v6046_v26  ;;  %v2304_v50 = vadd.f32 %v2303_v10, %v2143_v21  ;;  %3504 = vrot.lane.b32.xlu0 %v7991_v20, %s6578_s15  ;;  %2866 = vrot.lane.b32.xlu1 %v2801_v19, %s6578_s15  ;;  %v2992_v26 = vld [vmem:[#allocation2 + $0x18] sm:$0xff] }
 0x1b8   : > { %v962_v60 = vpop.permute.xlu1 %961  ;;  %6158 = vmatpush3.bf16.msra.mxu1 %v6501_v29 }
 0x1b9   : > { %vm2419_vm10 = vcmp.ge.f32.partialorder %v2304_v50, 0.0  ;;  %v2452_v22 = vmul.f32 %v7825_v49, %v2304_v50  ;;  %v1602_v61 = vpop.permute.xlu0 %1601  ;;  %v2146_v46 = vadd.f32 %v6048_v48, %v7812_v25  ;;  %1035 = vst.msk [vmem:[#allocation3 + $0x228] sm:$0xff] %vm1011_vm5, %v962_v60  ;;  %6159 = vmatprep.subr.bf16.mxu1 %v6502_v2 }
 0x1ba   : > { %1675 = vst.msk [vmem:[#allocation3 + $0x218] sm:$0xff] %vm1011_vm5, %v1602_v61 }
 0x1bb   : > { %v2484_v37 = vsel %vm2419_vm10, %v2304_v50, %v2452_v22  ;;  %v2307_v17 = vadd.f32 %v2306_v45, %v2146_v46  ;;  %2864 = vrot.lane.b32.xlu0 %v2800_v5, %s6578_s15  ;;  %3698 = vrot.lane.b32.xlu1 %v8008_v23, %s6579_s20 }
 0x1bc   : > { %2516 = vst.msk [vmem:[#allocation2 + $0x49] sm:$0xff] %vm311_vm0, %v2484_v37  ;;  %v1223_v39 = vpop.permute.xlu1 %1222  ;;  %v1819_v9 = vld [vmem:[#allocation3 + $0x230] sm:$0xff]  ;;  %6160 = vmatpush3.bf16.msra.mxu1 %v6503_v28 }
 0x1bd   : > { %vm2420_vm11 = vcmp.ge.f32.partialorder %v2307_v17, 0.0  ;;  %v2453_v10 = vmul.f32 %v7825_v49, %v2307_v17  ;;  %v960_v4 = vpop.permute.xlu0 %959  ;;  %1293 = vst.msk [vmem:[#allocation3 + $0x260] sm:$0xff] %vm625_vm3, %v1223_v39 }
 0x1be   : > { %1034 = vst.msk [vmem:[#allocation3 + $0x210] sm:$0xff] %vm1011_vm5, %v960_v4 }
 0x1bf   : > { %v2485_v0 = vsel %vm2420_vm11, %v2307_v17, %v2453_v10  ;;  %3696 = vrot.lane.b32.xlu0 %v8021_v30, %s6579_s20  ;;  %3058 = vrot.lane.b32.xlu1 %v2993_v18, %s6579_s20 }
 0x1c0   : > { %2517 = vst.msk [vmem:[#allocation2 + $0x51] sm:$0xff] %vm311_vm0, %v2485_v0  ;;  %v580_v44 = vpop.permute.xlu1 %579  ;;  %v1818_v56 = vld [vmem:[#allocation3 + $0x228] sm:$0xff] }
 0x1c1   : > { %v1221_v15 = vpop.permute.xlu0 %1220  ;;  %v1816_v42 = vld [vmem:[#allocation3 + $0x218] sm:$0xff]  ;;  %651 = vst.msk [vmem:[#allocation3 + $0x258] sm:$0xff] %vm625_vm3, %v580_v44 }
 0x1c2   : > { %1292 = vst.msk [vmem:[#allocation3 + $0x248] sm:$0xff] %vm625_vm3, %v1221_v15  ;;  %v1879_v1 = vpack.c.bf16 %v1819_v9, %v1816_v42 }
 0x1c3   : > { %3056 = vrot.lane.b32.xlu0 %v2992_v26, %s6579_s20  ;;  %v3188_v21 = vld [vmem:[#allocation2 + $0x49] sm:$0xff]  ;;  %3318 = vrot.lane.b32.xlu1 %v7957_v38, %s6577_s14 }
 0x1c4   : > { %2212 = vmatprep.mubr.bf16.mxu0 %v1879_v1  ;;  %3220 = vst.msk [vmem:[#allocation3 + $0x68] sm:$0xff] %vm311_vm0, %v3188_v21  ;;  %v2550_v19 = vld [vmem:[#allocation2 + $0x48] sm:$0xff]  ;;  %v1416_v48 = vpop.permute.xlu1 %1415 }
 0x1c5   : > { %v578_v35 = vpop.permute.xlu0 %577  ;;  %v1815_v57 = vld [vmem:[#allocation3 + $0x210] sm:$0xff]  ;;  %2582 = vst.msk [vmem:[#allocation3 + $0x90] sm:$0xff] %vm311_vm0, %v2550_v19  ;;  %v8061_v39 = vld [vmem:[#allocation2 + $0x48] sm:$0xff] }
 0x1c6   : > { %650 = vst.msk [vmem:[#allocation3 + $0x240] sm:$0xff] %vm625_vm3, %v578_v35  ;;  %v1878_v50 = vpack.c.bf16 %v1818_v56, %v1815_v57 }
 0x1c7   : > { %1486 = vst.msk [vmem:[#allocation3 + $0x260] sm:$0xff] %vm818_vm4, %v1416_v48  ;;  %3316 = vrot.lane.b32.xlu0 %v7960_v16, %s6577_s14  ;;  %v8039_v45 = vld [vmem:[#allocation2 + $0x52] sm:$0xff]  ;;  %2678 = vrot.lane.b32.xlu1 %v7874_v63, %s6577_s14  ;;  %v8043_v3 = vld [vmem:[#allocation2 + $0x4a] sm:$0xff] }
 0x1c8   : > { %v6049_v5 = vpop.f32.mrf.mxu0  ;;  %2213 = vmatmul.mubr.bf16.gmra.mxu0 %v1878_v50  ;;  %3859 = vst.msk [vmem:[#allocation3 + $0x58] sm:$0xff] %vm311_vm0, %v8039_v45  ;;  %v3189_v29 = vld [vmem:[#allocation2 + $0x51] sm:$0xff]  ;;  %3858 = vst.msk [vmem:[#allocation3 + $0x40] sm:$0xff] %vm311_vm0, %v8043_v3  ;;  %v773_v60 = vpop.permute.xlu1 %772 }
 0x1c9   : > { %v2551_v22 = vld [vmem:[#allocation2 + $0x50] sm:$0xff]  ;;  %v1414_v61 = vpop.permute.xlu0 %1413  ;;  %3221 = vst.msk [vmem:[#allocation3 + $0x80] sm:$0xff] %vm311_vm0, %v3189_v29  ;;  %v8097_v29 = vpop.f32.mrf.mxu1 }
 0x1ca   : > { %2583 = vst.msk [vmem:[#allocation3 + $0xa8] sm:$0xff] %vm311_vm0, %v2551_v22  ;;  %v6050_v46 = vpop.f32.mrf.mxu0  ;;  %v8055_v37 = vld [vmem:[#allocation2 + $0x50] sm:$0xff] }
 0x1cb   : > { %1485 = vst.msk [vmem:[#allocation3 + $0x248] sm:$0xff] %vm818_vm4, %v1414_v61  ;;  %v6051_v63 = vadd.f32 %v6050_v46, %v6049_v5  ;;  %844 = vst.msk [vmem:[#allocation3 + $0x258] sm:$0xff] %vm818_vm4, %v773_v60  ;;  %2676 = vrot.lane.b32.xlu0 %v7857_v53, %s6577_s14  ;;  %3510 = vrot.lane.b32.xlu1 %v8055_v37, %s6578_s15  ;;  %v8076_v26 = vld [vmem:[#allocation2 + $0x51] sm:$0xff] }
 0x1cc   : > { %v6052_v17 = vpop.f32.mrf.mxu0  ;;  %v1608_v4 = vpop.permute.xlu1 %1607 }
 0x1cd   : > { %v2151_v2 = vadd.f32 %v6051_v63, %v7812_v25  ;;  %v771_v28 = vpop.permute.xlu0 %770  ;;  %1678 = vst.msk [vmem:[#allocation3 + $0x260] sm:$0xff] %vm1011_vm5, %v1608_v4 }
 0x1ce   : > { %843 = vst.msk [vmem:[#allocation3 + $0x240] sm:$0xff] %vm818_vm4, %v771_v28  ;;  %v6053_v10 = vpop.f32.mrf.mxu0 }
 0x1cf   : > { %v2312_v0 = vadd.f32 %v7941_v52, %v2151_v2  ;;  %v6054_v18 = vadd.f32 %v6053_v10, %v6052_v17  ;;  %3508 = vrot.lane.b32.xlu0 %v8061_v39, %s6578_s15  ;;  %2870 = vrot.lane.b32.xlu1 %v7934_v59, %s6578_s15  ;;  %v2319_v17 = vpop.f32.mrf.mxu1 }
 0x1d0   : > { %v966_v42 = vpop.permute.xlu1 %965 }
 0x1d1   : > { %vm2421_vm12 = vcmp.ge.f32.partialorder %v2312_v0, 0.0  ;;  %v2454_v53 = vmul.f32 %v7825_v49, %v2312_v0  ;;  %v2154_v9 = vadd.f32 %v6054_v18, %v7812_v25  ;;  %v1606_v15 = vpop.permute.xlu0 %1605  ;;  %1037 = vst.msk [vmem:[#allocation3 + $0x258] sm:$0xff] %vm1011_vm5, %v966_v42 }
 0x1d2   : > { %1677 = vst.msk [vmem:[#allocation3 + $0x248] sm:$0xff] %vm1011_vm5, %v1606_v15  ;;  %v8125_v15 = vpop.f32.mrf.mxu1 }
 0x1d3   : > { %v2486_v44 = vsel %vm2421_vm12, %v2312_v0, %v2454_v53  ;;  %v2315_v52 = vadd.f32 %v7984_v11, %v2154_v9  ;;  %2868 = vrot.lane.b32.xlu0 %v7951_v34, %s6578_s15  ;;  %3702 = vrot.lane.b32.xlu1 %v8076_v26, %s6579_s20  ;;  %v8083_v11 = vld [vmem:[#allocation2 + $0x49] sm:$0xff] }
 0x1d4   : > { %2518 = vst.msk [vmem:[#allocation2 + $0x61] sm:$0xff] %vm311_vm0, %v2486_v44  ;;  %v1227_v56 = vpop.permute.xlu1 %1226  ;;  %v1825_v34 = vld [vmem:[#allocation3 + $0x260] sm:$0xff] }
 0x1d5   : > { %vm2422_vm13 = vcmp.ge.f32.partialorder %v2315_v52, 0.0  ;;  %v2455_v59 = vmul.f32 %v7825_v49, %v2315_v52  ;;  %v964_v1 = vpop.permute.xlu0 %963  ;;  %1295 = vst.msk [vmem:[#allocation3 + $0x290] sm:$0xff] %vm625_vm3, %v1227_v56 }
 0x1d6   : > { %1036 = vst.msk [vmem:[#allocation3 + $0x240] sm:$0xff] %vm1011_vm5, %v964_v1 }
 0x1d7   : > { %v2487_v21 = vsel %vm2422_vm13, %v2315_v52, %v2455_v59  ;;  %3700 = vrot.lane.b32.xlu0 %v8083_v11, %s6579_s20  ;;  %3062 = vrot.lane.b32.xlu1 %v7977_v32, %s6579_s20 }
 0x1d8   : > { %2519 = vst.msk [vmem:[#allocation2 + $0x69] sm:$0xff] %vm311_vm0, %v2487_v21  ;;  %v584_v57 = vpop.permute.xlu1 %583  ;;  %v1824_v50 = vld [vmem:[#allocation3 + $0x258] sm:$0xff] }
 0x1d9   : > { %v1225_v19 = vpop.permute.xlu0 %1224  ;;  %v1822_v35 = vld [vmem:[#allocation3 + $0x248] sm:$0xff]  ;;  %653 = vst.msk [vmem:[#allocation3 + $0x288] sm:$0xff] %vm625_vm3, %v584_v57 }
 0x1da   : > { %1294 = vst.msk [vmem:[#allocation3 + $0x278] sm:$0xff] %vm625_vm3, %v1225_v19  ;;  %v1882_v48 = vpack.c.bf16 %v1825_v34, %v1822_v35 }
 0x1db   : > { %3060 = vrot.lane.b32.xlu0 %v7991_v20, %s6579_s20  ;;  %v3190_v5 = vld [vmem:[#allocation2 + $0x61] sm:$0xff]  ;;  %3322 = vrot.lane.b32.xlu1 %v8039_v45, %s6577_s14 }
 0x1dc   : > { %2220 = vmatprep.mubr.bf16.mxu0 %v1882_v48  ;;  %3222 = vst.msk [vmem:[#allocation3 + $0x98] sm:$0xff] %vm311_vm0, %v3190_v5  ;;  %v2552_v32 = vld [vmem:[#allocation2 + $0x60] sm:$0xff]  ;;  %v1420_v46 = vpop.permute.xlu1 %1419 }
 0x1dd   : > { %v582_v22 = vpop.permute.xlu0 %581  ;;  %v1821_v61 = vld [vmem:[#allocation3 + $0x240] sm:$0xff]  ;;  %2584 = vst.msk [vmem:[#allocation3 + $0xc0] sm:$0xff] %vm311_vm0, %v2552_v32  ;;  %v8129_v1 = vld [vmem:[#allocation2 + $0x60] sm:$0xff] }
 0x1de   : > { %652 = vst.msk [vmem:[#allocation3 + $0x270] sm:$0xff] %vm625_vm3, %v582_v22  ;;  %v1881_v60 = vpack.c.bf16 %v1824_v50, %v1821_v61  ;;  %v8149_v61 = vld [vmem:[#allocation2 + $0x61] sm:$0xff] }
 0x1df   : > { %1488 = vst.msk [vmem:[#allocation3 + $0x290] sm:$0xff] %vm818_vm4, %v1420_v46  ;;  %3320 = vrot.lane.b32.xlu0 %v8043_v3, %s6577_s14  ;;  %v8105_v20 = vld [vmem:[#allocation2 + $0x6a] sm:$0xff]  ;;  %2682 = vrot.lane.b32.xlu1 %v8008_v23, %s6577_s14  ;;  %v8109_v2 = vld [vmem:[#allocation2 + $0x62] sm:$0xff] }
 0x1e0   : > { %v6055_v63 = vpop.f32.mrf.mxu0  ;;  %2221 = vmatmul.mubr.bf16.gmra.mxu0 %v1881_v60  ;;  %3861 = vst.msk [vmem:[#allocation3 + $0x88] sm:$0xff] %vm311_vm0, %v8105_v20  ;;  %v3191_v28 = vld [vmem:[#allocation2 + $0x69] sm:$0xff]  ;;  %3860 = vst.msk [vmem:[#allocation3 + $0x70] sm:$0xff] %vm311_vm0, %v8109_v2  ;;  %v777_v23 = vpop.permute.xlu1 %776 }
 0x1e1   : > { %v2553_v10 = vld [vmem:[#allocation2 + $0x68] sm:$0xff]  ;;  %v1418_v4 = vpop.permute.xlu0 %1417  ;;  %3223 = vst.msk [vmem:[#allocation3 + $0xb0] sm:$0xff] %vm311_vm0, %v3191_v28 }
 0x1e2   : > { %2585 = vst.msk [vmem:[#allocation3 + $0xd8] sm:$0xff] %vm311_vm0, %v2553_v10  ;;  %v6056_v0 = vpop.f32.mrf.mxu0  ;;  %v8121_v53 = vld [vmem:[#allocation2 + $0x68] sm:$0xff] }
 0x1e3   : > { %1487 = vst.msk [vmem:[#allocation3 + $0x278] sm:$0xff] %vm818_vm4, %v1418_v4  ;;  %v6057_v18 = vadd.f32 %v6056_v0, %v6055_v63  ;;  %846 = vst.msk [vmem:[#allocation3 + $0x288] sm:$0xff] %vm818_vm4, %v777_v23  ;;  %2680 = vrot.lane.b32.xlu0 %v8021_v30, %s6577_s14  ;;  %3514 = vrot.lane.b32.xlu1 %v8121_v53, %s6578_s15  ;;  %v2322_v30 = vpop.f32.mrf.mxu1  ;;  %v8142_v5 = vld [vmem:[#allocation2 + $0x69] sm:$0xff] }
 0x1e4   : > { %v6058_v9 = vpop.f32.mrf.mxu0  ;;  %v1612_v59 = vpop.permute.xlu1 %1611 }
 0x1e5   : > { %v775_v42 = vpop.permute.xlu0 %774  ;;  %v2159_v44 = vadd.f32 %v6057_v18, %v7812_v25  ;;  %1680 = vst.msk [vmem:[#allocation3 + $0x290] sm:$0xff] %vm1011_vm5, %v1612_v59 }
 0x1e6   : > { %845 = vst.msk [vmem:[#allocation3 + $0x270] sm:$0xff] %vm818_vm4, %v775_v42  ;;  %v6059_v52 = vpop.f32.mrf.mxu0 }
 0x1e7   : > { %v6060_v56 = vadd.f32 %v6059_v52, %v6058_v9  ;;  %v2320_v21 = vadd.f32 %v2319_v17, %v2159_v44  ;;  %3512 = vrot.lane.b32.xlu0 %v8129_v1, %s6578_s15  ;;  %2874 = vrot.lane.b32.xlu1 %v7957_v38, %s6578_s15 }
 0x1e8   : > { %v970_v57 = vpop.permute.xlu1 %969 }
 0x1e9   : > { %vm2423_vm14 = vcmp.ge.f32.partialorder %v2320_v21, 0.0  ;;  %v2456_v34 = vmul.f32 %v7825_v49, %v2320_v21  ;;  %v1610_v19 = vpop.permute.xlu0 %1609  ;;  %v2162_v35 = vadd.f32 %v6060_v56, %v7812_v25  ;;  %1039 = vst.msk [vmem:[#allocation3 + $0x288] sm:$0xff] %vm1011_vm5, %v970_v57 }
 0x1ea   : > { %1679 = vst.msk [vmem:[#allocation3 + $0x278] sm:$0xff] %vm1011_vm5, %v1610_v19 }
 0x1eb   : > { %v2488_v48 = vsel %vm2423_vm14, %v2320_v21, %v2456_v34  ;;  %v2323_v50 = vadd.f32 %v2322_v30, %v2162_v35  ;;  %2872 = vrot.lane.b32.xlu0 %v7960_v16, %s6578_s15  ;;  %3706 = vrot.lane.b32.xlu1 %v8142_v5, %s6579_s20 }
 0x1ec   : > { %2520 = vst.msk [vmem:[#allocation2 + $0x79] sm:$0xff] %vm311_vm0, %v2488_v48  ;;  %v1231_v22 = vpop.permute.xlu1 %1230  ;;  %v1831_v16 = vld [vmem:[#allocation3 + $0x290] sm:$0xff] }
 0x1ed   : > { %vm2424_vm15 = vcmp.ge.f32.partialorder %v2323_v50, 0.0  ;;  %v2457_v38 = vmul.f32 %v7825_v49, %v2323_v50  ;;  %v968_v32 = vpop.permute.xlu0 %967  ;;  %1297 = vst.msk [vmem:[#allocation3 + $0x2c0] sm:$0xff] %vm625_vm3, %v1231_v22 }
 0x1ee   : > { %1038 = vst.msk [vmem:[#allocation3 + $0x270] sm:$0xff] %vm1011_vm5, %v968_v32 }
 0x1ef   : > { %v2489_v46 = vsel %vm2424_vm15, %v2323_v50, %v2457_v38  ;;  %3704 = vrot.lane.b32.xlu0 %v8149_v61, %s6579_s20  ;;  %3066 = vrot.lane.b32.xlu1 %v8055_v37, %s6579_s20 }
 0x1f0   : > { %2521 = vst.msk [vmem:[#allocation2 + $0x81] sm:$0xff] %vm311_vm0, %v2489_v46  ;;  %v588_v17 = vpop.permute.xlu1 %587  ;;  %v1830_v10 = vld [vmem:[#allocation3 + $0x288] sm:$0xff] }
 0x1f1   : > { %v1229_v60 = vpop.permute.xlu0 %1228  ;;  %v1828_v63 = vld [vmem:[#allocation3 + $0x278] sm:$0xff]  ;;  %655 = vst.msk [vmem:[#allocation3 + $0x2b8] sm:$0xff] %vm625_vm3, %v588_v17 }
 0x1f2   : > { %1296 = vst.msk [vmem:[#allocation3 + $0x2a8] sm:$0xff] %vm625_vm3, %v1229_v60  ;;  %v1885_v28 = vpack.c.bf16 %v1831_v16, %v1828_v63 }
 0x1f3   : > { %3064 = vrot.lane.b32.xlu0 %v8061_v39, %s6579_s20  ;;  %v3192_v4 = vld [vmem:[#allocation2 + $0x79] sm:$0xff]  ;;  %3326 = vrot.lane.b32.xlu1 %v8105_v20, %s6577_s14 }
 0x1f4   : > { %2228 = vmatprep.mubr.bf16.mxu0 %v1885_v28  ;;  %3224 = vst.msk [vmem:[#allocation3 + $0xc8] sm:$0xff] %vm311_vm0, %v3192_v4  ;;  %v2554_v37 = vld [vmem:[#allocation2 + $0x78] sm:$0xff]  ;;  %v1424_v18 = vpop.permute.xlu1 %1423 }
 0x1f5   : > { %v586_v0 = vpop.permute.xlu0 %585  ;;  %v1827_v23 = vld [vmem:[#allocation3 + $0x270] sm:$0xff]  ;;  %2586 = vst.msk [vmem:[#allocation3 + $0xf0] sm:$0xff] %vm311_vm0, %v2554_v37  ;;  %v8191_v38 = vld [vmem:[#allocation2 + $0x78] sm:$0xff] }
 0x1f6   : > { %654 = vst.msk [vmem:[#allocation3 + $0x2a0] sm:$0xff] %vm625_vm3, %v586_v0  ;;  %v1884_v9 = vpack.c.bf16 %v1830_v10, %v1827_v23 }
 0x1f7   : > { %1490 = vst.msk [vmem:[#allocation3 + $0x2c0] sm:$0xff] %vm818_vm4, %v1424_v18  ;;  %3324 = vrot.lane.b32.xlu0 %v8109_v2, %s6577_s14  ;;  %v8169_v39 = vld [vmem:[#allocation2 + $0x82] sm:$0xff]  ;;  %2686 = vrot.lane.b32.xlu1 %v8076_v26, %s6577_s14  ;;  %v8173_v44 = vld [vmem:[#allocation2 + $0x7a] sm:$0xff] }
 0x1f8   : > { %v6061_v42 = vpop.f32.mrf.mxu0  ;;  %2229 = vmatmul.mubr.bf16.gmra.mxu0 %v1884_v9  ;;  %3863 = vst.msk [vmem:[#allocation3 + $0xb8] sm:$0xff] %vm311_vm0, %v8169_v39  ;;  %v3193_v52 = vld [vmem:[#allocation2 + $0x81] sm:$0xff]  ;;  %3862 = vst.msk [vmem:[#allocation3 + $0xa0] sm:$0xff] %vm311_vm0, %v8173_v44  ;;  %v781_v30 = vpop.permute.xlu1 %780 }
 0x1f9   : > { %v2555_v59 = vld [vmem:[#allocation2 + $0x80] sm:$0xff]  ;;  %v1422_v56 = vpop.permute.xlu0 %1421  ;;  %3225 = vst.msk [vmem:[#allocation3 + $0xe0] sm:$0xff] %vm311_vm0, %v3193_v52 }
 0x1fa   : > { %2587 = vst.msk [vmem:[#allocation3 + $0x108] sm:$0xff] %vm311_vm0, %v2555_v59  ;;  %v6062_v21 = vpop.f32.mrf.mxu0  ;;  %v8185_v34 = vld [vmem:[#allocation2 + $0x80] sm:$0xff] }
 0x1fb   : > { %1489 = vst.msk [vmem:[#allocation3 + $0x2a8] sm:$0xff] %vm818_vm4, %v1422_v56  ;;  %v6063_v26 = vadd.f32 %v6062_v21, %v6061_v42  ;;  %848 = vst.msk [vmem:[#allocation3 + $0x2b8] sm:$0xff] %vm818_vm4, %v781_v30  ;;  %2684 = vrot.lane.b32.xlu0 %v8083_v11, %s6577_s14  ;;  %3518 = vrot.lane.b32.xlu1 %v8185_v34, %s6578_s15  ;;  %v8206_v17 = vld [vmem:[#allocation2 + $0x81] sm:$0xff]  ;;  %v8227_v42 = vpop.f32.mrf.mxu1 }
 0x1fc   : > { %v6064_v19 = vpop.f32.mrf.mxu0  ;;  %v1616_v50 = vpop.permute.xlu1 %1615 }
 0x1fd   : > { %v2167_v35 = vadd.f32 %v6063_v26, %v7812_v25  ;;  %v779_v57 = vpop.permute.xlu0 %778  ;;  %1682 = vst.msk [vmem:[#allocation3 + $0x2c0] sm:$0xff] %vm1011_vm5, %v1616_v50  ;;  %v2335_v26 = vpop.f32.mrf.mxu1 }
 0x1fe   : > { %847 = vst.msk [vmem:[#allocation3 + $0x2a0] sm:$0xff] %vm818_vm4, %v779_v57  ;;  %v6065_v48 = vpop.f32.mrf.mxu0 }
 0x1ff   : > { %v2328_v32 = vadd.f32 %v8097_v29, %v2167_v35  ;;  %v6066_v22 = vadd.f32 %v6065_v48, %v6064_v19  ;;  %3516 = vrot.lane.b32.xlu0 %v8191_v38, %s6578_s15  ;;  %2878 = vrot.lane.b32.xlu1 %v8039_v45, %s6578_s15 }
 0x200   : > { %v974_v60 = vpop.permute.xlu1 %973 }
 0x201   : > { %vm2425_vm1 = vcmp.ge.f32.partialorder %v2328_v32, 0.0  ;;  %v2458_v11 = vmul.f32 %v7825_v49, %v2328_v32  ;;  %v2170_v46 = vadd.f32 %v6066_v22, %v7812_v25  ;;  %v1614_v16 = vpop.permute.xlu0 %1613  ;;  %1041 = vst.msk [vmem:[#allocation3 + $0x2b8] sm:$0xff] %vm1011_vm5, %v974_v60  ;;  %v8260_v60 = vld [vmem:[%s9962_s2] ss:$0 sm:$0xff] }
 0x202   : > { %1681 = vst.msk [vmem:[#allocation3 + $0x2a8] sm:$0xff] %vm1011_vm5, %v1614_v16 }
 0x203   : > { %v2490_v63 = vsel %vm2425_vm1, %v2328_v32, %v2458_v11  ;;  %v2331_v29 = vadd.f32 %v8125_v15, %v2170_v46  ;;  %2876 = vrot.lane.b32.xlu0 %v8043_v3, %s6578_s15  ;;  %3710 = vrot.lane.b32.xlu1 %v8206_v17, %s6579_s20  ;;  %v8213_v15 = vld [vmem:[#allocation2 + $0x79] sm:$0xff]  ;;  %v8255_v46 = vpop.f32.mrf.mxu1 }
 0x204   : > { %2522 = vst.msk [vmem:[#allocation2 + $0x91] sm:$0xff] %vm311_vm0, %v2490_v63  ;;  %v1235_v28 = vpop.permute.xlu1 %1234  ;;  %v1837_v3 = vld [vmem:[#allocation3 + $0x2c0] sm:$0xff] }
 0x205   : > { %vm2426_vm2 = vcmp.ge.f32.partialorder %v2331_v29, 0.0  ;;  %v2459_v25 = vmul.f32 %v7825_v49, %v2331_v29  ;;  %v972_v45 = vpop.permute.xlu0 %971  ;;  %1299 = vst.msk [vmem:[#allocation3 + $0x2f0] sm:$0xff] %vm625_vm3, %v1235_v28 }
 0x206   : > { %1040 = vst.msk [vmem:[#allocation3 + $0x2a0] sm:$0xff] %vm1011_vm5, %v972_v45 }
 0x207   : > { %v2491_v10 = vsel %vm2426_vm2, %v2331_v29, %v2459_v25  ;;  %3708 = vrot.lane.b32.xlu0 %v8213_v15, %s6579_s20  ;;  %3070 = vrot.lane.b32.xlu1 %v8121_v53, %s6579_s20 }
 0x208   : > { %2523 = vst.msk [vmem:[#allocation2 + $0x99] sm:$0xff] %vm311_vm0, %v2491_v10  ;;  %v592_v0 = vpop.permute.xlu1 %591  ;;  %v1836_v18 = vld [vmem:[#allocation3 + $0x2b8] sm:$0xff]  ;;  %v2338_v10 = vpop.f32.mrf.mxu1 }
 0x209   : > { %v1233_v4 = vpop.permute.xlu0 %1232  ;;  %v1834_v37 = vld [vmem:[#allocation3 + $0x2a8] sm:$0xff]  ;;  %657 = vst.msk [vmem:[#allocation3 + $0x2e8] sm:$0xff] %vm625_vm3, %v592_v0 }
 0x20a   : > { %1298 = vst.msk [vmem:[#allocation3 + $0x2d8] sm:$0xff] %vm625_vm3, %v1233_v4  ;;  %v1888_v23 = vpack.c.bf16 %v1837_v3, %v1834_v37 }
 0x20b   : > { %3068 = vrot.lane.b32.xlu0 %v8129_v1, %s6579_s20  ;;  %v3194_v9 = vld [vmem:[#allocation2 + $0x91] sm:$0xff]  ;;  %3330 = vrot.lane.b32.xlu1 %v8169_v39, %s6577_s14 }
 0x20c   : > { %2236 = vmatprep.mubr.bf16.mxu0 %v1888_v23  ;;  %3226 = vst.msk [vmem:[#allocation3 + $0xf8] sm:$0xff] %vm311_vm0, %v3194_v9  ;;  %v2556_v53 = vld [vmem:[#allocation2 + $0x90] sm:$0xff]  ;;  %v1428_v56 = vpop.permute.xlu1 %1427 }
 0x20d   : > { %v590_v52 = vpop.permute.xlu0 %589  ;;  %v1833_v59 = vld [vmem:[#allocation3 + $0x2a0] sm:$0xff]  ;;  %2588 = vst.msk [vmem:[#allocation3 + $0x120] sm:$0xff] %vm311_vm0, %v2556_v53 }
 0x20e   : > { %656 = vst.msk [vmem:[#allocation3 + $0x2d0] sm:$0xff] %vm625_vm3, %v590_v52  ;;  %v1887_v21 = vpack.c.bf16 %v1836_v18, %v1833_v59  ;;  %v8264_v25 = vld [vmem:[#allocation2 + $0x90] sm:$0xff] }
 0x20f   : > { %1492 = vst.msk [vmem:[#allocation3 + $0x2f0] sm:$0xff] %vm818_vm4, %v1428_v56  ;;  %3328 = vrot.lane.b32.xlu0 %v8173_v44, %s6577_s14  ;;  %v8235_v1 = vld [vmem:[#allocation2 + $0x9a] sm:$0xff]  ;;  %2690 = vrot.lane.b32.xlu1 %v8142_v5, %s6577_s14  ;;  %v8239_v19 = vld [vmem:[#allocation2 + $0x92] sm:$0xff] }
 0x210   : > { %v6067_v30 = vpop.f32.mrf.mxu0  ;;  %2237 = vmatmul.mubr.bf16.gmra.mxu0 %v1887_v21  ;;  %3865 = vst.msk [vmem:[#allocation3 + $0xe8] sm:$0xff] %vm311_vm0, %v8235_v1  ;;  %v3195_v35 = vld [vmem:[#allocation2 + $0x99] sm:$0xff]  ;;  %3864 = vst.msk [vmem:[#allocation3 + $0xd0] sm:$0xff] %vm311_vm0, %v8239_v19  ;;  %v785_v5 = vpop.permute.xlu1 %784  ;;  %v8284_v59 = vld [vmem:[#allocation2 + $0x91] sm:$0xff] }
 0x211   : > { %v2557_v57 = vld [vmem:[#allocation2 + $0x98] sm:$0xff]  ;;  %v1426_v48 = vpop.permute.xlu0 %1425  ;;  %3227 = vst.msk [vmem:[#allocation3 + $0x110] sm:$0xff] %vm311_vm0, %v3195_v35 }
 0x212   : > { %2589 = vst.msk [vmem:[#allocation3 + $0x138] sm:$0xff] %vm311_vm0, %v2557_v57  ;;  %v6068_v50 = vpop.f32.mrf.mxu0  ;;  %v8251_v22 = vld [vmem:[#allocation2 + $0x98] sm:$0xff] }
 0x213   : > { %1491 = vst.msk [vmem:[#allocation3 + $0x2d8] sm:$0xff] %vm818_vm4, %v1426_v48  ;;  %v6069_v32 = vadd.f32 %v6068_v50, %v6067_v30  ;;  %850 = vst.msk [vmem:[#allocation3 + $0x2e8] sm:$0xff] %vm818_vm4, %v785_v5  ;;  %2688 = vrot.lane.b32.xlu0 %v8149_v61, %s6577_s14  ;;  %3522 = vrot.lane.b32.xlu1 %v8251_v22, %s6578_s15  ;;  %v8277_v9 = vld [vmem:[#allocation2 + $0x99] sm:$0xff] }
 0x214   : > { %v6070_v11 = vpop.f32.mrf.mxu0  ;;  %v1620_v61 = vpop.permute.xlu1 %1619  ;;  %v3893_v5 = vld [vmem:[#allocation3 + $0x28] sm:$0xff] }
 0x215   : > { %v783_v16 = vpop.permute.xlu0 %782  ;;  %v2175_v63 = vadd.f32 %v8260_v60, %v6069_v32  ;;  %1684 = vst.msk [vmem:[#allocation3 + $0x2f0] sm:$0xff] %vm1011_vm5, %v1620_v61 }
 0x216   : > { %849 = vst.msk [vmem:[#allocation3 + $0x2d0] sm:$0xff] %vm818_vm4, %v783_v16  ;;  %v6071_v29 = vpop.f32.mrf.mxu0 }
 0x217   : > { %v6072_v45 = vadd.f32 %v6071_v29, %v6070_v11  ;;  %v2336_v28 = vadd.f32 %v2335_v26, %v2175_v63  ;;  %3520 = vrot.lane.b32.xlu0 %v8264_v25, %s6578_s15  ;;  %2882 = vrot.lane.b32.xlu1 %v8105_v20, %s6578_s15 }
 0x218   : > { %v978_v0 = vpop.permute.xlu1 %977 }
 0x219   : > { %vm2427_vm6 = vcmp.ge.f32.partialorder %v2336_v28, 0.0  ;;  %v2460_v3 = vmul.f32 %v7825_v49, %v2336_v28  ;;  %v1618_v4 = vpop.permute.xlu0 %1617  ;;  %v2178_v37 = vadd.f32 %v8260_v60, %v6072_v45  ;;  %1043 = vst.msk [vmem:[#allocation3 + $0x2e8] sm:$0xff] %vm1011_vm5, %v978_v0 }
 0x21a   : > { %1683 = vst.msk [vmem:[#allocation3 + $0x2d8] sm:$0xff] %vm1011_vm5, %v1618_v4 }
 0x21b   : > { %v2492_v23 = vsel %vm2427_vm6, %v2336_v28, %v2460_v3  ;;  %v2339_v18 = vadd.f32 %v2338_v10, %v2178_v37  ;;  %2880 = vrot.lane.b32.xlu0 %v8109_v2, %s6578_s15  ;;  %3714 = vrot.lane.b32.xlu1 %v8277_v9, %s6579_s20 }
 0x21c   : > { %2524 = vst.msk [vmem:[#allocation2 + $0xa9] sm:$0xff] %vm311_vm0, %v2492_v23  ;;  %v3315_v52 = vpop.permute.xlu1 %3314  ;;  %v1843_v2 = vld [vmem:[#allocation3 + $0x2f0] sm:$0xff]  ;;  %v3896_v23 = vld [vmem:[#allocation3 + $0x40] sm:$0xff] }
 0x21d   : > { %vm2428_vm7 = vcmp.ge.f32.partialorder %v2339_v18, 0.0  ;;  %v2461_v20 = vmul.f32 %v7825_v49, %v2339_v18  ;;  %v976_v53 = vpop.permute.xlu0 %975  ;;  %3409 = vst.msk [vmem:[#allocation3 + $0x20] sm:$0xff] %vm625_vm3, %v3315_v52  ;;  %v3905_v52 = vld [vmem:[#allocation3 + $0x88] sm:$0xff] }
 0x21e   : > { %1042 = vst.msk [vmem:[#allocation3 + $0x2d0] sm:$0xff] %vm1011_vm5, %v976_v53  ;;  %v3902_v53 = vld [vmem:[#allocation3 + $0x70] sm:$0xff] }
 0x21f   : > { %v2493_v56 = vsel %vm2428_vm7, %v2339_v18, %v2461_v20  ;;  %3712 = vrot.lane.b32.xlu0 %v8284_v59, %s6579_s20  ;;  %3074 = vrot.lane.b32.xlu1 %v8185_v34, %s6579_s20  ;;  %v3890_v34 = vld [vmem:[#allocation3 + $0x10] sm:$0xff]  ;;  %v3899_v18 = vld [vmem:[#allocation3 + $0x58] sm:$0xff] }
 0x220   : > { %2525 = vst.msk [vmem:[#allocation2 + $0xb1] sm:$0xff] %vm311_vm0, %v2493_v56  ;;  %v2675_v26 = vpop.permute.xlu1 %2674  ;;  %v1842_v57 = vld [vmem:[#allocation3 + $0x2e8] sm:$0xff]  ;;  %v3986_v63 = vpack.c.bf16 %v3893_v5, %v3890_v34 }
 0x221   : > { %v3313_v21 = vpop.permute.xlu0 %3312  ;;  %v1840_v30 = vld [vmem:[#allocation3 + $0x2d8] sm:$0xff]  ;;  %2769 = vst.msk [vmem:[#allocation3 + $0x18] sm:$0xff] %vm625_vm3, %v2675_v26 }
 0x222   : > { %3408 = vst.msk [vmem:[#allocation3 + $0x8] sm:$0xff] %vm625_vm3, %v3313_v21  ;;  %v1891_v35 = vpack.c.bf16 %v1843_v2, %v1840_v30 }
 0x223   : > { %3072 = vrot.lane.b32.xlu0 %v8191_v38, %s6579_s20  ;;  %v8296_v48 = vld [vmem:[#allocation2 + $0xa9] sm:$0xff]  ;;  %3334 = vrot.lane.b32.xlu1 %v8235_v1, %s6577_s14 }
 0x224   : > { %v2558_v50 = vld [vmem:[#allocation2 + $0xa8] sm:$0xff]  ;;  %2244 = vmatprep.mubr.bf16.mxu0 %v1891_v35  ;;  %3228 = vst.msk [vmem:[#allocation3 + $0x128] sm:$0xff] %vm311_vm0, %v8296_v48 }
 0x225   : > { %2590 = vst.msk [vmem:[#allocation3 + $0x150] sm:$0xff] %vm311_vm0, %v2558_v50  ;;  %v2673_v32 = vpop.permute.xlu0 %2672  ;;  %v1839_v11 = vld [vmem:[#allocation3 + $0x2d0] sm:$0xff]  ;;  %v3507_v38 = vpop.permute.xlu1 %3506  ;;  %v8333_v26 = vld [vmem:[#allocation2 + $0xa8] sm:$0xff]  ;;  %v3992_v50 = vpack.c.bf16 %v3905_v52, %v3902_v53 }
 0x226   : > { %2768 = vst.msk [vmem:[#allocation3] sm:$0xff] %vm625_vm3, %v2673_v32  ;;  %v1890_v16 = vpack.c.bf16 %v1842_v57, %v1839_v11 }
 0x227   : > { %3601 = vst.msk [vmem:[#allocation3 + $0x20] sm:$0xff] %vm818_vm4, %v3507_v38  ;;  %3332 = vrot.lane.b32.xlu0 %v8239_v19, %s6577_s14  ;;  %v8307_v29 = vld [vmem:[#allocation2 + $0xb1] sm:$0xff]  ;;  %2694 = vrot.lane.b32.xlu1 %v8206_v17, %s6577_s14 }
 0x228   : > { %v8309_v61 = vld [vmem:[#allocation2 + $0xb2] sm:$0xff]  ;;  %v6073_v45 = vpop.f32.mrf.mxu0  ;;  %2245 = vmatmul.mubr.bf16.gmra.mxu0 %v1890_v16  ;;  %v8313_v28 = vld [vmem:[#allocation2 + $0xaa] sm:$0xff]  ;;  %3229 = vst.msk [vmem:[#allocation3 + $0x140] sm:$0xff] %vm311_vm0, %v8307_v29 }
 0x229   : > { %3867 = vst.msk [vmem:[#allocation3 + $0x118] sm:$0xff] %vm311_vm0, %v8309_v61  ;;  %v2559_v10 = vld [vmem:[#allocation2 + $0xb0] sm:$0xff]  ;;  %6362 = vmatprep.mubr.msk.bf16.mxu0 %vm311_vm0, %v3986_v63  ;;  %v3505_v3 = vpop.permute.xlu0 %3504  ;;  %3866 = vst.msk [vmem:[#allocation3 + $0x100] sm:$0xff] %vm311_vm0, %v8313_v28  ;;  %v2867_v4 = vpop.permute.xlu1 %2866  ;;  %v3911_v16 = vld [vmem:[#allocation3 + $0xb8] sm:$0xff] }
 0x22a   : > { %2591 = vst.msk [vmem:[#allocation3 + $0x168] sm:$0xff] %vm311_vm0, %v2559_v10  ;;  %v6074_v17 = vpop.f32.mrf.mxu0  ;;  %v8327_v0 = vld [vmem:[#allocation2 + $0xb0] sm:$0xff]  ;;  %v3914_v63 = vld [vmem:[#allocation3 + $0xd0] sm:$0xff] }
 0x22b   : > { %3600 = vst.msk [vmem:[#allocation3 + $0x8] sm:$0xff] %vm818_vm4, %v3505_v3  ;;  %v6075_v37 = vadd.f32 %v6074_v17, %v6073_v45  ;;  %2961 = vst.msk [vmem:[#allocation3 + $0x18] sm:$0xff] %vm818_vm4, %v2867_v4  ;;  %2692 = vrot.lane.b32.xlu0 %v8213_v15, %s6577_s14  ;;  %3526 = vrot.lane.b32.xlu1 %v8327_v0, %s6578_s15  ;;  %v3989_v15 = vpack.c.bf16 %v3899_v18, %v3896_v23  ;;  %v3917_v45 = vld [vmem:[#allocation3 + $0xe8] sm:$0xff] }
 0x22c   : > { %v6076_v20 = vpop.f32.mrf.mxu0 }
 0x22d   : > { %v2183_v56 = vadd.f32 %v8260_v60, %v6075_v37  ;;  %v2865_v2 = vpop.permute.xlu0 %2864  ;;  %v3699_v30 = vpop.permute.xlu1 %3698 }
 0x22e   : > { %2960 = vst.msk [vmem:[#allocation3] sm:$0xff] %vm818_vm4, %v2865_v2  ;;  %v6077_v21 = vpop.f32.mrf.mxu0 }
 0x22f   : > { %v2344_v35 = vadd.f32 %v8227_v42, %v2183_v56  ;;  %v6078_v57 = vadd.f32 %v6077_v21, %v6076_v20  ;;  %3793 = vst.msk [vmem:[#allocation3 + $0x20] sm:$0xff] %vm1011_vm5, %v3699_v30  ;;  %3524 = vrot.lane.b32.xlu0 %v8333_v26, %s6578_s15  ;;  %2886 = vrot.lane.b32.xlu1 %v8169_v39, %s6578_s15  ;;  %v3908_v39 = vld [vmem:[#allocation3 + $0xa0] sm:$0xff] }
 0x230   : > { %6363 = vmatmul.mubr.msk.bf16.vlgmr.msra.gmra.mxu0 %vm311_vm0, %v3989_v15  ;;  %v3995_v17 = vpack.c.bf16 %v3911_v16, %v3908_v39  ;;  %v3923_v52 = vld [vmem:[#allocation3 + $0x118] sm:$0xff]  ;;  %v3920_v56 = vld [vmem:[#allocation3 + $0x100] sm:$0xff] }
 0x231   : > { %vm2429_vm8 = vcmp.ge.f32.partialorder %v2344_v35, 0.0  ;;  %v2462_v34 = vmul.f32 %v7825_v49, %v2344_v35  ;;  %v2186_v5 = vadd.f32 %v8260_v60, %v6078_v57  ;;  %6366 = vmatprep.mubr.msk.bf16.mxu0 %vm311_vm0, %v3992_v50  ;;  %v3697_v42 = vpop.permute.xlu0 %3696  ;;  %v3059_v32 = vpop.permute.xlu1 %3058  ;;  %v4001_v50 = vpack.c.bf16 %v3923_v52, %v3920_v56 }
 0x232   : > { %3792 = vst.msk [vmem:[#allocation3 + $0x8] sm:$0xff] %vm1011_vm5, %v3697_v42  ;;  %3153 = vst.msk [vmem:[#allocation3 + $0x18] sm:$0xff] %vm1011_vm5, %v3059_v32 }
 0x233   : > { %v2494_v11 = vsel %vm2429_vm8, %v2344_v35, %v2462_v34  ;;  %v2347_v38 = vadd.f32 %v8255_v46, %v2186_v5  ;;  %2884 = vrot.lane.b32.xlu0 %v8173_v44, %s6578_s15  ;;  %3718 = vrot.lane.b32.xlu1 %v8307_v29, %s6579_s20  ;;  %v3998_v44 = vpack.c.bf16 %v3917_v45, %v3914_v63 }
 0x234   : > { %2526 = vst.msk [vmem:[#allocation2 + $0xc1] sm:$0xff] %vm311_vm0, %v2494_v11 }
 0x235   : > { %vm2430_vm9 = vcmp.ge.f32.partialorder %v2347_v38, 0.0  ;;  %v2463_v10 = vmul.f32 %v7825_v49, %v2347_v38  ;;  %v3057_v3 = vpop.permute.xlu0 %3056  ;;  %v3319_v46 = vpop.permute.xlu1 %3318 }
 0x236   : > { %3152 = vst.msk [vmem:[#allocation3] sm:$0xff] %vm1011_vm5, %v3057_v3  ;;  %v3892_v18 = vld [vmem:[#allocation3 + $0x20] sm:$0xff] }
 0x237   : > { %v2495_v4 = vsel %vm2430_vm9, %v2347_v38, %v2463_v10  ;;  %3411 = vst.msk [vmem:[#allocation3 + $0x50] sm:$0xff] %vm625_vm3, %v3319_v46  ;;  %3716 = vrot.lane.b32.xlu0 %v8296_v48, %s6579_s20  ;;  %3078 = vrot.lane.b32.xlu1 %v8251_v22, %s6579_s20  ;;  %v8371_v22 = vpop.f32.mrf.mxu1 }
 0x238   : > { %2527 = vst.msk [vmem:[#allocation2 + $0xc9] sm:$0xff] %vm311_vm0, %v2495_v4  ;;  %6367 = vmatmul.mubr.msk.bf16.gmra.mxu0 %vm311_vm0, %v3995_v17 }
 0x239   : > { %6370 = vmatprep.mubr.msk.bf16.mxu0 %vm311_vm0, %v3998_v44  ;;  %v3317_v37 = vpop.permute.xlu0 %3316  ;;  %v3889_v23 = vld [vmem:[#allocation3 + $0x8] sm:$0xff]  ;;  %v2679_v20 = vpop.permute.xlu1 %2678  ;;  %v3891_v35 = vld [vmem:[#allocation3 + $0x18] sm:$0xff] }
 0x23a   : > { %3410 = vst.msk [vmem:[#allocation3 + $0x38] sm:$0xff] %vm625_vm3, %v3317_v37  ;;  %v3985_v53 = vpack.c.bf16 %v3892_v18, %v3889_v23  ;;  %2771 = vst.msk [vmem:[#allocation3 + $0x48] sm:$0xff] %vm625_vm3, %v2679_v20  ;;  %v2351_v32 = vpop.f32.mrf.mxu1 }
 0x23b   : > { %3076 = vrot.lane.b32.xlu0 %v8264_v25, %s6579_s20  ;;  %v8367_v2 = vld [vmem:[#allocation2 + $0xc1] sm:$0xff]  ;;  %3338 = vrot.lane.b32.xlu1 %v8309_v61, %s6577_s14 }
 0x23c   : > { %v2560_v21 = vld [vmem:[#allocation2 + $0xc0] sm:$0xff]  ;;  %4263 = vmatprep.mubr.bf16.mxu1 %v3985_v53  ;;  %3230 = vst.msk [vmem:[#allocation3 + $0x158] sm:$0xff] %vm311_vm0, %v8367_v2  ;;  %v8402_v46 = vpop.f32.mrf.mxu1 }
 0x23d   : > { %2592 = vst.msk [vmem:[#allocation3 + $0x180] sm:$0xff] %vm311_vm0, %v2560_v21  ;;  %v2677_v30 = vpop.permute.xlu0 %2676  ;;  %v3888_v15 = vld [vmem:[#allocation3] sm:$0xff]  ;;  %v3511_v25 = vpop.permute.xlu1 %3510  ;;  %v8408_v37 = vld [vmem:[#allocation2 + $0xc0] sm:$0xff] }
 0x23e   : > { %2770 = vst.msk [vmem:[#allocation3 + $0x30] sm:$0xff] %vm625_vm3, %v2677_v30  ;;  %v3984_v57 = vpack.c.bf16 %v3891_v35, %v3888_v15  ;;  %v2354_v53 = vpop.f32.mrf.mxu1 }
 0x23f   : > { %3603 = vst.msk [vmem:[#allocation3 + $0x50] sm:$0xff] %vm818_vm4, %v3511_v25  ;;  %3336 = vrot.lane.b32.xlu0 %v8313_v28, %s6577_s14  ;;  %v8380_v34 = vld [vmem:[#allocation2 + $0xc2] sm:$0xff]  ;;  %v8382_v5 = vld [vmem:[#allocation2 + $0xca] sm:$0xff]  ;;  %2698 = vrot.lane.b32.xlu1 %v8277_v9, %s6577_s14 }
 0x240   : > { %v6079_v42 = vpop.f32.mrf.mxu0  ;;  %4264 = vmatmul.mubr.bf16.vlgmr.msra.gmra.mxu1 %v3984_v57  ;;  %6371 = vmatmul.mubr.msk.bf16.gmra.mxu0 %vm311_vm0, %v4001_v50  ;;  %3868 = vst.msk [vmem:[#allocation3 + $0x130] sm:$0xff] %vm311_vm0, %v8380_v34  ;;  %3869 = vst.msk [vmem:[#allocation3 + $0x148] sm:$0xff] %vm311_vm0, %v8382_v5  ;;  %v8389_v11 = vld [vmem:[#allocation2 + $0xc9] sm:$0xff] }
 0x241   : > { %v2561_v38 = vld [vmem:[#allocation2 + $0xc8] sm:$0xff]  ;;  %v3509_v39 = vpop.permute.xlu0 %3508  ;;  %3231 = vst.msk [vmem:[#allocation3 + $0x170] sm:$0xff] %vm311_vm0, %v8389_v11  ;;  %v2871_v63 = vpop.permute.xlu1 %2870 }
 0x242   : > { %2593 = vst.msk [vmem:[#allocation3 + $0x198] sm:$0xff] %vm311_vm0, %v2561_v38  ;;  %v6080_v16 = vpop.f32.mrf.mxu0  ;;  %v8400_v3 = vld [vmem:[#allocation2 + $0xc8] sm:$0xff] }
 0x243   : > { %3602 = vst.msk [vmem:[#allocation3 + $0x38] sm:$0xff] %vm818_vm4, %v3509_v39  ;;  %v6081_v45 = vadd.f32 %v6080_v16, %v6079_v42  ;;  %2963 = vst.msk [vmem:[#allocation3 + $0x48] sm:$0xff] %vm818_vm4, %v2871_v63  ;;  %2696 = vrot.lane.b32.xlu0 %v8284_v59, %s6577_s14  ;;  %3530 = vrot.lane.b32.xlu1 %v8400_v3, %s6578_s15 }
 0x244   : > { %v6082_v10 = vpop.f32.mrf.mxu0 }
 0x245   : > { %v2869_v9 = vpop.permute.xlu0 %2868  ;;  %v2191_v17 = vadd.f32 %v8260_v60, %v6081_v45  ;;  %v3703_v44 = vpop.permute.xlu1 %3702 }
 0x246   : > { %2962 = vst.msk [vmem:[#allocation3 + $0x30] sm:$0xff] %vm818_vm4, %v2869_v9  ;;  %v6083_v4 = vpop.f32.mrf.mxu0 }
 0x247   : > { %v6084_v23 = vadd.f32 %v6083_v4, %v6082_v10  ;;  %v2352_v18 = vadd.f32 %v2351_v32, %v2191_v17  ;;  %3795 = vst.msk [vmem:[#allocation3 + $0x50] sm:$0xff] %vm1011_vm5, %v3703_v44  ;;  %3528 = vrot.lane.b32.xlu0 %v8408_v37, %s6578_s15  ;;  %v3926_v59 = vld [vmem:[#allocation3 + $0x130] sm:$0xff]  ;;  %v3929_v20 = vld [vmem:[#allocation3 + $0x148] sm:$0xff]  ;;  %2890 = vrot.lane.b32.xlu1 %v8235_v1, %s6578_s15 }
 0x248   : > { %v4004_v52 = vpack.c.bf16 %v3929_v20, %v3926_v59 }
 0x249   : > { %vm2431_vm10 = vcmp.ge.f32.partialorder %v2352_v18, 0.0  ;;  %v2464_v56 = vmul.f32 %v7825_v49, %v2352_v18  ;;  %v3701_v21 = vpop.permute.xlu0 %3700  ;;  %v2194_v30 = vadd.f32 %v8260_v60, %v6084_v23  ;;  %v3063_v15 = vpop.permute.xlu1 %3062 }
 0x24a   : > { %3794 = vst.msk [vmem:[#allocation3 + $0x38] sm:$0xff] %vm1011_vm5, %v3701_v21  ;;  %6374 = vmatprep.mubr.msk.bf16.mxu0 %vm311_vm0, %v4004_v52  ;;  %3155 = vst.msk [vmem:[#allocation3 + $0x48] sm:$0xff] %vm1011_vm5, %v3063_v15 }
 0x24b   : > { %v2496_v35 = vsel %vm2431_vm10, %v2352_v18, %v2464_v56  ;;  %v2355_v25 = vadd.f32 %v2354_v53, %v2194_v30  ;;  %2888 = vrot.lane.b32.xlu0 %v8239_v19, %s6578_s15  ;;  %3722 = vrot.lane.b32.xlu1 %v8389_v11, %s6579_s20 }
 0x24c   : > { %2528 = vst.msk [vmem:[#allocation2 + $0xd9] sm:$0xff] %vm311_vm0, %v2496_v35 }
 0x24d   : > { %vm2432_vm11 = vcmp.ge.f32.partialorder %v2355_v25, 0.0  ;;  %v2465_v57 = vmul.f32 %v7825_v49, %v2355_v25  ;;  %v3061_v1 = vpop.permute.xlu0 %3060  ;;  %v3323_v50 = vpop.permute.xlu1 %3322 }
 0x24e   : > { %3154 = vst.msk [vmem:[#allocation3 + $0x30] sm:$0xff] %vm1011_vm5, %v3061_v1  ;;  %v3898_v38 = vld [vmem:[#allocation3 + $0x50] sm:$0xff] }
 0x24f   : > { %v2497_v42 = vsel %vm2432_vm11, %v2355_v25, %v2465_v57  ;;  %3413 = vst.msk [vmem:[#allocation3 + $0x80] sm:$0xff] %vm625_vm3, %v3323_v50  ;;  %3720 = vrot.lane.b32.xlu0 %v8367_v2, %s6579_s20  ;;  %3082 = vrot.lane.b32.xlu1 %v8327_v0, %s6579_s20 }
 0x250   : > { %2529 = vst.msk [vmem:[#allocation2 + $0xe1] sm:$0xff] %vm311_vm0, %v2497_v42 }
 0x251   : > { %v3321_v19 = vpop.permute.xlu0 %3320  ;;  %v3895_v32 = vld [vmem:[#allocation3 + $0x38] sm:$0xff]  ;;  %v2683_v39 = vpop.permute.xlu1 %2682  ;;  %v3897_v9 = vld [vmem:[#allocation3 + $0x48] sm:$0xff] }
 0x252   : > { %3412 = vst.msk [vmem:[#allocation3 + $0x68] sm:$0xff] %vm625_vm3, %v3321_v19  ;;  %v3988_v16 = vpack.c.bf16 %v3898_v38, %v3895_v32  ;;  %2773 = vst.msk [vmem:[#allocation3 + $0x78] sm:$0xff] %vm625_vm3, %v2683_v39 }
 0x253   : > { %3080 = vrot.lane.b32.xlu0 %v8333_v26, %s6579_s20  ;;  %v8437_v63 = vld [vmem:[#allocation2 + $0xd9] sm:$0xff]  ;;  %3342 = vrot.lane.b32.xlu1 %v8382_v5, %s6577_s14 }
 0x254   : > { %v2562_v45 = vld [vmem:[#allocation2 + $0xd8] sm:$0xff]  ;;  %4271 = vmatprep.mubr.bf16.mxu1 %v3988_v16  ;;  %3232 = vst.msk [vmem:[#allocation3 + $0x188] sm:$0xff] %vm311_vm0, %v8437_v63 }
 0x255   : > { %2594 = vst.msk [vmem:[#allocation3 + $0x1b0] sm:$0xff] %vm311_vm0, %v2562_v45  ;;  %v2681_v0 = vpop.permute.xlu0 %2680  ;;  %v3894_v10 = vld [vmem:[#allocation3 + $0x30] sm:$0xff]  ;;  %v3515_v17 = vpop.permute.xlu1 %3514  ;;  %v8473_v57 = vld [vmem:[#allocation2 + $0xd8] sm:$0xff] }
 0x256   : > { %2772 = vst.msk [vmem:[#allocation3 + $0x60] sm:$0xff] %vm625_vm3, %v2681_v0  ;;  %v3987_v4 = vpack.c.bf16 %v3897_v9, %v3894_v10 }
 0x257   : > { %3605 = vst.msk [vmem:[#allocation3 + $0x80] sm:$0xff] %vm818_vm4, %v3515_v17  ;;  %3340 = vrot.lane.b32.xlu0 %v8380_v34, %s6577_s14  ;;  %v8448_v26 = vld [vmem:[#allocation2 + $0xda] sm:$0xff]  ;;  %v8450_v44 = vld [vmem:[#allocation2 + $0xe2] sm:$0xff]  ;;  %2702 = vrot.lane.b32.xlu1 %v8307_v29, %s6577_s14 }
 0x258   : > { %v6085_v23 = vpop.f32.mrf.mxu0  ;;  %4272 = vmatmul.mubr.bf16.gmra.mxu1 %v3987_v4  ;;  %3870 = vst.msk [vmem:[#allocation3 + $0x160] sm:$0xff] %vm311_vm0, %v8448_v26  ;;  %3871 = vst.msk [vmem:[#allocation3 + $0x178] sm:$0xff] %vm311_vm0, %v8450_v44  ;;  %v8456_v18 = vld [vmem:[#allocation2 + $0xe1] sm:$0xff] }
 0x259   : > { %v2563_v59 = vld [vmem:[#allocation2 + $0xe0] sm:$0xff]  ;;  %v3513_v20 = vpop.permute.xlu0 %3512  ;;  %3233 = vst.msk [vmem:[#allocation3 + $0x1a0] sm:$0xff] %vm311_vm0, %v8456_v18  ;;  %v2875_v52 = vpop.permute.xlu1 %2874 }
 0x25a   : > { %2595 = vst.msk [vmem:[#allocation3 + $0x1c8] sm:$0xff] %vm311_vm0, %v2563_v59  ;;  %v6086_v53 = vpop.f32.mrf.mxu0  ;;  %v8467_v30 = vld [vmem:[#allocation2 + $0xe0] sm:$0xff] }
 0x25b   : > { %3604 = vst.msk [vmem:[#allocation3 + $0x68] sm:$0xff] %vm818_vm4, %v3513_v20  ;;  %v6087_v56 = vadd.f32 %v6086_v53, %v6085_v23  ;;  %2965 = vst.msk [vmem:[#allocation3 + $0x78] sm:$0xff] %vm818_vm4, %v2875_v52  ;;  %2700 = vrot.lane.b32.xlu0 %v8296_v48, %s6577_s14  ;;  %3534 = vrot.lane.b32.xlu1 %v8467_v30, %s6578_s15  ;;  %v8506_v53 = vpop.f32.mrf.mxu1 }
 0x25c   : > { %v6088_v21 = vpop.f32.mrf.mxu0 }
 0x25d   : > { %v2199_v29 = vadd.f32 %v8260_v60, %v6087_v56  ;;  %v2873_v15 = vpop.permute.xlu0 %2872  ;;  %v3707_v25 = vpop.permute.xlu1 %3706 }
 0x25e   : > { %2964 = vst.msk [vmem:[#allocation3 + $0x60] sm:$0xff] %vm818_vm4, %v2873_v15  ;;  %v6089_v35 = vpop.f32.mrf.mxu0 }
 0x25f   : > { %v2360_v1 = vadd.f32 %v8371_v22, %v2199_v29  ;;  %v6090_v50 = vadd.f32 %v6089_v35, %v6088_v21  ;;  %3797 = vst.msk [vmem:[#allocation3 + $0x80] sm:$0xff] %vm1011_vm5, %v3707_v25  ;;  %3532 = vrot.lane.b32.xlu0 %v8473_v57, %s6578_s15  ;;  %v3932_v48 = vld [vmem:[#allocation3 + $0x160] sm:$0xff]  ;;  %v3935_v42 = vld [vmem:[#allocation3 + $0x178] sm:$0xff]  ;;  %2894 = vrot.lane.b32.xlu1 %v8309_v61, %s6578_s15  ;;  %v2367_v25 = vpop.f32.mrf.mxu1 }
 0x260   : > { %v4007_v19 = vpack.c.bf16 %v3935_v42, %v3932_v48 }
 0x261   : > { %vm2433_vm12 = vcmp.ge.f32.partialorder %v2360_v1, 0.0  ;;  %v2466_v32 = vmul.f32 %v7825_v49, %v2360_v1  ;;  %v2202_v38 = vadd.f32 %v8260_v60, %v6090_v50  ;;  %v3705_v39 = vpop.permute.xlu0 %3704  ;;  %v3067_v22 = vpop.permute.xlu1 %3066 }
 0x262   : > { %3796 = vst.msk [vmem:[#allocation3 + $0x68] sm:$0xff] %vm1011_vm5, %v3705_v39  ;;  %6375 = vmatmul.mubr.msk.bf16.gmra.mxu0 %vm311_vm0, %v4007_v19  ;;  %3157 = vst.msk [vmem:[#allocation3 + $0x78] sm:$0xff] %vm1011_vm5, %v3067_v22 }
 0x263   : > { %v2498_v16 = vsel %vm2433_vm12, %v2360_v1, %v2466_v32  ;;  %v2363_v45 = vadd.f32 %v8402_v46, %v2202_v38  ;;  %2892 = vrot.lane.b32.xlu0 %v8313_v28, %s6578_s15  ;;  %3726 = vrot.lane.b32.xlu1 %v8456_v18, %s6579_s20 }
 0x264   : > { %2530 = vst.msk [vmem:[#allocation2 + $0xf1] sm:$0xff] %vm311_vm0, %v2498_v16 }
 0x265   : > { %vm2434_vm13 = vcmp.ge.f32.partialorder %v2363_v45, 0.0  ;;  %v2467_v0 = vmul.f32 %v7825_v49, %v2363_v45  ;;  %v3065_v61 = vpop.permute.xlu0 %3064  ;;  %v3327_v10 = vpop.permute.xlu1 %3326 }
 0x266   : > { %3156 = vst.msk [vmem:[#allocation3 + $0x60] sm:$0xff] %vm1011_vm5, %v3065_v61  ;;  %v3904_v17 = vld [vmem:[#allocation3 + $0x80] sm:$0xff] }
 0x267   : > { %v2499_v9 = vsel %vm2434_vm13, %v2363_v45, %v2467_v0  ;;  %3415 = vst.msk [vmem:[#allocation3 + $0xb0] sm:$0xff] %vm625_vm3, %v3327_v10  ;;  %3724 = vrot.lane.b32.xlu0 %v8437_v63, %s6579_s20  ;;  %3086 = vrot.lane.b32.xlu1 %v8400_v3, %s6579_s20 }
 0x268   : > { %2531 = vst.msk [vmem:[#allocation2 + $0xf9] sm:$0xff] %vm311_vm0, %v2499_v9 }
 0x269   : > { %v3325_v28 = vpop.permute.xlu0 %3324  ;;  %v3901_v46 = vld [vmem:[#allocation3 + $0x68] sm:$0xff]  ;;  %v2687_v4 = vpop.permute.xlu1 %2686  ;;  %v3903_v56 = vld [vmem:[#allocation3 + $0x78] sm:$0xff] }
 0x26a   : > { %3414 = vst.msk [vmem:[#allocation3 + $0x98] sm:$0xff] %vm625_vm3, %v3325_v28  ;;  %v3991_v23 = vpack.c.bf16 %v3904_v17, %v3901_v46  ;;  %2775 = vst.msk [vmem:[#allocation3 + $0xa8] sm:$0xff] %vm625_vm3, %v2687_v4 }
 0x26b   : > { %3084 = vrot.lane.b32.xlu0 %v8408_v37, %s6579_s20  ;;  %v8504_v59 = vld [vmem:[#allocation2 + $0xf1] sm:$0xff]  ;;  %3346 = vrot.lane.b32.xlu1 %v8450_v44, %s6577_s14 }
 0x26c   : > { %v2564_v20 = vld [vmem:[#allocation2 + $0xf0] sm:$0xff]  ;;  %4279 = vmatprep.mubr.bf16.mxu1 %v3991_v23  ;;  %3234 = vst.msk [vmem:[#allocation3 + $0x1b8] sm:$0xff] %vm311_vm0, %v8504_v59 }
 0x26d   : > { %2596 = vst.msk [vmem:[#allocation3 + $0x1e0] sm:$0xff] %vm311_vm0, %v2564_v20  ;;  %v2685_v3 = vpop.permute.xlu0 %2684  ;;  %v3900_v52 = vld [vmem:[#allocation3 + $0x60] sm:$0xff]  ;;  %v3519_v37 = vpop.permute.xlu1 %3518 }
 0x26e   : > { %2774 = vst.msk [vmem:[#allocation3 + $0x90] sm:$0xff] %vm625_vm3, %v2685_v3  ;;  %v3990_v21 = vpack.c.bf16 %v3903_v56, %v3900_v52  ;;  %v8544_v61 = vld [vmem:[#allocation2 + $0xf0] sm:$0xff] }
 0x26f   : > { %3607 = vst.msk [vmem:[#allocation3 + $0xb0] sm:$0xff] %vm818_vm4, %v3519_v37  ;;  %3344 = vrot.lane.b32.xlu0 %v8448_v26, %s6577_s14  ;;  %v8517_v29 = vld [vmem:[#allocation2 + $0xf2] sm:$0xff]  ;;  %v8519_v15 = vld [vmem:[#allocation2 + $0xfa] sm:$0xff]  ;;  %2706 = vrot.lane.b32.xlu1 %v8389_v11, %s6577_s14  ;;  %v8538_v11 = vpop.f32.mrf.mxu1 }
 0x270   : > { %v6091_v35 = vpop.f32.mrf.mxu0  ;;  %4280 = vmatmul.mubr.bf16.gmra.mxu1 %v3990_v21  ;;  %3872 = vst.msk [vmem:[#allocation3 + $0x190] sm:$0xff] %vm311_vm0, %v8517_v29  ;;  %3873 = vst.msk [vmem:[#allocation3 + $0x1a8] sm:$0xff] %vm311_vm0, %v8519_v15  ;;  %v8525_v1 = vld [vmem:[#allocation2 + $0xf9] sm:$0xff] }
 0x271   : > { %v2565_v50 = vld [vmem:[#allocation2 + $0xf8] sm:$0xff]  ;;  %v3517_v48 = vpop.permute.xlu0 %3516  ;;  %3235 = vst.msk [vmem:[#allocation3 + $0x1d0] sm:$0xff] %vm311_vm0, %v8525_v1  ;;  %v2879_v19 = vpop.permute.xlu1 %2878 }
 0x272   : > { %2597 = vst.msk [vmem:[#allocation3 + $0x1f8] sm:$0xff] %vm311_vm0, %v2565_v50  ;;  %v6092_v42 = vpop.f32.mrf.mxu0  ;;  %v8536_v39 = vld [vmem:[#allocation2 + $0xf8] sm:$0xff]  ;;  %v2370_v46 = vpop.f32.mrf.mxu1 }
 0x273   : > { %3606 = vst.msk [vmem:[#allocation3 + $0x98] sm:$0xff] %vm818_vm4, %v3517_v48  ;;  %v6093_v32 = vadd.f32 %v6092_v42, %v6091_v35  ;;  %2967 = vst.msk [vmem:[#allocation3 + $0xa8] sm:$0xff] %vm818_vm4, %v2879_v19  ;;  %2704 = vrot.lane.b32.xlu0 %v8367_v2, %s6577_s14  ;;  %3538 = vrot.lane.b32.xlu1 %v8536_v39, %s6578_s15 }
 0x274   : > { %v6094_v38 = vpop.f32.mrf.mxu0 }
 0x275   : > { %v2877_v22 = vpop.permute.xlu0 %2876  ;;  %v2207_v16 = vadd.f32 %v8260_v60, %v6093_v32  ;;  %v3711_v0 = vpop.permute.xlu1 %3710 }
 0x276   : > { %2966 = vst.msk [vmem:[#allocation3 + $0x90] sm:$0xff] %vm818_vm4, %v2877_v22  ;;  %v6095_v45 = vpop.f32.mrf.mxu0 }
 0x277   : > { %v6096_v10 = vadd.f32 %v6095_v45, %v6094_v38  ;;  %v2368_v9 = vadd.f32 %v2367_v25, %v2207_v16  ;;  %3799 = vst.msk [vmem:[#allocation3 + $0xb0] sm:$0xff] %vm1011_vm5, %v3711_v0  ;;  %3536 = vrot.lane.b32.xlu0 %v8544_v61, %s6578_s15  ;;  %v3938_v2 = vld [vmem:[#allocation3 + $0x190] sm:$0xff]  ;;  %v3941_v28 = vld [vmem:[#allocation3 + $0x1a8] sm:$0xff]  ;;  %2898 = vrot.lane.b32.xlu1 %v8382_v5, %s6578_s15 }
 0x278   : > { %v4010_v17 = vpack.c.bf16 %v3941_v28, %v3938_v2 }
 0x279   : > { %vm2435_vm14 = vcmp.ge.f32.partialorder %v2368_v9, 0.0  ;;  %v2468_v4 = vmul.f32 %v7825_v49, %v2368_v9  ;;  %v3709_v23 = vpop.permute.xlu0 %3708  ;;  %v2210_v20 = vadd.f32 %v8260_v60, %v6096_v10  ;;  %v3071_v3 = vpop.permute.xlu1 %3070 }
 0x27a   : > { %3798 = vst.msk [vmem:[#allocation3 + $0x98] sm:$0xff] %vm1011_vm5, %v3709_v23  ;;  %6378 = vmatprep.mubr.msk.bf16.mxu0 %vm311_vm0, %v4010_v17  ;;  %3159 = vst.msk [vmem:[#allocation3 + $0xa8] sm:$0xff] %vm1011_vm5, %v3071_v3 }
 0x27b   : > { %v2500_v52 = vsel %vm2435_vm14, %v2368_v9, %v2468_v4  ;;  %v2371_v56 = vadd.f32 %v2370_v46, %v2210_v20  ;;  %2896 = vrot.lane.b32.xlu0 %v8380_v34, %s6578_s15  ;;  %3730 = vrot.lane.b32.xlu1 %v8525_v1, %s6579_s20  ;;  %vm4822_vm14 = vcmask 154712  }
 0x27c   : > { %2532 = vst.msk [vmem:[#allocation2 + $0x109] sm:$0xff] %vm311_vm0, %v2500_v52 }
 0x27d   : > { %vm2436_vm15 = vcmp.ge.f32.partialorder %v2371_v56, 0.0  ;;  %v2469_v5 = vmul.f32 %v7825_v49, %v2371_v56  ;;  %v3069_v37 = vpop.permute.xlu0 %3068  ;;  %v3331_v21 = vpop.permute.xlu1 %3330 }
 0x27e   : > { %3158 = vst.msk [vmem:[#allocation3 + $0x90] sm:$0xff] %vm1011_vm5, %v3069_v37  ;;  %v3910_v50 = vld [vmem:[#allocation3 + $0xb0] sm:$0xff] }
 0x27f   : > { %v2501_v35 = vsel %vm2436_vm15, %v2371_v56, %v2469_v5  ;;  %3417 = vst.msk [vmem:[#allocation3 + $0xe0] sm:$0xff] %vm625_vm3, %v3331_v21  ;;  %3728 = vrot.lane.b32.xlu0 %v8504_v59, %s6579_s20  ;;  %3090 = vrot.lane.b32.xlu1 %v8467_v30, %s6579_s20  ;;  %vm4959_vm15 = vcmask 1041409  }
 0x280   : > { %2533 = vst.msk [vmem:[#allocation2 + $0x111] sm:$0xff] %vm311_vm0, %v2501_v35 }
 0x281   : > { %v3329_v34 = vpop.permute.xlu0 %3328  ;;  %v3907_v25 = vld [vmem:[#allocation3 + $0x98] sm:$0xff]  ;;  %v2691_v48 = vpop.permute.xlu1 %2690  ;;  %v3909_v22 = vld [vmem:[#allocation3 + $0xa8] sm:$0xff] }
 0x282   : > { %3416 = vst.msk [vmem:[#allocation3 + $0xc8] sm:$0xff] %vm625_vm3, %v3329_v34  ;;  %v3994_v42 = vpack.c.bf16 %v3910_v50, %v3907_v25  ;;  %2777 = vst.msk [vmem:[#allocation3 + $0xd8] sm:$0xff] %vm625_vm3, %v2691_v48 }
 0x283   : > { %3088 = vrot.lane.b32.xlu0 %v8473_v57, %s6579_s20  ;;  %v8573_v19 = vld [vmem:[#allocation2 + $0x109] sm:$0xff]  ;;  %3350 = vrot.lane.b32.xlu1 %v8519_v15, %s6577_s14 }
 0x284   : > { %v2566_v32 = vld [vmem:[#allocation2 + $0x108] sm:$0xff]  ;;  %4287 = vmatprep.mubr.bf16.mxu1 %v3994_v42  ;;  %3236 = vst.msk [vmem:[#allocation3 + $0x1e8] sm:$0xff] %vm311_vm0, %v8573_v19 }
 0x285   : > { %2598 = vst.msk [vmem:[#allocation3 + $0x210] sm:$0xff] %vm311_vm0, %v2566_v32  ;;  %v2689_v30 = vpop.permute.xlu0 %2688  ;;  %v3906_v38 = vld [vmem:[#allocation3 + $0x90] sm:$0xff]  ;;  %v3523_v16 = vpop.permute.xlu1 %3522  ;;  %v8609_v5 = vld [vmem:[#allocation2 + $0x108] sm:$0xff] }
 0x286   : > { %2776 = vst.msk [vmem:[#allocation3 + $0xc0] sm:$0xff] %vm625_vm3, %v2689_v30  ;;  %v3993_v45 = vpack.c.bf16 %v3909_v22, %v3906_v38 }
 0x287   : > { %3609 = vst.msk [vmem:[#allocation3 + $0xe0] sm:$0xff] %vm818_vm4, %v3523_v16  ;;  %3348 = vrot.lane.b32.xlu0 %v8517_v29, %s6577_s14  ;;  %v8584_v57 = vld [vmem:[#allocation2 + $0x10a] sm:$0xff]  ;;  %v8586_v0 = vld [vmem:[#allocation2 + $0x112] sm:$0xff]  ;;  %2710 = vrot.lane.b32.xlu1 %v8456_v18, %s6577_s14 }
 0x288   : > { %v6097_v10 = vpop.f32.mrf.mxu0  ;;  %4288 = vmatmul.mubr.bf16.gmra.mxu1 %v3993_v45  ;;  %3874 = vst.msk [vmem:[#allocation3 + $0x1c0] sm:$0xff] %vm311_vm0, %v8584_v57  ;;  %3875 = vst.msk [vmem:[#allocation3 + $0x1d8] sm:$0xff] %vm311_vm0, %v8586_v0  ;;  %v8592_v9 = vld [vmem:[#allocation2 + $0x111] sm:$0xff] }
 0x289   : > { %v2567_v2 = vld [vmem:[#allocation2 + $0x110] sm:$0xff]  ;;  %v3521_v28 = vpop.permute.xlu0 %3520  ;;  %3237 = vst.msk [vmem:[#allocation3 + $0x200] sm:$0xff] %vm311_vm0, %v8592_v9  ;;  %v2883_v17 = vpop.permute.xlu1 %2882 }
 0x28a   : > { %2599 = vst.msk [vmem:[#allocation3 + $0x228] sm:$0xff] %vm311_vm0, %v2567_v2  ;;  %v6098_v46 = vpop.f32.mrf.mxu0  ;;  %v8603_v20 = vld [vmem:[#allocation2 + $0x110] sm:$0xff] }
 0x28b   : > { %3608 = vst.msk [vmem:[#allocation3 + $0xc8] sm:$0xff] %vm818_vm4, %v3521_v28  ;;  %v6099_v4 = vadd.f32 %v6098_v46, %v6097_v10  ;;  %2969 = vst.msk [vmem:[#allocation3 + $0xd8] sm:$0xff] %vm818_vm4, %v2883_v17  ;;  %2708 = vrot.lane.b32.xlu0 %v8437_v63, %s6577_s14  ;;  %3542 = vrot.lane.b32.xlu1 %v8603_v20, %s6578_s15  ;;  %v8642_v46 = vpop.f32.mrf.mxu1 }
 0x28c   : > { %v6100_v23 = vpop.f32.mrf.mxu0 }
 0x28d   : > { %v2215_v18 = vadd.f32 %v8260_v60, %v6099_v4  ;;  %v2881_v3 = vpop.permute.xlu0 %2880  ;;  %v3715_v56 = vpop.permute.xlu1 %3714 }
 0x28e   : > { %2968 = vst.msk [vmem:[#allocation3 + $0xc0] sm:$0xff] %vm818_vm4, %v2881_v3  ;;  %v6101_v52 = vpop.f32.mrf.mxu0 }
 0x28f   : > { %v2376_v37 = vadd.f32 %v8506_v53, %v2215_v18  ;;  %v6102_v21 = vadd.f32 %v6101_v52, %v6100_v23  ;;  %3801 = vst.msk [vmem:[#allocation3 + $0xe0] sm:$0xff] %vm1011_vm5, %v3715_v56  ;;  %3540 = vrot.lane.b32.xlu0 %v8609_v5, %s6578_s15  ;;  %v3944_v63 = vld [vmem:[#allocation3 + $0x1c0] sm:$0xff]  ;;  %v3947_v35 = vld [vmem:[#allocation3 + $0x1d8] sm:$0xff]  ;;  %2902 = vrot.lane.b32.xlu1 %v8450_v44, %s6578_s15  ;;  %v2383_v56 = vpop.f32.mrf.mxu1 }
 0x290   : > { %v4013_v34 = vpack.c.bf16 %v3947_v35, %v3944_v63 }
 0x291   : > { %vm2437_vm1 = vcmp.ge.f32.partialorder %v2376_v37, 0.0  ;;  %v2470_v25 = vmul.f32 %v7825_v49, %v2376_v37  ;;  %v2218_v50 = vadd.f32 %v8260_v60, %v6102_v21  ;;  %v3713_v48 = vpop.permute.xlu0 %3712  ;;  %v3075_v53 = vpop.permute.xlu1 %3074 }
 0x292   : > { %3800 = vst.msk [vmem:[#allocation3 + $0xc8] sm:$0xff] %vm1011_vm5, %v3713_v48  ;;  %6379 = vmatmul.mubr.msk.bf16.gmra.mxu0 %vm311_vm0, %v4013_v34  ;;  %3161 = vst.msk [vmem:[#allocation3 + $0xd8] sm:$0xff] %vm1011_vm5, %v3075_v53 }
 0x293   : > { %v2502_v42 = vsel %vm2437_vm1, %v2376_v37, %v2470_v25  ;;  %v2379_v32 = vadd.f32 %v8538_v11, %v2218_v50  ;;  %2900 = vrot.lane.b32.xlu0 %v8448_v26, %s6578_s15  ;;  %3734 = vrot.lane.b32.xlu1 %v8592_v9, %s6579_s20  ;;  %vm4961_vm1 = vcmask 1042434  }
 0x294   : > { %2534 = vst.msk [vmem:[#allocation2 + $0x121] sm:$0xff] %vm311_vm0, %v2502_v42 }
 0x295   : > { %vm2438_vm2 = vcmp.ge.f32.partialorder %v2379_v32, 0.0  ;;  %v2471_v30 = vmul.f32 %v7825_v49, %v2379_v32  ;;  %v3073_v44 = vpop.permute.xlu0 %3072  ;;  %v3335_v38 = vpop.permute.xlu1 %3334 }
 0x296   : > { %3160 = vst.msk [vmem:[#allocation3 + $0xc0] sm:$0xff] %vm1011_vm5, %v3073_v44  ;;  %v3916_v16 = vld [vmem:[#allocation3 + $0xe0] sm:$0xff] }
 0x297   : > { %v2503_v22 = vsel %vm2438_vm2, %v2379_v32, %v2471_v30  ;;  %3419 = vst.msk [vmem:[#allocation3 + $0x110] sm:$0xff] %vm625_vm3, %v3335_v38  ;;  %3732 = vrot.lane.b32.xlu0 %v8573_v19, %s6579_s20  ;;  %3094 = vrot.lane.b32.xlu1 %v8536_v39, %s6579_s20  ;;  %vm4963_vm2 = vcmask 1043459  }
 0x298   : > { %2535 = vst.msk [vmem:[#allocation2 + $0x129] sm:$0xff] %vm311_vm0, %v2503_v22 }
 0x299   : > { %v3333_v26 = vpop.permute.xlu0 %3332  ;;  %v3913_v11 = vld [vmem:[#allocation3 + $0xc8] sm:$0xff]  ;;  %v2695_v45 = vpop.permute.xlu1 %2694  ;;  %v3915_v4 = vld [vmem:[#allocation3 + $0xd8] sm:$0xff] }
 0x29a   : > { %3418 = vst.msk [vmem:[#allocation3 + $0xf8] sm:$0xff] %vm625_vm3, %v3333_v26  ;;  %v3997_v10 = vpack.c.bf16 %v3916_v16, %v3913_v11  ;;  %2779 = vst.msk [vmem:[#allocation3 + $0x108] sm:$0xff] %vm625_vm3, %v2695_v45 }
 0x29b   : > { %3092 = vrot.lane.b32.xlu0 %v8544_v61, %s6579_s20  ;;  %v8640_v2 = vld [vmem:[#allocation2 + $0x121] sm:$0xff]  ;;  %3354 = vrot.lane.b32.xlu1 %v8586_v0, %s6577_s14 }
 0x29c   : > { %v2568_v28 = vld [vmem:[#allocation2 + $0x120] sm:$0xff]  ;;  %4295 = vmatprep.mubr.bf16.mxu1 %v3997_v10  ;;  %3238 = vst.msk [vmem:[#allocation3 + $0x218] sm:$0xff] %vm311_vm0, %v8640_v2 }
 0x29d   : > { %2600 = vst.msk [vmem:[#allocation3 + $0x240] sm:$0xff] %vm311_vm0, %v2568_v28  ;;  %v2693_v39 = vpop.permute.xlu0 %2692  ;;  %v3912_v17 = vld [vmem:[#allocation3 + $0xc0] sm:$0xff]  ;;  %v3527_v61 = vpop.permute.xlu1 %3526  ;;  %v8680_v44 = vld [vmem:[#allocation2 + $0x120] sm:$0xff] }
 0x29e   : > { %2778 = vst.msk [vmem:[#allocation3 + $0xf0] sm:$0xff] %vm625_vm3, %v2693_v39  ;;  %v3996_v23 = vpack.c.bf16 %v3915_v4, %v3912_v17  ;;  %v8691_v10 = vld [vmem:[%s9962_s2] ss:$0 sm:$0xff] }
 0x29f   : > { %3611 = vst.msk [vmem:[#allocation3 + $0x110] sm:$0xff] %vm818_vm4, %v3527_v61  ;;  %3352 = vrot.lane.b32.xlu0 %v8584_v57, %s6577_s14  ;;  %v8653_v18 = vld [vmem:[#allocation2 + $0x122] sm:$0xff]  ;;  %v8655_v3 = vld [vmem:[#allocation2 + $0x12a] sm:$0xff]  ;;  %2714 = vrot.lane.b32.xlu1 %v8525_v1, %s6577_s14  ;;  %v8674_v1 = vpop.f32.mrf.mxu1 }
 0x2a0   : > { %v6103_v52 = vpop.f32.mrf.mxu0  ;;  %4296 = vmatmul.mubr.bf16.gmra.mxu1 %v3996_v23  ;;  %3876 = vst.msk [vmem:[#allocation3 + $0x1f0] sm:$0xff] %vm311_vm0, %v8653_v18  ;;  %3877 = vst.msk [vmem:[#allocation3 + $0x208] sm:$0xff] %vm311_vm0, %v8655_v3  ;;  %v8661_v37 = vld [vmem:[#allocation2 + $0x129] sm:$0xff] }
 0x2a1   : > { %v2569_v21 = vld [vmem:[#allocation2 + $0x128] sm:$0xff]  ;;  %v3525_v63 = vpop.permute.xlu0 %3524  ;;  %3239 = vst.msk [vmem:[#allocation3 + $0x230] sm:$0xff] %vm311_vm0, %v8661_v37  ;;  %v2887_v34 = vpop.permute.xlu1 %2886 }
 0x2a2   : > { %2601 = vst.msk [vmem:[#allocation3 + $0x258] sm:$0xff] %vm311_vm0, %v2569_v21  ;;  %v6104_v35 = vpop.f32.mrf.mxu0  ;;  %v8672_v48 = vld [vmem:[#allocation2 + $0x128] sm:$0xff]  ;;  %v2386_v11 = vpop.f32.mrf.mxu1 }
 0x2a3   : > { %3610 = vst.msk [vmem:[#allocation3 + $0xf8] sm:$0xff] %vm818_vm4, %v3525_v63  ;;  %v6105_v25 = vadd.f32 %v6104_v35, %v6103_v52  ;;  %2971 = vst.msk [vmem:[#allocation3 + $0x108] sm:$0xff] %vm818_vm4, %v2887_v34  ;;  %2712 = vrot.lane.b32.xlu0 %v8504_v59, %s6577_s14  ;;  %3546 = vrot.lane.b32.xlu1 %v8672_v48, %s6578_s15 }
 0x2a4   : > { %v6106_v50 = vpop.f32.mrf.mxu0 }
 0x2a5   : > { %v2885_v53 = vpop.permute.xlu0 %2884  ;;  %v2223_v42 = vadd.f32 %v8260_v60, %v6105_v25  ;;  %v3719_v30 = vpop.permute.xlu1 %3718 }
 0x2a6   : > { %2970 = vst.msk [vmem:[#allocation3 + $0xf0] sm:$0xff] %vm818_vm4, %v2885_v53  ;;  %v6107_v32 = vpop.f32.mrf.mxu0 }
 0x2a7   : > { %v6108_v38 = vadd.f32 %v6107_v32, %v6106_v50  ;;  %v2384_v22 = vadd.f32 %v2383_v56, %v2223_v42  ;;  %3803 = vst.msk [vmem:[#allocation3 + $0x110] sm:$0xff] %vm1011_vm5, %v3719_v30  ;;  %3544 = vrot.lane.b32.xlu0 %v8680_v44, %s6578_s15  ;;  %v3950_v59 = vld [vmem:[#allocation3 + $0x1f0] sm:$0xff]  ;;  %v3953_v26 = vld [vmem:[#allocation3 + $0x208] sm:$0xff]  ;;  %2906 = vrot.lane.b32.xlu1 %v8519_v15, %s6578_s15 }
 0x2a8   : > { %v4016_v16 = vpack.c.bf16 %v3953_v26, %v3950_v59 }
 0x2a9   : > { %vm2439_vm6 = vcmp.ge.f32.partialorder %v2384_v22, 0.0  ;;  %v2472_v60 = vmul.f32 %v7825_v49, %v2384_v22  ;;  %v3717_v45 = vpop.permute.xlu0 %3716  ;;  %v2226_v28 = vadd.f32 %v8691_v10, %v6108_v38  ;;  %v3079_v39 = vpop.permute.xlu1 %3078 }
 0x2aa   : > { %3802 = vst.msk [vmem:[#allocation3 + $0xf8] sm:$0xff] %vm1011_vm5, %v3717_v45  ;;  %6382 = vmatprep.mubr.msk.bf16.mxu0 %vm311_vm0, %v4016_v16  ;;  %3163 = vst.msk [vmem:[#allocation3 + $0x108] sm:$0xff] %vm1011_vm5, %v3079_v39 }
 0x2ab   : > { %v2504_v17 = vsel %vm2439_vm6, %v2384_v22, %v2472_v60  ;;  %v2387_v4 = vadd.f32 %v2386_v11, %v2226_v28  ;;  %2904 = vrot.lane.b32.xlu0 %v8517_v29, %s6578_s15  ;;  %3738 = vrot.lane.b32.xlu1 %v8661_v37, %s6579_s20  ;;  %vm4965_vm6 = vcmask 1044484  }
 0x2ac   : > { %2536 = vst.msk [vmem:[#allocation2 + $0x139] sm:$0xff] %vm311_vm0, %v2504_v17 }
 0x2ad   : > { %vm2440_vm7 = vcmp.ge.f32.partialorder %v2387_v4, 0.0  ;;  %v2473_v15 = vmul.f32 %v7825_v49, %v2387_v4  ;;  %v3077_v61 = vpop.permute.xlu0 %3076  ;;  %v3339_v23 = vpop.permute.xlu1 %3338 }
 0x2ae   : > { %3162 = vst.msk [vmem:[#allocation3 + $0xf0] sm:$0xff] %vm1011_vm5, %v3077_v61  ;;  %v3922_v21 = vld [vmem:[#allocation3 + $0x110] sm:$0xff] }
 0x2af   : > { %v2505_v52 = vsel %vm2440_vm7, %v2387_v4, %v2473_v15  ;;  %3421 = vst.msk [vmem:[#allocation3 + $0x140] sm:$0xff] %vm625_vm3, %v3339_v23  ;;  %3736 = vrot.lane.b32.xlu0 %v8640_v2, %s6579_s20  ;;  %3098 = vrot.lane.b32.xlu1 %v8603_v20, %s6579_s20  ;;  %vm4967_vm7 = vcmask 1045509  }
 0x2b0   : > { %2537 = vst.msk [vmem:[#allocation2 + $0x141] sm:$0xff] %vm311_vm0, %v2505_v52 }
 0x2b1   : > { %v3337_v29 = vpop.permute.xlu0 %3336  ;;  %v3919_v56 = vld [vmem:[#allocation3 + $0xf8] sm:$0xff]  ;;  %v2699_v35 = vpop.permute.xlu1 %2698  ;;  %v3921_v53 = vld [vmem:[#allocation3 + $0x108] sm:$0xff] }
 0x2b2   : > { %3420 = vst.msk [vmem:[#allocation3 + $0x128] sm:$0xff] %vm625_vm3, %v3337_v29  ;;  %v4000_v63 = vpack.c.bf16 %v3922_v21, %v3919_v56  ;;  %2781 = vst.msk [vmem:[#allocation3 + $0x138] sm:$0xff] %vm625_vm3, %v2699_v35 }
 0x2b3   : > { %3096 = vrot.lane.b32.xlu0 %v8609_v5, %s6579_s20  ;;  %v8713_v34 = vld [vmem:[#allocation2 + $0x139] sm:$0xff]  ;;  %3358 = vrot.lane.b32.xlu1 %v8655_v3, %s6577_s14 }
 0x2b4   : > { %v2570_v25 = vld [vmem:[#allocation2 + $0x138] sm:$0xff]  ;;  %4303 = vmatprep.mubr.bf16.mxu1 %v4000_v63  ;;  %3240 = vst.msk [vmem:[#allocation3 + $0x248] sm:$0xff] %vm311_vm0, %v8713_v34 }
 0x2b5   : > { %2602 = vst.msk [vmem:[#allocation3 + $0x270] sm:$0xff] %vm311_vm0, %v2570_v25  ;;  %v2697_v20 = vpop.permute.xlu0 %2696  ;;  %v3918_v50 = vld [vmem:[#allocation3 + $0xf0] sm:$0xff]  ;;  %v3531_v42 = vpop.permute.xlu1 %3530  ;;  %v8750_v4 = vld [vmem:[#allocation2 + $0x138] sm:$0xff] }
 0x2b6   : > { %2780 = vst.msk [vmem:[#allocation3 + $0x120] sm:$0xff] %vm625_vm3, %v2697_v20  ;;  %v3999_v5 = vpack.c.bf16 %v3921_v53, %v3918_v50 }
 0x2b7   : > { %3356 = vrot.lane.b32.xlu0 %v8653_v18, %s6577_s14  ;;  %v8724_v32 = vld [vmem:[#allocation2 + $0x13a] sm:$0xff]  ;;  %v8726_v30 = vld [vmem:[#allocation2 + $0x142] sm:$0xff]  ;;  %3613 = vst.msk [vmem:[#allocation3 + $0x140] sm:$0xff] %vm818_vm4, %v3531_v42  ;;  %2718 = vrot.lane.b32.xlu1 %v8592_v9, %s6577_s14 }
 0x2b8   : > { %v6109_v38 = vpop.f32.mrf.mxu0  ;;  %4304 = vmatmul.mubr.bf16.gmra.mxu1 %v3999_v5  ;;  %3878 = vst.msk [vmem:[#allocation3 + $0x220] sm:$0xff] %vm311_vm0, %v8724_v32  ;;  %3879 = vst.msk [vmem:[#allocation3 + $0x238] sm:$0xff] %vm311_vm0, %v8726_v30  ;;  %v8733_v22 = vld [vmem:[#allocation2 + $0x141] sm:$0xff] }
 0x2b9   : > { %v2571_v59 = vld [vmem:[#allocation2 + $0x140] sm:$0xff]  ;;  %v3529_v26 = vpop.permute.xlu0 %3528  ;;  %3241 = vst.msk [vmem:[#allocation3 + $0x260] sm:$0xff] %vm311_vm0, %v8733_v22  ;;  %v2891_v60 = vpop.permute.xlu1 %2890 }
 0x2ba   : > { %2603 = vst.msk [vmem:[#allocation3 + $0x288] sm:$0xff] %vm311_vm0, %v2571_v59  ;;  %v6110_v11 = vpop.f32.mrf.mxu0  ;;  %v8744_v28 = vld [vmem:[#allocation2 + $0x140] sm:$0xff] }
 0x2bb   : > { %3612 = vst.msk [vmem:[#allocation3 + $0x128] sm:$0xff] %vm818_vm4, %v3529_v26  ;;  %v6111_v16 = vadd.f32 %v6110_v11, %v6109_v38  ;;  %2716 = vrot.lane.b32.xlu0 %v8573_v19, %s6577_s14  ;;  %2973 = vst.msk [vmem:[#allocation3 + $0x138] sm:$0xff] %vm818_vm4, %v2891_v60  ;;  %3550 = vrot.lane.b32.xlu1 %v8744_v28, %s6578_s15  ;;  %v8785_v11 = vpop.f32.mrf.mxu1 }
 0x2bc   : > { %v6112_v45 = vpop.f32.mrf.mxu0 }
 0x2bd   : > { %v2231_v9 = vadd.f32 %v8691_v10, %v6111_v16  ;;  %v2889_v39 = vpop.permute.xlu0 %2888  ;;  %v3723_v19 = vpop.permute.xlu1 %3722 }
 0x2be   : > { %2972 = vst.msk [vmem:[#allocation3 + $0x120] sm:$0xff] %vm818_vm4, %v2889_v39  ;;  %v6113_v17 = vpop.f32.mrf.mxu0 }
 0x2bf   : > { %v2392_v15 = vadd.f32 %v8642_v46, %v2231_v9  ;;  %v6114_v61 = vadd.f32 %v6113_v17, %v6112_v45  ;;  %3548 = vrot.lane.b32.xlu0 %v8750_v4, %s6578_s15  ;;  %v3956_v23 = vld [vmem:[#allocation3 + $0x220] sm:$0xff]  ;;  %v3959_v52 = vld [vmem:[#allocation3 + $0x238] sm:$0xff]  ;;  %3805 = vst.msk [vmem:[#allocation3 + $0x140] sm:$0xff] %vm1011_vm5, %v3723_v19  ;;  %2910 = vrot.lane.b32.xlu1 %v8586_v0, %s6578_s15 }
 0x2c0   : > { %v4019_v29 = vpack.c.bf16 %v3959_v52, %v3956_v23 }
 0x2c1   : > { %vm2441_vm8 = vcmp.ge.f32.partialorder %v2392_v15, 0.0  ;;  %v2474_v56 = vmul.f32 %v7825_v49, %v2392_v15  ;;  %v2234_v21 = vadd.f32 %v8691_v10, %v6114_v61  ;;  %v3721_v63 = vpop.permute.xlu0 %3720  ;;  %v3083_v25 = vpop.permute.xlu1 %3082 }
 0x2c2   : > { %3804 = vst.msk [vmem:[#allocation3 + $0x128] sm:$0xff] %vm1011_vm5, %v3721_v63  ;;  %6383 = vmatmul.mubr.msk.bf16.gmra.mxu0 %vm311_vm0, %v4019_v29  ;;  %3165 = vst.msk [vmem:[#allocation3 + $0x138] sm:$0xff] %vm1011_vm5, %v3083_v25  ;;  %v2399_v61 = vpop.f32.mrf.mxu1 }
 0x2c3   : > { %v2506_v46 = vsel %vm2441_vm8, %v2392_v15, %v2474_v56  ;;  %v2395_v35 = vadd.f32 %v8674_v1, %v2234_v21  ;;  %2908 = vrot.lane.b32.xlu0 %v8584_v57, %s6578_s15  ;;  %3742 = vrot.lane.b32.xlu1 %v8733_v22, %s6579_s20  ;;  %vm4969_vm8 = vcmask 1046534  }
 0x2c4   : > { %2538 = vst.msk [vmem:[#allocation2 + $0x151] sm:$0xff] %vm311_vm0, %v2506_v46  ;;  %v8819_v63 = vpop.f32.mrf.mxu1 }
 0x2c5   : > { %vm2442_vm9 = vcmp.ge.f32.partialorder %v2395_v35, 0.0  ;;  %v2475_v20 = vmul.f32 %v7825_v49, %v2395_v35  ;;  %v3081_v0 = vpop.permute.xlu0 %3080  ;;  %v3343_v53 = vpop.permute.xlu1 %3342 }
 0x2c6   : > { %3164 = vst.msk [vmem:[#allocation3 + $0x120] sm:$0xff] %vm1011_vm5, %v3081_v0  ;;  %v3928_v5 = vld [vmem:[#allocation3 + $0x140] sm:$0xff] }
 0x2c7   : > { %v2507_v50 = vsel %vm2442_vm9, %v2395_v35, %v2475_v20  ;;  %3740 = vrot.lane.b32.xlu0 %v8713_v34, %s6579_s20  ;;  %3423 = vst.msk [vmem:[#allocation3 + $0x170] sm:$0xff] %vm625_vm3, %v3343_v53  ;;  %3102 = vrot.lane.b32.xlu1 %v8672_v48, %s6579_s20  ;;  %v2402_v53 = vpop.f32.mrf.mxu1  ;;  %vm4971_vm9 = vcmask 1047559  }
 0x2c8   : > { %2539 = vst.msk [vmem:[#allocation2 + $0x159] sm:$0xff] %vm311_vm0, %v2507_v50 }
 0x2c9   : > { %v3341_v57 = vpop.permute.xlu0 %3340  ;;  %v3925_v1 = vld [vmem:[#allocation3 + $0x128] sm:$0xff]  ;;  %v2703_v38 = vpop.permute.xlu1 %2702  ;;  %v3927_v16 = vld [vmem:[#allocation3 + $0x138] sm:$0xff] }
 0x2ca   : > { %3422 = vst.msk [vmem:[#allocation3 + $0x158] sm:$0xff] %vm625_vm3, %v3341_v57  ;;  %v4003_v42 = vpack.c.bf16 %v3928_v5, %v3925_v1  ;;  %2783 = vst.msk [vmem:[#allocation3 + $0x168] sm:$0xff] %vm625_vm3, %v2703_v38 }
 0x2cb   : > { %3100 = vrot.lane.b32.xlu0 %v8680_v44, %s6579_s20  ;;  %v8780_v59 = vld [vmem:[#allocation2 + $0x150] sm:$0xff]  ;;  %3362 = vrot.lane.b32.xlu1 %v8726_v30, %s6577_s14 }
 0x2cc   : > { %v8782_v26 = vld [vmem:[#allocation2 + $0x151] sm:$0xff]  ;;  %4311 = vmatprep.mubr.bf16.mxu1 %v4003_v42  ;;  %2604 = vst.msk [vmem:[#allocation3 + $0x2a0] sm:$0xff] %vm311_vm0, %v8780_v59 }
 0x2cd   : > { %3242 = vst.msk [vmem:[#allocation3 + $0x278] sm:$0xff] %vm311_vm0, %v8782_v26  ;;  %v2701_v48 = vpop.permute.xlu0 %2700  ;;  %v3924_v44 = vld [vmem:[#allocation3 + $0x120] sm:$0xff]  ;;  %v3535_v45 = vpop.permute.xlu1 %3534 }
 0x2ce   : > { %2782 = vst.msk [vmem:[#allocation3 + $0x150] sm:$0xff] %vm625_vm3, %v2701_v48  ;;  %v4002_v60 = vpack.c.bf16 %v3927_v16, %v3924_v44 }
 0x2cf   : > { %3360 = vrot.lane.b32.xlu0 %v8724_v32, %s6577_s14  ;;  %v8796_v9 = vld [vmem:[#allocation2 + $0x158] sm:$0xff]  ;;  %3615 = vst.msk [vmem:[#allocation3 + $0x170] sm:$0xff] %vm818_vm4, %v3535_v45  ;;  %2722 = vrot.lane.b32.xlu1 %v8661_v37, %s6577_s14 }
 0x2d0   : > { %v8798_v39 = vld [vmem:[#allocation2 + $0x152] sm:$0xff]  ;;  %v8800_v17 = vld [vmem:[#allocation2 + $0x15a] sm:$0xff]  ;;  %v6115_v15 = vpop.f32.mrf.mxu0  ;;  %4312 = vmatmul.mubr.bf16.gmra.mxu1 %v4002_v60  ;;  %2605 = vst.msk [vmem:[#allocation3 + $0x2b8] sm:$0xff] %vm311_vm0, %v8796_v9 }
 0x2d1   : > { %3880 = vst.msk [vmem:[#allocation3 + $0x250] sm:$0xff] %vm311_vm0, %v8798_v39  ;;  %3881 = vst.msk [vmem:[#allocation3 + $0x268] sm:$0xff] %vm311_vm0, %v8800_v17  ;;  %v8807_v19 = vld [vmem:[#allocation2 + $0x159] sm:$0xff]  ;;  %v3533_v23 = vpop.permute.xlu0 %3532  ;;  %v2895_v56 = vpop.permute.xlu1 %2894 }
 0x2d2   : > { %3243 = vst.msk [vmem:[#allocation3 + $0x290] sm:$0xff] %vm311_vm0, %v8807_v19  ;;  %v6116_v52 = vpop.f32.mrf.mxu0 }
 0x2d3   : > { %3614 = vst.msk [vmem:[#allocation3 + $0x158] sm:$0xff] %vm818_vm4, %v3533_v23  ;;  %v6117_v29 = vadd.f32 %v6116_v52, %v6115_v15  ;;  %2720 = vrot.lane.b32.xlu0 %v8640_v2, %s6577_s14  ;;  %2975 = vst.msk [vmem:[#allocation3 + $0x168] sm:$0xff] %vm818_vm4, %v2895_v56  ;;  %3554 = vrot.lane.b32.xlu1 %v8796_v9, %s6578_s15 }
 0x2d4   : > { %v6118_v21 = vpop.f32.mrf.mxu0 }
 0x2d5   : > { %v2893_v37 = vpop.permute.xlu0 %2892  ;;  %v2239_v46 = vadd.f32 %v8691_v10, %v6117_v29  ;;  %v3727_v0 = vpop.permute.xlu1 %3726 }
 0x2d6   : > { %2974 = vst.msk [vmem:[#allocation3 + $0x150] sm:$0xff] %vm818_vm4, %v2893_v37  ;;  %v6119_v35 = vpop.f32.mrf.mxu0 }
 0x2d7   : > { %v6120_v25 = vadd.f32 %v6119_v35, %v6118_v21  ;;  %v2400_v20 = vadd.f32 %v2399_v61, %v2239_v46  ;;  %3552 = vrot.lane.b32.xlu0 %v8780_v59, %s6578_s15  ;;  %3807 = vst.msk [vmem:[#allocation3 + $0x170] sm:$0xff] %vm1011_vm5, %v3727_v0  ;;  %2914 = vrot.lane.b32.xlu1 %v8655_v3, %s6578_s15 }
 0x2d8   : > { %v3962_v2 = vld [vmem:[#allocation3 + $0x250] sm:$0xff]  ;;  %v3965_v50 = vld [vmem:[#allocation3 + $0x268] sm:$0xff] }
 0x2d9   : > { %v4022_v57 = vpack.c.bf16 %v3965_v50, %v3962_v2  ;;  %vm2443_vm10 = vcmp.ge.f32.partialorder %v2400_v20, 0.0  ;;  %v2476_v1 = vmul.f32 %v7825_v49, %v2400_v20  ;;  %v3725_v5 = vpop.permute.xlu0 %3724  ;;  %v2242_v42 = vadd.f32 %v8691_v10, %v6120_v25  ;;  %v3087_v44 = vpop.permute.xlu1 %3086 }
 0x2da   : > { %3806 = vst.msk [vmem:[#allocation3 + $0x158] sm:$0xff] %vm1011_vm5, %v3725_v5  ;;  %3167 = vst.msk [vmem:[#allocation3 + $0x168] sm:$0xff] %vm1011_vm5, %v3087_v44 }
 0x2db   : > { %6386 = vmatprep.mubr.msk.bf16.mxu0 %vm311_vm0, %v4022_v57  ;;  %v2508_v38 = vsel %vm2443_vm10, %v2400_v20, %v2476_v1  ;;  %v2403_v48 = vadd.f32 %v2402_v53, %v2242_v42  ;;  %2912 = vrot.lane.b32.xlu0 %v8653_v18, %s6578_s15  ;;  %vm4982_vm10 = vcmask 154648  }
 0x2dc   : > { %2540 = vst.msk [vmem:[#allocation2 + $0x169] sm:$0xff] %vm311_vm0, %v2508_v38  ;;  %3746 = vrot.lane.b32.xlu1 %v8807_v19, %s6579_s20 }
 0x2dd   : > { %vm2444_vm11 = vcmp.ge.f32.partialorder %v2403_v48, 0.0  ;;  %v2477_v3 = vmul.f32 %v7825_v49, %v2403_v48  ;;  %v3085_v16 = vpop.permute.xlu0 %3084  ;;  %v3347_v45 = vpop.permute.xlu1 %3346 }
 0x2de   : > { %3166 = vst.msk [vmem:[#allocation3 + $0x150] sm:$0xff] %vm1011_vm5, %v3085_v16  ;;  %v3934_v61 = vld [vmem:[#allocation3 + $0x170] sm:$0xff] }
 0x2df   : > { %v2509_v60 = vsel %vm2444_vm11, %v2403_v48, %v2477_v3  ;;  %3744 = vrot.lane.b32.xlu0 %v8782_v26, %s6579_s20  ;;  %3425 = vst.msk [vmem:[#allocation3 + $0x1a0] sm:$0xff] %vm625_vm3, %v3347_v45  ;;  %vm5182_vm11 = vcmask 179200  }
 0x2e0   : > { %2541 = vst.msk [vmem:[#allocation2 + $0x171] sm:$0xff] %vm311_vm0, %v2509_v60  ;;  %3106 = vrot.lane.b32.xlu1 %v8744_v28, %s6579_s20 }
 0x2e1   : > { %v3345_v18 = vpop.permute.xlu0 %3344  ;;  %v3931_v15 = vld [vmem:[#allocation3 + $0x158] sm:$0xff]  ;;  %v2707_v52 = vpop.permute.xlu1 %2706  ;;  %v3933_v37 = vld [vmem:[#allocation3 + $0x168] sm:$0xff] }
 0x2e2   : > { %3424 = vst.msk [vmem:[#allocation3 + $0x188] sm:$0xff] %vm625_vm3, %v3345_v18  ;;  %v4006_v23 = vpack.c.bf16 %v3934_v61, %v3931_v15  ;;  %2785 = vst.msk [vmem:[#allocation3 + $0x198] sm:$0xff] %vm625_vm3, %v2707_v52 }
 0x2e3   : > { %3104 = vrot.lane.b32.xlu0 %v8750_v4, %s6579_s20  ;;  %v8851_v29 = vld [vmem:[#allocation2 + $0x168] sm:$0xff] }
 0x2e4   : > { %v8853_v56 = vld [vmem:[#allocation2 + $0x169] sm:$0xff]  ;;  %4319 = vmatprep.mubr.bf16.mxu1 %v4006_v23  ;;  %2606 = vst.msk [vmem:[#allocation3 + $0x2d0] sm:$0xff] %vm311_vm0, %v8851_v29  ;;  %3366 = vrot.lane.b32.xlu1 %v8800_v17, %s6577_s14 }
 0x2e5   : > { %3244 = vst.msk [vmem:[#allocation3 + $0x2a8] sm:$0xff] %vm311_vm0, %v8853_v56  ;;  %v2705_v28 = vpop.permute.xlu0 %2704  ;;  %v3930_v21 = vld [vmem:[#allocation3 + $0x150] sm:$0xff]  ;;  %v3539_v46 = vpop.permute.xlu1 %3538 }
 0x2e6   : > { %2784 = vst.msk [vmem:[#allocation3 + $0x180] sm:$0xff] %vm625_vm3, %v2705_v28  ;;  %v4005_v4 = vpack.c.bf16 %v3933_v37, %v3930_v21 }
 0x2e7   : > { %3364 = vrot.lane.b32.xlu0 %v8798_v39, %s6577_s14  ;;  %v8865_v35 = vld [vmem:[#allocation2 + $0x170] sm:$0xff]  ;;  %3617 = vst.msk [vmem:[#allocation3 + $0x1a0] sm:$0xff] %vm818_vm4, %v3539_v46 }
 0x2e8   : > { %v8867_v25 = vld [vmem:[#allocation2 + $0x16a] sm:$0xff]  ;;  %v8869_v20 = vld [vmem:[#allocation2 + $0x172] sm:$0xff]  ;;  %v6121_v0 = vpop.f32.mrf.mxu0  ;;  %4320 = vmatmul.mubr.bf16.gmra.mxu1 %v4005_v4  ;;  %2607 = vst.msk [vmem:[#allocation3 + $0x2e8] sm:$0xff] %vm311_vm0, %v8865_v35  ;;  %2726 = vrot.lane.b32.xlu1 %v8733_v22, %s6577_s14 }
 0x2e9   : > { %3882 = vst.msk [vmem:[#allocation3 + $0x280] sm:$0xff] %vm311_vm0, %v8867_v25  ;;  %3883 = vst.msk [vmem:[#allocation3 + $0x298] sm:$0xff] %vm311_vm0, %v8869_v20  ;;  %v8876_v2 = vld [vmem:[#allocation2 + $0x171] sm:$0xff]  ;;  %v3537_v50 = vpop.permute.xlu0 %3536  ;;  %v2899_v1 = vpop.permute.xlu1 %2898 }
 0x2ea   : > { %3245 = vst.msk [vmem:[#allocation3 + $0x2c0] sm:$0xff] %vm311_vm0, %v8876_v2  ;;  %v6122_v53 = vpop.f32.mrf.mxu0 }
 0x2eb   : > { %3616 = vst.msk [vmem:[#allocation3 + $0x188] sm:$0xff] %vm818_vm4, %v3537_v50  ;;  %v6123_v57 = vadd.f32 %v6122_v53, %v6121_v0  ;;  %2724 = vrot.lane.b32.xlu0 %v8713_v34, %s6577_s14  ;;  %2977 = vst.msk [vmem:[#allocation3 + $0x198] sm:$0xff] %vm818_vm4, %v2899_v1 }
 0x2ec   : > { %v6124_v5 = vpop.f32.mrf.mxu0  ;;  %3558 = vrot.lane.b32.xlu1 %v8865_v35, %s6578_s15 }
 0x2ed   : > { %v2247_v42 = vadd.f32 %v8691_v10, %v6123_v57  ;;  %v2897_v22 = vpop.permute.xlu0 %2896  ;;  %v3731_v3 = vpop.permute.xlu1 %3730 }
 0x2ee   : > { %2976 = vst.msk [vmem:[#allocation3 + $0x180] sm:$0xff] %vm818_vm4, %v2897_v22  ;;  %v6125_v38 = vpop.f32.mrf.mxu0 }
 0x2ef   : > { %v2408_v48 = vadd.f32 %v8785_v11, %v2247_v42  ;;  %v6126_v44 = vadd.f32 %v6125_v38, %v6124_v5  ;;  %3556 = vrot.lane.b32.xlu0 %v8851_v29, %s6578_s15  ;;  %3809 = vst.msk [vmem:[#allocation3 + $0x1a0] sm:$0xff] %vm1011_vm5, %v3731_v3 }
 0x2f0   : > { %v3968_v34 = vld [vmem:[#allocation3 + $0x280] sm:$0xff]  ;;  %v3971_v16 = vld [vmem:[#allocation3 + $0x298] sm:$0xff]  ;;  %2918 = vrot.lane.b32.xlu1 %v8726_v30, %s6578_s15 }
 0x2f1   : > { %v4025_v60 = vpack.c.bf16 %v3971_v16, %v3968_v34  ;;  %vm2445_vm12 = vcmp.ge.f32.partialorder %v2408_v48, 0.0  ;;  %v2478_v45 = vmul.f32 %v7825_v49, %v2408_v48  ;;  %v2250_v18 = vadd.f32 %v8691_v10, %v6126_v44  ;;  %v3729_v15 = vpop.permute.xlu0 %3728  ;;  %v3091_v23 = vpop.permute.xlu1 %3090 }
 0x2f2   : > { %3808 = vst.msk [vmem:[#allocation3 + $0x188] sm:$0xff] %vm1011_vm5, %v3729_v15  ;;  %3169 = vst.msk [vmem:[#allocation3 + $0x198] sm:$0xff] %vm1011_vm5, %v3091_v23  ;;  %v3983_v23 = vld [vmem:[#allocation3 + $0x2f8] sm:$0xff] }
 0x2f3   : > { %6387 = vmatmul.mubr.msk.bf16.gmra.mxu0 %vm311_vm0, %v4025_v60  ;;  %v2510_v11 = vsel %vm2445_vm12, %v2408_v48, %v2478_v45  ;;  %v2411_v61 = vadd.f32 %v8819_v63, %v2250_v18  ;;  %2916 = vrot.lane.b32.xlu0 %v8724_v32, %s6578_s15  ;;  %vm5412_vm12 = vcmask 1043456  }
 0x2f4   : > { %2542 = vst.msk [vmem:[#allocation2 + $0x181] sm:$0xff] %vm311_vm0, %v2510_v11  ;;  %3750 = vrot.lane.b32.xlu1 %v8876_v2, %s6579_s20 }
 0x2f5   : > { %vm2446_vm13 = vcmp.ge.f32.partialorder %v2411_v61, 0.0  ;;  %v2479_v10 = vmul.f32 %v7825_v49, %v2411_v61  ;;  %v3089_v30 = vpop.permute.xlu0 %3088  ;;  %v3351_v28 = vpop.permute.xlu1 %3350 }
 0x2f6   : > { %3168 = vst.msk [vmem:[#allocation3 + $0x180] sm:$0xff] %vm1011_vm5, %v3089_v30  ;;  %v3940_v63 = vld [vmem:[#allocation3 + $0x1a0] sm:$0xff] }
 0x2f7   : > { %v2511_v52 = vsel %vm2446_vm13, %v2411_v61, %v2479_v10  ;;  %3748 = vrot.lane.b32.xlu0 %v8853_v56, %s6579_s20  ;;  %3427 = vst.msk [vmem:[#allocation3 + $0x1d0] sm:$0xff] %vm625_vm3, %v3351_v28  ;;  %v3980_v61 = vld [vmem:[#allocation3 + $0x2e0] sm:$0xff]  ;;  %vm5195_vm13 = vcmask 359600  }
 0x2f8   : > { %2543 = vst.msk [vmem:[#allocation2 + $0x189] sm:$0xff] %vm311_vm0, %v2511_v52  ;;  %3110 = vrot.lane.b32.xlu1 %v8796_v9, %s6579_s20  ;;  %v4031_v30 = vpack.c.bf16 %v3983_v23, %v3980_v61 }
 0x2f9   : > { %v3349_v32 = vpop.permute.xlu0 %3348  ;;  %v3937_v49 = vld [vmem:[#allocation3 + $0x188] sm:$0xff]  ;;  %v2711_v37 = vpop.permute.xlu1 %2710  ;;  %v3939_v0 = vld [vmem:[#allocation3 + $0x198] sm:$0xff] }
 0x2fa   : > { %3426 = vst.msk [vmem:[#allocation3 + $0x1b8] sm:$0xff] %vm625_vm3, %v3349_v32  ;;  %v4009_v21 = vpack.c.bf16 %v3940_v63, %v3937_v49  ;;  %2787 = vst.msk [vmem:[#allocation3 + $0x1c8] sm:$0xff] %vm625_vm3, %v2711_v37 }
 0x2fb   : > { %3108 = vrot.lane.b32.xlu0 %v8780_v59, %s6579_s20  ;;  %v3660_v4 = vld [vmem:[#allocation2 + $0x181] sm:$0xff] }
 0x2fc   : > { %4327 = vmatprep.mubr.bf16.mxu1 %v4009_v21  ;;  %3246 = vst.msk [vmem:[#allocation3 + $0x2d8] sm:$0xff] %vm311_vm0, %v3660_v4  ;;  %3370 = vrot.lane.b32.xlu1 %v8869_v20, %s6577_s14  ;;  %v3471_v21 = vld [vmem:[#allocation2 + $0x1a0] sm:$0xff] }
 0x2fd   : > { %v2709_v9 = vpop.permute.xlu0 %2708  ;;  %v3936_v46 = vld [vmem:[#allocation3 + $0x180] sm:$0xff]  ;;  %v3543_v53 = vpop.permute.xlu1 %3542 }
 0x2fe   : > { %2786 = vst.msk [vmem:[#allocation3 + $0x1b0] sm:$0xff] %vm625_vm3, %v2709_v9  ;;  %v4008_v50 = vpack.c.bf16 %v3939_v0, %v3936_v46  ;;  %v3470_v9 = vld [vmem:[#allocation2 + $0x198] sm:$0xff] }
 0x2ff   : > { %3368 = vrot.lane.b32.xlu0 %v8867_v25, %s6577_s14  ;;  %v3852_v59 = vld [vmem:[#allocation2 + $0x182] sm:$0xff]  ;;  %v3853_v57 = vld [vmem:[#allocation2 + $0x18a] sm:$0xff]  ;;  %3619 = vst.msk [vmem:[#allocation3 + $0x1d0] sm:$0xff] %vm818_vm4, %v3543_v53 }
 0x300   : > { %4328 = vmatmul.mubr.bf16.gmra.mxu1 %v4008_v50  ;;  %3884 = vst.msk [vmem:[#allocation3 + $0x2b0] sm:$0xff] %vm311_vm0, %v3852_v59  ;;  %3885 = vst.msk [vmem:[#allocation3 + $0x2c8] sm:$0xff] %vm311_vm0, %v3853_v57  ;;  %v3661_v1 = vld [vmem:[#allocation2 + $0x189] sm:$0xff]  ;;  %2730 = vrot.lane.b32.xlu1 %v8807_v19, %s6577_s14  ;;  %v8942_v19 = vld [vmem:[#allocation2 + $0x180] sm:$0xff]  ;;  %v8963_v10 = vpop.f32.mrf.mxu1 }
 0x301   : > { %v3541_v5 = vpop.permute.xlu0 %3540  ;;  %3247 = vst.msk [vmem:[#allocation3 + $0x2f0] sm:$0xff] %vm311_vm0, %v3661_v1  ;;  %v2903_v42 = vpop.permute.xlu1 %2902  ;;  %v8937_v22 = vld [vmem:[#allocation2 + $0x188] sm:$0xff] }
 0x302   : > { %3618 = vst.msk [vmem:[#allocation3 + $0x1b8] sm:$0xff] %vm818_vm4, %v3541_v5  ;;  %2979 = vst.msk [vmem:[#allocation3 + $0x1c8] sm:$0xff] %vm818_vm4, %v2903_v42  ;;  %v3663_v53 = vld [vmem:[#allocation2 + $0x1a1] sm:$0xff] }
 0x303   : > { %2728 = vrot.lane.b32.xlu0 %v8782_v26, %s6577_s14 }
 0x304   : > { %3562 = vrot.lane.b32.xlu1 %v8937_v22, %s6578_s15 }
 0x305   : > { %v2901_v38 = vpop.permute.xlu0 %2900  ;;  %v3735_v48 = vpop.permute.xlu1 %3734 }
 0x306   : > { %2978 = vst.msk [vmem:[#allocation3 + $0x1b0] sm:$0xff] %vm818_vm4, %v2901_v38 }
 0x307   : > { %3560 = vrot.lane.b32.xlu0 %v8942_v19, %s6578_s15  ;;  %v3974_v44 = vld [vmem:[#allocation3 + $0x2b0] sm:$0xff]  ;;  %v3977_v3 = vld [vmem:[#allocation3 + $0x2c8] sm:$0xff]  ;;  %3811 = vst.msk [vmem:[#allocation3 + $0x1d0] sm:$0xff] %vm1011_vm5, %v3735_v48 }
 0x308   : > { %v4028_v26 = vpack.c.bf16 %v3977_v3, %v3974_v44  ;;  %2922 = vrot.lane.b32.xlu1 %v8800_v17, %s6578_s15 }
 0x309   : > { %v3733_v34 = vpop.permute.xlu0 %3732  ;;  %v3095_v16 = vpop.permute.xlu1 %3094 }
 0x30a   : > { %3810 = vst.msk [vmem:[#allocation3 + $0x1b8] sm:$0xff] %vm1011_vm5, %v3733_v34  ;;  %6390 = vmatprep.mubr.msk.bf16.mxu0 %vm311_vm0, %v4028_v26  ;;  %3171 = vst.msk [vmem:[#allocation3 + $0x1c8] sm:$0xff] %vm1011_vm5, %v3095_v16 }
 0x30b   : > { %2920 = vrot.lane.b32.xlu0 %v8798_v39, %s6578_s15  ;;  %6391 = vmatmul.mubr.msk.bf16.gmra.mxu0 %vm311_vm0, %v4031_v30 }
 0x30c   : > { %3754 = vrot.lane.b32.xlu1 %v3661_v1, %s6579_s20 }
 0x30d   : > { %v3093_v60 = vpop.permute.xlu0 %3092  ;;  %v3355_v45 = vpop.permute.xlu1 %3354 }
 0x30e   : > { %3170 = vst.msk [vmem:[#allocation3 + $0x1b0] sm:$0xff] %vm1011_vm5, %v3093_v60  ;;  %v3946_v15 = vld [vmem:[#allocation3 + $0x1d0] sm:$0xff] }
 0x30f   : > { %3752 = vrot.lane.b32.xlu0 %v3660_v4, %s6579_s20  ;;  %3429 = vst.msk [vmem:[#allocation3 + $0x200] sm:$0xff] %vm625_vm3, %v3355_v45 }
 0x310   : > { %3114 = vrot.lane.b32.xlu1 %v8865_v35, %s6579_s20 }
 0x311   : > { %v3353_v17 = vpop.permute.xlu0 %3352  ;;  %v3943_v18 = vld [vmem:[#allocation3 + $0x1b8] sm:$0xff]  ;;  %v2715_v11 = vpop.permute.xlu1 %2714  ;;  %v3945_v28 = vld [vmem:[#allocation3 + $0x1c8] sm:$0xff] }
 0x312   : > { %3428 = vst.msk [vmem:[#allocation3 + $0x1e8] sm:$0xff] %vm625_vm3, %v3353_v17  ;;  %v4012_v39 = vpack.c.bf16 %v3946_v15, %v3943_v18  ;;  %2789 = vst.msk [vmem:[#allocation3 + $0x1f8] sm:$0xff] %vm625_vm3, %v2715_v11 }
 0x313   : > { %3112 = vrot.lane.b32.xlu0 %v8851_v29, %s6579_s20  ;;  %v8970_v29 = vpop.f32.mrf.mxu1 }
 0x314   : > { %4335 = vmatprep.mubr.bf16.mxu1 %v4012_v39  ;;  %3374 = vrot.lane.b32.xlu1 %v3853_v57, %s6577_s14  ;;  %v3662_v57 = vld [vmem:[#allocation2 + $0x199] sm:$0xff] }
 0x315   : > { %v2713_v35 = vpop.permute.xlu0 %2712  ;;  %v3942_v52 = vld [vmem:[#allocation3 + $0x1b0] sm:$0xff]  ;;  %v3547_v49 = vpop.permute.xlu1 %3546 }
 0x316   : > { %2788 = vst.msk [vmem:[#allocation3 + $0x1e0] sm:$0xff] %vm625_vm3, %v2713_v35  ;;  %v4011_v32 = vpack.c.bf16 %v3945_v28, %v3942_v52  ;;  %v8978_v4 = vpop.f32.mrf.mxu1  ;;  %v6364_v28 = vpop.f32.mrf.mxu0 }
 0x317   : > { %3372 = vrot.lane.b32.xlu0 %v3852_v59, %s6577_s14  ;;  %3621 = vst.msk [vmem:[#allocation3 + $0x200] sm:$0xff] %vm818_vm4, %v3547_v49  ;;  %v6163_v49 = vadd.f32 %v8970_v29, %v8963_v10 }
 0x318   : > { %4336 = vmatmul.mubr.bf16.gmra.mxu1 %v4011_v32  ;;  %2734 = vrot.lane.b32.xlu1 %v8876_v2, %s6577_s14  ;;  %v8984_v2 = vpop.f32.mrf.mxu1 }
 0x319   : > { %v3545_v63 = vpop.permute.xlu0 %3544  ;;  %v2907_v37 = vpop.permute.xlu1 %2906 }
 0x31a   : > { %3620 = vst.msk [vmem:[#allocation3 + $0x1e8] sm:$0xff] %vm818_vm4, %v3545_v63  ;;  %2981 = vst.msk [vmem:[#allocation3 + $0x1f8] sm:$0xff] %vm818_vm4, %v2907_v37  ;;  %v6167_v50 = vpop.f32.mrf.mxu1  ;;  %v4426_v37 = vpop.f32.mrf.mxu0 }
 0x31b   : > { %2732 = vrot.lane.b32.xlu0 %v8853_v56, %s6577_s14  ;;  %s270_s14 = sand.u32 1, %s6566_s27  }
 0x31c   : > { %3566 = vrot.lane.b32.xlu1 %v3471_v21, %s6578_s15  ;;  %v6168_v5 = vpop.f32.mrf.mxu1  ;;  %v9020_v21 = vld [vmem:[%s9965_s5] ss:$0 sm:$0xff] }
 0x31d   : > { %v2905_v46 = vpop.permute.xlu0 %2904  ;;  %v3739_v0 = vpop.permute.xlu1 %3738 }
 0x31e   : > { %2980 = vst.msk [vmem:[#allocation3 + $0x1e0] sm:$0xff] %vm818_vm4, %v2905_v46  ;;  %v6170_v48 = vpop.f32.mrf.mxu1  ;;  %v6166_v46 = vadd.f32 %v8984_v2, %v8978_v4 }
 0x31f   : > { %3564 = vrot.lane.b32.xlu0 %v3470_v9, %s6578_s15  ;;  %3813 = vst.msk [vmem:[#allocation3 + $0x200] sm:$0xff] %vm1011_vm5, %v3739_v0  ;;  %v4266_v0 = vadd.f32 %v6163_v49, %v9020_v21 }
 0x320   : > { %2926 = vrot.lane.b32.xlu1 %v8869_v20, %s6578_s15  ;;  %v6171_v60 = vpop.f32.mrf.mxu1 }
 0x321   : > { %v3737_v56 = vpop.permute.xlu0 %3736  ;;  %v3099_v59 = vpop.permute.xlu1 %3098  ;;  %v6172_v2 = vadd.f32 %v6171_v60, %v6170_v48 }
 0x322   : > { %3812 = vst.msk [vmem:[#allocation3 + $0x1e8] sm:$0xff] %vm1011_vm5, %v3737_v56  ;;  %3173 = vst.msk [vmem:[#allocation3 + $0x1f8] sm:$0xff] %vm1011_vm5, %v3099_v59  ;;  %v6169_v56 = vadd.f32 %v6168_v5, %v6167_v50 }
 0x323   : > { %2924 = vrot.lane.b32.xlu0 %v8867_v25, %s6578_s15  ;;  %s6588_s15 = smov 4  }
 0x324   : > { %3758 = vrot.lane.b32.xlu1 %v3663_v53, %s6579_s20  ;;  %v4274_v4 = vadd.f32 %v6169_v56, %v9020_v21 }
 0x325   : > { %v3097_v1 = vpop.permute.xlu0 %3096  ;;  %v3359_v42 = vpop.permute.xlu1 %3358 }
 0x326   : > { %3172 = vst.msk [vmem:[#allocation3 + $0x1e0] sm:$0xff] %vm1011_vm5, %v3097_v1  ;;  %v3952_v25 = vld [vmem:[#allocation3 + $0x200] sm:$0xff] }
 0x327   : > { %3756 = vrot.lane.b32.xlu0 %v3662_v57, %s6579_s20  ;;  %3431 = vst.msk [vmem:[#allocation3 + $0x230] sm:$0xff] %vm625_vm3, %v3359_v42  ;;  %v6365_v57 = vpop.f32.mrf.mxu0  ;;  %v4269_v42 = vadd.f32 %v6166_v46, %v9020_v21 }
 0x328   : > { %3118 = vrot.lane.b32.xlu1 %v8937_v22, %s6579_s20 }
 0x329   : > { %v3357_v20 = vpop.permute.xlu0 %3356  ;;  %v3949_v38 = vld [vmem:[#allocation3 + $0x1e8] sm:$0xff]  ;;  %v2719_v3 = vpop.permute.xlu1 %2718  ;;  %v3951_v16 = vld [vmem:[#allocation3 + $0x1f8] sm:$0xff] }
 0x32a   : > { %3430 = vst.msk [vmem:[#allocation3 + $0x218] sm:$0xff] %vm625_vm3, %v3357_v20  ;;  %v4015_v44 = vpack.c.bf16 %v3952_v25, %v3949_v38  ;;  %2791 = vst.msk [vmem:[#allocation3 + $0x228] sm:$0xff] %vm625_vm3, %v2719_v3  ;;  %v9030_v20 = vadd.f32 %v4426_v37, %v4266_v0 }
 0x32b   : > { %3116 = vrot.lane.b32.xlu0 %v8942_v19, %s6579_s20 }
 0x32c   : > { %4343 = vmatprep.mubr.bf16.mxu1 %v4015_v44  ;;  %10046 = vst [vmem:[#allocation35_spill] sm:$0xff] %v9030_v20  ;;  %v4429_v44 = vpop.f32.mrf.mxu0  ;;  %v4553_v48 = vsel %vm311_vm0, %v9030_v20, 0.0 }
 0x32d   : > { %v2717_v26 = vpop.permute.xlu0 %2716  ;;  %v3948_v34 = vld [vmem:[#allocation3 + $0x1e0] sm:$0xff]  ;;  %v3551_v45 = vpop.permute.xlu1 %3550 }
 0x32e   : > { %2790 = vst.msk [vmem:[#allocation3 + $0x210] sm:$0xff] %vm625_vm3, %v2717_v26  ;;  %v4014_v22 = vpack.c.bf16 %v3951_v16, %v3948_v34  ;;  %v9034_v26 = vadd.f32 %v4429_v44, %v4269_v42  ;;  %v9037_v16 = vadd.f32 %v6364_v28, %v4274_v4 }
 0x32f   : > { %3623 = vst.msk [vmem:[#allocation3 + $0x230] sm:$0xff] %vm818_vm4, %v3551_v45 }
 0x330   : > { %v6173_v17 = vpop.f32.mrf.mxu1  ;;  %4344 = vmatmul.mubr.bf16.gmra.mxu1 %v4014_v22  ;;  %10047 = vst [vmem:[#allocation36_spill] sm:$0xff] %v9034_v26  ;;  %10048 = vst [vmem:[#allocation37_spill] sm:$0xff] %v9037_v16  ;;  %v4277_v22 = vadd.f32 %v6172_v2, %v9020_v21 }
 0x331   : > { %v3549_v18 = vpop.permute.xlu0 %3548  ;;  %v2911_v39 = vpop.permute.xlu1 %2910 }
 0x332   : > { %3622 = vst.msk [vmem:[#allocation3 + $0x218] sm:$0xff] %vm818_vm4, %v3549_v18  ;;  %v6174_v15 = vpop.f32.mrf.mxu1  ;;  %2983 = vst.msk [vmem:[#allocation3 + $0x228] sm:$0xff] %vm818_vm4, %v2911_v39  ;;  %v4556_v39 = vsel %vm311_vm0, %v9034_v26, 0.0 }
 0x333   : > { %v9006_v19 = vadd.f32 %v6174_v15, %v6173_v17 }
 0x334   : > { %v6176_v11 = vpop.f32.mrf.mxu1 }
 0x335   : > { %v2909_v61 = vpop.permute.xlu0 %2908  ;;  %v3743_v35 = vpop.permute.xlu1 %3742 }
 0x336   : > { %2982 = vst.msk [vmem:[#allocation3 + $0x210] sm:$0xff] %vm818_vm4, %v2909_v61  ;;  %v6177_v23 = vpop.f32.mrf.mxu1 }
 0x337   : > { %v9010_v30 = vadd.f32 %v6177_v23, %v6176_v11  ;;  %3815 = vst.msk [vmem:[#allocation3 + $0x230] sm:$0xff] %vm1011_vm5, %v3743_v35  ;;  %v9048_v11 = vadd.f32 %v6365_v57, %v4277_v22  ;;  %v4559_v23 = vsel %vm311_vm0, %v9037_v16, 0.0 }
 0x339   : > { %v3741_v52 = vpop.permute.xlu0 %3740  ;;  %v3103_v32 = vpop.permute.xlu1 %3102  ;;  %10049 = vst [vmem:[#allocation38_spill] sm:$0xff] %v9048_v11  ;;  %v4562_v49 = vsel %vm311_vm0, %v9048_v11, 0.0 }
 0x33a   : > { %3814 = vst.msk [vmem:[#allocation3 + $0x218] sm:$0xff] %vm1011_vm5, %v3741_v52  ;;  %3175 = vst.msk [vmem:[#allocation3 + $0x228] sm:$0xff] %vm1011_vm5, %v3103_v32 }
 0x33d   : > { %v3101_v63 = vpop.permute.xlu0 %3100  ;;  %v3363_v9 = vpop.permute.xlu1 %3362 }
 0x33e   : > { %3174 = vst.msk [vmem:[#allocation3 + $0x210] sm:$0xff] %vm1011_vm5, %v3101_v63  ;;  %v3958_v29 = vld [vmem:[#allocation3 + $0x230] sm:$0xff] }
 0x33f   : > { %3433 = vst.msk [vmem:[#allocation3 + $0x260] sm:$0xff] %vm625_vm3, %v3363_v9 }
 0x341   : > { %v3361_v53 = vpop.permute.xlu0 %3360  ;;  %v3955_v10 = vld [vmem:[#allocation3 + $0x218] sm:$0xff]  ;;  %v2723_v1 = vpop.permute.xlu1 %2722  ;;  %v3957_v5 = vld [vmem:[#allocation3 + $0x228] sm:$0xff] }
 0x342   : > { %3432 = vst.msk [vmem:[#allocation3 + $0x248] sm:$0xff] %vm625_vm3, %v3361_v53  ;;  %v4018_v59 = vpack.c.bf16 %v3958_v29, %v3955_v10  ;;  %2793 = vst.msk [vmem:[#allocation3 + $0x258] sm:$0xff] %vm625_vm3, %v2723_v1 }
 0x344   : > { %4351 = vmatprep.mubr.bf16.mxu1 %v4018_v59 }
 0x345   : > { %v2721_v38 = vpop.permute.xlu0 %2720  ;;  %v3954_v50 = vld [vmem:[#allocation3 + $0x210] sm:$0xff]  ;;  %v3555_v3 = vpop.permute.xlu1 %3554 }
 0x346   : > { %2792 = vst.msk [vmem:[#allocation3 + $0x240] sm:$0xff] %vm625_vm3, %v2721_v38  ;;  %v4017_v25 = vpack.c.bf16 %v3957_v5, %v3954_v50 }
 0x347   : > { %3625 = vst.msk [vmem:[#allocation3 + $0x260] sm:$0xff] %vm818_vm4, %v3555_v3 }
 0x348   : > { %v6179_v34 = vpop.f32.mrf.mxu1  ;;  %4352 = vmatmul.mubr.bf16.gmra.mxu1 %v4017_v25 }
 0x349   : > { %v3553_v45 = vpop.permute.xlu0 %3552  ;;  %v2915_v18 = vpop.permute.xlu1 %2914 }
 0x34a   : > { %3624 = vst.msk [vmem:[#allocation3 + $0x248] sm:$0xff] %vm818_vm4, %v3553_v45  ;;  %4554 = vadd.xlane.f32.xlu0 %v4553_v48  ;;  %v6180_v60 = vpop.f32.mrf.mxu1  ;;  %2985 = vst.msk [vmem:[#allocation3 + $0x258] sm:$0xff] %vm818_vm4, %v2915_v18 }
 0x34b   : > { %v9043_v17 = vadd.f32 %v6180_v60, %v6179_v34 }
 0x34c   : > { %v6182_v15 = vpop.f32.mrf.mxu1  ;;  %4557 = vadd.xlane.f32.xlu1 %v4556_v39 }
 0x34d   : > { %v2913_v61 = vpop.permute.xlu0 %2912 }
 0x34e   : > { %2984 = vst.msk [vmem:[#allocation3 + $0x240] sm:$0xff] %vm818_vm4, %v2913_v61  ;;  %4560 = vadd.xlane.f32.xlu0 %v4559_v23  ;;  %v6183_v35 = vpop.f32.mrf.mxu1  ;;  %v3747_v28 = vpop.permute.xlu1 %3746 }
 0x34f   : > { %v9053_v52 = vadd.f32 %v6183_v35, %v6182_v15  ;;  %3817 = vst.msk [vmem:[#allocation3 + $0x260] sm:$0xff] %vm1011_vm5, %v3747_v28 }
 0x351   : > { %v3745_v32 = vpop.permute.xlu0 %3744 }
 0x352   : > { %3816 = vst.msk [vmem:[#allocation3 + $0x248] sm:$0xff] %vm1011_vm5, %v3745_v32  ;;  %4563 = vadd.xlane.f32.xlu0 %v4562_v49  ;;  %v3107_v63 = vpop.permute.xlu1 %3106 }
 0x353   : > { %3177 = vst.msk [vmem:[#allocation3 + $0x258] sm:$0xff] %vm1011_vm5, %v3107_v63 }
 0x355   : > { %v3105_v37 = vpop.permute.xlu0 %3104 }
 0x356   : > { %3176 = vst.msk [vmem:[#allocation3 + $0x240] sm:$0xff] %vm1011_vm5, %v3105_v37  ;;  %v3367_v9 = vpop.permute.xlu1 %3366  ;;  %v3964_v56 = vld [vmem:[#allocation3 + $0x260] sm:$0xff] }
 0x357   : > { %3435 = vst.msk [vmem:[#allocation3 + $0x290] sm:$0xff] %vm625_vm3, %v3367_v9 }
 0x359   : > { %v3365_v46 = vpop.permute.xlu0 %3364  ;;  %v3961_v0 = vld [vmem:[#allocation3 + $0x248] sm:$0xff] }
 0x35a   : > { %3434 = vst.msk [vmem:[#allocation3 + $0x278] sm:$0xff] %vm625_vm3, %v3365_v46  ;;  %v4021_v53 = vpack.c.bf16 %v3964_v56, %v3961_v0  ;;  %v2727_v10 = vpop.permute.xlu1 %2726  ;;  %v3963_v57 = vld [vmem:[#allocation3 + $0x258] sm:$0xff] }
 0x35b   : > { %2795 = vst.msk [vmem:[#allocation3 + $0x288] sm:$0xff] %vm625_vm3, %v2727_v10 }
 0x35c   : > { %4359 = vmatprep.mubr.bf16.mxu1 %v4021_v53 }
 0x35d   : > { %v2725_v29 = vpop.permute.xlu0 %2724  ;;  %v3960_v59 = vld [vmem:[#allocation3 + $0x240] sm:$0xff] }
 0x35e   : > { %2794 = vst.msk [vmem:[#allocation3 + $0x270] sm:$0xff] %vm625_vm3, %v2725_v29  ;;  %v4020_v1 = vpack.c.bf16 %v3963_v57, %v3960_v59  ;;  %v3559_v42 = vpop.permute.xlu1 %3558 }
 0x35f   : > { %3627 = vst.msk [vmem:[#allocation3 + $0x290] sm:$0xff] %vm818_vm4, %v3559_v42 }
 0x360   : > { %v6185_v4 = vpop.f32.mrf.mxu1  ;;  %4360 = vmatmul.mubr.bf16.gmra.mxu1 %v4020_v1 }
 0x361   : > { %v3557_v2 = vpop.permute.xlu0 %3556 }
 0x362   : > { %3626 = vst.msk [vmem:[#allocation3 + $0x278] sm:$0xff] %vm818_vm4, %v3557_v2  ;;  %v6186_v38 = vpop.f32.mrf.mxu1  ;;  %v2919_v5 = vpop.permute.xlu1 %2918 }
 0x363   : > { %v9067_v50 = vadd.f32 %v6186_v38, %v6185_v4  ;;  %2987 = vst.msk [vmem:[#allocation3 + $0x288] sm:$0xff] %vm818_vm4, %v2919_v5 }
 0x364   : > { %v6188_v25 = vpop.f32.mrf.mxu1 }
 0x365   : > { %v2917_v44 = vpop.permute.xlu0 %2916 }
 0x366   : > { %2986 = vst.msk [vmem:[#allocation3 + $0x270] sm:$0xff] %vm818_vm4, %v2917_v44  ;;  %v6189_v3 = vpop.f32.mrf.mxu1  ;;  %v3751_v22 = vpop.permute.xlu1 %3750 }
 0x367   : > { %v9071_v34 = vadd.f32 %v6189_v3, %v6188_v25  ;;  %3819 = vst.msk [vmem:[#allocation3 + $0x290] sm:$0xff] %vm1011_vm5, %v3751_v22 }
 0x369   : > { %v3749_v45 = vpop.permute.xlu0 %3748 }
 0x36a   : > { %3818 = vst.msk [vmem:[#allocation3 + $0x278] sm:$0xff] %vm1011_vm5, %v3749_v45  ;;  %v3111_v48 = vpop.permute.xlu1 %3110 }
 0x36b   : > { %3179 = vst.msk [vmem:[#allocation3 + $0x288] sm:$0xff] %vm1011_vm5, %v3111_v48 }
 0x36d   : > { %v3109_v60 = vpop.permute.xlu0 %3108 }
 0x36e   : > { %3178 = vst.msk [vmem:[#allocation3 + $0x270] sm:$0xff] %vm1011_vm5, %v3109_v60  ;;  %v3371_v18 = vpop.permute.xlu1 %3370  ;;  %v3970_v61 = vld [vmem:[#allocation3 + $0x290] sm:$0xff] }
 0x36f   : > { %3437 = vst.msk [vmem:[#allocation3 + $0x2c0] sm:$0xff] %vm625_vm3, %v3371_v18 }
 0x371   : > { %v3369_v15 = vpop.permute.xlu0 %3368  ;;  %v3967_v39 = vld [vmem:[#allocation3 + $0x278] sm:$0xff] }
 0x372   : > { %3436 = vst.msk [vmem:[#allocation3 + $0x2a8] sm:$0xff] %vm625_vm3, %v3369_v15  ;;  %v4024_v23 = vpack.c.bf16 %v3970_v61, %v3967_v39  ;;  %v2731_v35 = vpop.permute.xlu1 %2730  ;;  %v3969_v49 = vld [vmem:[#allocation3 + $0x288] sm:$0xff] }
 0x373   : > { %2797 = vst.msk [vmem:[#allocation3 + $0x2b8] sm:$0xff] %vm625_vm3, %v2731_v35 }
 0x374   : > { %4367 = vmatprep.mubr.bf16.mxu1 %v4024_v23  ;;  %v9098_v23 = vpop.f32.mrf.mxu0 }
 0x375   : > { %v2729_v28 = vpop.permute.xlu0 %2728  ;;  %v3966_v32 = vld [vmem:[#allocation3 + $0x270] sm:$0xff] }
 0x376   : > { %2796 = vst.msk [vmem:[#allocation3 + $0x2a0] sm:$0xff] %vm625_vm3, %v2729_v28  ;;  %v4023_v63 = vpack.c.bf16 %v3969_v49, %v3966_v32  ;;  %v3563_v37 = vpop.permute.xlu1 %3562 }
 0x377   : > { %3629 = vst.msk [vmem:[#allocation3 + $0x2c0] sm:$0xff] %vm818_vm4, %v3563_v37  ;;  %v9104_v37 = vpop.f32.mrf.mxu0 }
 0x378   : > { %v6191_v9 = vpop.f32.mrf.mxu1  ;;  %4368 = vmatmul.mubr.bf16.gmra.mxu1 %v4023_v63 }
 0x379   : > { %v3561_v46 = vpop.permute.xlu0 %3560 }
 0x37a   : > { %3628 = vst.msk [vmem:[#allocation3 + $0x2a8] sm:$0xff] %vm818_vm4, %v3561_v46  ;;  %v6192_v0 = vpop.f32.mrf.mxu1  ;;  %v2923_v53 = vpop.permute.xlu1 %2922 }
 0x37b   : > { %v9083_v56 = vadd.f32 %v6192_v0, %v6191_v9  ;;  %2989 = vst.msk [vmem:[#allocation3 + $0x2b8] sm:$0xff] %vm818_vm4, %v2923_v53 }
 0x37c   : > { %v6194_v10 = vpop.f32.mrf.mxu1 }
 0x37d   : > { %v2921_v29 = vpop.permute.xlu0 %2920 }
 0x37e   : > { %2988 = vst.msk [vmem:[#allocation3 + $0x2a0] sm:$0xff] %vm818_vm4, %v2921_v29  ;;  %v6195_v59 = vpop.f32.mrf.mxu1  ;;  %v3755_v1 = vpop.permute.xlu1 %3754 }
 0x37f   : > { %v9087_v57 = vadd.f32 %v6195_v59, %v6194_v10  ;;  %3821 = vst.msk [vmem:[#allocation3 + $0x2c0] sm:$0xff] %vm1011_vm5, %v3755_v1  ;;  %v9110_v10 = vpop.f32.mrf.mxu0 }
 0x381   : > { %v3753_v42 = vpop.permute.xlu0 %3752  ;;  %v4445_v1 = vpop.f32.mrf.mxu0 }
 0x382   : > { %3820 = vst.msk [vmem:[#allocation3 + $0x2a8] sm:$0xff] %vm1011_vm5, %v3753_v42  ;;  %v3115_v4 = vpop.permute.xlu1 %3114 }
 0x383   : > { %3181 = vst.msk [vmem:[#allocation3 + $0x2b8] sm:$0xff] %vm1011_vm5, %v3115_v4 }
 0x385   : > { %v3113_v2 = vpop.permute.xlu0 %3112 }
 0x386   : > { %3180 = vst.msk [vmem:[#allocation3 + $0x2a0] sm:$0xff] %vm1011_vm5, %v3113_v2  ;;  %v3375_v38 = vpop.permute.xlu1 %3374  ;;  %v3976_v44 = vld [vmem:[#allocation3 + $0x2c0] sm:$0xff]  ;;  %v9115_v2 = vpop.f32.mrf.mxu0 }
 0x387   : > { %3439 = vst.msk [vmem:[#allocation3 + $0x2f0] sm:$0xff] %vm625_vm3, %v3375_v38 }
 0x389   : > { %v3373_v5 = vpop.permute.xlu0 %3372  ;;  %v3973_v25 = vld [vmem:[#allocation3 + $0x2a8] sm:$0xff] }
 0x38a   : > { %3438 = vst.msk [vmem:[#allocation3 + $0x2d8] sm:$0xff] %vm625_vm3, %v3373_v5  ;;  %v4027_v3 = vpack.c.bf16 %v3976_v44, %v3973_v25  ;;  %v2735_v22 = vpop.permute.xlu1 %2734  ;;  %v3975_v60 = vld [vmem:[#allocation3 + $0x2b8] sm:$0xff]  ;;  %v9117_v44 = vpop.f32.mrf.mxu0 }
 0x38b   : > { %2799 = vst.msk [vmem:[#allocation3 + $0x2e8] sm:$0xff] %vm625_vm3, %v2735_v22 }
 0x38c   : > { %4375 = vmatprep.mubr.bf16.mxu1 %v4027_v3 }
 0x38d   : > { %v2733_v45 = vpop.permute.xlu0 %2732  ;;  %v3972_v48 = vld [vmem:[#allocation3 + $0x2a0] sm:$0xff] }
 0x38e   : > { %2798 = vst.msk [vmem:[#allocation3 + $0x2d0] sm:$0xff] %vm625_vm3, %v2733_v45  ;;  %v4026_v18 = vpack.c.bf16 %v3975_v60, %v3972_v48  ;;  %v3567_v15 = vpop.permute.xlu1 %3566  ;;  %v9119_v45 = vpop.f32.mrf.mxu0  ;;  %vm359_vm3 = vcmask 23552  }
 0x38f   : > { %3631 = vst.msk [vmem:[#allocation3 + $0x2f0] sm:$0xff] %vm818_vm4, %v3567_v15 }
 0x390   : > { %v6197_v39 = vpop.f32.mrf.mxu1  ;;  %4376 = vmatmul.mubr.bf16.gmra.mxu1 %v4026_v18  ;;  %v9123_v15 = vpop.f32.mrf.mxu0 }
 0x391   : > { %v3565_v61 = vpop.permute.xlu0 %3564 }
 0x392   : > { %3630 = vst.msk [vmem:[#allocation3 + $0x2d8] sm:$0xff] %vm818_vm4, %v3565_v61  ;;  %v6198_v35 = vpop.f32.mrf.mxu1  ;;  %v2927_v32 = vpop.permute.xlu1 %2926 }
 0x393   : > { %v9101_v28 = vadd.f32 %v6198_v35, %v6197_v39  ;;  %2991 = vst.msk [vmem:[#allocation3 + $0x2e8] sm:$0xff] %vm818_vm4, %v2927_v32  ;;  %v9127_v35 = vpop.f32.mrf.mxu0 }
 0x394   : > { %v6200_v49 = vpop.f32.mrf.mxu1 }
 0x395   : > { %v2925_v63 = vpop.permute.xlu0 %2924  ;;  %v9129_v32 = vpop.f32.mrf.mxu0 }
 0x396   : > { %2990 = vst.msk [vmem:[#allocation3 + $0x2d0] sm:$0xff] %vm818_vm4, %v2925_v63  ;;  %v6201_v9 = vpop.f32.mrf.mxu1  ;;  %v3759_v0 = vpop.permute.xlu1 %3758  ;;  %vm364_vm4 = vcmask 179352  }
 0x397   : > { %v9107_v46 = vadd.f32 %v6201_v9, %v6200_v49  ;;  %3823 = vst.msk [vmem:[#allocation3 + $0x2f0] sm:$0xff] %vm1011_vm5, %v3759_v0  ;;  %v9131_v49 = vpop.f32.mrf.mxu0 }
 0x399   : > { %v3757_v53 = vpop.permute.xlu0 %3756  ;;  %v9133_v63 = vpop.f32.mrf.mxu0 }
 0x39a   : > { %3822 = vst.msk [vmem:[#allocation3 + $0x2d8] sm:$0xff] %vm1011_vm5, %v3757_v53  ;;  %v3119_v29 = vpop.permute.xlu1 %3118 }
 0x39b   : > { %3183 = vst.msk [vmem:[#allocation3 + $0x2e8] sm:$0xff] %vm1011_vm5, %v3119_v29  ;;  %v6380_v9 = vpop.f32.mrf.mxu0 }
 0x39d   : > { %v3117_v59 = vpop.permute.xlu0 %3116  ;;  %v4490_v53 = vpop.f32.mrf.mxu0 }
 0x39e   : > { %3182 = vst.msk [vmem:[#allocation3 + $0x2d0] sm:$0xff] %vm1011_vm5, %v3117_v59  ;;  %v3982_v42 = vld [vmem:[#allocation3 + $0x2f0] sm:$0xff]  ;;  %vm354_vm5 = vcmask 174080  }
 0x3a1   : > { %v3979_v4 = vld [vmem:[#allocation3 + $0x2d8] sm:$0xff] }
 0x3a2   : > { %v4030_v38 = vpack.c.bf16 %v3982_v42, %v3979_v4  ;;  %v3981_v25 = vld [vmem:[#allocation3 + $0x2e8] sm:$0xff] }
 0x3a4   : > { %4383 = vmatprep.mubr.bf16.mxu1 %v4030_v38  ;;  %v6381_v38 = vpop.f32.mrf.mxu0 }
 0x3a5   : > { %v3978_v5 = vld [vmem:[#allocation3 + $0x2d0] sm:$0xff] }
 0x3a6   : > { %v4029_v3 = vpack.c.bf16 %v3981_v25, %v3978_v5 }
 0x3a8   : > { %v6203_v22 = vpop.f32.mrf.mxu1  ;;  %4384 = vmatmul.mubr.bf16.gmra.mxu1 %v4029_v3 }
 0x3aa   : > { %v6204_v48 = vpop.f32.mrf.mxu1 }
 0x3ab   : > { %v9121_v60 = vadd.f32 %v6204_v48, %v6203_v22 }
 0x3ac   : > { %v6206_v18 = vpop.f32.mrf.mxu1 }
 0x3ae   : > { %v6207_v39 = vpop.f32.mrf.mxu1 }
 0x3af   : > { %v9125_v61 = vadd.f32 %v6207_v39, %v6206_v18  ;;  %v4493_v18 = vpop.f32.mrf.mxu0 }
 0x3c0   : > { %v6209_v0 = vpop.f32.mrf.mxu1 }
 0x3c2   : > { %v6210_v29 = vpop.f32.mrf.mxu1 }
 0x3c3   : > { %v6211_v59 = vadd.f32 %v6210_v29, %v6209_v0 }
 0x3c4   : > { %v6212_v42 = vpop.f32.mrf.mxu1 }
 0x3c5   : > { %v4330_v4 = vadd.f32 %v6211_v59, %v9020_v21 }
 0x3c6   : > { %v6213_v5 = vpop.f32.mrf.mxu1 }
 0x3c7   : > { %v9136_v25 = vadd.f32 %v4490_v53, %v4330_v4  ;;  %v6214_v3 = vadd.f32 %v6213_v5, %v6212_v42  ;;  %v4282_v53 = vadd.f32 %v9006_v19, %v9020_v21 }
 0x3c9   : > { %v4333_v22 = vadd.f32 %v6214_v3, %v9020_v21  ;;  %v4601_v48 = vsel %vm311_vm0, %v9136_v25, 0.0 }
 0x3ca   : > { %4602 = vadd.xlane.f32.xlu1 %v4601_v48  ;;  %v4285_v48 = vadd.f32 %v9010_v30, %v9020_v21 }
 0x3cb   : > { %v9141_v39 = vadd.f32 %v4493_v18, %v4333_v22  ;;  %v9151_v22 = vadd.f32 %v9104_v37, %v4282_v53  ;;  %v6384_v37 = vpop.f32.mrf.mxu0 }
 0x3cc   : > { %v9160_v19 = vadd.f32 %v4445_v1, %v4285_v48  ;;  %v4290_v1 = vadd.f32 %v9043_v17, %v9020_v21 }
 0x3cd   : > { %v4604_v0 = vsel %vm311_vm0, %v9141_v39, 0.0  ;;  %10050 = vst [vmem:[#allocation39_spill] sm:$0xff] %v9151_v22 }
 0x3ce   : > { %4605 = vadd.xlane.f32.xlu0 %v4604_v0  ;;  %10051 = vst [vmem:[#allocation40_spill] sm:$0xff] %v9160_v19  ;;  %v4568_v30 = vsel %vm311_vm0, %v9160_v19, 0.0 }
 0x3d8   : > { %v6215_v29 = vpop.f32.mrf.mxu1 }
 0x3da   : > { %v6216_v59 = vpop.f32.mrf.mxu1 }
 0x3db   : > { %v6217_v13 = vadd.f32 %v6216_v59, %v6215_v29  ;;  %v4506_v59 = vpop.f32.mrf.mxu0 }
 0x3dc   : > { %v6218_v14 = vpop.f32.mrf.mxu1 }
 0x3dd   : > { %v4338_v42 = vadd.f32 %v6217_v13, %v9020_v21 }
 0x3de   : > { %v6219_v4 = vpop.f32.mrf.mxu1 }
 0x3df   : > { %v9148_v5 = vadd.f32 %v6380_v9, %v4338_v42  ;;  %v6220_v3 = vadd.f32 %v6219_v4, %v6218_v14  ;;  %v4565_v14 = vsel %vm311_vm0, %v9151_v22, 0.0 }
 0x3e1   : > { %v4341_v18 = vadd.f32 %v6220_v3, %v9020_v21  ;;  %v4607_v0 = vsel %vm311_vm0, %v9148_v5, 0.0  ;;  %v6385_v3 = vpop.f32.mrf.mxu0 }
 0x3e2   : > { %4608 = vadd.xlane.f32.xlu1 %v4607_v0 }
 0x3e3   : > { %v9158_v29 = vadd.f32 %v6381_v38, %v4341_v18 }
 0x3e5   : > { %v4610_v13 = vsel %vm311_vm0, %v9158_v29, 0.0 }
 0x3e6   : > { %4611 = vadd.xlane.f32.xlu0 %v4610_v13  ;;  %4566 = vadd.xlane.f32.xlu1 %v4565_v14  ;;  %v9174_v13 = vadd.f32 %v9098_v23, %v4290_v1  ;;  %v4293_v14 = vadd.f32 %v9053_v52, %v9020_v21 }
 0x3e8   : > { %10052 = vst [vmem:[#allocation41_spill] sm:$0xff] %v9174_v13  ;;  %v4571_v23 = vsel %vm311_vm0, %v9174_v13, 0.0 }
 0x3ea   : > { %4569 = vadd.xlane.f32.xlu0 %v4568_v30 }
 0x3f0   : > { %v6221_v9 = vpop.f32.mrf.mxu1 }
 0x3f2   : > { %v6222_v53 = vpop.f32.mrf.mxu1 }
 0x3f3   : > { %v6223_v38 = vadd.f32 %v6222_v53, %v6221_v9  ;;  %v4509_v53 = vpop.f32.mrf.mxu0 }
 0x3f4   : > { %v6224_v42 = vpop.f32.mrf.mxu1 }
 0x3f5   : > { %v4346_v4 = vadd.f32 %v6223_v38, %v9020_v21  ;;  %v9184_v38 = vadd.f32 %v9110_v10, %v4293_v14  ;;  %v4298_v10 = vadd.f32 %v9067_v50, %v9020_v21 }
 0x3f6   : > { %v6225_v48 = vpop.f32.mrf.mxu1 }
 0x3f7   : > { %v9171_v18 = vadd.f32 %v4506_v59, %v4346_v4  ;;  %v6226_v0 = vadd.f32 %v6225_v48, %v6224_v42  ;;  %10053 = vst [vmem:[#allocation42_spill] sm:$0xff] %v9184_v38  ;;  %v4574_v52 = vsel %vm311_vm0, %v9184_v38, 0.0 }
 0x3f9   : > { %v4349_v30 = vadd.f32 %v6226_v0, %v9020_v21  ;;  %v4613_v9 = vsel %vm311_vm0, %v9171_v18, 0.0 }
 0x3fa   : > { %4614 = vadd.xlane.f32.xlu1 %v4613_v9 }
 0x3fb   : > { %v9181_v17 = vadd.f32 %v4509_v53, %v4349_v30  ;;  %v9198_v53 = vadd.f32 %v9117_v44, %v4298_v10 }
 0x3fd   : > { %v4616_v59 = vsel %vm311_vm0, %v9181_v17, 0.0  ;;  %10054 = vst [vmem:[#allocation43_spill] sm:$0xff] %v9198_v53  ;;  %v4577_v44 = vsel %vm311_vm0, %v9198_v53, 0.0 }
 0x3fe   : > { %4617 = vadd.xlane.f32.xlu0 %v4616_v59  ;;  %4572 = vadd.xlane.f32.xlu1 %v4571_v23  ;;  %v4301_v59 = vadd.f32 %v9071_v34, %v9020_v21 }
 0x400   : > { %v9208_v50 = vadd.f32 %v9123_v15, %v4301_v59  ;;  %v4306_v15 = vadd.f32 %v9083_v56, %v9020_v21 }
 0x402   : > { %4575 = vadd.xlane.f32.xlu0 %v4574_v52  ;;  %10055 = vst [vmem:[#allocation44_spill] sm:$0xff] %v9208_v50  ;;  %v4580_v34 = vsel %vm311_vm0, %v9208_v50, 0.0 }
 0x408   : > { %v6227_v42 = vpop.f32.mrf.mxu1 }
 0x40a   : > { %v6228_v1 = vpop.f32.mrf.mxu1 }
 0x40b   : > { %v6229_v4 = vadd.f32 %v6228_v1, %v6227_v42  ;;  %v6388_v1 = vpop.f32.mrf.mxu0 }
 0x40c   : > { %v6230_v48 = vpop.f32.mrf.mxu1 }
 0x40d   : > { %v4354_v0 = vadd.f32 %v6229_v4, %v9020_v21 }
 0x40e   : > { %v6231_v14 = vpop.f32.mrf.mxu1 }
 0x40f   : > { %v9195_v30 = vadd.f32 %v6384_v37, %v4354_v0  ;;  %v6232_v9 = vadd.f32 %v6231_v14, %v6230_v48  ;;  %v4522_v48 = vpop.f32.mrf.mxu0 }
 0x411   : > { %v4357_v23 = vadd.f32 %v6232_v9, %v9020_v21  ;;  %v4619_v52 = vsel %vm311_vm0, %v9195_v30, 0.0  ;;  %v6389_v9 = vpop.f32.mrf.mxu0 }
 0x412   : > { %4620 = vadd.xlane.f32.xlu1 %v4619_v52 }
 0x413   : > { %v9205_v42 = vadd.f32 %v6385_v3, %v4357_v23 }
 0x415   : > { %v4622_v37 = vsel %vm311_vm0, %v9205_v42, 0.0 }
 0x416   : > { %4623 = vadd.xlane.f32.xlu0 %v4622_v37  ;;  %4578 = vadd.xlane.f32.xlu1 %v4577_v44  ;;  %v9222_v37 = vadd.f32 %v9115_v2, %v4306_v15  ;;  %v4309_v44 = vadd.f32 %v9087_v57, %v9020_v21 }
 0x418   : > { %10057 = vst [vmem:[#allocation46_spill] sm:$0xff] %v9222_v37  ;;  %v4583_v2 = vsel %vm311_vm0, %v9222_v37, 0.0 }
 0x41a   : > { %4581 = vadd.xlane.f32.xlu0 %v4580_v34 }
 0x420   : > { %v6233_v4 = vpop.f32.mrf.mxu1 }
 0x422   : > { %v6234_v3 = vpop.f32.mrf.mxu1 }
 0x423   : > { %v6235_v10 = vadd.f32 %v6234_v3, %v6233_v4  ;;  %v4525_v3 = vpop.f32.mrf.mxu0 }
 0x424   : > { %v6236_v0 = vpop.f32.mrf.mxu1 }
 0x425   : > { %v4362_v14 = vadd.f32 %v6235_v10, %v9020_v21  ;;  %v9232_v10 = vadd.f32 %v9119_v45, %v4309_v44 }
 0x426   : > { %v6237_v59 = vpop.f32.mrf.mxu1 }
 0x427   : > { %v9219_v23 = vadd.f32 %v4522_v48, %v4362_v14  ;;  %v6238_v52 = vadd.f32 %v6237_v59, %v6236_v0  ;;  %10059 = vst [vmem:[#allocation48_spill] sm:$0xff] %v9232_v10  ;;  %v4586_v57 = vsel %vm311_vm0, %v9232_v10, 0.0 }
 0x429   : > { %10056 = vst [vmem:[#allocation45_spill] sm:$0xff] %v9219_v23  ;;  %v4365_v34 = vadd.f32 %v6238_v52, %v9020_v21  ;;  %v4625_v4 = vsel %vm311_vm0, %v9219_v23, 0.0 }
 0x42a   : > { %4626 = vadd.xlane.f32.xlu1 %v4625_v4 }
 0x42b   : > { %v9229_v56 = vadd.f32 %v4525_v3, %v4365_v34 }
 0x42d   : > { %10058 = vst [vmem:[#allocation47_spill] sm:$0xff] %v9229_v56  ;;  %v4628_v48 = vsel %vm311_vm0, %v9229_v56, 0.0 }
 0x42e   : > { %4629 = vadd.xlane.f32.xlu0 %v4628_v48  ;;  %4584 = vadd.xlane.f32.xlu1 %v4583_v2  ;;  %v4314_v2 = vadd.f32 %v9101_v28, %v9020_v21  ;;  %v4688_v28 = vsel %vm311_vm0, %v9037_v16, -inf }
 0x432   : > { %4587 = vadd.xlane.f32.xlu0 %v4586_v57 }
 0x438   : > { %v6239_v0 = vpop.f32.mrf.mxu1 }
 0x43a   : > { %v6240_v15 = vpop.f32.mrf.mxu1 }
 0x43b   : > { %v6241_v14 = vadd.f32 %v6240_v15, %v6239_v0  ;;  %v4682_v0 = vsel %vm311_vm0, %v9030_v20, -inf  ;;  %v4317_v15 = vadd.f32 %v9107_v46, %v9020_v21  ;;  %v5395_v20 = vld [vmem:[%s9966_s6 + $0xe8] sm:$0xff] }
 0x43c   : > { %v6242_v59 = vpop.f32.mrf.mxu1 }
 0x43d   : > { %v4370_v52 = vadd.f32 %v6241_v14, %v9020_v21  ;;  %v6392_v14 = vpop.f32.mrf.mxu0 }
 0x43e   : > { %v6243_v45 = vpop.f32.mrf.mxu1 }
 0x43f   : > { %v9241_v44 = vadd.f32 %v6388_v1, %v4370_v52  ;;  %v6244_v34 = vadd.f32 %v6243_v45, %v6242_v59  ;;  %v9255_v1 = vadd.f32 %v9129_v32, %v4314_v2  ;;  %v9264_v59 = vadd.f32 %v9133_v63, %v4317_v15  ;;  %v4538_v45 = vpop.f32.mrf.mxu0 }
 0x440   : > { %v4691_v52 = vsel %vm311_vm0, %v9048_v11, -inf  ;;  %v4810_v11 = vlaneseq }
 0x441   : > { %10060 = vst [vmem:[#allocation49_spill] sm:$0xff] %v9241_v44  ;;  %v4373_v4 = vadd.f32 %v6244_v34, %v9020_v21  ;;  %v4631_v3 = vsel %vm311_vm0, %v9241_v44, 0.0  ;;  %10062 = vst [vmem:[#allocation51_spill] sm:$0xff] %v9255_v1  ;;  %v4589_v32 = vsel %vm311_vm0, %v9255_v1, 0.0  ;;  %v4592_v34 = vsel %vm311_vm0, %v9264_v59, 0.0 }
 0x442   : > { %4632 = vadd.xlane.f32.xlu1 %v4631_v3  ;;  %10063 = vst [vmem:[#allocation52_spill] sm:$0xff] %v9264_v59  ;;  %v9430_v58 = vshrl.u32 %v4810_v11, 7 }
 0x443   : > { %v9246_v48 = vadd.f32 %v6389_v9, %v4373_v4  ;;  %v4685_v9 = vsel %vm311_vm0, %v9034_v26, -inf  ;;  %v5379_v26 = vld [vmem:[%s9966_s6 + $0x68] sm:$0xff] }
 0x445   : > { %10061 = vst [vmem:[#allocation50_spill] sm:$0xff] %v9246_v48  ;;  %v4634_v57 = vsel %vm311_vm0, %v9246_v48, 0.0 }
 0x446   : > { %4635 = vadd.xlane.f32.xlu0 %v4634_v57  ;;  %4683 = vmax.xlane.f32.xlu1 %v4682_v0  ;;  %v6393_v57 = vpop.f32.mrf.mxu0 }
 0x44a   : > { %4686 = vmax.xlane.f32.xlu0 %v4685_v9  ;;  %4689 = vmax.xlane.f32.xlu1 %v4688_v28  ;;  %v4541_v28 = vpop.f32.mrf.mxu0 }
 0x44e   : > { %4692 = vmax.xlane.f32.xlu0 %v4691_v52  ;;  %4590 = vadd.xlane.f32.xlu1 %v4589_v32  ;;  %v4322_v52 = vadd.f32 %v9121_v60, %v9020_v21  ;;  %v4694_v60 = vsel %vm311_vm0, %v9151_v22, -inf }
 0x450   : > { %v6245_v46 = vpop.f32.mrf.mxu1 }
 0x452   : > { %v6246_v4 = vpop.f32.mrf.mxu1  ;;  %4593 = vadd.xlane.f32.xlu0 %v4592_v34 }
 0x453   : > { %v6247_v3 = vadd.f32 %v6246_v4, %v6245_v46  ;;  %v9283_v46 = vadd.f32 %v9127_v35, %v4322_v52  ;;  %v4325_v4 = vadd.f32 %v9125_v61, %v9020_v21 }
 0x454   : > { %v6248_v2 = vpop.f32.mrf.mxu1 }
 0x455   : > { %v4378_v63 = vadd.f32 %v6247_v3, %v9020_v21  ;;  %10066 = vst [vmem:[#allocation55_spill] sm:$0xff] %v9283_v46  ;;  %v9292_v3 = vadd.f32 %v9131_v49, %v4325_v4  ;;  %v4595_v35 = vsel %vm311_vm0, %v9283_v46, 0.0  ;;  %v10069_v4 = vmov 0.0  }
 0x456   : > { %v6249_v0 = vpop.f32.mrf.mxu1  ;;  %360 = vst.msk [vmem:[#allocation4 + $0x3] sm:$0xff] %vm359_vm3, %v10069_v4  ;;  %361 = vst.msk [vmem:[#allocation4 + $0xb] sm:$0xff] %vm359_vm3, %v10069_v4 }
 0x457   : > { %v6250_v15 = vadd.f32 %v6249_v0, %v6248_v2  ;;  %v9273_v9 = vadd.f32 %v4538_v45, %v4378_v63  ;;  %10067 = vst [vmem:[#allocation56_spill] sm:$0xff] %v9292_v3  ;;  %v4598_v61 = vsel %vm311_vm0, %v9292_v3, 0.0  ;;  %362 = vst.msk [vmem:[#allocation4 + $0x1b] sm:$0xff] %vm359_vm3, %v10069_v4 }
 0x458   : > { %363 = vst.msk [vmem:[#allocation4 + $0x23] sm:$0xff] %vm359_vm3, %v10069_v4  ;;  %vm5208_vm3 = vcmask 540000  }
 0x459   : > { %10064 = vst [vmem:[#allocation53_spill] sm:$0xff] %v9273_v9  ;;  %v4381_v32 = vadd.f32 %v6250_v15, %v9020_v21  ;;  %v4637_v8 = vsel %vm311_vm0, %v9273_v9, 0.0  ;;  %365 = vst.msk [vmem:[#allocation4 + $0x3] sm:$0xff] %vm364_vm4, %v10069_v4 }
 0x45a   : > { %4638 = vadd.xlane.f32.xlu1 %v4637_v8  ;;  %v4697_v8 = vsel %vm311_vm0, %v9160_v19, -inf  ;;  %366 = vst.msk [vmem:[#allocation4 + $0xb] sm:$0xff] %vm364_vm4, %v10069_v4  ;;  %367 = vst.msk [vmem:[#allocation4 + $0x1b] sm:$0xff] %vm364_vm4, %v10069_v4  ;;  %v5396_v19 = vld [vmem:[%s9966_s6 + $0xf0] sm:$0xff] }
 0x45b   : > { %v9280_v34 = vadd.f32 %v4541_v28, %v4381_v32  ;;  %368 = vst.msk [vmem:[#allocation4 + $0x23] sm:$0xff] %vm364_vm4, %v10069_v4  ;;  %vm5221_vm4 = vcmask 720400  }
 0x45c   : > { %356 = vst.msk [vmem:[#allocation4 + $0x18] sm:$0x7] %vm354_vm5, %v10069_v4  ;;  %355 = vst.msk [vmem:[#allocation4] sm:$0x7] %vm354_vm5, %v10069_v4 }
 0x45d   : > { %10065 = vst [vmem:[#allocation54_spill] sm:$0xff] %v9280_v34  ;;  %v4640_v45 = vsel %vm311_vm0, %v9280_v34, 0.0  ;;  %357 = vst.msk [vmem:[#allocation4 + $0x13] sm:$0x7] %vm354_vm5, %v10069_v4 }
 0x45e   : > { %4641 = vadd.xlane.f32.xlu0 %v4640_v45  ;;  %4695 = vmax.xlane.f32.xlu1 %v4694_v60  ;;  %358 = vst.msk [vmem:[#allocation4 + $0x2b] sm:$0x7] %vm354_vm5, %v10069_v4  ;;  %v4721_v4 = vsel %vm311_vm0, %v9264_v59, -inf  ;;  %vm5330_vm5 = vcmask 64512  }
 0x462   : > { %4698 = vmax.xlane.f32.xlu0 %v4697_v8  ;;  %4596 = vadd.xlane.f32.xlu1 %v4595_v35  ;;  %v4706_v35 = vsel %vm311_vm0, %v9198_v53, -inf  ;;  %v5397_v53 = vld [vmem:[%s9966_s6 + $0xf8] sm:$0xff] }
 0x463   : > { %6275 = vmatprep.subr.mxu1 %v5397_v53  ;;  %v4811_v53 = vand.u32 127, %v4810_v11 }
 0x465   : > { %v4817_v7 = vadd.s32 4294967285, %v4811_v53  ;;  %v4812_v54 = vadd.s32 4294967293, %v4811_v53 }
 0x466   : > { %4599 = vadd.xlane.f32.xlu0 %v4598_v61  ;;  %v4709_v61 = vsel %vm311_vm0, %v9208_v50, -inf  ;;  %v5381_v50 = vld [vmem:[%s9966_s6 + $0x78] sm:$0xff] }
 0x467   : > { %6276 = vmatpush3.msra.mxu1 %v5381_v50 }
 0x468   : > { %v6251_v2 = vpop.f32.mrf.mxu1  ;;  %6277 = vmatprep.subr.mxu1 %v5396_v19 }
 0x469   : > { %6278 = vmatpush3.msra.mxu1 %v5380_v12 }
 0x46a   : > { %v6252_v63 = vpop.f32.mrf.mxu1  ;;  %6279 = vmatprep.subr.mxu1 %v5395_v20  ;;  %v5378_v20 = vld [vmem:[%s9966_s6 + $0x60] sm:$0xff] }
 0x46b   : > { %v6253_v0 = vadd.f32 %v6252_v63, %v6251_v2  ;;  %v4712_v2 = vsel %vm311_vm0, %v9222_v37, -inf  ;;  %v4715_v63 = vsel %vm311_vm0, %v9232_v10, -inf  ;;  %6280 = vmatpush3.msra.mxu1 %v5379_v26  ;;  %v5393_v26 = vld [vmem:[%s9966_s6 + $0xd8] sm:$0xff] }
 0x46c   : > { %v6254_v15 = vpop.f32.mrf.mxu1  ;;  %6281 = vmatprep.subr.mxu1 %v5394_v43 }
 0x46d   : > { %v4386_v28 = vadd.f32 %v6253_v0, %v9020_v21  ;;  %v4730_v0 = vsel %vm311_vm0, %v9136_v25, -inf  ;;  %6282 = vmatpush3.msra.mxu1 %v5378_v20 }
 0x46e   : > { %v6255_v49 = vpop.f32.mrf.mxu1  ;;  %6283 = vmatprep.subr.mxu1 %v5393_v26 }
 0x46f   : > { %v9301_v52 = vadd.f32 %v6392_v14, %v4386_v28  ;;  %v6256_v32 = vadd.f32 %v6255_v49, %v6254_v15  ;;  %v4733_v15 = vsel %vm311_vm0, %v9141_v39, -inf  ;;  %v4736_v28 = vsel %vm311_vm0, %v9148_v5, -inf }
 0x470   : > { %v4739_v49 = vsel %vm311_vm0, %v9158_v29, -inf }
 0x471   : > { %10068 = vst [vmem:[#allocation57_spill] sm:$0xff] %v9301_v52  ;;  %v4389_v45 = vadd.f32 %v6256_v32, %v9020_v21  ;;  %v4643_v60 = vsel %vm311_vm0, %v9301_v52, 0.0  ;;  %v4700_v21 = vsel %vm311_vm0, %v9174_v13, -inf  ;;  %v4718_v32 = vsel %vm311_vm0, %v9255_v1, -inf }
 0x472   : > { %4644 = vadd.xlane.f32.xlu1 %v4643_v60  ;;  %v4745_v60 = vsel %vm311_vm0, %v9181_v17, -inf }
 0x473   : > { %v9314_v14 = vadd.f32 %v6393_v57, %v4389_v45  ;;  %v4703_v57 = vsel %vm311_vm0, %v9184_v38, -inf  ;;  %v4742_v45 = vsel %vm311_vm0, %v9171_v18, -inf }
 0x475   : > { %10070 = vst [vmem:[#allocation58_spill] sm:$0xff] %v9314_v14  ;;  %v4646_v8 = vsel %vm311_vm0, %v9314_v14, 0.0 }
 0x476   : > { %4647 = vadd.xlane.f32.xlu0 %v4646_v8  ;;  %4701 = vmax.xlane.f32.xlu1 %v4700_v21  ;;  %v4724_v8 = vsel %vm311_vm0, %v9283_v46, -inf  ;;  %v9352_v21 = vpop.xlane.xlu0 %4554 }
 0x47a   : > { %4704 = vmax.xlane.f32.xlu0 %v4703_v57  ;;  %4707 = vmax.xlane.f32.xlu1 %v4706_v35  ;;  %v4727_v57 = vsel %vm311_vm0, %v9292_v3, -inf  ;;  %v4748_v35 = vsel %vm311_vm0, %v9195_v30, -inf }
 0x47e   : > { %4710 = vmax.xlane.f32.xlu0 %v4709_v61  ;;  %4713 = vmax.xlane.f32.xlu1 %v4712_v2  ;;  %v4751_v61 = vsel %vm311_vm0, %v9205_v42, -inf  ;;  %v4754_v2 = vsel %vm311_vm0, %v9219_v23, -inf }
 0x482   : > { %4716 = vmax.xlane.f32.xlu0 %v4715_v63  ;;  %4731 = vmax.xlane.f32.xlu1 %v4730_v0  ;;  %v9362_v63 = vpop.xlane.xlu0 %4560  ;;  %v4558_v0 = vpop.xlane.xlu1 %4557 }
 0x483   : > { %v4652_v53 = vmul.f32 0.03125, %v9362_v63 }
 0x486   : > { %4734 = vmax.xlane.f32.xlu0 %v4733_v15  ;;  %4737 = vmax.xlane.f32.xlu1 %v4736_v28  ;;  %v4757_v15 = vsel %vm311_vm0, %v9229_v56, -inf  ;;  %v4760_v28 = vsel %vm311_vm0, %v9241_v44, -inf  ;;  %v5375_v56 = vld [vmem:[%s9966_s6 + $0x48] sm:$0xff] }
 0x48a   : > { %4740 = vmax.xlane.f32.xlu0 %v4739_v49  ;;  %4719 = vmax.xlane.f32.xlu1 %v4718_v32  ;;  %v4564_v49 = vpop.xlane.xlu0 %4563  ;;  %v9368_v32 = vpop.xlane.xlu1 %4602 }
 0x48b   : > { %v4653_v55 = vmul.f32 0.03125, %v4564_v49  ;;  %v4650_v49 = vmul.f32 0.03125, %v9352_v21 }
 0x48e   : > { %4722 = vmax.xlane.f32.xlu0 %v4721_v4  ;;  %4743 = vmax.xlane.f32.xlu1 %v4742_v45  ;;  %v4763_v4 = vsel %vm311_vm0, %v9246_v48, -inf  ;;  %v4766_v45 = vsel %vm311_vm0, %v9273_v9, -inf  ;;  %v9435_v9 = vsub.s32 %v4817_v7, %v9430_v58  ;;  %v5377_v7 = vld [vmem:[%s9966_s6 + $0x58] sm:$0xff]  ;;  %v5392_v48 = vld [vmem:[%s9966_s6 + $0xd0] sm:$0xff] }
 0x48f   : > { %6284 = vmatpush3.msra.mxu1 %v5377_v7 }
 0x490   : > { %6285 = vmatprep.subr.mxu1 %v5392_v48 }
 0x492   : > { %4746 = vmax.xlane.f32.xlu0 %v4745_v60  ;;  %4725 = vmax.xlane.f32.xlu1 %v4724_v8  ;;  %v9374_v60 = vpop.xlane.xlu0 %4605  ;;  %v9376_v8 = vpop.xlane.xlu1 %4608 }
 0x496   : > { %4728 = vmax.xlane.f32.xlu0 %v4727_v57  ;;  %4749 = vmax.xlane.f32.xlu1 %v4748_v35  ;;  %v4769_v57 = vsel %vm311_vm0, %v9280_v34, -inf  ;;  %v4772_v35 = vsel %vm311_vm0, %v9301_v52, -inf  ;;  %v4651_v34 = vmul.f32 0.03125, %v4558_v0  ;;  %v9450_v0 = vsub.s32 %v4812_v54, %v9430_v58  ;;  %v5376_v54 = vld [vmem:[%s9966_s6 + $0x50] sm:$0xff] }
 0x497   : > { %6286 = vmatpush3.msra.mxu1 %v5376_v54 }
 0x498   : > { %v4821_v21 = vrot.slane %v4651_v34, %v9435_v9  ;;  %v4816_v34 = vrot.slane %v4650_v49, %v9450_v0 }
 0x49a   : > { %4752 = vmax.xlane.f32.xlu0 %v4751_v61  ;;  %4755 = vmax.xlane.f32.xlu1 %v4754_v2  ;;  %v9382_v61 = vpop.xlane.xlu0 %4611  ;;  %v4775_v2 = vsel %vm311_vm0, %v9314_v14, -inf }
 0x49e   : > { %4758 = vmax.xlane.f32.xlu0 %v4757_v15  ;;  %4761 = vmax.xlane.f32.xlu1 %v4760_v28  ;;  %v4567_v15 = vpop.xlane.xlu1 %4566  ;;  %v4570_v28 = vpop.xlane.xlu0 %4569 }
 0x49f   : > { %v4655_v11 = vmul.f32 0.03125, %v4570_v28  ;;  %v4654_v51 = vmul.f32 0.03125, %v4567_v15  ;;  %v5391_v15 = vld [vmem:[%s9966_s6 + $0xc8] sm:$0xff] }
 0x4a0   : > { %6287 = vmatprep.subr.mxu1 %v5391_v15 }
 0x4a1   : > { %v4836_v48 = vrot.slane %v4654_v51, %v9450_v0  ;;  %6288 = vmatpush3.msra.mxu1 %v5375_v56  ;;  %v5389_v51 = vld [vmem:[%s9966_s6 + $0xb8] sm:$0xff] }
 0x4a2   : > { %4764 = vmax.xlane.f32.xlu0 %v4763_v4  ;;  %4767 = vmax.xlane.f32.xlu1 %v4766_v45  ;;  %v9386_v4 = vpop.xlane.xlu1 %4614  ;;  %v9388_v45 = vpop.xlane.xlu0 %4617 }
 0x4a6   : > { %4770 = vmax.xlane.f32.xlu0 %v4769_v57  ;;  %4773 = vmax.xlane.f32.xlu1 %v4772_v35  ;;  %v4573_v46 = vpop.xlane.xlu1 %4572  ;;  %v4576_v3 = vpop.xlane.xlu0 %4575 }
 0x4a7   : > { %v4657_v44 = vmul.f32 0.03125, %v4576_v3  ;;  %v4831_v3 = vrot.slane %v4653_v55, %v9435_v9  ;;  %v4656_v63 = vmul.f32 0.03125, %v4573_v46  ;;  %v4827_v55 = vrot.slane %v4652_v53, %v9450_v0 }
 0x4a9   : > { %v4849_v46 = vrot.slane %v4657_v44, %v9435_v9  ;;  %v5374_v44 = vld [vmem:[%s9966_s6 + $0x40] sm:$0xff]  ;;  %v4832_v53 = vsel %vm4822_vm14, %v4831_v3, %v4827_v55  ;;  %v4845_v54 = vrot.slane %v4656_v63, %v9450_v0  ;;  %v5372_v55 = vld [vmem:[%s9966_s6 + $0x30] sm:$0xff] }
 0x4aa   : > { %4776 = vmax.xlane.f32.xlu0 %v4775_v2  ;;  %v9390_v1 = vpop.xlane.xlu1 %4620  ;;  %v9392_v59 = vpop.xlane.xlu0 %4623 }
 0x4ab   : > { %v4850_v3 = vsel %vm4822_vm14, %v4849_v46, %v4845_v54 }
 0x4ae   : > { %v4579_v57 = vpop.xlane.xlu1 %4578  ;;  %v4582_v35 = vpop.xlane.xlu0 %4581 }
 0x4af   : > { %v4659_v28 = vmul.f32 0.03125, %v4582_v35  ;;  %v4840_v35 = vrot.slane %v4655_v11, %v9435_v9  ;;  %v4658_v23 = vmul.f32 0.03125, %v4579_v57  ;;  %v5390_v11 = vld [vmem:[%s9966_s6 + $0xc0] sm:$0xff] }
 0x4b0   : > { %6289 = vmatprep.subr.mxu1 %v5390_v11 }
 0x4b1   : > { %v4858_v57 = vrot.slane %v4659_v28, %v9435_v9  ;;  %v4854_v28 = vrot.slane %v4658_v23, %v9450_v0  ;;  %6290 = vmatpush3.msra.mxu1 %v5374_v44 }
 0x4b2   : > { %6291 = vmatprep.subr.mxu1 %v5389_v51  ;;  %v4671_v51 = vmul.f32 0.03125, %v9388_v45  ;;  %v4672_v45 = vmul.f32 0.03125, %v9390_v1 }
 0x4b3   : > { %v9394_v52 = vpop.xlane.xlu1 %4626 }
 0x4b7   : > { %v9396_v37 = vpop.xlane.xlu0 %4629  ;;  %v9398_v14 = vpop.xlane.xlu1 %4584 }
 0x4bb   : > { %v4588_v2 = vpop.xlane.xlu0 %4587 }
 0x4bc   : > { %v4661_v20 = vmul.f32 0.03125, %v4588_v2  ;;  %v4660_v2 = vmul.f32 0.03125, %v9398_v14  ;;  %v4823_v14 = vsel %vm4822_vm14, %v4821_v21, %v4816_v34  ;;  %v5373_v21 = vld [vmem:[%s9966_s6 + $0x38] sm:$0xff] }
 0x4bd   : > { %v4960_v23 = vsel %vm4959_vm15, %v4832_v53, %v4823_v14  ;;  %6292 = vmatpush3.msra.mxu1 %v5373_v21  ;;  %v4673_v21 = vmul.f32 0.03125, %v9392_v59 }
 0x4be   : > { %v4867_v47 = vrot.slane %v4661_v20, %v9435_v9  ;;  %v4863_v56 = vrot.slane %v4660_v2, %v9450_v0  ;;  %v5388_v20 = vld [vmem:[%s9966_s6 + $0xb0] sm:$0xff] }
 0x4bf   : > { %6293 = vmatprep.subr.mxu1 %v5388_v20 }
 0x4c0   : > { %v4868_v2 = vsel %vm4822_vm14, %v4867_v47, %v4863_v56  ;;  %6294 = vmatpush3.msra.mxu1 %v5372_v55  ;;  %v4669_v47 = vmul.f32 0.03125, %v9382_v61  ;;  %v4670_v61 = vmul.f32 0.03125, %v9386_v4  ;;  %v4675_v56 = vmul.f32 0.03125, %v9396_v37 }
 0x4c1   : > { %v4921_v4 = vrot.slane %v4673_v21, %v9435_v9 }
 0x4c2   : > { %v4908_v1 = vrot.slane %v4670_v61, %v9450_v0 }
 0x4cb   : > { %v9400_v10 = vpop.xlane.xlu1 %4632 }
 0x4cc   : > { %v4676_v37 = vmul.f32 0.03125, %v9400_v10 }
 0x4cf   : > { %v9408_v13 = vpop.xlane.xlu0 %4635  ;;  %v9410_v38 = vpop.xlane.xlu1 %4683 }
 0x4d0   : > { %v4677_v20 = vmul.f32 0.03125, %v9408_v13  ;;  %v4930_v13 = vrot.slane %v4675_v56, %v9435_v9 }
 0x4d2   : > { %v4939_v55 = vrot.slane %v4677_v20, %v9435_v9 }
 0x4d3   : > { %v9412_v22 = vpop.xlane.xlu0 %4686  ;;  %v9420_v16 = vpop.xlane.xlu1 %4689 }
 0x4d7   : > { %v9422_v6 = vpop.xlane.xlu0 %4692  ;;  %v4591_v50 = vpop.xlane.xlu1 %4590 }
 0x4db   : > { %v4594_v19 = vpop.xlane.xlu0 %4593 }
 0x4dc   : > { %v4663_v26 = vmul.f32 0.03125, %v4594_v19  ;;  %v4662_v19 = vmul.f32 0.03125, %v4591_v50  ;;  %v4841_v50 = vsel %vm4822_vm14, %v4840_v35, %v4836_v48  ;;  %v4859_v35 = vsel %vm4822_vm14, %v4858_v57, %v4854_v28 }
 0x4dd   : > { %v4962_v46 = vsel %vm4961_vm1, %v4841_v50, %v4960_v23  ;;  %v4667_v28 = vmul.f32 0.03125, %v9374_v60  ;;  %v4912_v60 = vrot.slane %v4671_v51, %v9435_v9 }
 0x4de   : > { %v4876_v15 = vrot.slane %v4663_v26, %v9435_v9  ;;  %v4872_v26 = vrot.slane %v4662_v19, %v9450_v0  ;;  %v4964_v48 = vsel %vm4963_vm2, %v4850_v3, %v4962_v46  ;;  %v4666_v3 = vmul.f32 0.03125, %v9368_v32 }
 0x4df   : > { %v4966_v19 = vsel %vm4965_vm6, %v4859_v35, %v4964_v48  ;;  %v4894_v23 = vrot.slane %v4667_v28, %v9435_v9  ;;  %v4913_v46 = vsel %vm4822_vm14, %v4912_v60, %v4908_v1 }
 0x4e0   : > { %v4877_v57 = vsel %vm4822_vm14, %v4876_v15, %v4872_v26  ;;  %v4968_v14 = vsel %vm4967_vm7, %v4868_v2, %v4966_v19  ;;  %v4668_v15 = vmul.f32 0.03125, %v9376_v8  ;;  %v4674_v8 = vmul.f32 0.03125, %v9394_v52 }
 0x4e1   : > { %v4970_v53 = vsel %vm4969_vm8, %v4877_v57, %v4968_v14  ;;  %v4890_v35 = vrot.slane %v4666_v3, %v9450_v0 }
 0x4e2   : > { %v4899_v32 = vrot.slane %v4668_v15, %v9450_v0  ;;  %v4926_v10 = vrot.slane %v4674_v8, %v9450_v0 }
 0x4e3   : > { %v9432_v12 = vpop.xlane.xlu1 %4638 }
 0x4e4   : > { %v4678_v26 = vmul.f32 0.03125, %v9432_v12  ;;  %v4935_v12 = vrot.slane %v4676_v37, %v9450_v0 }
 0x4e6   : > { %v4944_v14 = vrot.slane %v4678_v26, %v9450_v0  ;;  %v4940_v51 = vsel %vm4822_vm14, %v4939_v55, %v4935_v12 }
 0x4e7   : > { %v9457_v43 = vpop.xlane.xlu0 %4641  ;;  %v9459_v62 = vpop.xlane.xlu1 %4695 }
 0x4e8   : > { %v4679_v59 = vmul.f32 0.03125, %v9457_v43  ;;  %v4917_v43 = vrot.slane %v4672_v45, %v9450_v0 }
 0x4ea   : > { %v4948_v2 = vrot.slane %v4679_v59, %v9435_v9  ;;  %v4922_v48 = vsel %vm4822_vm14, %v4921_v4, %v4917_v43 }
 0x4eb   : > { %v9482_v7 = vpop.xlane.xlu0 %4698  ;;  %v4597_v49 = vpop.xlane.xlu1 %4596 }
 0x4ec   : > { %v4664_v63 = vmul.f32 0.03125, %v4597_v49  ;;  %v4949_v15 = vsel %vm4822_vm14, %v4948_v2, %v4944_v14 }
 0x4ee   : > { %v4881_v49 = vrot.slane %v4664_v63, %v9450_v0  ;;  %v4903_v63 = vrot.slane %v4669_v47, %v9435_v9 }
 0x4ef   : > { %v4600_v34 = vpop.xlane.xlu0 %4599 }
 0x4f0   : > { %v4665_v11 = vmul.f32 0.03125, %v4600_v34  ;;  %v4904_v52 = vsel %vm4822_vm14, %v4903_v63, %v4899_v32 }
 0x4f2   : > { %v4885_v44 = vrot.slane %v4665_v11, %v9435_v9  ;;  %v4895_v11 = vsel %vm4822_vm14, %v4894_v23, %v4890_v35 }
 0x4f4   : > { %v4886_v54 = vsel %vm4822_vm14, %v4885_v44, %v4881_v49  ;;  %v4973_v49 = vsel %vm4959_vm15, %v4904_v52, %v4895_v11  ;;  %v4931_v44 = vsel %vm4822_vm14, %v4930_v13, %v4926_v10  ;;  %v5042_v52 = vrot.slane %v9482_v7, %v9435_v9 }
 0x4f5   : > { %v4972_v50 = vsel %vm4971_vm9, %v4886_v54, %v4970_v53  ;;  %v4974_v54 = vsel %vm4961_vm1, %v4913_v46, %v4973_v49  ;;  %v5024_v46 = vrot.slane %v9412_v22, %v9435_v9  ;;  %v5029_v10 = vrot.slane %v9420_v16, %v9450_v0 }
 0x4f6   : > { %4983 = vst.msk [vmem:[#allocation4 + $0x3] sm:$0xff] %vm4982_vm10, %v4972_v50  ;;  %v4975_v28 = vsel %vm4963_vm2, %v4922_v48, %v4974_v54  ;;  %v5038_v11 = vrot.slane %v9459_v62, %v9450_v0 }
 0x4f7   : > { %v4976_v21 = vsel %vm4965_vm6, %v4931_v44, %v4975_v28  ;;  %v5387_v28 = vld [vmem:[%s9966_s6 + $0xa8] sm:$0xff] }
 0x4f8   : > { %v4977_v56 = vsel %vm4967_vm7, %v4940_v51, %v4976_v21  ;;  %v5043_v22 = vsel %vm4822_vm14, %v5042_v52, %v5038_v11  ;;  %6295 = vmatprep.subr.mxu1 %v5387_v28  ;;  %v5386_v52 = vld [vmem:[%s9966_s6 + $0xa0] sm:$0xff] }
 0x4f9   : > { %v4978_v20 = vsel %vm4969_vm8, %v4949_v15, %v4977_v56  ;;  %v5371_v15 = vld [vmem:[%s9966_s6 + $0x28] sm:$0xff] }
 0x4fa   : > { %6296 = vmatpush3.msra.mxu1 %v5371_v15 }
 0x4fb   : > { %v4645_v34 = vpop.xlane.xlu1 %4644  ;;  %6297 = vmatprep.subr.mxu1 %v5386_v52 }
 0x4fc   : > { %v4680_v57 = vmul.f32 0.03125, %v4645_v34  ;;  %v5033_v34 = vrot.slane %v9422_v6, %v9435_v9  ;;  %v5020_v6 = vrot.slane %v9410_v38, %v9450_v0 }
 0x4fd   : > { %v5180_v19 = vld [vmem:[#allocation4] sm:$0xff] }
 0x4fe   : > { %5183 = vst.msk [vmem:[#allocation5] sm:$0xff] %vm5182_vm11, %v5180_v19  ;;  %v4953_v3 = vrot.slane %v4680_v57, %v9450_v0  ;;  %v5034_v7 = vsel %vm4822_vm14, %v5033_v34, %v5029_v10  ;;  %v5025_v62 = vsel %vm4822_vm14, %v5024_v46, %v5020_v6  ;;  %v5211_v52 = vld [vmem:[#allocation4 + $0x3] sm:$0xff] }
 0x4ff   : > { %v4648_v47 = vpop.xlane.xlu0 %4647  ;;  %v4702_v53 = vpop.xlane.xlu1 %4701 }
 0x500   : > { %v4681_v50 = vmul.f32 0.03125, %v4648_v47  ;;  %v5047_v12 = vrot.slane %v4702_v53, %v9450_v0  ;;  %v5161_v47 = vsel %vm4959_vm15, %v5034_v7, %v5025_v62 }
 0x501   : > { %v5162_v51 = vsel %vm4961_vm1, %v5043_v22, %v5161_v47 }
 0x502   : > { %v4957_v61 = vrot.slane %v4681_v50, %v9435_v9 }
 0x503   : > { %v4705_v63 = vpop.xlane.xlu0 %4704  ;;  %v4708_v45 = vpop.xlane.xlu1 %4707 }
 0x504   : > { %v4958_v60 = vsel %vm4822_vm14, %v4957_v61, %v4953_v3  ;;  %v5051_v2 = vrot.slane %v4705_v63, %v9435_v9  ;;  %v5056_v16 = vrot.slane %v4708_v45, %v9450_v0 }
 0x505   : > { %v4979_v8 = vsel %vm4971_vm9, %v4958_v60, %v4978_v20 }
 0x506   : > { %4984 = vst.msk [vmem:[#allocation4 + $0xb] sm:$0xff] %vm4982_vm10, %v4979_v8  ;;  %v5052_v14 = vsel %vm4822_vm14, %v5051_v2, %v5047_v12 }
 0x507   : > { %v4711_v59 = vpop.xlane.xlu0 %4710  ;;  %v4714_v23 = vpop.xlane.xlu1 %4713  ;;  %v5163_v21 = vsel %vm4963_vm2, %v5052_v14, %v5162_v51 }
 0x508   : > { %v5060_v48 = vrot.slane %v4711_v59, %v9435_v9  ;;  %v5065_v38 = vrot.slane %v4714_v23, %v9450_v0 }
 0x50a   : > { %v5061_v53 = vsel %vm4822_vm14, %v5060_v48, %v5056_v16 }
 0x50b   : > { %v4717_v32 = vpop.xlane.xlu0 %4716  ;;  %v9570_v4 = vpop.xlane.xlu1 %4731  ;;  %v5164_v63 = vsel %vm4965_vm6, %v5061_v53, %v5163_v21  ;;  %v5185_v53 = vld [vmem:[#allocation4 + $0x1] sm:$0xff] }
 0x50c   : > { %v5069_v57 = vrot.slane %v4717_v32, %v9435_v9  ;;  %v5092_v22 = vrot.slane %v9570_v4, %v9450_v0 }
 0x50d   : > { %v5181_v1 = vld [vmem:[#allocation4 + $0x8] sm:$0xff] }
 0x50e   : > { %5184 = vst.msk [vmem:[#allocation5 + $0x18] sm:$0xff] %vm5182_vm11, %v5181_v1  ;;  %v5070_v50 = vsel %vm4822_vm14, %v5069_v57, %v5065_v38  ;;  %vm5344_vm11 = vcmask 244800  }
 0x50f   : > { %v9572_v37 = vpop.xlane.xlu0 %4734  ;;  %v9574_v35 = vpop.xlane.xlu1 %4737  ;;  %v5165_v60 = vsel %vm4967_vm7, %v5070_v50, %v5164_v63 }
 0x510   : > { %v5096_v10 = vrot.slane %v9572_v37, %v9435_v9  ;;  %v5101_v12 = vrot.slane %v9574_v35, %v9450_v0  ;;  %v5385_v37 = vld [vmem:[%s9966_s6 + $0x98] sm:$0xff] }
 0x512   : > { %v5097_v62 = vsel %vm4822_vm14, %v5096_v10, %v5092_v22  ;;  %v5383_v10 = vld [vmem:[%s9966_s6 + $0x88] sm:$0xff]  ;;  %v5199_v22 = vld [vmem:[#allocation4 + $0xa] sm:$0xff] }
 0x513   : > { %v9577_v13 = vpop.xlane.xlu0 %4740  ;;  %v4720_v26 = vpop.xlane.xlu1 %4719 }
 0x514   : > { %v5074_v54 = vrot.slane %v4720_v26, %v9450_v0  ;;  %v5105_v46 = vrot.slane %v9577_v13, %v9435_v9  ;;  %v5369_v13 = vld [vmem:[%s9966_s6 + $0x18] sm:$0xff] }
 0x517   : > { %v4723_v43 = vpop.xlane.xlu0 %4722  ;;  %v9583_v55 = vpop.xlane.xlu1 %4743 }
 0x518   : > { %v5078_v19 = vrot.slane %v4723_v43, %v9435_v9  ;;  %v5370_v43 = vld [vmem:[%s9966_s6 + $0x20] sm:$0xff]  ;;  %v5110_v35 = vrot.slane %v9583_v55, %v9450_v0 }
 0x519   : > { %6298 = vmatpush3.msra.mxu1 %v5370_v43 }
 0x51a   : > { %v5079_v3 = vsel %vm4822_vm14, %v5078_v19, %v5074_v54  ;;  %6299 = vmatprep.subr.mxu1 %v5385_v37  ;;  %v5106_v19 = vsel %vm4822_vm14, %v5105_v46, %v5101_v12  ;;  %v5382_v12 = vld [vmem:[%s9966_s6 + $0x80] sm:$0xff] }
 0x51b   : > { %v4747_v49 = vpop.xlane.xlu0 %4746  ;;  %v4726_v44 = vpop.xlane.xlu1 %4725  ;;  %v5166_v8 = vsel %vm4969_vm8, %v5079_v3, %v5165_v60  ;;  %6300 = vmatpush3.msra.mxu1 %v5369_v13  ;;  %v5168_v50 = vsel %vm4959_vm15, %v5106_v19, %v5097_v62  ;;  %v5198_v60 = vld [vmem:[#allocation4 + $0x2] sm:$0xff]  ;;  %v5212_v19 = vld [vmem:[#allocation4 + $0xb] sm:$0xff]  ;;  %vm5263_vm15 = vcmask 212000  }
 0x51c   : > { %v5083_v45 = vrot.slane %v4726_v44, %v9450_v0  ;;  %v5114_v2 = vrot.slane %v4747_v49, %v9435_v9  ;;  %v5186_v37 = vld [vmem:[#allocation4 + $0x9] sm:$0xff] }
 0x51d   : > { %v5224_v13 = vld [vmem:[#allocation4 + $0x4] sm:$0xff] }
 0x51e   : > { %v5115_v14 = vsel %vm4822_vm14, %v5114_v2, %v5110_v35  ;;  %v5367_v2 = vld [vmem:[%s9966_s6 + $0x8] sm:$0xff]  ;;  %v5238_v35 = vld [vmem:[#allocation4 + $0xd] sm:$0xff] }
 0x51f   : > { %v4729_v61 = vpop.xlane.xlu0 %4728  ;;  %v4750_v56 = vpop.xlane.xlu1 %4749  ;;  %v5169_v3 = vsel %vm4961_vm1, %v5115_v14, %v5168_v50  ;;  %vm5276_vm1 = vcmask 392400  }
 0x520   : > { %v5087_v20 = vrot.slane %v4729_v61, %v9435_v9  ;;  %v5119_v49 = vrot.slane %v4750_v56, %v9450_v0 }
 0x522   : > { %v5088_v59 = vsel %vm4822_vm14, %v5087_v20, %v5083_v45 }
 0x523   : > { %v5167_v23 = vsel %vm4971_vm9, %v5088_v59, %v5166_v8  ;;  %v4753_v32 = vpop.xlane.xlu0 %4752  ;;  %v4756_v1 = vpop.xlane.xlu1 %4755 }
 0x524   : > { %5178 = vst.msk [vmem:[#allocation4 + $0x1b] sm:$0xff] %vm4982_vm10, %v5167_v23  ;;  %v5123_v57 = vrot.slane %v4753_v32, %v9435_v9  ;;  %v5128_v38 = vrot.slane %v4756_v1, %v9450_v0 }
 0x526   : > { %v5124_v55 = vsel %vm4822_vm14, %v5123_v57, %v5119_v49  ;;  %v5366_v57 = vld [vmem:[%s9966_s6] sm:$0xff] }
 0x527   : > { %v4759_v26 = vpop.xlane.xlu0 %4758  ;;  %v4762_v34 = vpop.xlane.xlu1 %4761  ;;  %v5170_v56 = vsel %vm4963_vm2, %v5124_v55, %v5169_v3  ;;  %vm5289_vm2 = vcmask 572800  }
 0x528   : > { %v5132_v16 = vrot.slane %v4759_v26, %v9435_v9  ;;  %v5137_v54 = vrot.slane %v4762_v34, %v9450_v0  ;;  %v5384_v34 = vld [vmem:[%s9966_s6 + $0x90] sm:$0xff] }
 0x529   : > { %6301 = vmatprep.subr.mxu1 %v5384_v34 }
 0x52a   : > { %v5133_v28 = vsel %vm4822_vm14, %v5132_v16, %v5128_v38  ;;  %v9706_v16 = vld [vmem:[%s9966_s6 + $0x130] sm:$0xf] }
 0x52b   : > { %v4765_v11 = vpop.xlane.xlu0 %4764  ;;  %v4768_v48 = vpop.xlane.xlu1 %4767  ;;  %v5279_v6 = vld [vmem:[#allocation4 + $0x19] sm:$0xff]  ;;  %v5171_v8 = vsel %vm4965_vm6, %v5133_v28, %v5170_v56  ;;  %vm5234_vm6 = vcmask 900800  }
 0x52c   : > { %v5266_v7 = vld [vmem:[#allocation4 + $0x18] sm:$0xff]  ;;  %5283 = vrot.lane.b32.xlu0 %v5279_v6, %s6580_s17  ;;  %v5141_v44 = vrot.slane %v4765_v11, %v9435_v9  ;;  %v5146_v15 = vrot.slane %v4768_v48, %v9450_v0  ;;  %v5253_v11 = vld [vmem:[#allocation4 + $0x6] sm:$0xff]  ;;  %v5254_v6 = vld [vmem:[#allocation4 + $0xe] sm:$0xff] }
 0x52d   : > { %5270 = vrot.lane.b32.xlu1 %v5266_v7, %s6581_s18  ;;  %v5292_v47 = vld [vmem:[#allocation4 + $0x1a] sm:$0xff]  ;;  %v5237_v7 = vld [vmem:[#allocation4 + $0x5] sm:$0xff] }
 0x52e   : > { %v5142_v61 = vsel %vm4822_vm14, %v5141_v44, %v5137_v54  ;;  %v5305_v20 = vld [vmem:[#allocation4 + $0x1b] sm:$0xff]  ;;  %v5225_v44 = vld [vmem:[#allocation4 + $0xc] sm:$0xff] }
 0x52f   : > { %v4771_v4 = vpop.xlane.xlu0 %4770  ;;  %v4774_v21 = vpop.xlane.xlu1 %4773  ;;  %v5172_v32 = vsel %vm4967_vm7, %v5142_v61, %v5171_v8  ;;  %vm5302_vm7 = vcmask 753200  }
 0x530   : > { %v5150_v51 = vrot.slane %v4771_v4, %v9435_v9  ;;  %5296 = vrot.lane.b32.xlu0 %v5292_v47, %s6582_s23  ;;  %v5155_v59 = vrot.slane %v4774_v21, %v9450_v0 }
 0x531   : > { %5189 = vrot.lane.b32.xlu1 %v5185_v53, %s6583_s24 }
 0x532   : > { %v5151_v63 = vsel %vm4822_vm14, %v5150_v51, %v5146_v15 }
 0x533   : > { %v4777_v45 = vpop.xlane.xlu0 %4776  ;;  %v5173_v1 = vsel %vm4969_vm8, %v5151_v63, %v5172_v32  ;;  %vm5247_vm8 = vcmask 1048432  }
 0x534   : > { %v5159_v23 = vrot.slane %v4777_v45, %v9435_v9  ;;  %5309 = vrot.lane.b32.xlu0 %v5305_v20, %s6584_s25  ;;  %v5368_v9 = vld [vmem:[%s9966_s6 + $0x10] sm:$0xff] }
 0x535   : > { %5202 = vrot.lane.b32.xlu1 %v5198_v60, %s6585_s9  ;;  %6302 = vmatpush3.msra.mxu1 %v5368_v9  ;;  %v5403_v9 = vld [vmem:[%s9966_s6 + $0x128] sm:$0xff] }
 0x536   : > { %v5160_v26 = vsel %vm4822_vm14, %v5159_v23, %v5155_v59  ;;  %6303 = vmatprep.subr.mxu1 %v5383_v10  ;;  %vm5249_vm14 = vcmask 31744  }
 0x537   : > { %v5174_v0 = vsel %vm4971_vm9, %v5160_v26, %v5173_v1  ;;  %6304 = vmatpush3.msra.mxu1 %v5367_v2  ;;  %vm5315_vm9 = vcmask 933600  }
 0x538   : > { %5179 = vst.msk [vmem:[#allocation4 + $0x23] sm:$0xff] %vm4982_vm10, %v5174_v0  ;;  %6305 = vmatprep.subr.mxu1 %v5382_v12  ;;  %vm5328_vm10 = vcmask 1048464   ;;  %v5398_v12 = vld [vmem:[%s9966_s6 + $0x100] sm:$0xff] }
 0x539   : > { %5215 = vrot.lane.b32.xlu1 %v5211_v52, %s6586_s16  ;;  %6306 = vmatpush3.msra.mxu1 %v5366_v57 }
 0x53a   : > { %6394 = vmatprep.subr.msk.mxu1 %vm5412_vm12, %v9706_v16 }
 0x53f   : > { %v5318_v43 = vld [vmem:[#allocation4 + $0x1c] sm:$0xff]  ;;  %v5319_v38 = vld [vmem:[#allocation4 + $0x24] sm:$0xff] }
 0x540   : > { %v5267_v46 = vld [vmem:[#allocation4 + $0x20] sm:$0xff]  ;;  %5322 = vrot.lane.b32.xlu0 %v5318_v43, %s6587_s19  ;;  %v5402_v43 = vld [vmem:[%s9966_s6 + $0x120] sm:$0xff] }
 0x541   : > { %5272 = vrot.lane.b32.xlu1 %v5267_v46, %s6581_s18  ;;  %v5280_v48 = vld [vmem:[#allocation4 + $0x21] sm:$0xff] }
 0x542   : > { %v5293_v49 = vld [vmem:[#allocation4 + $0x22] sm:$0xff] }
 0x543   : > { %v5306_v62 = vld [vmem:[#allocation4 + $0x23] sm:$0xff] }
 0x544   : > { %5257 = vrot.lane.b32.xlu0 %v5253_v11, %s6588_s15  ;;  %v5334_v14 = vld [vmem:[#allocation4 + $0x1d] sm:$0xff]  ;;  %v5335_v47 = vld [vmem:[#allocation4 + $0x25] sm:$0xff] }
 0x545   : > { %5285 = vrot.lane.b32.xlu1 %v5280_v48, %s6580_s17  ;;  %s6590_s17 = smov 88   ;;  %v5347_v4 = vld [vmem:[#allocation4 + $0x1e] sm:$0xff]  ;;  %v5348_v53 = vld [vmem:[#allocation4 + $0x26] sm:$0xff] }
 0x546   : > { %v5401_v46 = vld [vmem:[%s9966_s6 + $0x118] sm:$0xff]  ;;  %v5400_v11 = vld [vmem:[%s9966_s6 + $0x110] sm:$0xff]  ;;  %v5399_v48 = vld [vmem:[%s9966_s6 + $0x108] sm:$0xff] }
 0x548   : > { %5259 = vrot.lane.b32.xlu0 %v5254_v6, %s6588_s15 }
 0x549   : > { %5241 = vrot.lane.b32.xlu1 %v5237_v7, %s6589_s21 }
 0x54c   : > { %5191 = vrot.lane.b32.xlu0 %v5186_v37, %s6583_s24  ;;  %s6591_s24 = smov 8  }
 0x54d   : > { %5228 = vrot.lane.b32.xlu1 %v5224_v13, %s6590_s17 }
 0x550   : > { %5204 = vrot.lane.b32.xlu0 %v5199_v22, %s6585_s9  ;;  %s6592_s9 = smov 30  }
 0x551   : > { %5243 = vrot.lane.b32.xlu1 %v5238_v35, %s6589_s21  ;;  %s6520_s21 = scalar_lea.vmem %s6519_s30, 8192 }
 0x554   : > { %5217 = vrot.lane.b32.xlu0 %v5212_v19, %s6586_s16 }
 0x555   : > { %5298 = vrot.lane.b32.xlu1 %v5293_v49, %s6582_s23 }
 0x558   : > { %5230 = vrot.lane.b32.xlu0 %v5225_v44, %s6590_s17 }
 0x559   : > { %5311 = vrot.lane.b32.xlu1 %v5306_v62, %s6584_s25  ;;  %s6014_s25 = sshll.u32 %s6659_s3, 12  ;;  %s9919_s3 = scalar_lea.sflag [#allocation8], %s270_s14 }
 0x55a   : > { %s9907_s20 = scalar_lea.hbm %s9967_s7, %s6014_s25 }
 0x55c   : > { %5338 = vrot.lane.b32.xlu0 %v5334_v14, %s6591_s24 }
 0x55d   : > { %5324 = vrot.lane.b32.xlu1 %v5319_v38, %s6587_s19 }
 0x560   : > { %5351 = vrot.lane.b32.xlu0 %v5347_v4, %s6592_s9 }
 0x561   : > { %5340 = vrot.lane.b32.xlu1 %v5335_v47, %s6591_s24 }
 0x565   : > { %5353 = vrot.lane.b32.xlu1 %v5348_v53, %s6592_s9  ;;  %s5930_s9 = sshll.u32 %s270_s14, 8 }
 0x566   : > { %s9782_s23 = scalar_lea.vmem [#allocation7], %s5930_s9 }
 0x567   : > { %s5864_s16 = sshll.u32 %s9782_s23, 4  ;;  %s9911_s16 = int_to_ptr.vmem [resolvable:$true] %s5864_s16 }
 0x568   : > { %s6514_s18 = scalar_lea.vmem %s9911_s16, 4096  ;;  %p6521_p0 = scmp.lt.s32.totalorder %s9911_s16, %s6519_s30 }
 0x569   : > { %p6515_p11 = scmp.ne.s32.totalorder %s9911_s16, %s6514_s18  ;;  %p6522_p1 = scmp.lt.s32.totalorder %s6520_s21, %s6514_s18 }
 0x56b   : > { %p6516_p12 = pnand %p6515_p11, %p6676_p5  ;;  %p6523_p2 = por %p6522_p1, %p6521_p0 }
 0x56d   : > { %p6517_p13 = pneg %p6516_p12 }
 0x56f   : > { %p6524_p3 = pnand %p6523_p2, %p6517_p13 }
 0x59e   : > { %v5284_v54 = vpop.permute.xlu0 %5283 }
 0x59f   : > { %v5271_v55 = vpop.permute.xlu1 %5270 }
 0x5a2   : > { %v5297_v28 = vpop.permute.xlu0 %5296 }
 0x5a3   : > { %v5190_v51 = vpop.permute.xlu1 %5189 }
 0x5a4   : > { %5196 = vst.msk [vmem:[#allocation5] sm:$0xff] %vm5195_vm13, %v5190_v51 }
 0x5a6   : > { %v5310_v21 = vpop.permute.xlu0 %5309 }
 0x5a7   : > { %v5203_v50 = vpop.permute.xlu1 %5202 }
 0x5a8   : > { %5209 = vst.msk [vmem:[#allocation5] sm:$0xff] %vm5208_vm3, %v5203_v50 }
 0x5ab   : > { %v5216_v15 = vpop.permute.xlu1 %5215 }
 0x5ac   : > { %5222 = vst.msk [vmem:[#allocation5] sm:$0xff] %vm5221_vm4, %v5216_v15 }
 0x5b2   : > { %v5323_v3 = vpop.permute.xlu0 %5322 }
 0x5b3   : > { %v5273_v61 = vpop.permute.xlu1 %5272  ;;  %5331 = vst.msk [vmem:[#allocation5 + $0x10] sm:$0xff] %vm5330_vm5, %v5323_v3 }
 0x5b6   : > { %v5258_v56 = vpop.permute.xlu0 %5257 }
 0x5b7   : > { %v5286_v63 = vpop.permute.xlu1 %5285 }
 0x5ba   : > { %v5260_v45 = vpop.permute.xlu0 %5259 }
 0x5bb   : > { %v5242_v20 = vpop.permute.xlu1 %5241 }
 0x5bc   : > { %5250 = vst.msk [vmem:[#allocation5 + $0x8] sm:$0xff] %vm5249_vm14, %v5242_v20 }
 0x5bd   : > { %5264 = vst.msk [vmem:[#allocation5 + $0x8] sm:$0xff] %vm5263_vm15, %v5258_v56  ;;  %v5602_v56 = vsub.s32 2, %v9430_v58 }
 0x5be   : > { %5277 = vst.msk [vmem:[#allocation5 + $0x8] sm:$0xff] %vm5276_vm1, %v5271_v55  ;;  %v5192_v60 = vpop.permute.xlu0 %5191 }
 0x5bf   : > { %v5229_v8 = vpop.permute.xlu1 %5228  ;;  %5290 = vst.msk [vmem:[#allocation5 + $0x8] sm:$0xff] %vm5289_vm2, %v5284_v54 }
 0x5c0   : > { %5197 = vst.msk [vmem:[#allocation5 + $0x18] sm:$0xff] %vm5195_vm13, %v5192_v60  ;;  %vm5405_vm13 = vcmask 424960   ;;  %v5613_v60 = vsub.s32 3, %v9430_v58 }
 0x5c1   : > { %5235 = vst.msk [vmem:[#allocation5] sm:$0xff] %vm5234_vm6, %v5229_v8 }
 0x5c2   : > { %5303 = vst.msk [vmem:[#allocation5 + $0x8] sm:$0xff] %vm5302_vm7, %v5297_v28  ;;  %v5205_v59 = vpop.permute.xlu0 %5204  ;;  %v5580_v28 = vsub.s32 0, %v9430_v58 }
 0x5c3   : > { %5248 = vst.msk [vmem:[#allocation5] sm:$0xff] %vm5247_vm8, %v5242_v20  ;;  %v5244_v23 = vpop.permute.xlu1 %5243 }
 0x5c4   : > { %5316 = vst.msk [vmem:[#allocation5 + $0x8] sm:$0xff] %vm5315_vm9, %v5310_v21 }
 0x5c5   : > { %5329 = vst.msk [vmem:[#allocation5 + $0x8] sm:$0xff] %vm5328_vm10, %v5323_v3  ;;  %v5591_v3 = vsub.s32 1, %v9430_v58 }
 0x5c6   : > { %5210 = vst.msk [vmem:[#allocation5 + $0x18] sm:$0xff] %vm5208_vm3, %v5205_v59  ;;  %v5218_v32 = vpop.permute.xlu0 %5217  ;;  %v5624_v59 = vsub.s32 4, %v9430_v58 }
 0x5c7   : > { %5252 = vst.msk [vmem:[#allocation5 + $0x20] sm:$0xff] %vm5249_vm14, %v5244_v23  ;;  %v5299_v1 = vpop.permute.xlu1 %5298 }
 0x5c8   : > { %5265 = vst.msk [vmem:[#allocation5 + $0x20] sm:$0xff] %vm5263_vm15, %v5260_v45 }
 0x5c9   : > { %5278 = vst.msk [vmem:[#allocation5 + $0x20] sm:$0xff] %vm5276_vm1, %v5273_v61 }
 0x5ca   : > { %5291 = vst.msk [vmem:[#allocation5 + $0x20] sm:$0xff] %vm5289_vm2, %v5286_v63  ;;  %v5360_v34 = vld [vmem:[#allocation5] sm:$0xff]  ;;  %v5231_v0 = vpop.permute.xlu0 %5230 }
 0x5cb   : > { %5223 = vst.msk [vmem:[#allocation5 + $0x18] sm:$0xff] %vm5221_vm4, %v5218_v32  ;;  %v5312_v52 = vpop.permute.xlu1 %5311  ;;  %v5635_v32 = vsub.s32 5, %v9430_v58 }
 0x5cc   : > { %5304 = vst.msk [vmem:[#allocation5 + $0x20] sm:$0xff] %vm5302_vm7, %v5299_v1  ;;  %v5361_v26 = vld [vmem:[#allocation5 + $0x8] sm:$0xff] }
 0x5cd   : > { %5480 = vmatprep.mubr.f32.mxu1 %v5361_v26  ;;  %5236 = vst.msk [vmem:[#allocation5 + $0x18] sm:$0xff] %vm5234_vm6, %v5231_v0  ;;  %v5646_v26 = vsub.s32 6, %v9430_v58 }
 0x5ce   : > { %5481 = vmatmul.mubr.f32.vlgmr.msra.gmra.mxu1 %v5360_v34  ;;  %5317 = vst.msk [vmem:[#allocation5 + $0x20] sm:$0xff] %vm5315_vm9, %v5312_v52  ;;  %v5339_v10 = vpop.permute.xlu0 %5338 }
 0x5cf   : > { %6395 = vmatpush3.msk.msra.mxu1 %vm5412_vm12, %v9706_v16  ;;  %5251 = vst.msk [vmem:[#allocation5 + $0x18] sm:$0xff] %vm5247_vm8, %v5244_v23  ;;  %v5325_v2 = vpop.permute.xlu1 %5324  ;;  %vm5357_vm12 = vcmask 425200  }
 0x5d0   : > { %6396 = vmatprep.subr.mxu1 %v5403_v9  ;;  %5345 = vst.msk [vmem:[#allocation5 + $0x10] sm:$0xff] %vm5344_vm11, %v5339_v10 }
 0x5d1   : > { %6397 = vmatpush3.msra.mxu1 %v5403_v9  ;;  %5332 = vst.msk [vmem:[#allocation5 + $0x20] sm:$0xff] %vm5328_vm10, %v5325_v2 }
 0x5d2   : > { %6398 = vmatprep.subr.mxu1 %v5402_v43  ;;  %5333 = vst.msk [vmem:[#allocation5 + $0x28] sm:$0xff] %vm5330_vm5, %v5325_v2  ;;  %v5352_v6 = vpop.permute.xlu0 %5351 }
 0x5d3   : > { %6399 = vmatpush3.msra.mxu1 %v5402_v43  ;;  %v5341_v7 = vpop.permute.xlu1 %5340  ;;  %5358 = vst.msk [vmem:[#allocation5 + $0x10] sm:$0xff] %vm5357_vm12, %v5352_v6 }
 0x5d4   : > { %6400 = vmatprep.subr.mxu1 %v5401_v46  ;;  %5346 = vst.msk [vmem:[#allocation5 + $0x28] sm:$0xff] %vm5344_vm11, %v5341_v7 }
 0x5d5   : > { %6401 = vmatpush3.msra.mxu1 %v5401_v46 }
 0x5d6   : > { %6402 = vmatprep.subr.mxu1 %v5400_v11  ;;  %v5363_v13 = vld [vmem:[#allocation5 + $0x18] sm:$0xff] }
 0x5d7   : > { %6403 = vmatpush3.msra.mxu1 %v5400_v11  ;;  %v5354_v57 = vpop.permute.xlu1 %5353 }
 0x5d8   : > { %6404 = vmatprep.subr.mxu1 %v5399_v48  ;;  %v5364_v37 = vld [vmem:[#allocation5 + $0x20] sm:$0xff]  ;;  %5359 = vst.msk [vmem:[#allocation5 + $0x28] sm:$0xff] %vm5357_vm12, %v5354_v57 }
 0x5d9   : > { %6405 = vmatpush3.msra.mxu1 %v5399_v48  ;;  %5485 = vmatprep.mubr.f32.mxu1 %v5364_v37  ;;  %v5657_v48 = vsub.s32 7, %v9430_v58 }
 0x5da   : > { %6406 = vmatprep.subr.mxu1 %v5398_v12  ;;  %5486 = vmatmul.mubr.f32.gmra.mxu1 %v5363_v13  ;;  %v5362_v22 = vld [vmem:[#allocation5 + $0x10] sm:$0xff] }
 0x5db   : > { %6407 = vmatpush3.msra.mxu1 %v5398_v12  ;;  %6408 = vmatprep.mubr.msk.f32.mxu1 %vm5405_vm13, %v5362_v22 }
 0x5df   : > { %v5365_v35 = vld [vmem:[#allocation5 + $0x28] sm:$0xff] }
 0x5e0   : > { %6409 = vmatmul.mubr.msk.f32.vlgmr.msra.gmra.mxu1 %vm5405_vm13, %v5365_v35 }
 0x68e   : > { %v6307_v16 = vpop.f32.mrf.mxu1 }
 0x690   : > { %v6308_v19 = vpop.f32.mrf.mxu1 }
 0x691   : > { %v6309_v53 = vadd.f32 %v6308_v19, %v6307_v16 }
 0x69a   : > { %v6310_v49 = vpop.f32.mrf.mxu1 }
 0x69c   : > { %v6311_v44 = vpop.f32.mrf.mxu1 }
 0x69d   : > { %v6312_v62 = vadd.f32 %v6311_v44, %v6310_v49 }
 0x6a0   : > { %v6410_v14 = vpop.f32.mrf.mxu1 }
 0x6a1   : > { %v5563_v38 = vadd.f32 %v6410_v14, %v6312_v62 }
 0x6a2   : > { %v5557_v47 = vpop.f32.mrf.mxu1 }
 0x6a3   : > { %v6007_v4 = vmul.f32 -1.442695, %v5563_v38  ;;  %v5558_v51 = vadd.f32 %v6309_v53, %v5557_v47 }
 0x6a5   : > { %6504 = vpow2.f32 %v6007_v4  ;;  %v6006_v50 = vmul.f32 -1.442695, %v5558_v51  ;;  %v10071_v4 = vld [vmem:[#allocation26_spill] sm:$0xff]  ;;  %v10074_v51 = vld [vmem:[#allocation28_spill] sm:$0xff] }
 0x6b2   : > { %v6505_v55 = vpop.eup %6504 }
 0x6b3   : > { %v5573_v54 = vadd.f32 1.0, %v6505_v55  ;;  %v10073_v55 = vld [vmem:[#allocation45_spill] sm:$0xff] }
 0x6b5   : > { %6506 = vrcp.f32 %v5573_v54 }
 0x6b6   : > { %6508 = vpow2.f32 %v6006_v50  ;;  %v10075_v50 = vld [vmem:[#allocation27_spill] sm:$0xff] }
 0x6c2   : > { %v6507_v15 = vpop.eup %6506 }
 0x6c3   : > { %v5669_v21 = vrot.slane %v6507_v15, %v5580_v28  ;;  %v5680_v61 = vrot.slane %v6507_v15, %v5591_v3  ;;  %v6509_v63 = vpop.eup %6508  ;;  %v5691_v20 = vrot.slane %v6507_v15, %v5602_v56  ;;  %v5702_v8 = vrot.slane %v6507_v15, %v5613_v60 }
 0x6c4   : > { %v5572_v45 = vadd.f32 1.0, %v6509_v63  ;;  %v5713_v23 = vrot.slane %v6507_v15, %v5624_v59  ;;  %v5724_v1 = vrot.slane %v6507_v15, %v5635_v32  ;;  %v5735_v34 = vrot.slane %v6507_v15, %v5646_v26 }
 0x6c5   : > { %5675 = vbcast.lane.b32.xlu1 %v5669_v21, 264  ;;  %5671 = vbcast.lane.b32.xlu0 %v5669_v21, 256  ;;  %v5746_v7 = vrot.slane %v6507_v15, %v5657_v48  ;;  %v10076_v15 = vld [vmem:[#allocation50_spill] sm:$0xff] }
 0x6c6   : > { %6510 = vrcp.f32 %v5572_v45  ;;  %v10079_v45 = vld [vmem:[#allocation29_spill] sm:$0xff] }
 0x6c9   : > { %5686 = vbcast.lane.b32.xlu1 %v5680_v61, 264  ;;  %5682 = vbcast.lane.b32.xlu0 %v5680_v61, 256 }
 0x6cd   : > { %5697 = vbcast.lane.b32.xlu1 %v5691_v20, 264  ;;  %5693 = vbcast.lane.b32.xlu0 %v5691_v20, 256 }
 0x6d1   : > { %5708 = vbcast.lane.b32.xlu1 %v5702_v8, 264  ;;  %5704 = vbcast.lane.b32.xlu0 %v5702_v8, 256 }
 0x6d3   : > { %v6511_v9 = vpop.eup %6510 }
 0x6d4   : > { %v5581_v0 = vrot.slane %v6511_v9, %v5580_v28  ;;  %v5592_v52 = vrot.slane %v6511_v9, %v5591_v3  ;;  %v5603_v43 = vrot.slane %v6511_v9, %v5602_v56  ;;  %v5614_v46 = vrot.slane %v6511_v9, %v5613_v60  ;;  %v10077_v3 = vld [vmem:[#allocation49_spill] sm:$0xff]  ;;  %v10078_v56 = vld [vmem:[#allocation30_spill] sm:$0xff] }
 0x6d5   : > { %5719 = vbcast.lane.b32.xlu1 %v5713_v23, 264  ;;  %5715 = vbcast.lane.b32.xlu0 %v5713_v23, 256  ;;  %v5625_v10 = vrot.slane %v6511_v9, %v5624_v59  ;;  %v5636_v2 = vrot.slane %v6511_v9, %v5635_v32  ;;  %v5647_v11 = vrot.slane %v6511_v9, %v5646_v26  ;;  %v10080_v59 = vld [vmem:[#allocation54_spill] sm:$0xff]  ;;  %v10081_v32 = vld [vmem:[#allocation53_spill] sm:$0xff]  ;;  %v10082_v26 = vld [vmem:[#allocation32_spill] sm:$0xff] }
 0x6d6   : > { %v5658_v6 = vrot.slane %v6511_v9, %v5657_v48  ;;  %v10083_v9 = vld [vmem:[#allocation31_spill] sm:$0xff] }
 0x6d7   : > { %v10086_v48 = vld [vmem:[#allocation11_spill] sm:$0xff] }
 0x6d9   : > { %5730 = vbcast.lane.b32.xlu1 %v5724_v1, 264  ;;  %5726 = vbcast.lane.b32.xlu0 %v5724_v1, 256 }
 0x6dd   : > { %5741 = vbcast.lane.b32.xlu1 %v5735_v34, 264  ;;  %5737 = vbcast.lane.b32.xlu0 %v5735_v34, 256 }
 0x6e1   : > { %5587 = vbcast.lane.b32.xlu1 %v5581_v0, 264  ;;  %5583 = vbcast.lane.b32.xlu0 %v5581_v0, 256 }
 0x6e5   : > { %5598 = vbcast.lane.b32.xlu1 %v5592_v52, 264  ;;  %5594 = vbcast.lane.b32.xlu0 %v5592_v52, 256 }
 0x6e9   : > { %5609 = vbcast.lane.b32.xlu1 %v5603_v43, 264  ;;  %5605 = vbcast.lane.b32.xlu0 %v5603_v43, 256 }
 0x6ed   : > { %5620 = vbcast.lane.b32.xlu1 %v5614_v46, 264  ;;  %5616 = vbcast.lane.b32.xlu0 %v5614_v46, 256  ;;  %v10084_v46 = vld [vmem:[#allocation36_spill] sm:$0xff] }
 0x6f1   : > { %5631 = vbcast.lane.b32.xlu1 %v5625_v10, 264  ;;  %5627 = vbcast.lane.b32.xlu0 %v5625_v10, 256 }
 0x6f5   : > { %5642 = vbcast.lane.b32.xlu1 %v5636_v2, 264  ;;  %5638 = vbcast.lane.b32.xlu0 %v5636_v2, 256  ;;  %v10085_v2 = vld [vmem:[#allocation35_spill] sm:$0xff] }
 0x6f9   : > { %5653 = vbcast.lane.b32.xlu1 %v5647_v11, 264  ;;  %5649 = vbcast.lane.b32.xlu0 %v5647_v11, 256 }
 0x6fd   : > { %5664 = vbcast.lane.b32.xlu1 %v5658_v6, 264  ;;  %5660 = vbcast.lane.b32.xlu0 %v5658_v6, 256 }
 0x701   : > { %5752 = vbcast.lane.b32.xlu1 %v5746_v7, 264  ;;  %5748 = vbcast.lane.b32.xlu0 %v5746_v7, 256  ;;  %v10087_v7 = vld [vmem:[#allocation10_spill] sm:$0xff] }
 0x737   : > { %v5676_v12 = vpop.permute.xlu1 %5675  ;;  %v5672_v57 = vpop.permute.xlu0 %5671 }
 0x738   : > { %v5771_v37 = vmul.f32 %v5676_v12, %v9141_v39  ;;  %v5770_v13 = vmul.f32 %v5672_v57, %v9136_v25 }
 0x73a   : > { %v5803_v22 = vadd.f32 %v5771_v37, %v7115_v24  ;;  %v5802_v35 = vadd.f32 %v5770_v13, %v7104_v27  ;;  %v10088_v13 = vld [vmem:[#allocation38_spill] sm:$0xff] }
 0x73b   : > { %v5687_v58 = vpop.permute.xlu1 %5686  ;;  %v5683_v16 = vpop.permute.xlu0 %5682 }
 0x73c   : > { %5835 = vst.msk [vmem:[%s9782_s23 + $0x88] sm:$0xff] %vm311_vm0, %v5803_v22  ;;  %5834 = vst.msk [vmem:[%s9782_s23 + $0x80] sm:$0xff] %vm311_vm0, %v5802_v35  ;;  %v5773_v25 = vmul.f32 %v5687_v58, %v9158_v29  ;;  %v5772_v24 = vmul.f32 %v5683_v16, %v9148_v5  ;;  %v10089_v35 = vld [vmem:[#allocation37_spill] sm:$0xff] }
 0x73d   : > { %v10090_v16 = vld [vmem:[#allocation13_spill] sm:$0xff] }
 0x73e   : > { %v5805_v27 = vadd.f32 %v5773_v25, %v7173_v31  ;;  %v5804_v39 = vadd.f32 %v5772_v24, %v7170_v33  ;;  %v10091_v24 = vld [vmem:[#allocation12_spill] sm:$0xff] }
 0x73f   : > { %v5698_v19 = vpop.permute.xlu1 %5697  ;;  %v5694_v49 = vpop.permute.xlu0 %5693 }
 0x740   : > { %5837 = vst.msk [vmem:[%s9782_s23 + $0x98] sm:$0xff] %vm311_vm0, %v5805_v27  ;;  %5836 = vst.msk [vmem:[%s9782_s23 + $0x90] sm:$0xff] %vm311_vm0, %v5804_v39  ;;  %v5775_v44 = vmul.f32 %v5698_v19, %v9181_v17  ;;  %v5774_v62 = vmul.f32 %v5694_v49, %v9171_v18  ;;  %v10092_v49 = vld [vmem:[#allocation40_spill] sm:$0xff] }
 0x742   : > { %v5807_v29 = vadd.f32 %v5775_v44, %v7225_v41  ;;  %v5806_v5 = vadd.f32 %v5774_v62, %v7222_v40  ;;  %v10072_v40 = vld [vmem:[#allocation47_spill] sm:$0xff] }
 0x743   : > { %v5709_v14 = vpop.permute.xlu1 %5708  ;;  %v5705_v31 = vpop.permute.xlu0 %5704  ;;  %v10093_v62 = vld [vmem:[#allocation39_spill] sm:$0xff] }
 0x744   : > { %5839 = vst.msk [vmem:[%s9782_s23 + $0xa8] sm:$0xff] %vm311_vm0, %v5807_v29  ;;  %5838 = vst.msk [vmem:[%s9782_s23 + $0xa0] sm:$0xff] %vm311_vm0, %v5806_v5  ;;  %v5777_v33 = vmul.f32 %v5709_v14, %v9205_v42  ;;  %v5776_v38 = vmul.f32 %v5705_v31, %v9195_v30  ;;  %v10094_v5 = vld [vmem:[#allocation15_spill] sm:$0xff]  ;;  %v10095_v31 = vld [vmem:[#allocation14_spill] sm:$0xff] }
 0x746   : > { %v5809_v17 = vadd.f32 %v5777_v33, %v7279_v36  ;;  %v5808_v18 = vadd.f32 %v5776_v38, %v10071_v4  ;;  %v10096_v4 = vld [vmem:[#allocation42_spill] sm:$0xff] }
 0x747   : > { %v5720_v47 = vpop.permute.xlu1 %5719  ;;  %v5716_v41 = vpop.permute.xlu0 %5715 }
 0x748   : > { %5841 = vst.msk [vmem:[%s9782_s23 + $0xb8] sm:$0xff] %vm311_vm0, %v5809_v17  ;;  %5840 = vst.msk [vmem:[%s9782_s23 + $0xb0] sm:$0xff] %vm311_vm0, %v5808_v18  ;;  %v5779_v53 = vmul.f32 %v5720_v47, %v10072_v40  ;;  %v5778_v54 = vmul.f32 %v5716_v41, %v10073_v55  ;;  %v10097_v47 = vld [vmem:[#allocation41_spill] sm:$0xff]  ;;  %v10099_v55 = vld [vmem:[#allocation16_spill] sm:$0xff] }
 0x749   : > { %v10098_v40 = vld [vmem:[#allocation17_spill] sm:$0xff] }
 0x74a   : > { %v5811_v42 = vadd.f32 %v5779_v53, %v10074_v51  ;;  %v5810_v30 = vadd.f32 %v5778_v54, %v10075_v50  ;;  %v10100_v50 = vld [vmem:[#allocation44_spill] sm:$0xff] }
 0x74b   : > { %v5731_v28 = vpop.permute.xlu1 %5730  ;;  %v5727_v36 = vpop.permute.xlu0 %5726 }
 0x74c   : > { %5843 = vst.msk [vmem:[%s9782_s23 + $0xc8] sm:$0xff] %vm311_vm0, %v5811_v42  ;;  %5842 = vst.msk [vmem:[%s9782_s23 + $0xc0] sm:$0xff] %vm311_vm0, %v5810_v30  ;;  %v5781_v21 = vmul.f32 %v5731_v28, %v10076_v15  ;;  %v5780_v61 = vmul.f32 %v5727_v36, %v10077_v3  ;;  %v10101_v28 = vld [vmem:[#allocation43_spill] sm:$0xff]  ;;  %v10103_v3 = vld [vmem:[#allocation18_spill] sm:$0xff] }
 0x74d   : > { %v10102_v15 = vld [vmem:[#allocation19_spill] sm:$0xff] }
 0x74e   : > { %v5813_v63 = vadd.f32 %v5781_v21, %v10078_v56  ;;  %v5812_v20 = vadd.f32 %v5780_v61, %v10079_v45  ;;  %v10104_v45 = vld [vmem:[#allocation48_spill] sm:$0xff] }
 0x74f   : > { %v5742_v60 = vpop.permute.xlu1 %5741  ;;  %v5738_v8 = vpop.permute.xlu0 %5737 }
 0x750   : > { %5845 = vst.msk [vmem:[%s9782_s23 + $0xd8] sm:$0xff] %vm311_vm0, %v5813_v63  ;;  %5844 = vst.msk [vmem:[%s9782_s23 + $0xd0] sm:$0xff] %vm311_vm0, %v5812_v20  ;;  %v5783_v23 = vmul.f32 %v5742_v60, %v10080_v59  ;;  %v5782_v1 = vmul.f32 %v5738_v8, %v10081_v32  ;;  %v10105_v60 = vld [vmem:[#allocation46_spill] sm:$0xff]  ;;  %v10106_v59 = vld [vmem:[#allocation21_spill] sm:$0xff] }
 0x751   : > { %v10107_v32 = vld [vmem:[#allocation20_spill] sm:$0xff] }
 0x752   : > { %v5815_v34 = vadd.f32 %v5783_v23, %v10082_v26  ;;  %v5814_v0 = vadd.f32 %v5782_v1, %v10083_v9  ;;  %v10108_v9 = vld [vmem:[#allocation52_spill] sm:$0xff] }
 0x753   : > { %v5588_v52 = vpop.permute.xlu1 %5587  ;;  %v5584_v43 = vpop.permute.xlu0 %5583 }
 0x754   : > { %5847 = vst.msk [vmem:[%s9782_s23 + $0xe8] sm:$0xff] %vm311_vm0, %v5815_v34  ;;  %5846 = vst.msk [vmem:[%s9782_s23 + $0xe0] sm:$0xff] %vm311_vm0, %v5814_v0  ;;  %v5755_v10 = vmul.f32 %v5588_v52, %v10084_v46  ;;  %v5754_v11 = vmul.f32 %v5584_v43, %v10085_v2  ;;  %v10109_v52 = vld [vmem:[#allocation51_spill] sm:$0xff]  ;;  %v10111_v2 = vld [vmem:[#allocation22_spill] sm:$0xff] }
 0x755   : > { %v10110_v46 = vld [vmem:[#allocation23_spill] sm:$0xff] }
 0x756   : > { %v5787_v6 = vadd.f32 %v5755_v10, %v10086_v48  ;;  %v5786_v12 = vadd.f32 %v5754_v11, %v10087_v7  ;;  %v10112_v7 = vld [vmem:[#allocation56_spill] sm:$0xff] }
 0x757   : > { %v5599_v57 = vpop.permute.xlu1 %5598  ;;  %v5595_v37 = vpop.permute.xlu0 %5594 }
 0x758   : > { %5819 = vst.msk [vmem:[%s9782_s23 + $0x8] sm:$0xff] %vm311_vm0, %v5787_v6  ;;  %5818 = vst.msk [vmem:[%s9782_s23] sm:$0xff] %vm311_vm0, %v5786_v12  ;;  %v5757_v22 = vmul.f32 %v5599_v57, %v10088_v13  ;;  %v5756_v58 = vmul.f32 %v5595_v37, %v10089_v35  ;;  %v10113_v57 = vld [vmem:[#allocation55_spill] sm:$0xff]  ;;  %v10114_v13 = vld [vmem:[#allocation25_spill] sm:$0xff] }
 0x759   : > { %v10115_v35 = vld [vmem:[#allocation24_spill] sm:$0xff] }
 0x75a   : > { %v5789_v25 = vadd.f32 %v5757_v22, %v10090_v16  ;;  %v5788_v27 = vadd.f32 %v5756_v58, %v10091_v24  ;;  %v10116_v24 = vld [vmem:[#allocation58_spill] sm:$0xff] }
 0x75b   : > { %v5610_v39 = vpop.permute.xlu1 %5609  ;;  %v5606_v19 = vpop.permute.xlu0 %5605 }
 0x75c   : > { %5821 = vst.msk [vmem:[%s9782_s23 + $0x18] sm:$0xff] %vm311_vm0, %v5789_v25  ;;  %5820 = vst.msk [vmem:[%s9782_s23 + $0x10] sm:$0xff] %vm311_vm0, %v5788_v27  ;;  %v5759_v44 = vmul.f32 %v5610_v39, %v10092_v49  ;;  %v5758_v29 = vmul.f32 %v5606_v19, %v10093_v62  ;;  %v10117_v39 = vld [vmem:[#allocation57_spill] sm:$0xff]  ;;  %v10118_v49 = vld [vmem:[#allocation34_spill] sm:$0xff] }
 0x75d   : > { %v10119_v62 = vld [vmem:[#allocation33_spill] sm:$0xff] }
 0x75e   : > { %v5791_v14 = vadd.f32 %v5759_v44, %v10094_v5  ;;  %v5790_v33 = vadd.f32 %v5758_v29, %v10095_v31 }
 0x75f   : > { %v5621_v38 = vpop.permute.xlu1 %5620  ;;  %v5617_v17 = vpop.permute.xlu0 %5616 }
 0x760   : > { %5823 = vst.msk [vmem:[%s9782_s23 + $0x28] sm:$0xff] %vm311_vm0, %v5791_v14  ;;  %5822 = vst.msk [vmem:[%s9782_s23 + $0x20] sm:$0xff] %vm311_vm0, %v5790_v33  ;;  %v5761_v18 = vmul.f32 %v5621_v38, %v10096_v4  ;;  %v5760_v41 = vmul.f32 %v5617_v17, %v10097_v47 }
 0x762   : > { %v5793_v53 = vadd.f32 %v5761_v18, %v10098_v40  ;;  %v5792_v54 = vadd.f32 %v5760_v41, %v10099_v55 }
 0x763   : > { %v5632_v51 = vpop.permute.xlu1 %5631  ;;  %v5628_v42 = vpop.permute.xlu0 %5627 }
 0x764   : > { %5825 = vst.msk [vmem:[%s9782_s23 + $0x38] sm:$0xff] %vm311_vm0, %v5793_v53  ;;  %5824 = vst.msk [vmem:[%s9782_s23 + $0x30] sm:$0xff] %vm311_vm0, %v5792_v54  ;;  %v5763_v30 = vmul.f32 %v5632_v51, %v10100_v50  ;;  %v5762_v36 = vmul.f32 %v5628_v42, %v10101_v28 }
 0x766   : > { %v5795_v21 = vadd.f32 %v5763_v30, %v10102_v15  ;;  %v5794_v61 = vadd.f32 %v5762_v36, %v10103_v3 }
 0x767   : > { %v5643_v56 = vpop.permute.xlu1 %5642  ;;  %v5639_v63 = vpop.permute.xlu0 %5638 }
 0x768   : > { %5827 = vst.msk [vmem:[%s9782_s23 + $0x48] sm:$0xff] %vm311_vm0, %v5795_v21  ;;  %5826 = vst.msk [vmem:[%s9782_s23 + $0x40] sm:$0xff] %vm311_vm0, %v5794_v61  ;;  %v5765_v20 = vmul.f32 %v5643_v56, %v10104_v45  ;;  %v5764_v8 = vmul.f32 %v5639_v63, %v10105_v60 }
 0x76a   : > { %v5797_v23 = vadd.f32 %v5765_v20, %v10106_v59  ;;  %v5796_v1 = vadd.f32 %v5764_v8, %v10107_v32 }
 0x76b   : > { %v5654_v26 = vpop.permute.xlu1 %5653  ;;  %v5650_v34 = vpop.permute.xlu0 %5649 }
 0x76c   : > { %5829 = vst.msk [vmem:[%s9782_s23 + $0x58] sm:$0xff] %vm311_vm0, %v5797_v23  ;;  %5828 = vst.msk [vmem:[%s9782_s23 + $0x50] sm:$0xff] %vm311_vm0, %v5796_v1  ;;  %v5767_v0 = vmul.f32 %v5654_v26, %v10108_v9  ;;  %v5766_v43 = vmul.f32 %v5650_v34, %v10109_v52 }
 0x76e   : > { %v5799_v10 = vadd.f32 %v5767_v0, %v10110_v46  ;;  %v5798_v11 = vadd.f32 %v5766_v43, %v10111_v2 }
 0x76f   : > { %v5665_v48 = vpop.permute.xlu1 %5664  ;;  %v5661_v6 = vpop.permute.xlu0 %5660 }
 0x770   : > { %5831 = vst.msk [vmem:[%s9782_s23 + $0x68] sm:$0xff] %vm311_vm0, %v5799_v10  ;;  %5830 = vst.msk [vmem:[%s9782_s23 + $0x60] sm:$0xff] %vm311_vm0, %v5798_v11  ;;  %v5769_v12 = vmul.f32 %v5665_v48, %v10112_v7  ;;  %v5768_v37 = vmul.f32 %v5661_v6, %v10113_v57 }
 0x772   : > { %v5801_v22 = vadd.f32 %v5769_v12, %v10114_v13  ;;  %v5800_v58 = vadd.f32 %v5768_v37, %v10115_v35 }
 0x773   : > { %v5753_v16 = vpop.permute.xlu1 %5752  ;;  %v5749_v25 = vpop.permute.xlu0 %5748 }
 0x774   : > { %5833 = vst.msk [vmem:[%s9782_s23 + $0x78] sm:$0xff] %vm311_vm0, %v5801_v22  ;;  %5832 = vst.msk [vmem:[%s9782_s23 + $0x70] sm:$0xff] %vm311_vm0, %v5800_v58  ;;  %v5785_v27 = vmul.f32 %v5753_v16, %v10116_v24  ;;  %v5784_v19 = vmul.f32 %v5749_v25, %v10117_v39 }
 0x776   : > { %v5817_v44 = vadd.f32 %v5785_v27, %v10118_v49  ;;  %v5816_v29 = vadd.f32 %v5784_v19, %v10119_v62 }
 0x778   : > { %5849 = vst.msk [vmem:[%s9782_s23 + $0xf8] sm:$0xff] %vm311_vm0, %v5817_v44  ;;  %5848 = vst.msk [vmem:[%s9782_s23 + $0xf0] sm:$0xff] %vm311_vm0, %v5816_v29 }
 0x779   : > { %6527 = shalt.err (!%p6524_p3)
}
 0x77a   : > { %s6528_s17 = scalar_lea.hbm %s9907_s20, 4096  ;;  %s6532_s9 = scalar_lea.hbm %s9967_s7, 8192 }
 0x77b   : > { %p6529_p4 = scmp.ne.s32.totalorder %s9907_s20, %s6528_s17  ;;  %p6533_p9 = scmp.lt.s32.totalorder %s9907_s20, %s9967_s7 }
 0x77c   : > { %p6534_p10 = scmp.lt.s32.totalorder %s6532_s9, %s6528_s17 }
 0x77d   : > { %p6530_p7 = pnand %p6529_p4, %p6676_p5 }
 0x77e   : > { %p6535_p11 = por %p6534_p10, %p6533_p9 }
 0x77f   : > { %p6531_p8 = pneg %p6530_p7 }
 0x781   : > { %p6536_p12 = pnand %p6535_p11, %p6531_p8 }
 0x783   : > { %6539 = shalt.err (!%p6536_p12)
}
 0x784   : > { %s6594_s19 = smov 128  }
 0x785   : > { %6411 = dma.vmem_to_hbm [thread:$0]  (%p6676_p5), %s9911_s16, 4096, %s9907_s20, %s9919_s3, %s6594_s19, %s6594_s19, %s6591_s24  }
 0x786 PF: > { %p6417_p13 = scmp.ge.s32.totalorder %s6574_s29, 2  ;;  %s5879_s15 = sand.u32 1, %s6562_s26  }
 0x787   : > { %s5880_s18 = scalar_lea.sflag [#allocation8], %s5879_s15 }
 0x788   : > { %p6414_p0 = pnand %p6417_p13, %p6680_p6 }
 0x78a   : > { %p6415_p1 = pneg %p6414_p0 }
 0x78c   : > { %6557 = dma.done.wait (%p6415_p1), %s5880_s18, 4096  }
 0x78d   : > { %6559 = vsyncadd (%p6415_p1), %s5880_s18, 4294963200  ;;  %p18_p2 = scmp.ge.s32.totalorder %s6663_s8, 4   ;;  %s10120_s26 = smov %s6566_s27 }
 0x78e   : > { %s10121_s27 = smov %s6570_s28  ;;  %s10122_s28 = smov %s6674_s11 }
 0x78f   : > { %s10123_s29 = smov %s6663_s8  ;;  %20 = sbr.rel (!%p18_p2) target bundleno = 5 (0x5), region = 87 }
 0x794   :  { %5885 = vsyncpa [#allocation8], 1 }
 0x795   :  { %5887 = vsyncpa [#allocation8 + $0x1], 1 }

</bundles_post_ra>
